<compile_context>
chip_gen: v5e
topology: v5e:2x2
jax: 0.10.0
libtpu: 0.0.40
codegen_flags: <defaults>
</compile_context>

<pallas_src>
import numpy as np
import jax
import jax.numpy as jnp
from jax import lax
from jax.experimental import pallas as pl
from jax.experimental.pallas import tpu as pltpu

FT_DEPTH = 5
FT_SMOOTH = 1e-5

# cvec column indices (per-channel Cf vectors, packed as (Cf, 7))
C_BCONV1, C_BCONV2, C_SN12, C_BN12, C_SN21, C_BN21, C_BFUSE = range(7)


# ----------------------------------------------------------------------------
# Wrapper: packs operands, runs the fused Pallas kernel, returns NCHW.
# ----------------------------------------------------------------------------
def expand_n_combine_v3_forward(x1_nchw, x2_nchw, params):
    x1 = x1_nchw.astype(jnp.float32)
    x2 = x2_nchw.astype(jnp.float32)
    N, Cin, H, W = x1.shape
    _, Cf, H2, W2 = x2.shape
    assert (H2, W2) == (2 * H, 2 * W)
    HW = H2 * W2

    # --- bilinear x2 upsample (align_corners=False) as separable shifted adds
    # (wrapper XLA, see TODO in header; no dense Kronecker operand anywhere).
    xm = jnp.concatenate([x1[:, :, :1], x1[:, :, :-1]], axis=2)
    xp = jnp.concatenate([x1[:, :, 1:], x1[:, :, -1:]], axis=2)
    ev = 0.75 * x1 + 0.25 * xm
    od = 0.75 * x1 + 0.25 * xp
    xr = jnp.stack([ev, od], axis=3).reshape(N, Cin, H2, W)
    xm = jnp.concatenate([xr[..., :1], xr[..., :-1]], axis=3)
    xp = jnp.concatenate([xr[..., 1:], xr[..., -1:]], axis=3)
    ev = 0.75 * xr + 0.25 * xm
    od = 0.75 * xr + 0.25 * xp
    up = jnp.stack([ev, od], axis=4).reshape(N, Cin, HW)    # (N, Cin, H2*W2)
    x2f = x2.reshape(N, Cf, HW)                             # pure reshape of NCHW

    # --- pack weights: HWIO -> (Cout, 9*Cin), folded-BN scale pre-multiplied
    def wmat(wk, sk):
        cout = wk.shape[-1]
        return jnp.transpose(wk, (3, 0, 1, 2)).reshape(cout, -1) * sk[:, None]

    w1 = wmat(params["w1"], params["s_conv1"])                     # (Cf, 9*Cin)
    w2 = wmat(params["w2"], params["s_conv2"])                     # (Cf, 9*Cf)
    wo1 = jnp.concatenate([wmat(params["w_q12"], params["s_q12"]),   # reads out1
                           wmat(params["w_k21"], params["s_k21"]),
                           wmat(params["w_v21"], params["s_v21"])], axis=0)
    wo2 = jnp.concatenate([wmat(params["w_k12"], params["s_k12"]),   # reads out2
                           wmat(params["w_v12"], params["s_v12"]),
                           wmat(params["w_q21"], params["s_q21"])], axis=0)
    wf = wmat(params["wf"], params["s_fuse"])                      # (Cf, 18*Cf)

    g1, g2 = params["gamma1"], params["gamma2"]
    cvec = jnp.stack([params["b_conv1"], params["b_conv2"],
                      g1 * params["s_norm12"], g1 * params["b_norm12"],
                      g2 * params["s_norm21"], g2 * params["b_norm21"],
                      params["b_fuse"]], axis=1)                   # (Cf, 7)
    bqkv = jnp.stack(
        [jnp.concatenate([params["b_q12"], params["b_k21"], params["b_v21"]]),
         jnp.concatenate([params["b_k12"], params["b_v12"], params["b_q21"]])],
        axis=1)                                                    # (3*Cf, 2)

    # ------------------------------------------------------------------
    # Fused kernel (one batch element per grid step, everything in VMEM).
    # Layout: channels on sublanes, H2*W2 pixels on lanes (lane-dense).
    # ------------------------------------------------------------------
    def kernel(up_ref, x2_ref, w1_ref, w2_ref, wo1_ref, wo2_ref, wf_ref,
               cv_ref, bq_ref, o_ref):
        col = lax.broadcasted_iota(jnp.int32, (1, HW), 1) % W2
        m_left = (col > 0).astype(jnp.float32)        # valid lanes for dx == -1
        m_right = (col < W2 - 1).astype(jnp.float32)  # valid lanes for dx == +1
        PAD = W2 + 1

        def cv(i):
            return cv_ref[:, i:i + 1]                 # (Cf, 1)

        def sigmoid(t):                               # EUP tanh, no VPU divide
            return 0.5 * jnp.tanh(0.5 * t) + 0.5

        # One zero-pad + 9 lane-shifted taps per *input*; the (9*C, HW) patch
        # matrix is shared by every conv that reads this input.
        def im2col(img):
            c = img.shape[0]
            zp = jnp.zeros((c, PAD), jnp.float32)
            xpad = jnp.concatenate([zp, img, zp], axis=1)     # (c, HW + 2*PAD)
            taps = []
            for ty in (-1, 0, 1):
                for tx in (-1, 0, 1):
                    off = PAD + ty * W2 + tx
                    t = xpad[:, off:off + HW]
                    if tx == -1:
                        t = t * m_left
                    elif tx == 1:
                        t = t * m_right
                    taps.append(t)
            return jnp.concatenate(taps, axis=0)              # (9*c, HW)

        def conv(wref, patches, bias):                # BN scale folded in wref
            y = jnp.dot(wref[...], patches, preferred_element_type=jnp.float32)
            return y + bias

        out1 = jnp.maximum(conv(w1_ref, im2col(up_ref[0]), cv(C_BCONV1)), 0.0)
        out2 = jnp.maximum(conv(w2_ref, im2col(x2_ref[0]), cv(C_BCONV2)), 0.0)

        # q/k/v convs: one shared im2col + one stacked matmul per source image
        qkv1 = sigmoid(conv(wo1_ref, im2col(out1), bq_ref[:, 0:1]))  # q12,k21,v21
        qkv2 = sigmoid(conv(wo2_ref, im2col(out2), bq_ref[:, 1:2]))  # k12,v12,q21
        q12, k21, v21 = qkv1[0:Cf], qkv1[Cf:2 * Cf], qkv1[2 * Cf:3 * Cf]
        k12, v12, q21 = qkv2[0:Cf], qkv2[Cf:2 * Cf], qkv2[2 * Cf:3 * Cf]

        # fractal Tanimoto with complement (depth=5), reciprocals on the EUP
        def tnmt(p, l, axis):
            tpl = jnp.sum(p * l, axis=axis, keepdims=True)
            tpp = jnp.sum(p * p, axis=axis, keepdims=True)
            tll = jnp.sum(l * l, axis=axis, keepdims=True)
            den = jnp.zeros_like(tpl)
            for d in range(FT_DEPTH):
                a = float(2 ** d)
                b = -(2.0 * a - 1.0)
                den = den + pl.reciprocal(a * (tpp + tll) + b * tpl + FT_SMOOTH,
                                          approx=True)
            return (tpl + FT_SMOOTH) * den * (1.0 / FT_DEPTH)

        def ftan(p, l, axis):
            return 0.5 * (tnmt(p, l, axis) + tnmt(1.0 - p, 1.0 - l, axis))

        def relatt(q, k, v, s_col, b_col):
            att_spat = ftan(q, k, 0)                  # (1, HW)  channel metric
            att_chan = ftan(q, k, 1)                  # (Cf, 1)  spatial metric
            r = 0.5 * (att_chan * v) * (att_spat * v)
            return r * cv(s_col) + cv(b_col)          # BN + gamma folded

        r12 = relatt(q12, k12, v12, C_SN12, C_BN12)
        r21 = relatt(q21, k21, v21, C_SN21, C_BN21)

        fuse_in = jnp.concatenate([out1 * (1.0 + r12), out2 * (1.0 + r21)],
                                  axis=0)             # (2*Cf, HW)
        fused = jnp.maximum(conv(wf_ref, im2col(fuse_in), cv(C_BFUSE)), 0.0)
        # the final F.relu in ExpandNCombine_V3 is a no-op on the ReLU'd fuse
        o_ref[0] = fused                              # lane-dense (Cf, HW) store

    out = pl.pallas_call(
        kernel,
        out_shape=jax.ShapeDtypeStruct((N, Cf, HW), jnp.float32),
        grid_spec=pltpu.PrefetchScalarGridSpec(
            num_scalar_prefetch=0,
            grid=(N,),
            in_specs=[
                pl.BlockSpec((1, Cin, HW), lambda n: (n, 0, 0)),
                pl.BlockSpec((1, Cf, HW), lambda n: (n, 0, 0)),
                # weight / bias operands: constant block index -> not re-DMA'd
                # across grid steps (single-buffering them is negligible here).
                pl.BlockSpec((Cf, 9 * Cin), lambda n: (0, 0)),
                pl.BlockSpec((Cf, 9 * Cf), lambda n: (0, 0)),
                pl.BlockSpec((3 * Cf, 9 * Cf), lambda n: (0, 0)),
                pl.BlockSpec((3 * Cf, 9 * Cf), lambda n: (0, 0)),
                pl.BlockSpec((Cf, 9 * 2 * Cf), lambda n: (0, 0)),
                pl.BlockSpec((Cf, 7), lambda n: (0, 0)),
                pl.BlockSpec((3 * Cf, 2), lambda n: (0, 0)),
            ],
            out_specs=pl.BlockSpec((1, Cf, HW), lambda n: (n, 0, 0)),
        ),
        compiler_params=pltpu.CompilerParams(
            dimension_semantics=("parallel",),
            vmem_limit_bytes=32 * 1024 * 1024),
    )(up, x2f, w1, w2, wo1, wo2, wf, cvec, bqkv)

    return out.reshape(N, Cf, H2, W2)                 # NCHW, pure reshape


# ----------------------------------------------------------------------------
# Deterministic synthetic parameters (inference-mode BN folded to scale/bias)
# ----------------------------------------------------------------------------
def upsample_matrix(n_in, scale=2):
    """1-D PyTorch bilinear (align_corners=False) upsampling weights."""
    n_out = n_in * scale
    M = np.zeros((n_out, n_in), np.float32)
    for i in range(n_out):
        src = max((i + 0.5) / scale - 0.5, 0.0)
        i0 = min(int(np.floor(src)), n_in - 1)
        frac = src - i0
        i1 = min(i0 + 1, n_in - 1)
        M[i, i0] += 1.0 - frac
        M[i, i1] += frac
    return M


def make_params(key, in_channels, nfilters, H, W):
    eps = 1e-5
    keys = iter(jax.random.split(key, 80))

    def nk():
        return next(keys)

    def conv_bn_fold(cin, cout):
        w = 0.1 * jax.random.normal(nk(), (3, 3, cin, cout), jnp.float32)
        cb = 0.1 * jax.random.normal(nk(), (cout,), jnp.float32)
        g = 1.0 + 0.1 * jax.random.normal(nk(), (cout,), jnp.float32)
        be = 0.1 * jax.random.normal(nk(), (cout,), jnp.float32)
        mu = 0.1 * jax.random.normal(nk(), (cout,), jnp.float32)
        var = 0.5 + jax.random.uniform(nk(), (cout,), jnp.float32)
        s = g / jnp.sqrt(var + eps)
        b = be + (cb - mu) * s
        return w, s, b

    def bn_fold(c):
        g = 1.0 + 0.1 * jax.random.normal(nk(), (c,), jnp.float32)
        be = 0.1 * jax.random.normal(nk(), (c,), jnp.float32)
        mu = 0.1 * jax.random.normal(nk(), (c,), jnp.float32)
        var = 0.5 + jax.random.uniform(nk(), (c,), jnp.float32)
        s = g / jnp.sqrt(var + eps)
        return s, be - mu * s

    p = {}
    p["w1"], p["s_conv1"], p["b_conv1"] = conv_bn_fold(in_channels, nfilters)
    p["w2"], p["s_conv2"], p["b_conv2"] = conv_bn_fold(nfilters, nfilters)
    for tag in ("q12", "k12", "v12"):
        p["w_" + tag], p["s_" + tag], p["b_" + tag] = conv_bn_fold(nfilters, nfilters)
    p["s_norm12"], p["b_norm12"] = bn_fold(nfilters)
    for tag in ("q21", "k21", "v21"):
        p["w_" + tag], p["s_" + tag], p["b_" + tag] = conv_bn_fold(nfilters, nfilters)
    p["s_norm21"], p["b_norm21"] = bn_fold(nfilters)
    p["wf"], p["s_fuse"], p["b_fuse"] = conv_bn_fold(2 * nfilters, nfilters)
    # gamma1/gamma2 are zero-initialized in PyTorch; nonzero here so the
    # attention branches are actually exercised by the correctness check.
    p["gamma1"] = 0.5 * jax.random.normal(nk(), (), jnp.float32)
    p["gamma2"] = 0.5 * jax.random.normal(nk(), (), jnp.float32)
    # 1-D bilinear matrices (used by the pure-JAX reference only)
    p["Mh"] = jnp.asarray(upsample_matrix(H))
    p["Mw"] = jnp.asarray(upsample_matrix(W))
    return p


# ----------------------------------------------------------------------------
# Pure-JAX reference (independent code path: einsum upsample + XLA convs)
# ----------------------------------------------------------------------------
def reference_forward(x1_nchw, x2_nchw, p):
    hi = lax.Precision.HIGHEST
    x1 = jnp.transpose(x1_nchw, (0, 2, 3, 1)).astype(jnp.float32)
    x2 = jnp.transpose(x2_nchw, (0, 2, 3, 1)).astype(jnp.float32)
    up = jnp.einsum("Oh,Pw,nhwc->nOPc", p["Mh"], p["Mw"], x1, precision=hi)

    def conv_bn(x, w, s, b):
        y = lax.conv_general_dilated(
            x, w, (1, 1), ((1, 1), (1, 1)),
            dimension_numbers=("NHWC", "HWIO", "NHWC"), precision=hi)
        return y * s + b

    relu = lambda t: jnp.maximum(t, 0.0)
    sigmoid = jax.nn.sigmoid

    out1 = relu(conv_bn(up, p["w1"], p["s_conv1"], p["b_conv1"]))
    out2 = relu(conv_bn(x2, p["w2"], p["s_conv2"], p["b_conv2"]))

    def tnmt(pr, lb, axes):
        tpl = jnp.sum(pr * lb, axis=axes, keepdims=True)
        tpp = jnp.sum(pr * pr, axis=axes, keepdims=True)
        tll = jnp.sum(lb * lb, axis=axes, keepdims=True)
        den = 0.0
        for d in range(FT_DEPTH):
            a = 2.0 ** d
            b = -(2.0 * a - 1.0)
            den = den + 1.0 / (a * (tpp + tll) + b * tpl + FT_SMOOTH)
        return (tpl + FT_SMOOTH) * den * (1.0 / FT_DEPTH)

    def ftan(pr, lb, axes):
        return 0.5 * (tnmt(pr, lb, axes) + tnmt(1.0 - pr, 1.0 - lb, axes))

    def relatt(i1, i2, i3, tag, norm_tag):
        q = sigmoid(conv_bn(i1, p["w_q" + tag], p["s_q" + tag], p["b_q" + tag]))
        k = sigmoid(conv_bn(i2, p["w_k" + tag], p["s_k" + tag], p["b_k" + tag]))
        v = sigmoid(conv_bn(i3, p["w_v" + tag], p["s_v" + tag], p["b_v" + tag]))
        att_spat = ftan(q, k, (3,))        # channel reduction (PyTorch axis=1)
        att_chan = ftan(q, k, (1, 2))      # spatial reduction (PyTorch [2,3])
        v_cspat = 0.5 * (att_chan * v) * (att_spat * v)
        return v_cspat * p["s_" + norm_tag] + p["b_" + norm_tag]

    r12 = p["gamma1"] * relatt(out1, out2, out2, "12", "norm12")
    r21 = p["gamma2"] * relatt(out2, out1, out1, "21", "norm21")
    out12 = out1 * (1.0 + r12)
    out21 = out2 * (1.0 + r21)
    fuse = relu(conv_bn(jnp.concatenate([out12, out21], axis=-1),
                        p["wf"], p["s_fuse"], p["b_fuse"]))
    return jnp.transpose(relu(fuse), (0, 3, 1, 2))


if __name__ == "__main__":
    N, Cin, H, W = 2, 4, 16, 16
    nfilters = 8

    key = jax.random.PRNGKey(0)
    k1, k2, kp = jax.random.split(key, 3)
    x1 = jax.random.normal(k1, (N, Cin, H, W), jnp.float32)            # NCHW
    x2 = jax.random.normal(k2, (N, nfilters, 2 * H, 2 * W), jnp.float32)

    params = make_params(kp, Cin, nfilters, H, W)

    out = jax.block_until_ready(expand_n_combine_v3_forward(x1, x2, params))
    ref = jax.block_until_ready(reference_forward(x1, x2, params))

    assert out.shape == (N, nfilters, 2 * H, 2 * W), out.shape
    np.testing.assert_allclose(np.asarray(out), np.asarray(ref),
                               rtol=5e-3, atol=5e-3)
    print("KERNEL_OK")
</pallas_src>

<mosaic_0001>
module attributes {stable_mosaic.version = 11 : i64} {
  func.func @kernel(%arg0: i32, %arg1: memref<1x4x1024xf32, #tpu.memory_space<vmem>>, %arg2: memref<1x8x1024xf32, #tpu.memory_space<vmem>>, %arg3: memref<8x36xf32, #tpu.memory_space<vmem>>, %arg4: memref<8x72xf32, #tpu.memory_space<vmem>>, %arg5: memref<24x72xf32, #tpu.memory_space<vmem>>, %arg6: memref<24x72xf32, #tpu.memory_space<vmem>>, %arg7: memref<8x144xf32, #tpu.memory_space<vmem>>, %arg8: memref<8x7xf32, #tpu.memory_space<vmem>>, %arg9: memref<24x2xf32, #tpu.memory_space<vmem>>, %arg10: memref<1x8x1024xf32, #tpu.memory_space<vmem>>) attributes {dimension_semantics = [#tpu.dimension_semantics<parallel>], iteration_bounds = array<i64: 2>, scalar_prefetch = 0 : i64, scratch_operands = 0 : i64, tpu.core_type = #tpu.core_type<tc>, window_params = [{transform_indices = @transform_0, window_bounds = array<i64: 1, 4, 1024>}, {transform_indices = @transform_1, window_bounds = array<i64: 1, 8, 1024>}, {pipeline_mode = #tpu.pipeline_mode<synchronous>, transform_indices = @transform_2, window_bounds = array<i64: 8, 36>}, {pipeline_mode = #tpu.pipeline_mode<synchronous>, transform_indices = @transform_3, window_bounds = array<i64: 8, 72>}, {pipeline_mode = #tpu.pipeline_mode<synchronous>, transform_indices = @transform_4, window_bounds = array<i64: 24, 72>}, {pipeline_mode = #tpu.pipeline_mode<synchronous>, transform_indices = @transform_5, window_bounds = array<i64: 24, 72>}, {pipeline_mode = #tpu.pipeline_mode<synchronous>, transform_indices = @transform_6, window_bounds = array<i64: 8, 144>}, {pipeline_mode = #tpu.pipeline_mode<synchronous>, transform_indices = @transform_7, window_bounds = array<i64: 8, 7>}, {pipeline_mode = #tpu.pipeline_mode<synchronous>, transform_indices = @transform_8, window_bounds = array<i64: 24, 2>}, {transform_indices = @transform_9, window_bounds = array<i64: 1, 8, 1024>}]} {
    %0 = tpu.iota {dimensions = array<i32: 1>} : vector<1x1024xi32>
    %c32_i32 = arith.constant 32 : i32
    %c0_i32 = arith.constant 0 : i32
    %1 = arith.cmpi eq, %c32_i32, %c0_i32 : i32
    %c1_i32 = arith.constant 1 : i32
    %2 = arith.select %1, %c1_i32, %c32_i32 : i32
    %3 = vector.broadcast %2 : i32 to vector<1x1024xi32>
    %4 = arith.remsi %0, %3 : vector<1x1024xi32>
    %c0_i32_0 = arith.constant 0 : i32
    %5 = vector.broadcast %c0_i32_0 : i32 to vector<1x1024xi32>
    %6 = arith.cmpi ne, %4, %5 : vector<1x1024xi32>
    %c0_i32_1 = arith.constant 0 : i32
    %7 = vector.broadcast %c0_i32_1 : i32 to vector<1x1024xi32>
    %8 = arith.cmpi slt, %4, %7 : vector<1x1024xi32>
    %c0_i32_2 = arith.constant 0 : i32
    %9 = arith.cmpi slt, %2, %c0_i32_2 : i32
    %10 = vector.broadcast %9 : i1 to vector<1x1024xi1>
    %11 = vector.broadcast %10 : vector<1x1024xi1> to vector<1x1024xi1>
    %12 = arith.xori %8, %11 : vector<1x1024xi1>
    %13 = arith.andi %12, %6 : vector<1x1024xi1>
    %14 = vector.broadcast %2 : i32 to vector<1x1024xi32>
    %15 = arith.addi %4, %14 : vector<1x1024xi32>
    %16 = arith.select %13, %15, %4 : vector<1x1024xi1>, vector<1x1024xi32>
    %c0_i32_3 = arith.constant 0 : i32
    %17 = vector.broadcast %c0_i32_3 : i32 to vector<1x1024xi32>
    %18 = arith.cmpi sgt, %16, %17 : vector<1x1024xi32>
    %19 = arith.extui %18 : vector<1x1024xi1> to vector<1x1024xi32>
    %20 = arith.sitofp %19 : vector<1x1024xi32> to vector<1x1024xf32>
    %c31_i32 = arith.constant 31 : i32
    %21 = vector.broadcast %c31_i32 : i32 to vector<1x1024xi32>
    %22 = arith.cmpi slt, %16, %21 : vector<1x1024xi32>
    %23 = arith.extui %22 : vector<1x1024xi1> to vector<1x1024xi32>
    %24 = arith.sitofp %23 : vector<1x1024xi32> to vector<1x1024xf32>
    %c0 = arith.constant 0 : index
    %c0_4 = arith.constant 0 : index
    %c0_5 = arith.constant 0 : index
    %25 = vector.load %arg1[%c0, %c0_4, %c0_5] : memref<1x4x1024xf32, #tpu.memory_space<vmem>>, vector<1x4x1024xf32>
    %26 = vector.shape_cast %25 : vector<1x4x1024xf32> to vector<4x1024xf32>
    %cst = arith.constant 0.000000e+00 : f32
    %27 = vector.broadcast %cst : f32 to vector<4x33xf32>
    %28 = tpu.concatenate %27, %26, %27 in 1 : vector<4x33xf32>, vector<4x1024xf32>, vector<4x33xf32> -> vector<4x1090xf32>
    %29 = vector.extract_strided_slice %28 {offsets = [0, 0], sizes = [4, 1024], strides = [1, 1]} : vector<4x1090xf32> to vector<4x1024xf32>
    %30 = vector.broadcast %20 : vector<1x1024xf32> to vector<4x1024xf32>
    %31 = arith.mulf %29, %30 : vector<4x1024xf32>
    %32 = vector.extract_strided_slice %28 {offsets = [0, 1], sizes = [4, 1024], strides = [1, 1]} : vector<4x1090xf32> to vector<4x1024xf32>
    %33 = vector.extract_strided_slice %28 {offsets = [0, 2], sizes = [4, 1024], strides = [1, 1]} : vector<4x1090xf32> to vector<4x1024xf32>
    %34 = vector.broadcast %24 : vector<1x1024xf32> to vector<4x1024xf32>
    %35 = arith.mulf %33, %34 : vector<4x1024xf32>
    %36 = vector.extract_strided_slice %28 {offsets = [0, 32], sizes = [4, 1024], strides = [1, 1]} : vector<4x1090xf32> to vector<4x1024xf32>
    %37 = vector.broadcast %20 : vector<1x1024xf32> to vector<4x1024xf32>
    %38 = arith.mulf %36, %37 : vector<4x1024xf32>
    %39 = vector.extract_strided_slice %28 {offsets = [0, 33], sizes = [4, 1024], strides = [1, 1]} : vector<4x1090xf32> to vector<4x1024xf32>
    %40 = vector.extract_strided_slice %28 {offsets = [0, 34], sizes = [4, 1024], strides = [1, 1]} : vector<4x1090xf32> to vector<4x1024xf32>
    %41 = vector.broadcast %24 : vector<1x1024xf32> to vector<4x1024xf32>
    %42 = arith.mulf %40, %41 : vector<4x1024xf32>
    %43 = vector.extract_strided_slice %28 {offsets = [0, 64], sizes = [4, 1024], strides = [1, 1]} : vector<4x1090xf32> to vector<4x1024xf32>
    %44 = vector.broadcast %20 : vector<1x1024xf32> to vector<4x1024xf32>
    %45 = arith.mulf %43, %44 : vector<4x1024xf32>
    %46 = vector.extract_strided_slice %28 {offsets = [0, 65], sizes = [4, 1024], strides = [1, 1]} : vector<4x1090xf32> to vector<4x1024xf32>
    %47 = vector.extract_strided_slice %28 {offsets = [0, 66], sizes = [4, 1024], strides = [1, 1]} : vector<4x1090xf32> to vector<4x1024xf32>
    %48 = vector.broadcast %24 : vector<1x1024xf32> to vector<4x1024xf32>
    %49 = arith.mulf %47, %48 : vector<4x1024xf32>
    %50 = tpu.concatenate %31, %32, %35, %38, %39, %42, %45, %46, %49 in 0 : vector<4x1024xf32>, vector<4x1024xf32>, vector<4x1024xf32>, vector<4x1024xf32>, vector<4x1024xf32>, vector<4x1024xf32>, vector<4x1024xf32>, vector<4x1024xf32>, vector<4x1024xf32> -> vector<36x1024xf32>
    %c0_6 = arith.constant 0 : index
    %c0_7 = arith.constant 0 : index
    %51 = vector.load %arg8[%c0_6, %c0_7] : memref<8x7xf32, #tpu.memory_space<vmem>>, vector<8x1xf32>
    %c0_8 = arith.constant 0 : index
    %c0_9 = arith.constant 0 : index
    %52 = vector.load %arg3[%c0_8, %c0_9] : memref<8x36xf32, #tpu.memory_space<vmem>>, vector<8x36xf32>
    %cst_10 = arith.constant dense<0.000000e+00> : vector<8x1024xf32>
    %53 = tpu.matmul %52, %50, %cst_10 {dimension_numbers = #tpu.dot_dimension_numbers<[1], [0], [0], [1], [0, 0, 1, 1], [], []>} : vector<8x36xf32>, vector<36x1024xf32>, vector<8x1024xf32> -> vector<8x1024xf32>
    %54 = vector.broadcast %51 : vector<8x1xf32> to vector<8x1024xf32>
    %55 = arith.addf %53, %54 : vector<8x1024xf32>
    %cst_11 = arith.constant 0.000000e+00 : f32
    %56 = vector.broadcast %cst_11 : f32 to vector<8x1024xf32>
    %57 = arith.maximumf %55, %56 : vector<8x1024xf32>
    %c0_12 = arith.constant 0 : index
    %c0_13 = arith.constant 0 : index
    %c0_14 = arith.constant 0 : index
    %58 = vector.load %arg2[%c0_12, %c0_13, %c0_14] : memref<1x8x1024xf32, #tpu.memory_space<vmem>>, vector<1x8x1024xf32>
    %59 = vector.shape_cast %58 : vector<1x8x1024xf32> to vector<8x1024xf32>
    %cst_15 = arith.constant 0.000000e+00 : f32
    %60 = vector.broadcast %cst_15 : f32 to vector<8x33xf32>
    %61 = tpu.concatenate %60, %59, %60 in 1 : vector<8x33xf32>, vector<8x1024xf32>, vector<8x33xf32> -> vector<8x1090xf32>
    %62 = vector.extract_strided_slice %61 {offsets = [0, 0], sizes = [8, 1024], strides = [1, 1]} : vector<8x1090xf32> to vector<8x1024xf32>
    %63 = vector.broadcast %20 : vector<1x1024xf32> to vector<8x1024xf32>
    %64 = arith.mulf %62, %63 : vector<8x1024xf32>
    %65 = vector.extract_strided_slice %61 {offsets = [0, 1], sizes = [8, 1024], strides = [1, 1]} : vector<8x1090xf32> to vector<8x1024xf32>
    %66 = vector.extract_strided_slice %61 {offsets = [0, 2], sizes = [8, 1024], strides = [1, 1]} : vector<8x1090xf32> to vector<8x1024xf32>
    %67 = vector.broadcast %24 : vector<1x1024xf32> to vector<8x1024xf32>
    %68 = arith.mulf %66, %67 : vector<8x1024xf32>
    %69 = vector.extract_strided_slice %61 {offsets = [0, 32], sizes = [8, 1024], strides = [1, 1]} : vector<8x1090xf32> to vector<8x1024xf32>
    %70 = vector.broadcast %20 : vector<1x1024xf32> to vector<8x1024xf32>
    %71 = arith.mulf %69, %70 : vector<8x1024xf32>
    %72 = vector.extract_strided_slice %61 {offsets = [0, 33], sizes = [8, 1024], strides = [1, 1]} : vector<8x1090xf32> to vector<8x1024xf32>
    %73 = vector.extract_strided_slice %61 {offsets = [0, 34], sizes = [8, 1024], strides = [1, 1]} : vector<8x1090xf32> to vector<8x1024xf32>
    %74 = vector.broadcast %24 : vector<1x1024xf32> to vector<8x1024xf32>
    %75 = arith.mulf %73, %74 : vector<8x1024xf32>
    %76 = vector.extract_strided_slice %61 {offsets = [0, 64], sizes = [8, 1024], strides = [1, 1]} : vector<8x1090xf32> to vector<8x1024xf32>
    %77 = vector.broadcast %20 : vector<1x1024xf32> to vector<8x1024xf32>
    %78 = arith.mulf %76, %77 : vector<8x1024xf32>
    %79 = vector.extract_strided_slice %61 {offsets = [0, 65], sizes = [8, 1024], strides = [1, 1]} : vector<8x1090xf32> to vector<8x1024xf32>
    %80 = vector.extract_strided_slice %61 {offsets = [0, 66], sizes = [8, 1024], strides = [1, 1]} : vector<8x1090xf32> to vector<8x1024xf32>
    %81 = vector.broadcast %24 : vector<1x1024xf32> to vector<8x1024xf32>
    %82 = arith.mulf %80, %81 : vector<8x1024xf32>
    %83 = tpu.concatenate %64, %65, %68, %71, %72, %75, %78, %79, %82 in 0 : vector<8x1024xf32>, vector<8x1024xf32>, vector<8x1024xf32>, vector<8x1024xf32>, vector<8x1024xf32>, vector<8x1024xf32>, vector<8x1024xf32>, vector<8x1024xf32>, vector<8x1024xf32> -> vector<72x1024xf32>
    %c0_16 = arith.constant 0 : index
    %c1 = arith.constant 1 : index
    %84 = vector.load %arg8[%c0_16, %c1] : memref<8x7xf32, #tpu.memory_space<vmem>>, vector<8x1xf32>
    %c0_17 = arith.constant 0 : index
    %c0_18 = arith.constant 0 : index
    %85 = vector.load %arg4[%c0_17, %c0_18] : memref<8x72xf32, #tpu.memory_space<vmem>>, vector<8x72xf32>
    %cst_19 = arith.constant dense<0.000000e+00> : vector<8x1024xf32>
    %86 = tpu.matmul %85, %83, %cst_19 {dimension_numbers = #tpu.dot_dimension_numbers<[1], [0], [0], [1], [0, 0, 1, 1], [], []>} : vector<8x72xf32>, vector<72x1024xf32>, vector<8x1024xf32> -> vector<8x1024xf32>
    %87 = vector.broadcast %84 : vector<8x1xf32> to vector<8x1024xf32>
    %88 = arith.addf %86, %87 : vector<8x1024xf32>
    %cst_20 = arith.constant 0.000000e+00 : f32
    %89 = vector.broadcast %cst_20 : f32 to vector<8x1024xf32>
    %90 = arith.maximumf %88, %89 : vector<8x1024xf32>
    %cst_21 = arith.constant 0.000000e+00 : f32
    %91 = vector.broadcast %cst_21 : f32 to vector<8x33xf32>
    %92 = tpu.concatenate %91, %57, %91 in 1 : vector<8x33xf32>, vector<8x1024xf32>, vector<8x33xf32> -> vector<8x1090xf32>
    %93 = vector.extract_strided_slice %92 {offsets = [0, 0], sizes = [8, 1024], strides = [1, 1]} : vector<8x1090xf32> to vector<8x1024xf32>
    %94 = vector.broadcast %20 : vector<1x1024xf32> to vector<8x1024xf32>
    %95 = arith.mulf %93, %94 : vector<8x1024xf32>
    %96 = vector.extract_strided_slice %92 {offsets = [0, 1], sizes = [8, 1024], strides = [1, 1]} : vector<8x1090xf32> to vector<8x1024xf32>
    %97 = vector.extract_strided_slice %92 {offsets = [0, 2], sizes = [8, 1024], strides = [1, 1]} : vector<8x1090xf32> to vector<8x1024xf32>
    %98 = vector.broadcast %24 : vector<1x1024xf32> to vector<8x1024xf32>
    %99 = arith.mulf %97, %98 : vector<8x1024xf32>
    %100 = vector.extract_strided_slice %92 {offsets = [0, 32], sizes = [8, 1024], strides = [1, 1]} : vector<8x1090xf32> to vector<8x1024xf32>
    %101 = vector.broadcast %20 : vector<1x1024xf32> to vector<8x1024xf32>
    %102 = arith.mulf %100, %101 : vector<8x1024xf32>
    %103 = vector.extract_strided_slice %92 {offsets = [0, 33], sizes = [8, 1024], strides = [1, 1]} : vector<8x1090xf32> to vector<8x1024xf32>
    %104 = vector.extract_strided_slice %92 {offsets = [0, 34], sizes = [8, 1024], strides = [1, 1]} : vector<8x1090xf32> to vector<8x1024xf32>
    %105 = vector.broadcast %24 : vector<1x1024xf32> to vector<8x1024xf32>
    %106 = arith.mulf %104, %105 : vector<8x1024xf32>
    %107 = vector.extract_strided_slice %92 {offsets = [0, 64], sizes = [8, 1024], strides = [1, 1]} : vector<8x1090xf32> to vector<8x1024xf32>
    %108 = vector.broadcast %20 : vector<1x1024xf32> to vector<8x1024xf32>
    %109 = arith.mulf %107, %108 : vector<8x1024xf32>
    %110 = vector.extract_strided_slice %92 {offsets = [0, 65], sizes = [8, 1024], strides = [1, 1]} : vector<8x1090xf32> to vector<8x1024xf32>
    %111 = vector.extract_strided_slice %92 {offsets = [0, 66], sizes = [8, 1024], strides = [1, 1]} : vector<8x1090xf32> to vector<8x1024xf32>
    %112 = vector.broadcast %24 : vector<1x1024xf32> to vector<8x1024xf32>
    %113 = arith.mulf %111, %112 : vector<8x1024xf32>
    %114 = tpu.concatenate %95, %96, %99, %102, %103, %106, %109, %110, %113 in 0 : vector<8x1024xf32>, vector<8x1024xf32>, vector<8x1024xf32>, vector<8x1024xf32>, vector<8x1024xf32>, vector<8x1024xf32>, vector<8x1024xf32>, vector<8x1024xf32>, vector<8x1024xf32> -> vector<72x1024xf32>
    %c0_22 = arith.constant 0 : index
    %c0_23 = arith.constant 0 : index
    %115 = vector.load %arg9[%c0_22, %c0_23] : memref<24x2xf32, #tpu.memory_space<vmem>>, vector<24x1xf32>
    %c0_24 = arith.constant 0 : index
    %c0_25 = arith.constant 0 : index
    %116 = vector.load %arg5[%c0_24, %c0_25] : memref<24x72xf32, #tpu.memory_space<vmem>>, vector<24x72xf32>
    %cst_26 = arith.constant dense<0.000000e+00> : vector<24x1024xf32>
    %117 = tpu.matmul %116, %114, %cst_26 {dimension_numbers = #tpu.dot_dimension_numbers<[1], [0], [0], [1], [0, 0, 1, 1], [], []>} : vector<24x72xf32>, vector<72x1024xf32>, vector<24x1024xf32> -> vector<24x1024xf32>
    %118 = vector.broadcast %115 : vector<24x1xf32> to vector<24x1024xf32>
    %119 = arith.addf %117, %118 : vector<24x1024xf32>
    %cst_27 = arith.constant 5.000000e-01 : f32
    %120 = vector.broadcast %cst_27 : f32 to vector<24x1024xf32>
    %121 = arith.mulf %120, %119 : vector<24x1024xf32>
    %122 = math.tanh %121 : vector<24x1024xf32>
    %cst_28 = arith.constant 5.000000e-01 : f32
    %123 = vector.broadcast %cst_28 : f32 to vector<24x1024xf32>
    %124 = arith.mulf %123, %122 : vector<24x1024xf32>
    %cst_29 = arith.constant 5.000000e-01 : f32
    %125 = vector.broadcast %cst_29 : f32 to vector<24x1024xf32>
    %126 = arith.addf %124, %125 : vector<24x1024xf32>
    %cst_30 = arith.constant 0.000000e+00 : f32
    %127 = vector.broadcast %cst_30 : f32 to vector<8x33xf32>
    %128 = tpu.concatenate %127, %90, %127 in 1 : vector<8x33xf32>, vector<8x1024xf32>, vector<8x33xf32> -> vector<8x1090xf32>
    %129 = vector.extract_strided_slice %128 {offsets = [0, 0], sizes = [8, 1024], strides = [1, 1]} : vector<8x1090xf32> to vector<8x1024xf32>
    %130 = vector.broadcast %20 : vector<1x1024xf32> to vector<8x1024xf32>
    %131 = arith.mulf %129, %130 : vector<8x1024xf32>
    %132 = vector.extract_strided_slice %128 {offsets = [0, 1], sizes = [8, 1024], strides = [1, 1]} : vector<8x1090xf32> to vector<8x1024xf32>
    %133 = vector.extract_strided_slice %128 {offsets = [0, 2], sizes = [8, 1024], strides = [1, 1]} : vector<8x1090xf32> to vector<8x1024xf32>
    %134 = vector.broadcast %24 : vector<1x1024xf32> to vector<8x1024xf32>
    %135 = arith.mulf %133, %134 : vector<8x1024xf32>
    %136 = vector.extract_strided_slice %128 {offsets = [0, 32], sizes = [8, 1024], strides = [1, 1]} : vector<8x1090xf32> to vector<8x1024xf32>
    %137 = vector.broadcast %20 : vector<1x1024xf32> to vector<8x1024xf32>
    %138 = arith.mulf %136, %137 : vector<8x1024xf32>
    %139 = vector.extract_strided_slice %128 {offsets = [0, 33], sizes = [8, 1024], strides = [1, 1]} : vector<8x1090xf32> to vector<8x1024xf32>
    %140 = vector.extract_strided_slice %128 {offsets = [0, 34], sizes = [8, 1024], strides = [1, 1]} : vector<8x1090xf32> to vector<8x1024xf32>
    %141 = vector.broadcast %24 : vector<1x1024xf32> to vector<8x1024xf32>
    %142 = arith.mulf %140, %141 : vector<8x1024xf32>
    %143 = vector.extract_strided_slice %128 {offsets = [0, 64], sizes = [8, 1024], strides = [1, 1]} : vector<8x1090xf32> to vector<8x1024xf32>
    %144 = vector.broadcast %20 : vector<1x1024xf32> to vector<8x1024xf32>
    %145 = arith.mulf %143, %144 : vector<8x1024xf32>
    %146 = vector.extract_strided_slice %128 {offsets = [0, 65], sizes = [8, 1024], strides = [1, 1]} : vector<8x1090xf32> to vector<8x1024xf32>
    %147 = vector.extract_strided_slice %128 {offsets = [0, 66], sizes = [8, 1024], strides = [1, 1]} : vector<8x1090xf32> to vector<8x1024xf32>
    %148 = vector.broadcast %24 : vector<1x1024xf32> to vector<8x1024xf32>
    %149 = arith.mulf %147, %148 : vector<8x1024xf32>
    %150 = tpu.concatenate %131, %132, %135, %138, %139, %142, %145, %146, %149 in 0 : vector<8x1024xf32>, vector<8x1024xf32>, vector<8x1024xf32>, vector<8x1024xf32>, vector<8x1024xf32>, vector<8x1024xf32>, vector<8x1024xf32>, vector<8x1024xf32>, vector<8x1024xf32> -> vector<72x1024xf32>
    %c0_31 = arith.constant 0 : index
    %c1_32 = arith.constant 1 : index
    %151 = vector.load %arg9[%c0_31, %c1_32] : memref<24x2xf32, #tpu.memory_space<vmem>>, vector<24x1xf32>
    %c0_33 = arith.constant 0 : index
    %c0_34 = arith.constant 0 : index
    %152 = vector.load %arg6[%c0_33, %c0_34] : memref<24x72xf32, #tpu.memory_space<vmem>>, vector<24x72xf32>
    %cst_35 = arith.constant dense<0.000000e+00> : vector<24x1024xf32>
    %153 = tpu.matmul %152, %150, %cst_35 {dimension_numbers = #tpu.dot_dimension_numbers<[1], [0], [0], [1], [0, 0, 1, 1], [], []>} : vector<24x72xf32>, vector<72x1024xf32>, vector<24x1024xf32> -> vector<24x1024xf32>
    %154 = vector.broadcast %151 : vector<24x1xf32> to vector<24x1024xf32>
    %155 = arith.addf %153, %154 : vector<24x1024xf32>
    %cst_36 = arith.constant 5.000000e-01 : f32
    %156 = vector.broadcast %cst_36 : f32 to vector<24x1024xf32>
    %157 = arith.mulf %156, %155 : vector<24x1024xf32>
    %158 = math.tanh %157 : vector<24x1024xf32>
    %cst_37 = arith.constant 5.000000e-01 : f32
    %159 = vector.broadcast %cst_37 : f32 to vector<24x1024xf32>
    %160 = arith.mulf %159, %158 : vector<24x1024xf32>
    %cst_38 = arith.constant 5.000000e-01 : f32
    %161 = vector.broadcast %cst_38 : f32 to vector<24x1024xf32>
    %162 = arith.addf %160, %161 : vector<24x1024xf32>
    %163 = vector.extract_strided_slice %126 {offsets = [0, 0], sizes = [8, 1024], strides = [1, 1]} : vector<24x1024xf32> to vector<8x1024xf32>
    %164 = vector.extract_strided_slice %126 {offsets = [8, 0], sizes = [8, 1024], strides = [1, 1]} : vector<24x1024xf32> to vector<8x1024xf32>
    %165 = vector.extract_strided_slice %126 {offsets = [16, 0], sizes = [8, 1024], strides = [1, 1]} : vector<24x1024xf32> to vector<8x1024xf32>
    %166 = vector.extract_strided_slice %162 {offsets = [0, 0], sizes = [8, 1024], strides = [1, 1]} : vector<24x1024xf32> to vector<8x1024xf32>
    %167 = vector.extract_strided_slice %162 {offsets = [8, 0], sizes = [8, 1024], strides = [1, 1]} : vector<24x1024xf32> to vector<8x1024xf32>
    %168 = vector.extract_strided_slice %162 {offsets = [16, 0], sizes = [8, 1024], strides = [1, 1]} : vector<24x1024xf32> to vector<8x1024xf32>
    %169 = arith.mulf %163, %166 : vector<8x1024xf32>
    %cst_39 = arith.constant dense<0.000000e+00> : vector<1024xf32>
    %170 = vector.multi_reduction <add>, %169, %cst_39 [0] : vector<8x1024xf32> to vector<1024xf32>
    %171 = vector.shape_cast %170 : vector<1024xf32> to vector<1x1024xf32>
    %172 = arith.mulf %163, %163 : vector<8x1024xf32>
    %cst_40 = arith.constant dense<0.000000e+00> : vector<1024xf32>
    %173 = vector.multi_reduction <add>, %172, %cst_40 [0] : vector<8x1024xf32> to vector<1024xf32>
    %174 = vector.shape_cast %173 : vector<1024xf32> to vector<1x1024xf32>
    %175 = arith.mulf %166, %166 : vector<8x1024xf32>
    %cst_41 = arith.constant dense<0.000000e+00> : vector<1024xf32>
    %176 = vector.multi_reduction <add>, %175, %cst_41 [0] : vector<8x1024xf32> to vector<1024xf32>
    %177 = vector.shape_cast %176 : vector<1024xf32> to vector<1x1024xf32>
    %cst_42 = arith.constant 0.000000e+00 : f32
    %178 = vector.broadcast %cst_42 : f32 to vector<1x1024xf32>
    %179 = arith.addf %174, %177 : vector<1x1024xf32>
    %cst_43 = arith.constant 1.000000e+00 : f32
    %180 = vector.broadcast %cst_43 : f32 to vector<1x1024xf32>
    %181 = arith.mulf %180, %179 : vector<1x1024xf32>
    %cst_44 = arith.constant -1.000000e+00 : f32
    %182 = vector.broadcast %cst_44 : f32 to vector<1x1024xf32>
    %183 = arith.mulf %182, %171 : vector<1x1024xf32>
    %184 = arith.addf %181, %183 : vector<1x1024xf32>
    %cst_45 = arith.constant 9.99999974E-6 : f32
    %185 = vector.broadcast %cst_45 : f32 to vector<1x1024xf32>
    %186 = arith.addf %184, %185 : vector<1x1024xf32>
    %187 = tpu.reciprocal %186 {approx = true} : vector<1x1024xf32> -> vector<1x1024xf32>
    %188 = arith.addf %178, %187 : vector<1x1024xf32>
    %189 = arith.addf %174, %177 : vector<1x1024xf32>
    %cst_46 = arith.constant 2.000000e+00 : f32
    %190 = vector.broadcast %cst_46 : f32 to vector<1x1024xf32>
    %191 = arith.mulf %190, %189 : vector<1x1024xf32>
    %cst_47 = arith.constant -3.000000e+00 : f32
    %192 = vector.broadcast %cst_47 : f32 to vector<1x1024xf32>
    %193 = arith.mulf %192, %171 : vector<1x1024xf32>
    %194 = arith.addf %191, %193 : vector<1x1024xf32>
    %cst_48 = arith.constant 9.99999974E-6 : f32
    %195 = vector.broadcast %cst_48 : f32 to vector<1x1024xf32>
    %196 = arith.addf %194, %195 : vector<1x1024xf32>
    %197 = tpu.reciprocal %196 {approx = true} : vector<1x1024xf32> -> vector<1x1024xf32>
    %198 = arith.addf %188, %197 : vector<1x1024xf32>
    %199 = arith.addf %174, %177 : vector<1x1024xf32>
    %cst_49 = arith.constant 4.000000e+00 : f32
    %200 = vector.broadcast %cst_49 : f32 to vector<1x1024xf32>
    %201 = arith.mulf %200, %199 : vector<1x1024xf32>
    %cst_50 = arith.constant -7.000000e+00 : f32
    %202 = vector.broadcast %cst_50 : f32 to vector<1x1024xf32>
    %203 = arith.mulf %202, %171 : vector<1x1024xf32>
    %204 = arith.addf %201, %203 : vector<1x1024xf32>
    %cst_51 = arith.constant 9.99999974E-6 : f32
    %205 = vector.broadcast %cst_51 : f32 to vector<1x1024xf32>
    %206 = arith.addf %204, %205 : vector<1x1024xf32>
    %207 = tpu.reciprocal %206 {approx = true} : vector<1x1024xf32> -> vector<1x1024xf32>
    %208 = arith.addf %198, %207 : vector<1x1024xf32>
    %209 = arith.addf %174, %177 : vector<1x1024xf32>
    %cst_52 = arith.constant 8.000000e+00 : f32
    %210 = vector.broadcast %cst_52 : f32 to vector<1x1024xf32>
    %211 = arith.mulf %210, %209 : vector<1x1024xf32>
    %cst_53 = arith.constant -1.500000e+01 : f32
    %212 = vector.broadcast %cst_53 : f32 to vector<1x1024xf32>
    %213 = arith.mulf %212, %171 : vector<1x1024xf32>
    %214 = arith.addf %211, %213 : vector<1x1024xf32>
    %cst_54 = arith.constant 9.99999974E-6 : f32
    %215 = vector.broadcast %cst_54 : f32 to vector<1x1024xf32>
    %216 = arith.addf %214, %215 : vector<1x1024xf32>
    %217 = tpu.reciprocal %216 {approx = true} : vector<1x1024xf32> -> vector<1x1024xf32>
    %218 = arith.addf %208, %217 : vector<1x1024xf32>
    %219 = arith.addf %174, %177 : vector<1x1024xf32>
    %cst_55 = arith.constant 1.600000e+01 : f32
    %220 = vector.broadcast %cst_55 : f32 to vector<1x1024xf32>
    %221 = arith.mulf %220, %219 : vector<1x1024xf32>
    %cst_56 = arith.constant -3.100000e+01 : f32
    %222 = vector.broadcast %cst_56 : f32 to vector<1x1024xf32>
    %223 = arith.mulf %222, %171 : vector<1x1024xf32>
    %224 = arith.addf %221, %223 : vector<1x1024xf32>
    %cst_57 = arith.constant 9.99999974E-6 : f32
    %225 = vector.broadcast %cst_57 : f32 to vector<1x1024xf32>
    %226 = arith.addf %224, %225 : vector<1x1024xf32>
    %227 = tpu.reciprocal %226 {approx = true} : vector<1x1024xf32> -> vector<1x1024xf32>
    %228 = arith.addf %218, %227 : vector<1x1024xf32>
    %cst_58 = arith.constant 9.99999974E-6 : f32
    %229 = vector.broadcast %cst_58 : f32 to vector<1x1024xf32>
    %230 = arith.addf %171, %229 : vector<1x1024xf32>
    %231 = arith.mulf %230, %228 : vector<1x1024xf32>
    %cst_59 = arith.constant 2.000000e-01 : f32
    %232 = vector.broadcast %cst_59 : f32 to vector<1x1024xf32>
    %233 = arith.mulf %231, %232 : vector<1x1024xf32>
    %cst_60 = arith.constant 1.000000e+00 : f32
    %234 = vector.broadcast %cst_60 : f32 to vector<8x1024xf32>
    %235 = arith.subf %234, %163 : vector<8x1024xf32>
    %cst_61 = arith.constant 1.000000e+00 : f32
    %236 = vector.broadcast %cst_61 : f32 to vector<8x1024xf32>
    %237 = arith.subf %236, %166 : vector<8x1024xf32>
    %238 = arith.mulf %235, %237 : vector<8x1024xf32>
    %cst_62 = arith.constant dense<0.000000e+00> : vector<1024xf32>
    %239 = vector.multi_reduction <add>, %238, %cst_62 [0] : vector<8x1024xf32> to vector<1024xf32>
    %240 = vector.shape_cast %239 : vector<1024xf32> to vector<1x1024xf32>
    %241 = arith.mulf %235, %235 : vector<8x1024xf32>
    %cst_63 = arith.constant dense<0.000000e+00> : vector<1024xf32>
    %242 = vector.multi_reduction <add>, %241, %cst_63 [0] : vector<8x1024xf32> to vector<1024xf32>
    %243 = vector.shape_cast %242 : vector<1024xf32> to vector<1x1024xf32>
    %244 = arith.mulf %237, %237 : vector<8x1024xf32>
    %cst_64 = arith.constant dense<0.000000e+00> : vector<1024xf32>
    %245 = vector.multi_reduction <add>, %244, %cst_64 [0] : vector<8x1024xf32> to vector<1024xf32>
    %246 = vector.shape_cast %245 : vector<1024xf32> to vector<1x1024xf32>
    %cst_65 = arith.constant 0.000000e+00 : f32
    %247 = vector.broadcast %cst_65 : f32 to vector<1x1024xf32>
    %248 = arith.addf %243, %246 : vector<1x1024xf32>
    %cst_66 = arith.constant 1.000000e+00 : f32
    %249 = vector.broadcast %cst_66 : f32 to vector<1x1024xf32>
    %250 = arith.mulf %249, %248 : vector<1x1024xf32>
    %cst_67 = arith.constant -1.000000e+00 : f32
    %251 = vector.broadcast %cst_67 : f32 to vector<1x1024xf32>
    %252 = arith.mulf %251, %240 : vector<1x1024xf32>
    %253 = arith.addf %250, %252 : vector<1x1024xf32>
    %cst_68 = arith.constant 9.99999974E-6 : f32
    %254 = vector.broadcast %cst_68 : f32 to vector<1x1024xf32>
    %255 = arith.addf %253, %254 : vector<1x1024xf32>
    %256 = tpu.reciprocal %255 {approx = true} : vector<1x1024xf32> -> vector<1x1024xf32>
    %257 = arith.addf %247, %256 : vector<1x1024xf32>
    %258 = arith.addf %243, %246 : vector<1x1024xf32>
    %cst_69 = arith.constant 2.000000e+00 : f32
    %259 = vector.broadcast %cst_69 : f32 to vector<1x1024xf32>
    %260 = arith.mulf %259, %258 : vector<1x1024xf32>
    %cst_70 = arith.constant -3.000000e+00 : f32
    %261 = vector.broadcast %cst_70 : f32 to vector<1x1024xf32>
    %262 = arith.mulf %261, %240 : vector<1x1024xf32>
    %263 = arith.addf %260, %262 : vector<1x1024xf32>
    %cst_71 = arith.constant 9.99999974E-6 : f32
    %264 = vector.broadcast %cst_71 : f32 to vector<1x1024xf32>
    %265 = arith.addf %263, %264 : vector<1x1024xf32>
    %266 = tpu.reciprocal %265 {approx = true} : vector<1x1024xf32> -> vector<1x1024xf32>
    %267 = arith.addf %257, %266 : vector<1x1024xf32>
    %268 = arith.addf %243, %246 : vector<1x1024xf32>
    %cst_72 = arith.constant 4.000000e+00 : f32
    %269 = vector.broadcast %cst_72 : f32 to vector<1x1024xf32>
    %270 = arith.mulf %269, %268 : vector<1x1024xf32>
    %cst_73 = arith.constant -7.000000e+00 : f32
    %271 = vector.broadcast %cst_73 : f32 to vector<1x1024xf32>
    %272 = arith.mulf %271, %240 : vector<1x1024xf32>
    %273 = arith.addf %270, %272 : vector<1x1024xf32>
    %cst_74 = arith.constant 9.99999974E-6 : f32
    %274 = vector.broadcast %cst_74 : f32 to vector<1x1024xf32>
    %275 = arith.addf %273, %274 : vector<1x1024xf32>
    %276 = tpu.reciprocal %275 {approx = true} : vector<1x1024xf32> -> vector<1x1024xf32>
    %277 = arith.addf %267, %276 : vector<1x1024xf32>
    %278 = arith.addf %243, %246 : vector<1x1024xf32>
    %cst_75 = arith.constant 8.000000e+00 : f32
    %279 = vector.broadcast %cst_75 : f32 to vector<1x1024xf32>
    %280 = arith.mulf %279, %278 : vector<1x1024xf32>
    %cst_76 = arith.constant -1.500000e+01 : f32
    %281 = vector.broadcast %cst_76 : f32 to vector<1x1024xf32>
    %282 = arith.mulf %281, %240 : vector<1x1024xf32>
    %283 = arith.addf %280, %282 : vector<1x1024xf32>
    %cst_77 = arith.constant 9.99999974E-6 : f32
    %284 = vector.broadcast %cst_77 : f32 to vector<1x1024xf32>
    %285 = arith.addf %283, %284 : vector<1x1024xf32>
    %286 = tpu.reciprocal %285 {approx = true} : vector<1x1024xf32> -> vector<1x1024xf32>
    %287 = arith.addf %277, %286 : vector<1x1024xf32>
    %288 = arith.addf %243, %246 : vector<1x1024xf32>
    %cst_78 = arith.constant 1.600000e+01 : f32
    %289 = vector.broadcast %cst_78 : f32 to vector<1x1024xf32>
    %290 = arith.mulf %289, %288 : vector<1x1024xf32>
    %cst_79 = arith.constant -3.100000e+01 : f32
    %291 = vector.broadcast %cst_79 : f32 to vector<1x1024xf32>
    %292 = arith.mulf %291, %240 : vector<1x1024xf32>
    %293 = arith.addf %290, %292 : vector<1x1024xf32>
    %cst_80 = arith.constant 9.99999974E-6 : f32
    %294 = vector.broadcast %cst_80 : f32 to vector<1x1024xf32>
    %295 = arith.addf %293, %294 : vector<1x1024xf32>
    %296 = tpu.reciprocal %295 {approx = true} : vector<1x1024xf32> -> vector<1x1024xf32>
    %297 = arith.addf %287, %296 : vector<1x1024xf32>
    %cst_81 = arith.constant 9.99999974E-6 : f32
    %298 = vector.broadcast %cst_81 : f32 to vector<1x1024xf32>
    %299 = arith.addf %240, %298 : vector<1x1024xf32>
    %300 = arith.mulf %299, %297 : vector<1x1024xf32>
    %cst_82 = arith.constant 2.000000e-01 : f32
    %301 = vector.broadcast %cst_82 : f32 to vector<1x1024xf32>
    %302 = arith.mulf %300, %301 : vector<1x1024xf32>
    %303 = arith.addf %233, %302 : vector<1x1024xf32>
    %cst_83 = arith.constant 5.000000e-01 : f32
    %304 = vector.broadcast %cst_83 : f32 to vector<1x1024xf32>
    %305 = arith.mulf %304, %303 : vector<1x1024xf32>
    %306 = arith.mulf %163, %166 : vector<8x1024xf32>
    %cst_84 = arith.constant dense<0.000000e+00> : vector<8xf32>
    %307 = vector.multi_reduction <add>, %306, %cst_84 [1] : vector<8x1024xf32> to vector<8xf32>
    %308 = vector.shape_cast %307 : vector<8xf32> to vector<8x1xf32>
    %309 = arith.mulf %163, %163 : vector<8x1024xf32>
    %cst_85 = arith.constant dense<0.000000e+00> : vector<8xf32>
    %310 = vector.multi_reduction <add>, %309, %cst_85 [1] : vector<8x1024xf32> to vector<8xf32>
    %311 = vector.shape_cast %310 : vector<8xf32> to vector<8x1xf32>
    %312 = arith.mulf %166, %166 : vector<8x1024xf32>
    %cst_86 = arith.constant dense<0.000000e+00> : vector<8xf32>
    %313 = vector.multi_reduction <add>, %312, %cst_86 [1] : vector<8x1024xf32> to vector<8xf32>
    %314 = vector.shape_cast %313 : vector<8xf32> to vector<8x1xf32>
    %cst_87 = arith.constant 0.000000e+00 : f32
    %315 = vector.broadcast %cst_87 : f32 to vector<8x1xf32>
    %316 = arith.addf %311, %314 : vector<8x1xf32>
    %cst_88 = arith.constant 1.000000e+00 : f32
    %317 = vector.broadcast %cst_88 : f32 to vector<8x1xf32>
    %318 = arith.mulf %317, %316 : vector<8x1xf32>
    %cst_89 = arith.constant -1.000000e+00 : f32
    %319 = vector.broadcast %cst_89 : f32 to vector<8x1xf32>
    %320 = arith.mulf %319, %308 : vector<8x1xf32>
    %321 = arith.addf %318, %320 : vector<8x1xf32>
    %cst_90 = arith.constant 9.99999974E-6 : f32
    %322 = vector.broadcast %cst_90 : f32 to vector<8x1xf32>
    %323 = arith.addf %321, %322 : vector<8x1xf32>
    %324 = tpu.reciprocal %323 {approx = true} : vector<8x1xf32> -> vector<8x1xf32>
    %325 = arith.addf %315, %324 : vector<8x1xf32>
    %326 = arith.addf %311, %314 : vector<8x1xf32>
    %cst_91 = arith.constant 2.000000e+00 : f32
    %327 = vector.broadcast %cst_91 : f32 to vector<8x1xf32>
    %328 = arith.mulf %327, %326 : vector<8x1xf32>
    %cst_92 = arith.constant -3.000000e+00 : f32
    %329 = vector.broadcast %cst_92 : f32 to vector<8x1xf32>
    %330 = arith.mulf %329, %308 : vector<8x1xf32>
    %331 = arith.addf %328, %330 : vector<8x1xf32>
    %cst_93 = arith.constant 9.99999974E-6 : f32
    %332 = vector.broadcast %cst_93 : f32 to vector<8x1xf32>
    %333 = arith.addf %331, %332 : vector<8x1xf32>
    %334 = tpu.reciprocal %333 {approx = true} : vector<8x1xf32> -> vector<8x1xf32>
    %335 = arith.addf %325, %334 : vector<8x1xf32>
    %336 = arith.addf %311, %314 : vector<8x1xf32>
    %cst_94 = arith.constant 4.000000e+00 : f32
    %337 = vector.broadcast %cst_94 : f32 to vector<8x1xf32>
    %338 = arith.mulf %337, %336 : vector<8x1xf32>
    %cst_95 = arith.constant -7.000000e+00 : f32
    %339 = vector.broadcast %cst_95 : f32 to vector<8x1xf32>
    %340 = arith.mulf %339, %308 : vector<8x1xf32>
    %341 = arith.addf %338, %340 : vector<8x1xf32>
    %cst_96 = arith.constant 9.99999974E-6 : f32
    %342 = vector.broadcast %cst_96 : f32 to vector<8x1xf32>
    %343 = arith.addf %341, %342 : vector<8x1xf32>
    %344 = tpu.reciprocal %343 {approx = true} : vector<8x1xf32> -> vector<8x1xf32>
    %345 = arith.addf %335, %344 : vector<8x1xf32>
    %346 = arith.addf %311, %314 : vector<8x1xf32>
    %cst_97 = arith.constant 8.000000e+00 : f32
    %347 = vector.broadcast %cst_97 : f32 to vector<8x1xf32>
    %348 = arith.mulf %347, %346 : vector<8x1xf32>
    %cst_98 = arith.constant -1.500000e+01 : f32
    %349 = vector.broadcast %cst_98 : f32 to vector<8x1xf32>
    %350 = arith.mulf %349, %308 : vector<8x1xf32>
    %351 = arith.addf %348, %350 : vector<8x1xf32>
    %cst_99 = arith.constant 9.99999974E-6 : f32
    %352 = vector.broadcast %cst_99 : f32 to vector<8x1xf32>
    %353 = arith.addf %351, %352 : vector<8x1xf32>
    %354 = tpu.reciprocal %353 {approx = true} : vector<8x1xf32> -> vector<8x1xf32>
    %355 = arith.addf %345, %354 : vector<8x1xf32>
    %356 = arith.addf %311, %314 : vector<8x1xf32>
    %cst_100 = arith.constant 1.600000e+01 : f32
    %357 = vector.broadcast %cst_100 : f32 to vector<8x1xf32>
    %358 = arith.mulf %357, %356 : vector<8x1xf32>
    %cst_101 = arith.constant -3.100000e+01 : f32
    %359 = vector.broadcast %cst_101 : f32 to vector<8x1xf32>
    %360 = arith.mulf %359, %308 : vector<8x1xf32>
    %361 = arith.addf %358, %360 : vector<8x1xf32>
    %cst_102 = arith.constant 9.99999974E-6 : f32
    %362 = vector.broadcast %cst_102 : f32 to vector<8x1xf32>
    %363 = arith.addf %361, %362 : vector<8x1xf32>
    %364 = tpu.reciprocal %363 {approx = true} : vector<8x1xf32> -> vector<8x1xf32>
    %365 = arith.addf %355, %364 : vector<8x1xf32>
    %cst_103 = arith.constant 9.99999974E-6 : f32
    %366 = vector.broadcast %cst_103 : f32 to vector<8x1xf32>
    %367 = arith.addf %308, %366 : vector<8x1xf32>
    %368 = arith.mulf %367, %365 : vector<8x1xf32>
    %cst_104 = arith.constant 2.000000e-01 : f32
    %369 = vector.broadcast %cst_104 : f32 to vector<8x1xf32>
    %370 = arith.mulf %368, %369 : vector<8x1xf32>
    %cst_105 = arith.constant 1.000000e+00 : f32
    %371 = vector.broadcast %cst_105 : f32 to vector<8x1024xf32>
    %372 = arith.subf %371, %163 : vector<8x1024xf32>
    %cst_106 = arith.constant 1.000000e+00 : f32
    %373 = vector.broadcast %cst_106 : f32 to vector<8x1024xf32>
    %374 = arith.subf %373, %166 : vector<8x1024xf32>
    %375 = arith.mulf %372, %374 : vector<8x1024xf32>
    %cst_107 = arith.constant dense<0.000000e+00> : vector<8xf32>
    %376 = vector.multi_reduction <add>, %375, %cst_107 [1] : vector<8x1024xf32> to vector<8xf32>
    %377 = vector.shape_cast %376 : vector<8xf32> to vector<8x1xf32>
    %378 = arith.mulf %372, %372 : vector<8x1024xf32>
    %cst_108 = arith.constant dense<0.000000e+00> : vector<8xf32>
    %379 = vector.multi_reduction <add>, %378, %cst_108 [1] : vector<8x1024xf32> to vector<8xf32>
    %380 = vector.shape_cast %379 : vector<8xf32> to vector<8x1xf32>
    %381 = arith.mulf %374, %374 : vector<8x1024xf32>
    %cst_109 = arith.constant dense<0.000000e+00> : vector<8xf32>
    %382 = vector.multi_reduction <add>, %381, %cst_109 [1] : vector<8x1024xf32> to vector<8xf32>
    %383 = vector.shape_cast %382 : vector<8xf32> to vector<8x1xf32>
    %cst_110 = arith.constant 0.000000e+00 : f32
    %384 = vector.broadcast %cst_110 : f32 to vector<8x1xf32>
    %385 = arith.addf %380, %383 : vector<8x1xf32>
    %cst_111 = arith.constant 1.000000e+00 : f32
    %386 = vector.broadcast %cst_111 : f32 to vector<8x1xf32>
    %387 = arith.mulf %386, %385 : vector<8x1xf32>
    %cst_112 = arith.constant -1.000000e+00 : f32
    %388 = vector.broadcast %cst_112 : f32 to vector<8x1xf32>
    %389 = arith.mulf %388, %377 : vector<8x1xf32>
    %390 = arith.addf %387, %389 : vector<8x1xf32>
    %cst_113 = arith.constant 9.99999974E-6 : f32
    %391 = vector.broadcast %cst_113 : f32 to vector<8x1xf32>
    %392 = arith.addf %390, %391 : vector<8x1xf32>
    %393 = tpu.reciprocal %392 {approx = true} : vector<8x1xf32> -> vector<8x1xf32>
    %394 = arith.addf %384, %393 : vector<8x1xf32>
    %395 = arith.addf %380, %383 : vector<8x1xf32>
    %cst_114 = arith.constant 2.000000e+00 : f32
    %396 = vector.broadcast %cst_114 : f32 to vector<8x1xf32>
    %397 = arith.mulf %396, %395 : vector<8x1xf32>
    %cst_115 = arith.constant -3.000000e+00 : f32
    %398 = vector.broadcast %cst_115 : f32 to vector<8x1xf32>
    %399 = arith.mulf %398, %377 : vector<8x1xf32>
    %400 = arith.addf %397, %399 : vector<8x1xf32>
    %cst_116 = arith.constant 9.99999974E-6 : f32
    %401 = vector.broadcast %cst_116 : f32 to vector<8x1xf32>
    %402 = arith.addf %400, %401 : vector<8x1xf32>
    %403 = tpu.reciprocal %402 {approx = true} : vector<8x1xf32> -> vector<8x1xf32>
    %404 = arith.addf %394, %403 : vector<8x1xf32>
    %405 = arith.addf %380, %383 : vector<8x1xf32>
    %cst_117 = arith.constant 4.000000e+00 : f32
    %406 = vector.broadcast %cst_117 : f32 to vector<8x1xf32>
    %407 = arith.mulf %406, %405 : vector<8x1xf32>
    %cst_118 = arith.constant -7.000000e+00 : f32
    %408 = vector.broadcast %cst_118 : f32 to vector<8x1xf32>
    %409 = arith.mulf %408, %377 : vector<8x1xf32>
    %410 = arith.addf %407, %409 : vector<8x1xf32>
    %cst_119 = arith.constant 9.99999974E-6 : f32
    %411 = vector.broadcast %cst_119 : f32 to vector<8x1xf32>
    %412 = arith.addf %410, %411 : vector<8x1xf32>
    %413 = tpu.reciprocal %412 {approx = true} : vector<8x1xf32> -> vector<8x1xf32>
    %414 = arith.addf %404, %413 : vector<8x1xf32>
    %415 = arith.addf %380, %383 : vector<8x1xf32>
    %cst_120 = arith.constant 8.000000e+00 : f32
    %416 = vector.broadcast %cst_120 : f32 to vector<8x1xf32>
    %417 = arith.mulf %416, %415 : vector<8x1xf32>
    %cst_121 = arith.constant -1.500000e+01 : f32
    %418 = vector.broadcast %cst_121 : f32 to vector<8x1xf32>
    %419 = arith.mulf %418, %377 : vector<8x1xf32>
    %420 = arith.addf %417, %419 : vector<8x1xf32>
    %cst_122 = arith.constant 9.99999974E-6 : f32
    %421 = vector.broadcast %cst_122 : f32 to vector<8x1xf32>
    %422 = arith.addf %420, %421 : vector<8x1xf32>
    %423 = tpu.reciprocal %422 {approx = true} : vector<8x1xf32> -> vector<8x1xf32>
    %424 = arith.addf %414, %423 : vector<8x1xf32>
    %425 = arith.addf %380, %383 : vector<8x1xf32>
    %cst_123 = arith.constant 1.600000e+01 : f32
    %426 = vector.broadcast %cst_123 : f32 to vector<8x1xf32>
    %427 = arith.mulf %426, %425 : vector<8x1xf32>
    %cst_124 = arith.constant -3.100000e+01 : f32
    %428 = vector.broadcast %cst_124 : f32 to vector<8x1xf32>
    %429 = arith.mulf %428, %377 : vector<8x1xf32>
    %430 = arith.addf %427, %429 : vector<8x1xf32>
    %cst_125 = arith.constant 9.99999974E-6 : f32
    %431 = vector.broadcast %cst_125 : f32 to vector<8x1xf32>
    %432 = arith.addf %430, %431 : vector<8x1xf32>
    %433 = tpu.reciprocal %432 {approx = true} : vector<8x1xf32> -> vector<8x1xf32>
    %434 = arith.addf %424, %433 : vector<8x1xf32>
    %cst_126 = arith.constant 9.99999974E-6 : f32
    %435 = vector.broadcast %cst_126 : f32 to vector<8x1xf32>
    %436 = arith.addf %377, %435 : vector<8x1xf32>
    %437 = arith.mulf %436, %434 : vector<8x1xf32>
    %cst_127 = arith.constant 2.000000e-01 : f32
    %438 = vector.broadcast %cst_127 : f32 to vector<8x1xf32>
    %439 = arith.mulf %437, %438 : vector<8x1xf32>
    %440 = arith.addf %370, %439 : vector<8x1xf32>
    %cst_128 = arith.constant 5.000000e-01 : f32
    %441 = vector.broadcast %cst_128 : f32 to vector<8x1xf32>
    %442 = arith.mulf %441, %440 : vector<8x1xf32>
    %443 = vector.broadcast %442 : vector<8x1xf32> to vector<8x1024xf32>
    %444 = arith.mulf %443, %167 : vector<8x1024xf32>
    %cst_129 = arith.constant 5.000000e-01 : f32
    %445 = vector.broadcast %cst_129 : f32 to vector<8x1024xf32>
    %446 = arith.mulf %445, %444 : vector<8x1024xf32>
    %447 = vector.broadcast %305 : vector<1x1024xf32> to vector<8x1024xf32>
    %448 = arith.mulf %447, %167 : vector<8x1024xf32>
    %449 = arith.mulf %446, %448 : vector<8x1024xf32>
    %c0_130 = arith.constant 0 : index
    %c2 = arith.constant 2 : index
    %450 = vector.load %arg8[%c0_130, %c2] : memref<8x7xf32, #tpu.memory_space<vmem>>, vector<8x1xf32>
    %451 = vector.broadcast %450 : vector<8x1xf32> to vector<8x1024xf32>
    %452 = arith.mulf %449, %451 : vector<8x1024xf32>
    %c0_131 = arith.constant 0 : index
    %c3 = arith.constant 3 : index
    %453 = vector.load %arg8[%c0_131, %c3] : memref<8x7xf32, #tpu.memory_space<vmem>>, vector<8x1xf32>
    %454 = vector.broadcast %453 : vector<8x1xf32> to vector<8x1024xf32>
    %455 = arith.addf %452, %454 : vector<8x1024xf32>
    %456 = arith.mulf %168, %164 : vector<8x1024xf32>
    %cst_132 = arith.constant dense<0.000000e+00> : vector<1024xf32>
    %457 = vector.multi_reduction <add>, %456, %cst_132 [0] : vector<8x1024xf32> to vector<1024xf32>
    %458 = vector.shape_cast %457 : vector<1024xf32> to vector<1x1024xf32>
    %459 = arith.mulf %168, %168 : vector<8x1024xf32>
    %cst_133 = arith.constant dense<0.000000e+00> : vector<1024xf32>
    %460 = vector.multi_reduction <add>, %459, %cst_133 [0] : vector<8x1024xf32> to vector<1024xf32>
    %461 = vector.shape_cast %460 : vector<1024xf32> to vector<1x1024xf32>
    %462 = arith.mulf %164, %164 : vector<8x1024xf32>
    %cst_134 = arith.constant dense<0.000000e+00> : vector<1024xf32>
    %463 = vector.multi_reduction <add>, %462, %cst_134 [0] : vector<8x1024xf32> to vector<1024xf32>
    %464 = vector.shape_cast %463 : vector<1024xf32> to vector<1x1024xf32>
    %cst_135 = arith.constant 0.000000e+00 : f32
    %465 = vector.broadcast %cst_135 : f32 to vector<1x1024xf32>
    %466 = arith.addf %461, %464 : vector<1x1024xf32>
    %cst_136 = arith.constant 1.000000e+00 : f32
    %467 = vector.broadcast %cst_136 : f32 to vector<1x1024xf32>
    %468 = arith.mulf %467, %466 : vector<1x1024xf32>
    %cst_137 = arith.constant -1.000000e+00 : f32
    %469 = vector.broadcast %cst_137 : f32 to vector<1x1024xf32>
    %470 = arith.mulf %469, %458 : vector<1x1024xf32>
    %471 = arith.addf %468, %470 : vector<1x1024xf32>
    %cst_138 = arith.constant 9.99999974E-6 : f32
    %472 = vector.broadcast %cst_138 : f32 to vector<1x1024xf32>
    %473 = arith.addf %471, %472 : vector<1x1024xf32>
    %474 = tpu.reciprocal %473 {approx = true} : vector<1x1024xf32> -> vector<1x1024xf32>
    %475 = arith.addf %465, %474 : vector<1x1024xf32>
    %476 = arith.addf %461, %464 : vector<1x1024xf32>
    %cst_139 = arith.constant 2.000000e+00 : f32
    %477 = vector.broadcast %cst_139 : f32 to vector<1x1024xf32>
    %478 = arith.mulf %477, %476 : vector<1x1024xf32>
    %cst_140 = arith.constant -3.000000e+00 : f32
    %479 = vector.broadcast %cst_140 : f32 to vector<1x1024xf32>
    %480 = arith.mulf %479, %458 : vector<1x1024xf32>
    %481 = arith.addf %478, %480 : vector<1x1024xf32>
    %cst_141 = arith.constant 9.99999974E-6 : f32
    %482 = vector.broadcast %cst_141 : f32 to vector<1x1024xf32>
    %483 = arith.addf %481, %482 : vector<1x1024xf32>
    %484 = tpu.reciprocal %483 {approx = true} : vector<1x1024xf32> -> vector<1x1024xf32>
    %485 = arith.addf %475, %484 : vector<1x1024xf32>
    %486 = arith.addf %461, %464 : vector<1x1024xf32>
    %cst_142 = arith.constant 4.000000e+00 : f32
    %487 = vector.broadcast %cst_142 : f32 to vector<1x1024xf32>
    %488 = arith.mulf %487, %486 : vector<1x1024xf32>
    %cst_143 = arith.constant -7.000000e+00 : f32
    %489 = vector.broadcast %cst_143 : f32 to vector<1x1024xf32>
    %490 = arith.mulf %489, %458 : vector<1x1024xf32>
    %491 = arith.addf %488, %490 : vector<1x1024xf32>
    %cst_144 = arith.constant 9.99999974E-6 : f32
    %492 = vector.broadcast %cst_144 : f32 to vector<1x1024xf32>
    %493 = arith.addf %491, %492 : vector<1x1024xf32>
    %494 = tpu.reciprocal %493 {approx = true} : vector<1x1024xf32> -> vector<1x1024xf32>
    %495 = arith.addf %485, %494 : vector<1x1024xf32>
    %496 = arith.addf %461, %464 : vector<1x1024xf32>
    %cst_145 = arith.constant 8.000000e+00 : f32
    %497 = vector.broadcast %cst_145 : f32 to vector<1x1024xf32>
    %498 = arith.mulf %497, %496 : vector<1x1024xf32>
    %cst_146 = arith.constant -1.500000e+01 : f32
    %499 = vector.broadcast %cst_146 : f32 to vector<1x1024xf32>
    %500 = arith.mulf %499, %458 : vector<1x1024xf32>
    %501 = arith.addf %498, %500 : vector<1x1024xf32>
    %cst_147 = arith.constant 9.99999974E-6 : f32
    %502 = vector.broadcast %cst_147 : f32 to vector<1x1024xf32>
    %503 = arith.addf %501, %502 : vector<1x1024xf32>
    %504 = tpu.reciprocal %503 {approx = true} : vector<1x1024xf32> -> vector<1x1024xf32>
    %505 = arith.addf %495, %504 : vector<1x1024xf32>
    %506 = arith.addf %461, %464 : vector<1x1024xf32>
    %cst_148 = arith.constant 1.600000e+01 : f32
    %507 = vector.broadcast %cst_148 : f32 to vector<1x1024xf32>
    %508 = arith.mulf %507, %506 : vector<1x1024xf32>
    %cst_149 = arith.constant -3.100000e+01 : f32
    %509 = vector.broadcast %cst_149 : f32 to vector<1x1024xf32>
    %510 = arith.mulf %509, %458 : vector<1x1024xf32>
    %511 = arith.addf %508, %510 : vector<1x1024xf32>
    %cst_150 = arith.constant 9.99999974E-6 : f32
    %512 = vector.broadcast %cst_150 : f32 to vector<1x1024xf32>
    %513 = arith.addf %511, %512 : vector<1x1024xf32>
    %514 = tpu.reciprocal %513 {approx = true} : vector<1x1024xf32> -> vector<1x1024xf32>
    %515 = arith.addf %505, %514 : vector<1x1024xf32>
    %cst_151 = arith.constant 9.99999974E-6 : f32
    %516 = vector.broadcast %cst_151 : f32 to vector<1x1024xf32>
    %517 = arith.addf %458, %516 : vector<1x1024xf32>
    %518 = arith.mulf %517, %515 : vector<1x1024xf32>
    %cst_152 = arith.constant 2.000000e-01 : f32
    %519 = vector.broadcast %cst_152 : f32 to vector<1x1024xf32>
    %520 = arith.mulf %518, %519 : vector<1x1024xf32>
    %cst_153 = arith.constant 1.000000e+00 : f32
    %521 = vector.broadcast %cst_153 : f32 to vector<8x1024xf32>
    %522 = arith.subf %521, %168 : vector<8x1024xf32>
    %cst_154 = arith.constant 1.000000e+00 : f32
    %523 = vector.broadcast %cst_154 : f32 to vector<8x1024xf32>
    %524 = arith.subf %523, %164 : vector<8x1024xf32>
    %525 = arith.mulf %522, %524 : vector<8x1024xf32>
    %cst_155 = arith.constant dense<0.000000e+00> : vector<1024xf32>
    %526 = vector.multi_reduction <add>, %525, %cst_155 [0] : vector<8x1024xf32> to vector<1024xf32>
    %527 = vector.shape_cast %526 : vector<1024xf32> to vector<1x1024xf32>
    %528 = arith.mulf %522, %522 : vector<8x1024xf32>
    %cst_156 = arith.constant dense<0.000000e+00> : vector<1024xf32>
    %529 = vector.multi_reduction <add>, %528, %cst_156 [0] : vector<8x1024xf32> to vector<1024xf32>
    %530 = vector.shape_cast %529 : vector<1024xf32> to vector<1x1024xf32>
    %531 = arith.mulf %524, %524 : vector<8x1024xf32>
    %cst_157 = arith.constant dense<0.000000e+00> : vector<1024xf32>
    %532 = vector.multi_reduction <add>, %531, %cst_157 [0] : vector<8x1024xf32> to vector<1024xf32>
    %533 = vector.shape_cast %532 : vector<1024xf32> to vector<1x1024xf32>
    %cst_158 = arith.constant 0.000000e+00 : f32
    %534 = vector.broadcast %cst_158 : f32 to vector<1x1024xf32>
    %535 = arith.addf %530, %533 : vector<1x1024xf32>
    %cst_159 = arith.constant 1.000000e+00 : f32
    %536 = vector.broadcast %cst_159 : f32 to vector<1x1024xf32>
    %537 = arith.mulf %536, %535 : vector<1x1024xf32>
    %cst_160 = arith.constant -1.000000e+00 : f32
    %538 = vector.broadcast %cst_160 : f32 to vector<1x1024xf32>
    %539 = arith.mulf %538, %527 : vector<1x1024xf32>
    %540 = arith.addf %537, %539 : vector<1x1024xf32>
    %cst_161 = arith.constant 9.99999974E-6 : f32
    %541 = vector.broadcast %cst_161 : f32 to vector<1x1024xf32>
    %542 = arith.addf %540, %541 : vector<1x1024xf32>
    %543 = tpu.reciprocal %542 {approx = true} : vector<1x1024xf32> -> vector<1x1024xf32>
    %544 = arith.addf %534, %543 : vector<1x1024xf32>
    %545 = arith.addf %530, %533 : vector<1x1024xf32>
    %cst_162 = arith.constant 2.000000e+00 : f32
    %546 = vector.broadcast %cst_162 : f32 to vector<1x1024xf32>
    %547 = arith.mulf %546, %545 : vector<1x1024xf32>
    %cst_163 = arith.constant -3.000000e+00 : f32
    %548 = vector.broadcast %cst_163 : f32 to vector<1x1024xf32>
    %549 = arith.mulf %548, %527 : vector<1x1024xf32>
    %550 = arith.addf %547, %549 : vector<1x1024xf32>
    %cst_164 = arith.constant 9.99999974E-6 : f32
    %551 = vector.broadcast %cst_164 : f32 to vector<1x1024xf32>
    %552 = arith.addf %550, %551 : vector<1x1024xf32>
    %553 = tpu.reciprocal %552 {approx = true} : vector<1x1024xf32> -> vector<1x1024xf32>
    %554 = arith.addf %544, %553 : vector<1x1024xf32>
    %555 = arith.addf %530, %533 : vector<1x1024xf32>
    %cst_165 = arith.constant 4.000000e+00 : f32
    %556 = vector.broadcast %cst_165 : f32 to vector<1x1024xf32>
    %557 = arith.mulf %556, %555 : vector<1x1024xf32>
    %cst_166 = arith.constant -7.000000e+00 : f32
    %558 = vector.broadcast %cst_166 : f32 to vector<1x1024xf32>
    %559 = arith.mulf %558, %527 : vector<1x1024xf32>
    %560 = arith.addf %557, %559 : vector<1x1024xf32>
    %cst_167 = arith.constant 9.99999974E-6 : f32
    %561 = vector.broadcast %cst_167 : f32 to vector<1x1024xf32>
    %562 = arith.addf %560, %561 : vector<1x1024xf32>
    %563 = tpu.reciprocal %562 {approx = true} : vector<1x1024xf32> -> vector<1x1024xf32>
    %564 = arith.addf %554, %563 : vector<1x1024xf32>
    %565 = arith.addf %530, %533 : vector<1x1024xf32>
    %cst_168 = arith.constant 8.000000e+00 : f32
    %566 = vector.broadcast %cst_168 : f32 to vector<1x1024xf32>
    %567 = arith.mulf %566, %565 : vector<1x1024xf32>
    %cst_169 = arith.constant -1.500000e+01 : f32
    %568 = vector.broadcast %cst_169 : f32 to vector<1x1024xf32>
    %569 = arith.mulf %568, %527 : vector<1x1024xf32>
    %570 = arith.addf %567, %569 : vector<1x1024xf32>
    %cst_170 = arith.constant 9.99999974E-6 : f32
    %571 = vector.broadcast %cst_170 : f32 to vector<1x1024xf32>
    %572 = arith.addf %570, %571 : vector<1x1024xf32>
    %573 = tpu.reciprocal %572 {approx = true} : vector<1x1024xf32> -> vector<1x1024xf32>
    %574 = arith.addf %564, %573 : vector<1x1024xf32>
    %575 = arith.addf %530, %533 : vector<1x1024xf32>
    %cst_171 = arith.constant 1.600000e+01 : f32
    %576 = vector.broadcast %cst_171 : f32 to vector<1x1024xf32>
    %577 = arith.mulf %576, %575 : vector<1x1024xf32>
    %cst_172 = arith.constant -3.100000e+01 : f32
    %578 = vector.broadcast %cst_172 : f32 to vector<1x1024xf32>
    %579 = arith.mulf %578, %527 : vector<1x1024xf32>
    %580 = arith.addf %577, %579 : vector<1x1024xf32>
    %cst_173 = arith.constant 9.99999974E-6 : f32
    %581 = vector.broadcast %cst_173 : f32 to vector<1x1024xf32>
    %582 = arith.addf %580, %581 : vector<1x1024xf32>
    %583 = tpu.reciprocal %582 {approx = true} : vector<1x1024xf32> -> vector<1x1024xf32>
    %584 = arith.addf %574, %583 : vector<1x1024xf32>
    %cst_174 = arith.constant 9.99999974E-6 : f32
    %585 = vector.broadcast %cst_174 : f32 to vector<1x1024xf32>
    %586 = arith.addf %527, %585 : vector<1x1024xf32>
    %587 = arith.mulf %586, %584 : vector<1x1024xf32>
    %cst_175 = arith.constant 2.000000e-01 : f32
    %588 = vector.broadcast %cst_175 : f32 to vector<1x1024xf32>
    %589 = arith.mulf %587, %588 : vector<1x1024xf32>
    %590 = arith.addf %520, %589 : vector<1x1024xf32>
    %cst_176 = arith.constant 5.000000e-01 : f32
    %591 = vector.broadcast %cst_176 : f32 to vector<1x1024xf32>
    %592 = arith.mulf %591, %590 : vector<1x1024xf32>
    %593 = arith.mulf %168, %164 : vector<8x1024xf32>
    %cst_177 = arith.constant dense<0.000000e+00> : vector<8xf32>
    %594 = vector.multi_reduction <add>, %593, %cst_177 [1] : vector<8x1024xf32> to vector<8xf32>
    %595 = vector.shape_cast %594 : vector<8xf32> to vector<8x1xf32>
    %596 = arith.mulf %168, %168 : vector<8x1024xf32>
    %cst_178 = arith.constant dense<0.000000e+00> : vector<8xf32>
    %597 = vector.multi_reduction <add>, %596, %cst_178 [1] : vector<8x1024xf32> to vector<8xf32>
    %598 = vector.shape_cast %597 : vector<8xf32> to vector<8x1xf32>
    %599 = arith.mulf %164, %164 : vector<8x1024xf32>
    %cst_179 = arith.constant dense<0.000000e+00> : vector<8xf32>
    %600 = vector.multi_reduction <add>, %599, %cst_179 [1] : vector<8x1024xf32> to vector<8xf32>
    %601 = vector.shape_cast %600 : vector<8xf32> to vector<8x1xf32>
    %cst_180 = arith.constant 0.000000e+00 : f32
    %602 = vector.broadcast %cst_180 : f32 to vector<8x1xf32>
    %603 = arith.addf %598, %601 : vector<8x1xf32>
    %cst_181 = arith.constant 1.000000e+00 : f32
    %604 = vector.broadcast %cst_181 : f32 to vector<8x1xf32>
    %605 = arith.mulf %604, %603 : vector<8x1xf32>
    %cst_182 = arith.constant -1.000000e+00 : f32
    %606 = vector.broadcast %cst_182 : f32 to vector<8x1xf32>
    %607 = arith.mulf %606, %595 : vector<8x1xf32>
    %608 = arith.addf %605, %607 : vector<8x1xf32>
    %cst_183 = arith.constant 9.99999974E-6 : f32
    %609 = vector.broadcast %cst_183 : f32 to vector<8x1xf32>
    %610 = arith.addf %608, %609 : vector<8x1xf32>
    %611 = tpu.reciprocal %610 {approx = true} : vector<8x1xf32> -> vector<8x1xf32>
    %612 = arith.addf %602, %611 : vector<8x1xf32>
    %613 = arith.addf %598, %601 : vector<8x1xf32>
    %cst_184 = arith.constant 2.000000e+00 : f32
    %614 = vector.broadcast %cst_184 : f32 to vector<8x1xf32>
    %615 = arith.mulf %614, %613 : vector<8x1xf32>
    %cst_185 = arith.constant -3.000000e+00 : f32
    %616 = vector.broadcast %cst_185 : f32 to vector<8x1xf32>
    %617 = arith.mulf %616, %595 : vector<8x1xf32>
    %618 = arith.addf %615, %617 : vector<8x1xf32>
    %cst_186 = arith.constant 9.99999974E-6 : f32
    %619 = vector.broadcast %cst_186 : f32 to vector<8x1xf32>
    %620 = arith.addf %618, %619 : vector<8x1xf32>
    %621 = tpu.reciprocal %620 {approx = true} : vector<8x1xf32> -> vector<8x1xf32>
    %622 = arith.addf %612, %621 : vector<8x1xf32>
    %623 = arith.addf %598, %601 : vector<8x1xf32>
    %cst_187 = arith.constant 4.000000e+00 : f32
    %624 = vector.broadcast %cst_187 : f32 to vector<8x1xf32>
    %625 = arith.mulf %624, %623 : vector<8x1xf32>
    %cst_188 = arith.constant -7.000000e+00 : f32
    %626 = vector.broadcast %cst_188 : f32 to vector<8x1xf32>
    %627 = arith.mulf %626, %595 : vector<8x1xf32>
    %628 = arith.addf %625, %627 : vector<8x1xf32>
    %cst_189 = arith.constant 9.99999974E-6 : f32
    %629 = vector.broadcast %cst_189 : f32 to vector<8x1xf32>
    %630 = arith.addf %628, %629 : vector<8x1xf32>
    %631 = tpu.reciprocal %630 {approx = true} : vector<8x1xf32> -> vector<8x1xf32>
    %632 = arith.addf %622, %631 : vector<8x1xf32>
    %633 = arith.addf %598, %601 : vector<8x1xf32>
    %cst_190 = arith.constant 8.000000e+00 : f32
    %634 = vector.broadcast %cst_190 : f32 to vector<8x1xf32>
    %635 = arith.mulf %634, %633 : vector<8x1xf32>
    %cst_191 = arith.constant -1.500000e+01 : f32
    %636 = vector.broadcast %cst_191 : f32 to vector<8x1xf32>
    %637 = arith.mulf %636, %595 : vector<8x1xf32>
    %638 = arith.addf %635, %637 : vector<8x1xf32>
    %cst_192 = arith.constant 9.99999974E-6 : f32
    %639 = vector.broadcast %cst_192 : f32 to vector<8x1xf32>
    %640 = arith.addf %638, %639 : vector<8x1xf32>
    %641 = tpu.reciprocal %640 {approx = true} : vector<8x1xf32> -> vector<8x1xf32>
    %642 = arith.addf %632, %641 : vector<8x1xf32>
    %643 = arith.addf %598, %601 : vector<8x1xf32>
    %cst_193 = arith.constant 1.600000e+01 : f32
    %644 = vector.broadcast %cst_193 : f32 to vector<8x1xf32>
    %645 = arith.mulf %644, %643 : vector<8x1xf32>
    %cst_194 = arith.constant -3.100000e+01 : f32
    %646 = vector.broadcast %cst_194 : f32 to vector<8x1xf32>
    %647 = arith.mulf %646, %595 : vector<8x1xf32>
    %648 = arith.addf %645, %647 : vector<8x1xf32>
    %cst_195 = arith.constant 9.99999974E-6 : f32
    %649 = vector.broadcast %cst_195 : f32 to vector<8x1xf32>
    %650 = arith.addf %648, %649 : vector<8x1xf32>
    %651 = tpu.reciprocal %650 {approx = true} : vector<8x1xf32> -> vector<8x1xf32>
    %652 = arith.addf %642, %651 : vector<8x1xf32>
    %cst_196 = arith.constant 9.99999974E-6 : f32
    %653 = vector.broadcast %cst_196 : f32 to vector<8x1xf32>
    %654 = arith.addf %595, %653 : vector<8x1xf32>
    %655 = arith.mulf %654, %652 : vector<8x1xf32>
    %cst_197 = arith.constant 2.000000e-01 : f32
    %656 = vector.broadcast %cst_197 : f32 to vector<8x1xf32>
    %657 = arith.mulf %655, %656 : vector<8x1xf32>
    %cst_198 = arith.constant 1.000000e+00 : f32
    %658 = vector.broadcast %cst_198 : f32 to vector<8x1024xf32>
    %659 = arith.subf %658, %168 : vector<8x1024xf32>
    %cst_199 = arith.constant 1.000000e+00 : f32
    %660 = vector.broadcast %cst_199 : f32 to vector<8x1024xf32>
    %661 = arith.subf %660, %164 : vector<8x1024xf32>
    %662 = arith.mulf %659, %661 : vector<8x1024xf32>
    %cst_200 = arith.constant dense<0.000000e+00> : vector<8xf32>
    %663 = vector.multi_reduction <add>, %662, %cst_200 [1] : vector<8x1024xf32> to vector<8xf32>
    %664 = vector.shape_cast %663 : vector<8xf32> to vector<8x1xf32>
    %665 = arith.mulf %659, %659 : vector<8x1024xf32>
    %cst_201 = arith.constant dense<0.000000e+00> : vector<8xf32>
    %666 = vector.multi_reduction <add>, %665, %cst_201 [1] : vector<8x1024xf32> to vector<8xf32>
    %667 = vector.shape_cast %666 : vector<8xf32> to vector<8x1xf32>
    %668 = arith.mulf %661, %661 : vector<8x1024xf32>
    %cst_202 = arith.constant dense<0.000000e+00> : vector<8xf32>
    %669 = vector.multi_reduction <add>, %668, %cst_202 [1] : vector<8x1024xf32> to vector<8xf32>
    %670 = vector.shape_cast %669 : vector<8xf32> to vector<8x1xf32>
    %cst_203 = arith.constant 0.000000e+00 : f32
    %671 = vector.broadcast %cst_203 : f32 to vector<8x1xf32>
    %672 = arith.addf %667, %670 : vector<8x1xf32>
    %cst_204 = arith.constant 1.000000e+00 : f32
    %673 = vector.broadcast %cst_204 : f32 to vector<8x1xf32>
    %674 = arith.mulf %673, %672 : vector<8x1xf32>
    %cst_205 = arith.constant -1.000000e+00 : f32
    %675 = vector.broadcast %cst_205 : f32 to vector<8x1xf32>
    %676 = arith.mulf %675, %664 : vector<8x1xf32>
    %677 = arith.addf %674, %676 : vector<8x1xf32>
    %cst_206 = arith.constant 9.99999974E-6 : f32
    %678 = vector.broadcast %cst_206 : f32 to vector<8x1xf32>
    %679 = arith.addf %677, %678 : vector<8x1xf32>
    %680 = tpu.reciprocal %679 {approx = true} : vector<8x1xf32> -> vector<8x1xf32>
    %681 = arith.addf %671, %680 : vector<8x1xf32>
    %682 = arith.addf %667, %670 : vector<8x1xf32>
    %cst_207 = arith.constant 2.000000e+00 : f32
    %683 = vector.broadcast %cst_207 : f32 to vector<8x1xf32>
    %684 = arith.mulf %683, %682 : vector<8x1xf32>
    %cst_208 = arith.constant -3.000000e+00 : f32
    %685 = vector.broadcast %cst_208 : f32 to vector<8x1xf32>
    %686 = arith.mulf %685, %664 : vector<8x1xf32>
    %687 = arith.addf %684, %686 : vector<8x1xf32>
    %cst_209 = arith.constant 9.99999974E-6 : f32
    %688 = vector.broadcast %cst_209 : f32 to vector<8x1xf32>
    %689 = arith.addf %687, %688 : vector<8x1xf32>
    %690 = tpu.reciprocal %689 {approx = true} : vector<8x1xf32> -> vector<8x1xf32>
    %691 = arith.addf %681, %690 : vector<8x1xf32>
    %692 = arith.addf %667, %670 : vector<8x1xf32>
    %cst_210 = arith.constant 4.000000e+00 : f32
    %693 = vector.broadcast %cst_210 : f32 to vector<8x1xf32>
    %694 = arith.mulf %693, %692 : vector<8x1xf32>
    %cst_211 = arith.constant -7.000000e+00 : f32
    %695 = vector.broadcast %cst_211 : f32 to vector<8x1xf32>
    %696 = arith.mulf %695, %664 : vector<8x1xf32>
    %697 = arith.addf %694, %696 : vector<8x1xf32>
    %cst_212 = arith.constant 9.99999974E-6 : f32
    %698 = vector.broadcast %cst_212 : f32 to vector<8x1xf32>
    %699 = arith.addf %697, %698 : vector<8x1xf32>
    %700 = tpu.reciprocal %699 {approx = true} : vector<8x1xf32> -> vector<8x1xf32>
    %701 = arith.addf %691, %700 : vector<8x1xf32>
    %702 = arith.addf %667, %670 : vector<8x1xf32>
    %cst_213 = arith.constant 8.000000e+00 : f32
    %703 = vector.broadcast %cst_213 : f32 to vector<8x1xf32>
    %704 = arith.mulf %703, %702 : vector<8x1xf32>
    %cst_214 = arith.constant -1.500000e+01 : f32
    %705 = vector.broadcast %cst_214 : f32 to vector<8x1xf32>
    %706 = arith.mulf %705, %664 : vector<8x1xf32>
    %707 = arith.addf %704, %706 : vector<8x1xf32>
    %cst_215 = arith.constant 9.99999974E-6 : f32
    %708 = vector.broadcast %cst_215 : f32 to vector<8x1xf32>
    %709 = arith.addf %707, %708 : vector<8x1xf32>
    %710 = tpu.reciprocal %709 {approx = true} : vector<8x1xf32> -> vector<8x1xf32>
    %711 = arith.addf %701, %710 : vector<8x1xf32>
    %712 = arith.addf %667, %670 : vector<8x1xf32>
    %cst_216 = arith.constant 1.600000e+01 : f32
    %713 = vector.broadcast %cst_216 : f32 to vector<8x1xf32>
    %714 = arith.mulf %713, %712 : vector<8x1xf32>
    %cst_217 = arith.constant -3.100000e+01 : f32
    %715 = vector.broadcast %cst_217 : f32 to vector<8x1xf32>
    %716 = arith.mulf %715, %664 : vector<8x1xf32>
    %717 = arith.addf %714, %716 : vector<8x1xf32>
    %cst_218 = arith.constant 9.99999974E-6 : f32
    %718 = vector.broadcast %cst_218 : f32 to vector<8x1xf32>
    %719 = arith.addf %717, %718 : vector<8x1xf32>
    %720 = tpu.reciprocal %719 {approx = true} : vector<8x1xf32> -> vector<8x1xf32>
    %721 = arith.addf %711, %720 : vector<8x1xf32>
    %cst_219 = arith.constant 9.99999974E-6 : f32
    %722 = vector.broadcast %cst_219 : f32 to vector<8x1xf32>
    %723 = arith.addf %664, %722 : vector<8x1xf32>
    %724 = arith.mulf %723, %721 : vector<8x1xf32>
    %cst_220 = arith.constant 2.000000e-01 : f32
    %725 = vector.broadcast %cst_220 : f32 to vector<8x1xf32>
    %726 = arith.mulf %724, %725 : vector<8x1xf32>
    %727 = arith.addf %657, %726 : vector<8x1xf32>
    %cst_221 = arith.constant 5.000000e-01 : f32
    %728 = vector.broadcast %cst_221 : f32 to vector<8x1xf32>
    %729 = arith.mulf %728, %727 : vector<8x1xf32>
    %730 = vector.broadcast %729 : vector<8x1xf32> to vector<8x1024xf32>
    %731 = arith.mulf %730, %165 : vector<8x1024xf32>
    %cst_222 = arith.constant 5.000000e-01 : f32
    %732 = vector.broadcast %cst_222 : f32 to vector<8x1024xf32>
    %733 = arith.mulf %732, %731 : vector<8x1024xf32>
    %734 = vector.broadcast %592 : vector<1x1024xf32> to vector<8x1024xf32>
    %735 = arith.mulf %734, %165 : vector<8x1024xf32>
    %736 = arith.mulf %733, %735 : vector<8x1024xf32>
    %c0_223 = arith.constant 0 : index
    %c4 = arith.constant 4 : index
    %737 = vector.load %arg8[%c0_223, %c4] : memref<8x7xf32, #tpu.memory_space<vmem>>, vector<8x1xf32>
    %738 = vector.broadcast %737 : vector<8x1xf32> to vector<8x1024xf32>
    %739 = arith.mulf %736, %738 : vector<8x1024xf32>
    %c0_224 = arith.constant 0 : index
    %c5 = arith.constant 5 : index
    %740 = vector.load %arg8[%c0_224, %c5] : memref<8x7xf32, #tpu.memory_space<vmem>>, vector<8x1xf32>
    %741 = vector.broadcast %740 : vector<8x1xf32> to vector<8x1024xf32>
    %742 = arith.addf %739, %741 : vector<8x1024xf32>
    %cst_225 = arith.constant 1.000000e+00 : f32
    %743 = vector.broadcast %cst_225 : f32 to vector<8x1024xf32>
    %744 = arith.addf %743, %455 : vector<8x1024xf32>
    %745 = arith.mulf %57, %744 : vector<8x1024xf32>
    %cst_226 = arith.constant 1.000000e+00 : f32
    %746 = vector.broadcast %cst_226 : f32 to vector<8x1024xf32>
    %747 = arith.addf %746, %742 : vector<8x1024xf32>
    %748 = arith.mulf %90, %747 : vector<8x1024xf32>
    %749 = tpu.concatenate %745, %748 in 0 : vector<8x1024xf32>, vector<8x1024xf32> -> vector<16x1024xf32>
    %cst_227 = arith.constant 0.000000e+00 : f32
    %750 = vector.broadcast %cst_227 : f32 to vector<16x33xf32>
    %751 = tpu.concatenate %750, %749, %750 in 1 : vector<16x33xf32>, vector<16x1024xf32>, vector<16x33xf32> -> vector<16x1090xf32>
    %752 = vector.extract_strided_slice %751 {offsets = [0, 0], sizes = [16, 1024], strides = [1, 1]} : vector<16x1090xf32> to vector<16x1024xf32>
    %753 = vector.broadcast %20 : vector<1x1024xf32> to vector<16x1024xf32>
    %754 = arith.mulf %752, %753 : vector<16x1024xf32>
    %755 = vector.extract_strided_slice %751 {offsets = [0, 1], sizes = [16, 1024], strides = [1, 1]} : vector<16x1090xf32> to vector<16x1024xf32>
    %756 = vector.extract_strided_slice %751 {offsets = [0, 2], sizes = [16, 1024], strides = [1, 1]} : vector<16x1090xf32> to vector<16x1024xf32>
    %757 = vector.broadcast %24 : vector<1x1024xf32> to vector<16x1024xf32>
    %758 = arith.mulf %756, %757 : vector<16x1024xf32>
    %759 = vector.extract_strided_slice %751 {offsets = [0, 32], sizes = [16, 1024], strides = [1, 1]} : vector<16x1090xf32> to vector<16x1024xf32>
    %760 = vector.broadcast %20 : vector<1x1024xf32> to vector<16x1024xf32>
    %761 = arith.mulf %759, %760 : vector<16x1024xf32>
    %762 = vector.extract_strided_slice %751 {offsets = [0, 33], sizes = [16, 1024], strides = [1, 1]} : vector<16x1090xf32> to vector<16x1024xf32>
    %763 = vector.extract_strided_slice %751 {offsets = [0, 34], sizes = [16, 1024], strides = [1, 1]} : vector<16x1090xf32> to vector<16x1024xf32>
    %764 = vector.broadcast %24 : vector<1x1024xf32> to vector<16x1024xf32>
    %765 = arith.mulf %763, %764 : vector<16x1024xf32>
    %766 = vector.extract_strided_slice %751 {offsets = [0, 64], sizes = [16, 1024], strides = [1, 1]} : vector<16x1090xf32> to vector<16x1024xf32>
    %767 = vector.broadcast %20 : vector<1x1024xf32> to vector<16x1024xf32>
    %768 = arith.mulf %766, %767 : vector<16x1024xf32>
    %769 = vector.extract_strided_slice %751 {offsets = [0, 65], sizes = [16, 1024], strides = [1, 1]} : vector<16x1090xf32> to vector<16x1024xf32>
    %770 = vector.extract_strided_slice %751 {offsets = [0, 66], sizes = [16, 1024], strides = [1, 1]} : vector<16x1090xf32> to vector<16x1024xf32>
    %771 = vector.broadcast %24 : vector<1x1024xf32> to vector<16x1024xf32>
    %772 = arith.mulf %770, %771 : vector<16x1024xf32>
    %773 = tpu.concatenate %754, %755, %758, %761, %762, %765, %768, %769, %772 in 0 : vector<16x1024xf32>, vector<16x1024xf32>, vector<16x1024xf32>, vector<16x1024xf32>, vector<16x1024xf32>, vector<16x1024xf32>, vector<16x1024xf32>, vector<16x1024xf32>, vector<16x1024xf32> -> vector<144x1024xf32>
    %c0_228 = arith.constant 0 : index
    %c6 = arith.constant 6 : index
    %774 = vector.load %arg8[%c0_228, %c6] : memref<8x7xf32, #tpu.memory_space<vmem>>, vector<8x1xf32>
    %c0_229 = arith.constant 0 : index
    %c0_230 = arith.constant 0 : index
    %775 = vector.load %arg7[%c0_229, %c0_230] : memref<8x144xf32, #tpu.memory_space<vmem>>, vector<8x144xf32>
    %cst_231 = arith.constant dense<0.000000e+00> : vector<8x1024xf32>
    %776 = tpu.matmul %775, %773, %cst_231 {dimension_numbers = #tpu.dot_dimension_numbers<[1], [0], [0], [1], [0, 0, 1, 1], [], []>} : vector<8x144xf32>, vector<144x1024xf32>, vector<8x1024xf32> -> vector<8x1024xf32>
    %777 = vector.broadcast %774 : vector<8x1xf32> to vector<8x1024xf32>
    %778 = arith.addf %776, %777 : vector<8x1024xf32>
    %cst_232 = arith.constant 0.000000e+00 : f32
    %779 = vector.broadcast %cst_232 : f32 to vector<8x1024xf32>
    %780 = arith.maximumf %778, %779 : vector<8x1024xf32>
    %c0_233 = arith.constant 0 : index
    %c0_234 = arith.constant 0 : index
    %c0_235 = arith.constant 0 : index
    %781 = vector.load %arg10[%c0_233, %c0_234, %c0_235] : memref<1x8x1024xf32, #tpu.memory_space<vmem>>, vector<1x8x1024xf32>
    %782 = vector.shape_cast %781 : vector<1x8x1024xf32> to vector<8x1024xf32>
    %783 = vector.shape_cast %780 : vector<8x1024xf32> to vector<1x8x1024xf32>
    tpu.vector_store %arg10[%c0_233, %c0_234, %c0_235], %783 {strides = array<i32>} : memref<1x8x1024xf32, #tpu.memory_space<vmem>>, vector<1x8x1024xf32>,
    return
  }
  func.func @transform_0(%arg0: i32) -> (i32, i32, i32) {
    %c0_i32 = arith.constant 0 : i32
    %c0_i32_0 = arith.constant 0 : i32
    %c0_i32_1 = arith.constant 0 : i32
    return %arg0, %c0_i32, %c0_i32_0 : i32, i32, i32
  }
  func.func @transform_1(%arg0: i32) -> (i32, i32, i32) {
    %c0_i32 = arith.constant 0 : i32
    %c0_i32_0 = arith.constant 0 : i32
    %c0_i32_1 = arith.constant 0 : i32
    return %arg0, %c0_i32, %c0_i32_0 : i32, i32, i32
  }
  func.func @transform_2(%arg0: i32) -> (i32, i32) {
    %c0_i32 = arith.constant 0 : i32
    %c0_i32_0 = arith.constant 0 : i32
    %c0_i32_1 = arith.constant 0 : i32
    return %c0_i32, %c0_i32_0 : i32, i32
  }
  func.func @transform_3(%arg0: i32) -> (i32, i32) {
    %c0_i32 = arith.constant 0 : i32
    %c0_i32_0 = arith.constant 0 : i32
    %c0_i32_1 = arith.constant 0 : i32
    return %c0_i32, %c0_i32_0 : i32, i32
  }
  func.func @transform_4(%arg0: i32) -> (i32, i32) {
    %c0_i32 = arith.constant 0 : i32
    %c0_i32_0 = arith.constant 0 : i32
    %c0_i32_1 = arith.constant 0 : i32
    return %c0_i32, %c0_i32_0 : i32, i32
  }
  func.func @transform_5(%arg0: i32) -> (i32, i32) {
    %c0_i32 = arith.constant 0 : i32
    %c0_i32_0 = arith.constant 0 : i32
    %c0_i32_1 = arith.constant 0 : i32
    return %c0_i32, %c0_i32_0 : i32, i32
  }
  func.func @transform_6(%arg0: i32) -> (i32, i32) {
    %c0_i32 = arith.constant 0 : i32
    %c0_i32_0 = arith.constant 0 : i32
    %c0_i32_1 = arith.constant 0 : i32
    return %c0_i32, %c0_i32_0 : i32, i32
  }
  func.func @transform_7(%arg0: i32) -> (i32, i32) {
    %c0_i32 = arith.constant 0 : i32
    %c0_i32_0 = arith.constant 0 : i32
    %c0_i32_1 = arith.constant 0 : i32
    return %c0_i32, %c0_i32_0 : i32, i32
  }
  func.func @transform_8(%arg0: i32) -> (i32, i32) {
    %c0_i32 = arith.constant 0 : i32
    %c0_i32_0 = arith.constant 0 : i32
    %c0_i32_1 = arith.constant 0 : i32
    return %c0_i32, %c0_i32_0 : i32, i32
  }
  func.func @transform_9(%arg0: i32) -> (i32, i32, i32) {
    %c0_i32 = arith.constant 0 : i32
    %c0_i32_0 = arith.constant 0 : i32
    %c0_i32_1 = arith.constant 0 : i32
    return %arg0, %c0_i32, %c0_i32_0 : i32, i32, i32
  }
}

</mosaic_0001>

<bundles_post_ra>
// kernel: tpu_custom_call.1
= control target key start
LH: loop header
LB: loop body
LE: loop exit
PB: predicated region body
PF: predicated region fallthrough
CT: control target
= control target key end

     0   :  { %s15608_s0 = inlined_call_operand.hbm [shape: f32[2,4,1024], index: 0, kind: input, shape index: {}]   ;;  %s15609_s1 = inlined_call_operand.hbm [shape: f32[2,8,1024], index: 1, kind: input, shape index: {}]   ;;  %s15610_s2 = inlined_call_operand.hbm [shape: f32[8,36], index: 2, kind: input, shape index: {}]   ;;  %s15611_s3 = inlined_call_operand.hbm [shape: f32[8,72], index: 3, kind: input, shape index: {}]   ;;  %s15612_s4 = inlined_call_operand.vmem [shape: f32[24,72], index: 4, kind: input, shape index: {}]   ;;  %s15613_s5 = inlined_call_operand.hbm [shape: f32[24,72], index: 5, kind: input, shape index: {}]   ;;  %s15614_s6 = inlined_call_operand.hbm [shape: f32[8,144], index: 6, kind: input, shape index: {}]   ;;  %s15615_s7 = inlined_call_operand.hbm [shape: f32[8,7], index: 7, kind: input, shape index: {}]   ;;  %s15616_s8 = inlined_call_operand.vmem [shape: f32[24,2], index: 8, kind: input, shape index: {}]   ;;  %s15617_s9 = inlined_call_operand.hbm [shape: f32[2,8,1024], index: 9, kind: output, shape index: {}]  }
   0x1   :  { %16029 = sst [smem:[#allocation261_spill]] %s15610_s2 }
   0x2   :  { %16030 = sst [smem:[#allocation262_spill]] %s15611_s3 }
   0x3   :  { %16031 = sst [smem:[#allocation263_spill]] %s15613_s5 }
   0x4   :  { %16032 = sst [smem:[#allocation264_spill]] %s15614_s6 }
   0x5   :  { %16033 = sst [smem:[#allocation265_spill]] %s15615_s7 }
   0x6   :  { %14 = vsyncpa [#allocation3], 0 }
   0x7   :  { %16 = vsyncpa [#allocation3 + $0x1], 0 }
   0x8   :  { %17 = vsyncpa [#allocation6], 0 }
   0x9   :  { %19 = vsyncpa [#allocation6 + $0x1], 0 }
   0xa   :  { %20 = vsyncpa [#allocation9], 0 }
   0xb   :  { %21 = vsyncpa [#allocation12], 0 }
   0xc   :  { %22 = vsyncpa [#allocation4], 0 }
   0xd   :  { %24 = vsyncpa [#allocation4 + $0x1], 0  ;;  %s9262_s30 = smov 0   ;;  %s9264_s10 = smov 0  }
   0xe   :  { %s9266_s11 = smov 0   ;;  %s9268_s12 = smov 0  }
   0xf LB: > { %16034 = sst [smem:[#allocation21_spill]] %s9178_s11  ;;  %s9286_s16 = sadd.s32 4294967295, %s9182_s12   ;;  %s9182_s12 = sphi %s9268_s12, %s17133_s12   ;;  %s9178_s11 = sphi %s9266_s11, %s17135_s11   ;;  %s9174_s10 = sphi %s9264_s10, %s17137_s10   ;;  %s9170_s30 = sphi %s9262_s30, %s17136_s30  }
  0x10   : > { %s16035_s2 = sld [smem:[#allocation261_spill]]  ;;  %p7084_p0 = scmp.ge.s32.totalorder %s9182_s12, 1 }
  0x11   : > { %p51_p1 = scmp.eq.s32.totalorder %s9286_s16, 0  ;;  %p260_p2 = scmp.lt.s32.totalorder %s9182_s12, 3 }
  0x12   : > { %s9184_s18 = smov [#allocation7]   ;;  %s16037_s3 = sld [smem:[#allocation262_spill]] }
  0x13   : > { %p9291_p3 = pnand %p7084_p0, %p260_p2  ;;  %s274_s19 = sshll.u32 %s9184_s18, 4  ;;  %s275_s19 = int_to_ptr.vmem [resolvable:$true] %s274_s19 }
  0x14   : > { %s9185_s24 = smov [#allocation8]   ;;  %s16039_s6 = sld [smem:[#allocation264_spill]] }
  0x15   : > { %p7236_p5 = pneg %p9291_p3  ;;  %s286_s25 = sshll.u32 %s9185_s24, 4  ;;  %s287_s25 = int_to_ptr.vmem [resolvable:$true] %s286_s25 }
  0x16   : > { %s272_s15 = sshll.u32 %s16035_s2, 4  ;;  %s16040_s5 = sld [smem:[#allocation263_spill]]  ;;  %s273_s15 = int_to_ptr.hbm [resolvable:$true] %s272_s15 }
  0x17   : > { %p9303_p6 = pnand %p7236_p5, %p51_p1  ;;  %s9186_s18 = smov [#allocation11]  }
  0x18   : > { %s284_s22 = sshll.u32 %s16037_s3, 4  ;;  %s315_s20 = sshll.u32 %s9186_s18, 4  ;;  %s285_s22 = int_to_ptr.hbm [resolvable:$true] %s284_s22  ;;  %s316_s20 = int_to_ptr.vmem [resolvable:$true] %s315_s20 }
  0x19   : > { %7239 = dma.hbm_to_vmem [thread:$0]  (!%p9303_p6), %s273_s15, 128, %s275_s19, [#allocation6]  }
  0x1a   : > { %s313_s28 = sshll.u32 %s16039_s6, 4  ;;  %s9187_s21 = smov [#allocation10]   ;;  %s314_s28 = int_to_ptr.hbm [resolvable:$true] %s313_s28 }
  0x1b   : > { %7242 = dma.hbm_to_vmem [thread:$0]  (!%p9303_p6), %s285_s22, 128, %s287_s25, [#allocation9]  }
  0x1c   : > { %s298_s14 = sshll.u32 %s16040_s5, 4  ;;  %s300_s15 = sshll.u32 %s9187_s21, 4  ;;  %s299_s14 = int_to_ptr.hbm [resolvable:$true] %s298_s14  ;;  %s301_s15 = int_to_ptr.vmem [resolvable:$true] %s300_s15 }
  0x1d   : > { %7248 = dma.hbm_to_vmem [thread:$0]  (!%p9303_p6), %s314_s28, 256, %s316_s20, [#allocation12]  }
  0x1e   : > { %s9188_s19 = smov 128   ;;  %s9189_s22 = smov 8  }
  0x1f   : > { %7245 = dma.hbm_to_vmem [thread:$0]  (!%p9303_p6), %s299_s14, 384, %s301_s15, [#allocation9], %s9188_s19, %s9188_s19, %s9189_s22  }
  0x20   : > { %s16041_s7 = sld [smem:[#allocation265_spill]]  ;;  %s9190_s27 = smov [#allocation13]  }
  0x21   : > { %s327_s28 = sshll.u32 %s9190_s27, 4  ;;  %s7083_s29 = sadd.s32 4294967294, %s9182_s12   ;;  %s328_s28 = int_to_ptr.vmem [resolvable:$true] %s327_s28 }
  0x22   : > { %s9328_s13 = sadd.s32 1, %s9182_s12   ;;  %s37_s18 = sadd.s32 1, %s9178_s11 }
  0x23   : > { %16042 = sst [smem:[#allocation22_spill]] %s9328_s13  ;;  %s34_s14 = ssub.s32 %s9182_s12, %s9328_s13 }
  0x24   : > { %p44_p7 = scmp.ne.s32.totalorder %s9178_s11, %s9174_s10  ;;  %p35_p8 = scmp.eq.s32.totalorder %s34_s14, 0 }
  0x25   : > { %p45_p9 = scmp.eq.s32.totalorder %s9182_s12, 0  ;;  %p50_p10 = scmp.ne.s32.totalorder %s9174_s10, %s9170_s30 }
  0x26   : > { %s325_s26 = sshll.u32 %s16041_s7, 4  ;;  %p247_p11 = scmp.eq.s32.totalorder %s9286_s16, 1  ;;  %s326_s26 = int_to_ptr.hbm [resolvable:$true] %s325_s26 }
  0x27   : > { %7251 = dma.hbm_to_vmem [thread:$0]  (!%p9303_p6), %s326_s26, 128, %s328_s28, [#allocation12]  }
  0x28   : > { %s9340_s20 = scalar_select %p35_p8, %s9178_s11, %s37_s18  }
  0x29   : > { %p9342_p12 = por %p45_p9, %p44_p7  ;;  %p9348_p13 = por %p51_p1, %p50_p10 }
  0x2a   : > { %16043 = sst [smem:[#allocation23_spill]] %s9340_s20  ;;  %p9352_p0 = por %p247_p11, %p44_p7 }
  0x2b   : > { %p253_p2 = scmp.eq.s32.totalorder %s7083_s29, 1  ;;  %p7268_p5 = scmp.lt.s32.totalorder %s9182_s12, 2 }
  0x2c   : > { %s9358_s19 = sand.u32 1, %s9178_s11   ;;  %s7207_s25 = sshll.u32 %s9182_s12, 5 }
  0x2d   : > { %p9360_p6 = por %p253_p2, %p50_p10  ;;  %s7091_s24 = sshll.u32 %s9358_s19, 5 }
  0x2e   : > { %s350_s28 = scalar_lea.hbm %s15608_s0, %s7207_s25  ;;  %s345_s14 = scalar_lea.vmem [#allocation2], %s7091_s24 }
  0x2f   : > { %s352_s18 = sshll.u32 %s350_s28, 4  ;;  %s354_s2 = sshll.u32 %s345_s14, 4  ;;  %s353_s18 = int_to_ptr.hbm [resolvable:$true] %s352_s18  ;;  %s355_s2 = int_to_ptr.vmem [resolvable:$true] %s354_s2 }
  0x30   : > { %p9371_p7 = pnand %p7268_p5, %p9342_p12  ;;  %s361_s3 = sand.u32 1, %s9182_s12  }
  0x31   : > { %s7094_s5 = sshll.u32 %s9358_s19, 6  ;;  %s342_s6 = scalar_lea.sflag [#allocation3], %s9358_s19 }
  0x32   : > { %s9040_s7 = sshra.s32 %s353_s18, 4  ;;  %p9044_p9 = pneg %p9371_p7  ;;  %s9041_s7 = int_to_ptr.hbm [resolvable:$true] %s9040_s7 }
  0x33   : > { %s9042_s20 = scalar_lea.hbm %s9041_s7, 32  ;;  %s9047_s25 = scalar_lea.hbm %s15608_s0, 64 }
  0x34   : > { %p9043_p8 = scmp.ne.s32.totalorder %s9041_s7, %s9042_s20  ;;  %p9048_p12 = scmp.lt.s32.totalorder %s9041_s7, %s15608_s0 }
  0x35   : > { %p9049_p2 = scmp.lt.s32.totalorder %s9047_s25, %s9042_s20 }
  0x36   : > { %p9045_p10 = pnand %p9044_p9, %p9043_p8 }
  0x37   : > { %p9050_p5 = por %p9049_p2, %p9048_p12 }
  0x38   : > { %p9046_p11 = pneg %p9045_p10 }
  0x3a   : > { %p9051_p4 = pnand %p9050_p5, %p9046_p11 }
  0x3c   : > { %9054 = shalt.err (!%p9051_p4)
}
  0x3d   : > { %7255 = dma.hbm_to_vmem [thread:$0]  (!%p9371_p7), %s353_s18, 512, %s355_s2, %s342_s6  }
  0x3e   : > { %s7208_s19 = sshll.u32 %s9182_s12, 6  ;;  %s365_s28 = scalar_lea.vmem [#allocation5], %s7094_s5 }
  0x3f   : > { %s374_s14 = sshll.u32 %s365_s28, 4  ;;  %s370_s21 = scalar_lea.hbm %s15609_s1, %s7208_s19  ;;  %s375_s14 = int_to_ptr.vmem [resolvable:$true] %s374_s14 }
  0x40   : > { %s372_s24 = sshll.u32 %s370_s21, 4  ;;  %s362_s7 = scalar_lea.sflag [#allocation6], %s361_s3  ;;  %s373_s24 = int_to_ptr.hbm [resolvable:$true] %s372_s24 }
  0x41   : > { %s9070_s20 = sshra.s32 %s373_s24, 4  ;;  %s9077_s5 = scalar_lea.hbm %s15609_s1, 128  ;;  %s9071_s20 = int_to_ptr.hbm [resolvable:$true] %s9070_s20 }
  0x42   : > { %s9072_s25 = scalar_lea.hbm %s9071_s20, 64  ;;  %p9078_p11 = scmp.lt.s32.totalorder %s9071_s20, %s15609_s1 }
  0x43   : > { %p9073_p4 = scmp.ne.s32.totalorder %s9071_s20, %s9072_s25  ;;  %p9079_p12 = scmp.lt.s32.totalorder %s9077_s5, %s9072_s25 }
  0x45   : > { %p9075_p8 = pnand %p9073_p4, %p9044_p9  ;;  %p9080_p2 = por %p9079_p12, %p9078_p11 }
  0x47   : > { %p9076_p10 = pneg %p9075_p8 }
  0x49   : > { %p9081_p5 = pnand %p9080_p2, %p9076_p10 }
  0x4b   : > { %9084 = shalt.err (!%p9081_p5)
}
  0x4c   : > { %7258 = dma.hbm_to_vmem [thread:$0]  (!%p9371_p7), %s373_s24, 1024, %s375_s14, %s362_s7  }
  0x4d   : > { %383 = sbr.rel (%p9291_p3) target bundleno = 2467 (0x9a3), region = 56 }
  0x52   : > { %s9409_s3 = sand.u32 1, %s9174_s10  }
  0x53   : > { %s7098_s11 = sshll.u32 %s9409_s3, 5  ;;  %s386_s13 = scalar_lea.sflag [#allocation3], %s9409_s3 }
  0x54   : > { %s389_s27 = scalar_lea.vmem [#allocation2], %s7098_s11 }
  0x55   : > { %9145 = dma.done.wait (%p9348_p13), %s386_s13, 512  }
  0x56   : > { %9147 = vsyncadd (%p9348_p13), %s386_s13, 4294966784  ;;  %s395_s17 = sand.u32 1, %s9286_s16   ;;  %s7099_s29 = sshll.u32 %s9409_s3, 6 }
  0x57   : > { %s396_s19 = scalar_lea.sflag [#allocation6], %s395_s17  ;;  %s9421_s28 = scalar_lea.vmem [#allocation5], %s7099_s29 }
  0x58   : > { %9149 = dma.done.wait (%p9348_p13), %s396_s19, 1024  }
  0x59   : > { %9151 = vsyncadd (%p9348_p13), %s396_s19, 4294966272 }
  0x5a   : > { %9153 = dma.done.wait (%p51_p1), [#allocation6], 128  }
  0x5b   : > { %9155 = vsyncadd (%p51_p1), [#allocation6], 4294967168 }
  0x5c   : > { %9157 = dma.done.wait (%p51_p1), [#allocation9], 512  }
  0x5d   : > { %9159 = vsyncadd (%p51_p1), [#allocation9], 4294966784 }
  0x5e   : > { %9161 = dma.done.wait (%p51_p1), [#allocation12], 384  }
  0x5f   : > { %9163 = vsyncadd (%p51_p1), [#allocation12], 4294966912  ;;  %v465_v0 = vlaneseq  ;;  %v9191_v5 = vmov 0.0   ;;  %v619_v7 = vld [vmem:[%s389_s27 + $0x8] sm:$0xff]  ;;  %v618_v8 = vld [vmem:[%s389_s27] sm:$0xff]  ;;  %s9192_s23 = smov 2  }
  0x60   : > { %v620_v9 = vld [vmem:[%s389_s27 + $0x10] sm:$0xff]  ;;  %628 = vst [vmem:[#allocation1 + $0x10] ss:$2 sm:$0xff] %v619_v7  ;;  %v621_v10 = vld [vmem:[%s389_s27 + $0x18] sm:$0xff]  ;;  %s9193_s14 = smov 33   ;;  %s9194_s21 = smov 32  }
  0x61   : > { %v9439_v1 = vand.u32 127, %v465_v0  ;;  %626 = vst [vmem:[#allocation1] ss:$2 sm:$0xff] %v618_v8  ;;  %s9195_s24 = smov 34   ;;  %s9196_s7 = smov 64  }
  0x62   : > { %630 = vst [vmem:[#allocation1 + $0x20] ss:$2 sm:$0xff] %v620_v9  ;;  %s9197_s20 = smov 66   ;;  %s9198_s25 = smov 95  }
  0x63   : > { %v9442_v2 = vadd.s32 128, %v9439_v1  ;;  %v478_v3 = vand.u32 31, %v9439_v1  ;;  %632 = vst [vmem:[#allocation1 + $0x30] ss:$2 sm:$0xff] %v621_v10  ;;  %v472_v16 = vadd.s32 768, %v9439_v1  ;;  %v473_v17 = vadd.s32 896, %v9439_v1 }
  0x64   : > { %v470_v19 = vadd.s32 512, %v9439_v1  ;;  %v471_v23 = vadd.s32 640, %v9439_v1  ;;  %v468_v24 = vadd.s32 256, %v9439_v1  ;;  %v469_v25 = vadd.s32 384, %v9439_v1  ;;  %s9199_s2 = smov 127   ;;  %s9200_s6 = smov 126  }
  0x65   : > { %v485_v4 = vand.u32 31, %v9442_v2  ;;  %vm594_vm0 = vcmp.lt.s32.totalorder %v478_v3, 31  ;;  %v520_v21 = vand.u32 31, %v472_v16  ;;  %v527_v22 = vand.u32 31, %v473_v17  ;;  %s9201_s5 = smov 96   ;;  %s9202_s18 = smov 94  }
  0x66   : > { %v7114_v6 = vsel %vm594_vm0, 1.0, %v9191_v5  ;;  %v506_v27 = vand.u32 31, %v470_v19  ;;  %v513_v28 = vand.u32 31, %v471_v23  ;;  %v492_v29 = vand.u32 31, %v468_v24  ;;  %s9204_s26 = smov 63   ;;  %s9205_s11 = smov 62  }
  0x67   : > { %vm595_vm1 = vcmp.lt.s32.totalorder %v485_v4, 31  ;;  %v635_v13 = vld.sshfl [vmem:[#allocation1 + $0x10] sm:$0xff pattern:$0x75316420]  ;;  %vm600_vm2 = vcmp.lt.s32.totalorder %v520_v21, 31  ;;  %vm601_vm3 = vcmp.lt.s32.totalorder %v527_v22, 31 }
  0x68   : > { %v7115_v11 = vsel %vm595_vm1, 1.0, %v9191_v5  ;;  %645 = vrot.lane.b32.xlu1 %v635_v13, %s9193_s14  ;;  %v633_v14 = vld.sshfl [vmem:[#allocation1] sm:$0xff pattern:$0x75316420]  ;;  %v499_v30 = vand.u32 31, %v469_v25  ;;  %v7120_v32 = vsel %vm600_vm2, 1.0, %v9191_v5 }
  0x69   : > { %v9452_v12 = vpack.i.bf16 %v7115_v11, %v7114_v6  ;;  %641 = vrot.lane.b32.xlu0 %v633_v14, %s9193_s14  ;;  %v637_v15 = vld.sshfl [vmem:[#allocation1 + $0x20] sm:$0xff pattern:$0x75316420]  ;;  %v636_v18 = vld.sshfl [vmem:[#allocation1 + $0x18] sm:$0xff pattern:$0x75316420] }
  0x6a   : > { %v634_v20 = vld.sshfl [vmem:[#allocation1 + $0x8] sm:$0xff pattern:$0x75316420]  ;;  %v640_v31 = vld.sshfl [vmem:[#allocation1 + $0x38] sm:$0xff pattern:$0x75316420] }
  0x6b   : > { %7336 = vrot.lane.b32.xlu2 %v9452_v12, %s9192_s23  ;;  %v638_v26 = vld.sshfl [vmem:[#allocation1 + $0x28] sm:$0xff pattern:$0x75316420]  ;;  %v7121_v33 = vsel %vm601_vm3, 1.0, %v9191_v5  ;;  %vm598_vm4 = vcmp.lt.s32.totalorder %v506_v27, 31  ;;  %vm599_vm5 = vcmp.lt.s32.totalorder %v513_v28, 31 }
  0x6c   : > { %v639_v34 = vld.sshfl [vmem:[#allocation1 + $0x30] sm:$0xff pattern:$0x75316420]  ;;  %vm596_vm6 = vcmp.lt.s32.totalorder %v492_v29, 31  ;;  %vm597_vm7 = vcmp.lt.s32.totalorder %v499_v30, 31  ;;  %v7350_v35 = vpack.i.bf16 %v7121_v33, %v7120_v32  ;;  %v7118_v36 = vsel %vm598_vm4, 1.0, %v9191_v5 }
  0x6d   : > { %v7119_v37 = vsel %vm599_vm5, 1.0, %v9191_v5  ;;  %vm575_vm8 = vcmp.gt.s32.totalorder %v513_v28, 0  ;;  %vm574_vm9 = vcmp.gt.s32.totalorder %v506_v27, 0  ;;  %v7116_v38 = vsel %vm596_vm6, 1.0, %v9191_v5  ;;  %s9120_s27 = scalar_lea.hbm %s15617_s9, 128 }
  0x6e   : > { %v7117_v39 = vsel %vm597_vm7, 1.0, %v9191_v5  ;;  %v7345_v40 = vpack.i.bf16 %v7119_v37, %v7118_v36  ;;  %v9478_v41 = vsel %vm575_vm8, 1.0, %v9191_v5  ;;  %v9481_v42 = vsel %vm574_vm9, 1.0, %v9191_v5 }
  0x6f   : > { %16049 = vst [vmem:[#allocation24_spill] sm:$0xff] %v9478_v41  ;;  %v7340_v43 = vpack.i.bf16 %v7117_v39, %v7116_v38  ;;  %vm573_vm10 = vcmp.gt.s32.totalorder %v499_v30, 0  ;;  %vm572_vm11 = vcmp.gt.s32.totalorder %v492_v29, 0  ;;  %vm570_vm12 = vcmp.gt.s32.totalorder %v478_v3, 0 }
  0x70   : > { %647 = vrot.lane.b32.xlu1 %v636_v18, %s9193_s14  ;;  %16050 = vst [vmem:[#allocation25_spill] sm:$0xff] %v9481_v42  ;;  %vm571_vm13 = vcmp.gt.s32.totalorder %v485_v4, 0  ;;  %v7365_v44 = vpack.i.bf16 %v9478_v41, %v9481_v42  ;;  %v9491_v45 = vsel %vm573_vm10, 1.0, %v9191_v5  ;;  %v9494_v46 = vsel %vm572_vm11, 1.0, %v9191_v5 }
  0x71   : > { %643 = vrot.lane.b32.xlu0 %v634_v20, %s9193_s14  ;;  %16051 = vst [vmem:[#allocation26_spill] sm:$0xff] %v9491_v45  ;;  %v9498_v47 = vsel %vm570_vm12, 1.0, %v9191_v5  ;;  %v9501_v48 = vsel %vm571_vm13, 1.0, %v9191_v5  ;;  %v7360_v49 = vpack.i.bf16 %v9491_v45, %v9494_v46  ;;  %vm577_vm14 = vcmp.gt.s32.totalorder %v527_v22, 0 }
  0x72   : > { %16052 = vst [vmem:[#allocation27_spill] sm:$0xff] %v9494_v46  ;;  %v7355_v50 = vpack.i.bf16 %v9501_v48, %v9498_v47  ;;  %vm576_vm15 = vcmp.gt.s32.totalorder %v520_v21, 0  ;;  %v9508_v51 = vsel %vm577_vm14, 1.0, %v9191_v5  ;;  %vm657_vm0 = vcmask 269312  }
  0x73   : > { %649 = vrot.lane.b32.xlu2 %v637_v15, %s9193_s14  ;;  %16053 = vst [vmem:[#allocation28_spill] sm:$0xff] %v9498_v47  ;;  %v9511_v52 = vsel %vm576_vm15, 1.0, %v9191_v5  ;;  %vm708_vm1 = vcmask 15360   ;;  %vm758_vm2 = vcmask 261120   ;;  %vm842_vm3 = vcmask 523264  }
  0x74   : > { %16054 = vst [vmem:[#allocation29_spill] sm:$0xff] %v9501_v48  ;;  %v7370_v53 = vpack.i.bf16 %v9508_v51, %v9511_v52  ;;  %vm800_vm4 = vcmask 277504   ;;  %vm884_vm5 = vcmask 539648   ;;  %vm939_vm6 = vcmask 1039360  }
  0x75   : > { %16055 = vst [vmem:[#allocation30_spill] sm:$0xff] %v9508_v51  ;;  %vm1071_vm7 = vcmask 777216   ;;  %vm1255_vm8 = vcmask 1043456   ;;  %vm983_vm9 = vcmask 1031168   ;;  %vm1036_vm10 = vcmask 785408  }
  0x76   : > { %16056 = vst [vmem:[#allocation31_spill] sm:$0xff] %v9511_v52  ;;  %vm1124_vm11 = vcmask 769024   ;;  %vm1246_vm12 = vcmask 506880   ;;  %vm1202_vm13 = vcmask 515072   ;;  %vm1295_vm14 = vcmask 293888  }
  0x77   : > { %vm1910_vm15 = vcmask 588800  }
  0x78   : > { %655 = vrot.lane.b32.xlu1 %v640_v31, %s9193_s14 }
  0x79   : > { %653 = vrot.lane.b32.xlu0 %v639_v34, %s9193_s14 }
  0x7b   : > { %651 = vrot.lane.b32.xlu2 %v638_v26, %s9193_s14 }
  0x80   : > { %7346 = vrot.lane.b32.xlu1 %v7345_v40, %s9192_s23 }
  0x81   : > { %7341 = vrot.lane.b32.xlu0 %v7340_v43, %s9192_s23 }
  0x83   : > { %7351 = vrot.lane.b32.xlu2 %v7350_v35, %s9192_s23 }
  0x88   : > { %7361 = vrot.lane.b32.xlu1 %v7360_v49, %s9194_s21 }
  0x89   : > { %7356 = vrot.lane.b32.xlu0 %v7355_v50, %s9194_s21 }
  0x8b   : > { %7366 = vrot.lane.b32.xlu2 %v7365_v44, %s9194_s21 }
  0x90   : > { %7376 = vrot.lane.b32.xlu1 %v9452_v12, %s9195_s24 }
  0x91   : > { %7371 = vrot.lane.b32.xlu0 %v7370_v53, %s9194_s21 }
  0x93   : > { %7381 = vrot.lane.b32.xlu2 %v7340_v43, %s9195_s24 }
  0x98   : > { %7391 = vrot.lane.b32.xlu1 %v7350_v35, %s9195_s24 }
  0x99   : > { %7386 = vrot.lane.b32.xlu0 %v7345_v40, %s9195_s24 }
  0x9b   : > { %7396 = vrot.lane.b32.xlu2 %v7355_v50, %s9196_s7 }
  0xa0   : > { %7406 = vrot.lane.b32.xlu1 %v7365_v44, %s9196_s7 }
  0xa1   : > { %7401 = vrot.lane.b32.xlu0 %v7360_v49, %s9196_s7 }
  0xa3   : > { %7411 = vrot.lane.b32.xlu2 %v7370_v53, %s9196_s7 }
  0xa8   : > { %7421 = vrot.lane.b32.xlu1 %v7340_v43, %s9197_s20 }
  0xa9   : > { %7416 = vrot.lane.b32.xlu0 %v9452_v12, %s9197_s20 }
  0xab   : > { %7426 = vrot.lane.b32.xlu2 %v7345_v40, %s9197_s20 }
  0xb1   : > { %7431 = vrot.lane.b32.xlu0 %v7350_v35, %s9197_s20 }
  0xc5   : > { %v9521_v54 = vpop.permute.xlu2 %7336 }
  0xc6   : > { %v7339_v18 = vunpack.i.h.bf16 %v9521_v54  ;;  %v9566_v19 = vunpack.i.l.bf16 %v9521_v54 }
  0xc8   : > { %16058 = vst [vmem:[#allocation33_spill] sm:$0xff] %v9566_v19  ;;  %v9585_v27 = vsel %vm708_vm1, %v9566_v19, %v7339_v18 }
  0xc9   : > { %16059 = vst [vmem:[#allocation34_spill] sm:$0xff] %v9585_v27 }
  0xcd   : > { %v650_v55 = vpop.permute.xlu2 %649 }
  0xd5   : > { %v652_v56 = vpop.permute.xlu2 %651 }
  0xd6   : > { %v9524_v60 = vsel %vm657_vm0, %v650_v55, %v652_v56 }
  0xd7   : > { %16057 = vst [vmem:[#allocation32_spill] sm:$0xff] %v9524_v60  ;;  %v917_v2 = vrot.slane %v9524_v60, 4 }
  0xda   : > { %v646_v57 = vpop.permute.xlu1 %645 }
  0xdb   : > { %v642_v58 = vpop.permute.xlu0 %641 }
  0xdc   : > { %v9527_v62 = vsel %vm657_vm0, 0.0, %v642_v58 }
  0xdd   : > { %v7352_v59 = vpop.permute.xlu2 %7351  ;;  %v912_v11 = vrot.slane %v9527_v62, 4  ;;  %v725_v31 = vmul.f32 %v9566_v19, %v9527_v62 }
  0xde   : > { %v9596_v32 = vunpack.i.h.bf16 %v7352_v59  ;;  %v7353_v33 = vunpack.i.l.bf16 %v7352_v59 }
  0xe0   : > { %16060 = vst [vmem:[#allocation35_spill] sm:$0xff] %v9596_v32  ;;  %v9606_v39 = vsel %vm708_vm1, %v7353_v33, %v9596_v32 }
  0xe1   : > { %16062 = vst [vmem:[#allocation37_spill] sm:$0xff] %v9606_v39 }
  0xe2   : > { %v648_v61 = vpop.permute.xlu1 %647 }
  0xe3   : > { %v9530_v63 = vsel %vm657_vm0, %v646_v57, %v648_v61  ;;  %v9533_v0 = vsel %vm657_vm0, %v648_v61, %v650_v55  ;;  %v644_v1 = vpop.permute.xlu0 %643 }
  0xe4   : > { %v9537_v3 = vsel %vm657_vm0, %v642_v58, %v644_v1  ;;  %v9540_v4 = vsel %vm657_vm0, %v644_v1, %v646_v57  ;;  %v7445_v5 = vpack.i.bf16 %v9524_v60, %v9533_v0  ;;  %v916_v6 = vrot.slane %v9533_v0, 4 }
  0xe5   : > { %v7440_v7 = vpack.i.bf16 %v9530_v63, %v9540_v4  ;;  %v7435_v8 = vpack.i.bf16 %v9537_v3, %v9527_v62  ;;  %v914_v9 = vrot.slane %v9540_v4, 4  ;;  %v915_v10 = vrot.slane %v9530_v63, 4  ;;  %v9562_v16 = vpop.permute.xlu2 %7366 }
  0xe6   : > { %7446 = vrot.lane.b32.xlu0 %v7445_v5, %s9198_s25  ;;  %v913_v12 = vrot.slane %v9537_v3, 4  ;;  %v9556_v13 = vpack.i.bf16 %v917_v2, %v916_v6  ;;  %v726_v29 = vmul.f32 %v9585_v27, %v9537_v3  ;;  %v678_v27 = vmul.f32 %v9494_v46, %v9540_v4 }
  0xe7   : > { %7441 = vrot.lane.b32.xlu2 %v7440_v7, %s9198_s25  ;;  %7436 = vrot.lane.b32.xlu1 %v7435_v8, %s9198_s25  ;;  %v9558_v14 = vpack.i.bf16 %v915_v10, %v914_v9  ;;  %v679_v19 = vmul.f32 %v9491_v45, %v9530_v63 }
  0xe8   : > { %v9560_v15 = vpack.i.bf16 %v913_v12, %v912_v11  ;;  %v7475_v37 = vpack.i.bf16 %v726_v29, %v725_v31 }
  0xea   : > { %v656_v17 = vpop.permute.xlu1 %655 }
  0xeb   : > { %v654_v20 = vpop.permute.xlu0 %653  ;;  %v9579_v26 = vsel %vm657_vm0, %v656_v17, 0.0 }
  0xec   : > { %v9569_v21 = vsel %vm657_vm0, %v652_v56, %v654_v20  ;;  %v9572_v22 = vsel %vm657_vm0, %v654_v20, %v656_v17  ;;  %v15621_v58 = vrot.slane %v9579_v26, 4 }
  0xed   : > { %v7450_v23 = vpack.i.bf16 %v9572_v22, %v9569_v21  ;;  %v918_v24 = vrot.slane %v9569_v21, 4  ;;  %v919_v25 = vrot.slane %v9572_v22, 4  ;;  %v9598_v34 = vpop.permute.xlu2 %7381  ;;  %v732_v53 = vmul.f32 %v9606_v39, %v9572_v22 }
  0xee   : > { %7466 = vrot.lane.b32.xlu0 %v9556_v13, %s9199_s2 }
  0xef   : > { %1069 = vrot.lane.b32.xlu2 %v9579_v26, %s9198_s25  ;;  %7451 = vrot.lane.b32.xlu1 %v7450_v23, %s9198_s25  ;;  %v9590_v28 = vpack.i.bf16 %v919_v25, %v918_v24 }
  0xf2   : > { %v7347_v30 = vpop.permute.xlu1 %7346 }
  0xf3   : > { %v7349_v35 = vunpack.i.h.bf16 %v7347_v30  ;;  %v7342_v36 = vpop.permute.xlu0 %7341  ;;  %v7348_v43 = vunpack.i.l.bf16 %v7347_v30 }
  0xf4   : > { %v7344_v44 = vunpack.i.h.bf16 %v7342_v36  ;;  %v7343_v49 = vunpack.i.l.bf16 %v7342_v36 }
  0xf5   : > { %v9601_v38 = vsel %vm708_vm1, %v7349_v35, %v7353_v33  ;;  %v9617_v61 = vpop.permute.xlu2 %7396  ;;  %v9620_v1 = vsel %vm708_vm1, %v7348_v43, %v7349_v35 }
  0xf6   : > { %16061 = vst [vmem:[#allocation36_spill] sm:$0xff] %v9601_v38  ;;  %7476 = vrot.lane.b32.xlu0 %v7475_v37, %s9200_s6  ;;  %v731_v40 = vmul.f32 %v9601_v38, %v9569_v21  ;;  %v9623_v2 = vsel %vm708_vm1, %v7344_v44, %v7348_v43  ;;  %v9629_v6 = vsel %vm708_vm1, %v7339_v18, %v7343_v49  ;;  %v15622_v11 = vunpack.i.h.bf16 %v9617_v61 }
  0xf7   : > { %7461 = vrot.lane.b32.xlu2 %v9558_v14, %s9199_s2  ;;  %7456 = vrot.lane.b32.xlu1 %v9560_v15, %s9199_s2  ;;  %16063 = vst [vmem:[#allocation38_spill] sm:$0xff] %v9620_v1  ;;  %v9632_v7 = vsel %vm708_vm1, %v7343_v49, %v7344_v44  ;;  %v9649_v12 = vunpack.i.l.bf16 %v9617_v61  ;;  %v729_v18 = vmul.f32 %v9623_v2, %v9533_v0  ;;  %v7369_v49 = vunpack.i.h.bf16 %v9562_v16 }
  0xf8   : > { %v7490_v59 = vpack.i.bf16 %v732_v53, %v731_v40  ;;  %16064 = vst [vmem:[#allocation39_spill] sm:$0xff] %v9623_v2  ;;  %v730_v23 = vmul.f32 %v9620_v1, %v9524_v60  ;;  %v727_v24 = vmul.f32 %v9629_v6, %v9540_v4  ;;  %v728_v25 = vmul.f32 %v9632_v7, %v9530_v63 }
  0xf9   : > { %16066 = vst [vmem:[#allocation41_spill] sm:$0xff] %v9629_v6  ;;  %v9663_v31 = vsel %vm842_vm3, %v9649_v12, %v15622_v11  ;;  %v859_v53 = vmul.f32 %v9649_v12, %v9527_v62 }
  0xfa   : > { %v7362_v50 = vpop.permute.xlu1 %7361  ;;  %16067 = vst [vmem:[#allocation42_spill] sm:$0xff] %v9632_v7  ;;  %v7485_v43 = vpack.i.bf16 %v730_v23, %v729_v18  ;;  %v7480_v44 = vpack.i.bf16 %v728_v25, %v727_v24  ;;  %v9968_v7 = vmul.f32 %v9498_v47, %v9527_v62 }
  0xfb   : > { %v7364_v54 = vunpack.i.h.bf16 %v7362_v50  ;;  %v7363_v55 = vunpack.i.l.bf16 %v7362_v50  ;;  %v7357_v56 = vpop.permute.xlu0 %7356  ;;  %16069 = vst [vmem:[#allocation44_spill] sm:$0xff] %v9649_v12  ;;  %v7368_v50 = vunpack.i.l.bf16 %v9562_v16 }
  0xfc   : > { %v7359_v57 = vunpack.i.h.bf16 %v7357_v56  ;;  %16070 = vst [vmem:[#allocation45_spill] sm:$0xff] %v9663_v31  ;;  %v9665_v33 = vunpack.i.l.bf16 %v7357_v56 }
  0xfd   : > { %v9626_v5 = vsel %vm758_vm2, %v7363_v55, %v7364_v54 }
  0xfe   : > { %16065 = vst [vmem:[#allocation40_spill] sm:$0xff] %v9626_v5  ;;  %v9635_v8 = vsel %vm758_vm2, %v7359_v57, %v7363_v55  ;;  %7491 = vrot.lane.b32.xlu0 %v7490_v59, %s9200_s6  ;;  %v778_v9 = vmul.f32 %v9626_v5, %v9530_v63  ;;  %v860_v55 = vmul.f32 %v9663_v31, %v9537_v3 }
  0xff   : > { %16068 = vst [vmem:[#allocation43_spill] sm:$0xff] %v9635_v8  ;;  %937 = vrot.lane.b32.xlu2 %v15621_v58, %s9199_s2  ;;  %7471 = vrot.lane.b32.xlu1 %v9590_v28, %s9199_s2  ;;  %v777_v10 = vmul.f32 %v9635_v8, %v9540_v4  ;;  %v9682_v56 = vsel %vm758_vm2, %v9665_v33, %v7359_v57 }
 0x100   : > { %v1012_v17 = vrot.slane %v778_v9, 4  ;;  %16071 = vst [vmem:[#allocation46_spill] sm:$0xff] %v9665_v33  ;;  %v9691_v9 = vsel %vm758_vm2, %v7368_v50, %v7369_v49  ;;  %v733_v57 = vmul.f32 %v9596_v32, %v9579_v26  ;;  %v775_v23 = vmul.f32 %v9665_v33, %v9527_v62 }
 0x101   : > { %v1011_v20 = vrot.slane %v777_v10, 4  ;;  %16074 = vst [vmem:[#allocation49_spill] sm:$0xff] %v9682_v56  ;;  %v9694_v10 = vsel %vm758_vm2, %v7364_v54, %v7368_v50  ;;  %v776_v24 = vmul.f32 %v9682_v56, %v9537_v3 }
 0x102   : > { %v7377_v29 = vpop.permute.xlu1 %7376  ;;  %16076 = vst [vmem:[#allocation51_spill] sm:$0xff] %v9691_v9  ;;  %v1009_v58 = vrot.slane %v775_v23, 4 }
 0x103   : > { %v7372_v30 = vpop.permute.xlu0 %7371  ;;  %v7505_v36 = vpack.i.bf16 %v1012_v17, %v1011_v20  ;;  %v7379_v37 = vunpack.i.h.bf16 %v7377_v29  ;;  %v9669_v40 = vunpack.i.l.bf16 %v7377_v29  ;;  %16077 = vst [vmem:[#allocation52_spill] sm:$0xff] %v9694_v10  ;;  %v7495_v20 = vpack.i.bf16 %v860_v55, %v859_v53 }
 0x104   : > { %v9667_v35 = vunpack.i.h.bf16 %v7372_v30  ;;  %v7373_v25 = vunpack.i.l.bf16 %v7372_v30  ;;  %v779_v53 = vmul.f32 %v9694_v10, %v9533_v0  ;;  %v780_v55 = vmul.f32 %v9691_v9, %v9524_v60 }
 0x105   : > { %16073 = vst [vmem:[#allocation48_spill] sm:$0xff] %v9669_v40  ;;  %v9688_v59 = vsel %vm800_vm4, %v9669_v40, %v7379_v37  ;;  %v7384_v30 = vunpack.i.h.bf16 %v9598_v34  ;;  %v1010_v11 = vrot.slane %v776_v24, 4 }
 0x106   : > { %16072 = vst [vmem:[#allocation47_spill] sm:$0xff] %v9667_v35  ;;  %7506 = vrot.lane.b32.xlu0 %v7505_v36, %s9201_s5  ;;  %v783_v16 = vmul.f32 %v9667_v35, %v9579_v26  ;;  %v817_v36 = vmul.f32 %v9669_v40, %v9527_v62  ;;  %v818_v54 = vmul.f32 %v9688_v59, %v9537_v3  ;;  %v1014_v23 = vrot.slane %v780_v55, 4 }
 0x107   : > { %7486 = vrot.lane.b32.xlu2 %v7485_v43, %s9200_s6  ;;  %7481 = vrot.lane.b32.xlu1 %v7480_v44, %s9200_s6  ;;  %16075 = vst [vmem:[#allocation50_spill] sm:$0xff] %v9688_v59  ;;  %v9722_v59 = vsel %vm758_vm2, %v7373_v25, %v9667_v35 }
 0x108   : > { %v1017_v29 = vrot.slane %v783_v16, 4  ;;  %v7383_v16 = vunpack.i.l.bf16 %v9598_v34  ;;  %16080 = vst [vmem:[#allocation55_spill] sm:$0xff] %v9722_v59  ;;  %v1098_v40 = vrot.slane %v818_v54, 4 }
 0x10a   : > { %v7392_v17 = vpop.permute.xlu1 %7391  ;;  %v9725_v10 = vsel %vm800_vm4, %v7379_v37, %v7383_v16 }
 0x10b   : > { %v7387_v18 = vpop.permute.xlu0 %7386  ;;  %v9706_v43 = vunpack.i.h.bf16 %v7392_v17  ;;  %v7393_v44 = vunpack.i.l.bf16 %v7392_v17  ;;  %v9718_v17 = vsel %vm758_vm2, %v7369_v49, %v7373_v25  ;;  %16081 = vst [vmem:[#allocation56_spill] sm:$0xff] %v9725_v10  ;;  %v9735_v49 = vsel %vm800_vm4, %v7383_v16, %v7384_v30 }
 0x10c   : > { %v7389_v50 = vunpack.i.h.bf16 %v7387_v18  ;;  %16079 = vst [vmem:[#allocation54_spill] sm:$0xff] %v9718_v17  ;;  %v781_v24 = vmul.f32 %v9718_v17, %v9569_v21  ;;  %v782_v25 = vmul.f32 %v9722_v59, %v9572_v22  ;;  %v7388_v35 = vunpack.i.l.bf16 %v7387_v18 }
 0x10d   : > { %16078 = vst [vmem:[#allocation53_spill] sm:$0xff] %v9706_v43  ;;  %v9729_v34 = vsel %vm800_vm4, %v7393_v44, %v9706_v43  ;;  %v820_v59 = vmul.f32 %v9735_v49, %v9530_v63 }
 0x10e   : > { %1034 = vrot.lane.b32.xlu0 %v1017_v29, %s9201_s5  ;;  %v1097_v29 = vrot.slane %v817_v36, 4  ;;  %16082 = vst [vmem:[#allocation57_spill] sm:$0xff] %v9729_v34  ;;  %v824_v54 = vmul.f32 %v9729_v34, %v9572_v22  ;;  %v9756_v18 = vsel %vm800_vm4, %v7388_v35, %v7389_v50 }
 0x10f   : > { %7496 = vrot.lane.b32.xlu2 %v7495_v20, %s9196_s7  ;;  %981 = vrot.lane.b32.xlu1 %v733_v57, %s9200_s6  ;;  %v9732_v20 = vsel %vm800_vm4, %v7389_v50, %v7393_v44  ;;  %v1013_v57 = vrot.slane %v779_v53, 4  ;;  %16084 = vst [vmem:[#allocation59_spill] sm:$0xff] %v9735_v49  ;;  %v819_v44 = vmul.f32 %v9725_v10, %v9540_v4 }
 0x110   : > { %16083 = vst [vmem:[#allocation58_spill] sm:$0xff] %v9732_v20  ;;  %v7520_v37 = vpack.i.bf16 %v1098_v40, %v1097_v29  ;;  %v823_v36 = vmul.f32 %v9732_v20, %v9569_v21  ;;  %v7500_v53 = vpack.i.bf16 %v1010_v11, %v1009_v58  ;;  %v1015_v40 = vrot.slane %v781_v24, 4 }
 0x111   : > { %v7510_v16 = vpack.i.bf16 %v1014_v23, %v1013_v57  ;;  %v1104_v34 = vrot.slane %v824_v54, 4  ;;  %v1016_v20 = vrot.slane %v782_v25, 4  ;;  %v1099_v5 = vrot.slane %v819_v44, 4  ;;  %16086 = vst [vmem:[#allocation61_spill] sm:$0xff] %v9756_v18 }
 0x112   : > { %v1103_v29 = vrot.slane %v823_v36, 4  ;;  %v9753_v11 = vsel %vm800_vm4, %v7384_v30, %v7388_v35  ;;  %v1100_v57 = vrot.slane %v820_v59, 4  ;;  %v822_v30 = vmul.f32 %v9756_v18, %v9524_v60  ;;  %v7407_v35 = vpop.permute.xlu1 %7406  ;;  %v7412_v59 = vpop.permute.xlu2 %7411 }
 0x113   : > { %v7402_v55 = vpop.permute.xlu0 %7401  ;;  %16085 = vst [vmem:[#allocation60_spill] sm:$0xff] %v9753_v11  ;;  %v821_v36 = vmul.f32 %v9753_v11, %v9533_v0  ;;  %v7409_v54 = vunpack.i.h.bf16 %v7407_v35  ;;  %v7408_v44 = vunpack.i.l.bf16 %v7407_v35 }
 0x114   : > { %v7404_v10 = vunpack.i.h.bf16 %v7402_v55  ;;  %v7403_v58 = vunpack.i.l.bf16 %v7402_v55  ;;  %v7535_v23 = vpack.i.bf16 %v1104_v34, %v1103_v29  ;;  %v7525_v49 = vpack.i.bf16 %v1100_v57, %v1099_v5 }
 0x115   : > { %v1101_v50 = vrot.slane %v821_v36, 4  ;;  %v1102_v34 = vrot.slane %v822_v30, 4  ;;  %v7413_v55 = vunpack.i.l.bf16 %v7412_v59  ;;  %v9785_v57 = vsel %vm842_vm3, %v7408_v44, %v7409_v54 }
 0x116   : > { %7521 = vrot.lane.b32.xlu0 %v7520_v37, %s9202_s18  ;;  %v7515_v37 = vpack.i.bf16 %v1016_v20, %v1015_v40  ;;  %v9764_v25 = vsel %vm842_vm3, %v7403_v58, %v7404_v10  ;;  %v825_v20 = vmul.f32 %v9706_v43, %v9579_v26  ;;  %16092 = vst [vmem:[#allocation66_spill] sm:$0xff] %v9785_v57 }
 0x117   : > { %7501 = vrot.lane.b32.xlu2 %v7500_v53, %s9201_s5  ;;  %7511 = vrot.lane.b32.xlu1 %v7510_v16, %s9201_s5  ;;  %v16087_v53 = vunpack.i.h.bf16 %v9617_v61  ;;  %16089 = vst [vmem:[#allocation63_spill] sm:$0xff] %v9764_v25  ;;  %v862_v5 = vmul.f32 %v9764_v25, %v9530_v63  ;;  %v9779_v16 = vunpack.i.h.bf16 %v7412_v59  ;;  %v7530_v29 = vpack.i.bf16 %v1102_v34, %v1101_v50 }
 0x118   : > { %v15643_v59 = vmov 0  }
 0x119   : > { %v9761_v24 = vsel %vm842_vm3, %v16087_v53, %v7403_v58  ;;  %16090 = vst [vmem:[#allocation64_spill] sm:$0xff] %v9779_v16  ;;  %v9782_v58 = vsel %vm842_vm3, %v7409_v54, %v7413_v55  ;;  %v867_v35 = vmul.f32 %v9779_v16, %v9579_v26  ;;  %7575 = vset.pattern.permute.xlu0 %v15643_v59 }
 0x11a   : > { %16088 = vst [vmem:[#allocation62_spill] sm:$0xff] %v9761_v24  ;;  %v861_v61 = vmul.f32 %v9761_v24, %v9540_v4  ;;  %v865_v53 = vmul.f32 %v9782_v58, %v9569_v21  ;;  %7737 = vset.pattern.permute.xlu1 %v15643_v59  ;;  %v7422_v54 = vpop.permute.xlu1 %7421 }
 0x11b   : > { %16091 = vst [vmem:[#allocation65_spill] sm:$0xff] %v9782_v58  ;;  %v7417_v50 = vpop.permute.xlu0 %7416 }
 0x11c   : > { %v7540_v40 = vpack.i.bf16 %v862_v5, %v861_v61  ;;  %v9818_v34 = vunpack.i.l.bf16 %v7417_v50 }
 0x11e   : > { %7536 = vrot.lane.b32.xlu0 %v7535_v23, %s9202_s18  ;;  %v9788_v23 = vsel %vm842_vm3, %v7404_v10, %v7408_v44  ;;  %v864_v10 = vmul.f32 %v9785_v57, %v9524_v60  ;;  %16095 = vst [vmem:[#allocation69_spill] sm:$0xff] %v9818_v34  ;;  %v901_v44 = vmul.f32 %v9818_v34, %v9527_v62 }
 0x11f   : > { %7516 = vrot.lane.b32.xlu2 %v7515_v37, %s9201_s5  ;;  %7526 = vrot.lane.b32.xlu1 %v7525_v49, %s9202_s18  ;;  %v1105_v49 = vrot.slane %v825_v20, 4  ;;  %16093 = vst [vmem:[#allocation67_spill] sm:$0xff] %v9788_v23  ;;  %v9795_v37 = vsel %vm842_vm3, %v7413_v55, %v9779_v16  ;;  %v863_v36 = vmul.f32 %v9788_v23, %v9533_v0  ;;  %v7427_v20 = vpop.permute.xlu2 %7426  ;;  %v7424_v55 = vunpack.i.h.bf16 %v7422_v54  ;;  %v1486_v16 = vld [vmem:[%s9421_s28 + $0x18] sm:$0xff]  ;;  %v1489_v23 = vld [vmem:[%s9421_s28 + $0x30] sm:$0xff] }
 0x120   : > { %16094 = vst [vmem:[#allocation68_spill] sm:$0xff] %v9795_v37  ;;  %v866_v30 = vmul.f32 %v9795_v37, %v9572_v22  ;;  %v1488_v37 = vld [vmem:[%s9421_s28 + $0x28] sm:$0xff] }
 0x121   : > { %v7545_v5 = vpack.i.bf16 %v864_v10, %v863_v36 }
 0x122   : > { %v7550_v61 = vpack.i.bf16 %v866_v30, %v865_v53 }
 0x123   : > { %v7432_v36 = vpop.permute.xlu0 %7431 }
 0x124   : > { %v7433_v30 = vunpack.i.l.bf16 %v7432_v36 }
 0x126   : > { %7541 = vrot.lane.b32.xlu0 %v7540_v40, %s9196_s7  ;;  %v7423_v40 = vunpack.i.l.bf16 %v7422_v54 }
 0x127   : > { %7531 = vrot.lane.b32.xlu2 %v7530_v29, %s9202_s18  ;;  %1122 = vrot.lane.b32.xlu1 %v1105_v49, %s9202_s18  ;;  %v7419_v29 = vunpack.i.h.bf16 %v7417_v50 }
 0x129   : > { %v9834_v49 = vsel %vm884_vm5, %v7419_v29, %v7423_v40  ;;  %v9838_v53 = vsel %vm884_vm5, %v9818_v34, %v7419_v29 }
 0x12a   : > { %16098 = vst [vmem:[#allocation71_spill] sm:$0xff] %v9834_v49 }
 0x12b   : > { %16099 = vst [vmem:[#allocation72_spill] sm:$0xff] %v9838_v53 }
 0x12e   : > { %1166 = vrot.lane.b32.xlu0 %v867_v35, %s9196_s7  ;;  %v902_v35 = vmul.f32 %v9838_v53, %v9537_v3 }
 0x12f   : > { %7551 = vrot.lane.b32.xlu2 %v7550_v61, %s9196_s7  ;;  %7546 = vrot.lane.b32.xlu1 %v7545_v5, %s9196_s7  ;;  %v7429_v61 = vunpack.i.h.bf16 %v7427_v20  ;;  %v7428_v5 = vunpack.i.l.bf16 %v7427_v20 }
 0x131   : > { %v9850_v50 = vsel %vm884_vm5, %v7429_v61, %v7433_v30 }
 0x132   : > { %16100 = vst [vmem:[#allocation73_spill] sm:$0xff] %v9850_v50  ;;  %v907_v20 = vmul.f32 %v9850_v50, %v9569_v21 }
 0x136   : > { %7566 = vrot.lane.b32.xlu0 %v9556_v13, %s9204_s26  ;;  %v16096_v13 = vrot.slane %v9579_v26, 4 }
 0x137   : > { %7561 = vrot.lane.b32.xlu2 %v9558_v14, %s9204_s26  ;;  %7556 = vrot.lane.b32.xlu1 %v9560_v15, %s9204_s26  ;;  %v9829_v14 = vsel %vm884_vm5, %v7423_v40, %v7424_v55  ;;  %v9858_v40 = vsel %vm884_vm5, %v7424_v55, %v7428_v5 }
 0x138   : > { %16097 = vst [vmem:[#allocation70_spill] sm:$0xff] %v9829_v14  ;;  %v904_v10 = vmul.f32 %v9829_v14, %v9530_v63 }
 0x139   : > { %16102 = vst [vmem:[#allocation75_spill] sm:$0xff] %v9858_v40 }
 0x13e   : > { %1228 = vrot.lane.b32.xlu0 %v901_v44, %s9205_s11  ;;  %v9855_v44 = vsel %vm884_vm5, %v7428_v5, %v7429_v61 }
 0x13f   : > { %1200 = vrot.lane.b32.xlu2 %v16096_v13, %s9204_s26  ;;  %7571 = vrot.lane.b32.xlu1 %v9590_v28, %s9204_s26  ;;  %v903_v28 = vmul.f32 %v9834_v49, %v9540_v4  ;;  %16101 = vst [vmem:[#allocation74_spill] sm:$0xff] %v9855_v44  ;;  %v906_v29 = vmul.f32 %v9855_v44, %v9524_v60 }
 0x140   : > { %v905_v13 = vmul.f32 %v9858_v40, %v9533_v0  ;;  %v680_v44 = vmul.f32 %v9481_v42, %v9533_v0 }
 0x141   : > { %v9831_v15 = vpop.permute.xlu2 %7441 }
 0x142   : > { %v7444_v49 = vunpack.i.h.bf16 %v9831_v15  ;;  %v7443_v25 = vunpack.i.l.bf16 %v9831_v15  ;;  %v9991_v15 = vmul.f32 %v9501_v48, %v9537_v3  ;;  %v10009_v3 = vmul.f32 %v9511_v52, %v9569_v21 }
 0x144   : > { %v10002_v0 = vsel %vm1071_vm7, %v7443_v25, %v7444_v49  ;;  %16113 = vst [vmem:[#allocation84_spill] sm:$0xff] %v10009_v3 }
 0x146   : > { %1234 = vrot.lane.b32.xlu0 %v904_v10, %s9205_s11  ;;  %v9866_v10 = vunpack.i.h.bf16 %v7432_v36 }
 0x147   : > { %1232 = vrot.lane.b32.xlu2 %v903_v28, %s9205_s11  ;;  %1230 = vrot.lane.b32.xlu1 %v902_v35, %s9205_s11  ;;  %v9877_v35 = vld [vmem:[#allocation13] sm:$0xff] }
 0x148   : > { %16103 = vst [vmem:[#allocation76_spill] sm:$0xff] %v9866_v10  ;;  %v9875_v28 = vsel %vm884_vm5, %v7433_v30, %v9866_v10  ;;  %v909_v36 = vmul.f32 %v9866_v10, %v9579_v26  ;;  %v1483_v26 = vld [vmem:[%s9421_s28] sm:$0xff]  ;;  %v1485_v10 = vld [vmem:[%s9421_s28 + $0x10] sm:$0xff] }
 0x149   : > { %v9852_v54 = vpop.permute.xlu2 %1069  ;;  %16104 = vst [vmem:[#allocation77_spill] sm:$0xff] %v9875_v28  ;;  %v908_v61 = vmul.f32 %v9875_v28, %v9572_v22 }
 0x14a   : > { %16105 = vst [vmem:[#allocation78_spill] sm:$0xff] %v9877_v35 }
 0x14e   : > { %1240 = vrot.lane.b32.xlu0 %v907_v20, %s9205_s11 }
 0x14f   : > { %1238 = vrot.lane.b32.xlu2 %v906_v29, %s9205_s11  ;;  %1236 = vrot.lane.b32.xlu1 %v905_v13, %s9205_s11  ;;  %v1487_v29 = vld [vmem:[%s9421_s28 + $0x20] sm:$0xff]  ;;  %v1484_v13 = vld [vmem:[%s9421_s28 + $0x8] sm:$0xff] }
 0x151   : > { %v9871_v55 = vpop.permute.xlu2 %7461 }
 0x152   : > { %v7464_v50 = vunpack.i.h.bf16 %v9871_v55  ;;  %v16111_v62 = vunpack.i.l.bf16 %v9871_v55 }
 0x154   : > { %v942_v4 = vsel %vm939_vm6, %v16111_v62, %v7464_v50  ;;  %v10013_v62 = vmul.f32 %v9508_v51, %v9572_v22 }
 0x155   : > { %v10005_v34 = vsel %vm1255_vm8, %v678_v27, %v942_v4 }
 0x156   : > { %1292 = vperm.xlu0 %7575, %v9877_v35   ;;  %v1490_v35 = vld [vmem:[%s9421_s28 + $0x38] sm:$0xff]  ;;  %16114 = vst [vmem:[#allocation85_spill] sm:$0xff] %v10013_v62 }
 0x157   : > { %1244 = vrot.lane.b32.xlu2 %v909_v36, %s9205_s11  ;;  %1242 = vrot.lane.b32.xlu1 %v908_v61, %s9205_s11 }
 0x158   : > { %v9886_v5 = vpop.permute.xlu0 %7446 }
 0x159   : > { %v9888_v30 = vpop.permute.xlu2 %937  ;;  %v9890_v20 = vpop.permute.xlu1 %7436  ;;  %v7448_v45 = vunpack.i.l.bf16 %v9886_v5  ;;  %v16115_v48 = vunpack.i.h.bf16 %v9886_v5 }
 0x15a   : > { %16106 = vst [vmem:[#allocation79_spill] sm:$0xff] %v9888_v30  ;;  %v7439_v46 = vunpack.i.h.bf16 %v9890_v20  ;;  %v7438_v63 = vunpack.i.l.bf16 %v9890_v20 }
 0x15b   : > { %v10024_v27 = vsel %vm1071_vm7, %v7448_v45, %v16115_v48 }
 0x15c   : > { %v10027_v21 = vsel %vm1071_vm7, %v7439_v46, %v7443_v25 }
 0x15e   : > { %1507 = vrot.lane.b32.xlu0 %v1487_v29, %s9193_s14 }
 0x15f   : > { %1499 = vrot.lane.b32.xlu1 %v1483_v26, %s9193_s14  ;;  %1501 = vrot.lane.b32.xlu2 %v1484_v13, %s9193_s14 }
 0x160   : > { %v9898_v36 = vpop.permute.xlu0 %7466 }
 0x161   : > { %16107 = vst [vmem:[#allocation80_spill] sm:$0xff] %v9898_v36  ;;  %v9900_v61 = vpop.permute.xlu1 %7451  ;;  %v9902_v59 = vpop.permute.xlu2 %7486  ;;  %v7468_v14 = vunpack.i.l.bf16 %v9898_v36  ;;  %v16112_v6 = vunpack.i.h.bf16 %v9898_v36 }
 0x162   : > { %v7454_v42 = vunpack.i.h.bf16 %v9900_v61  ;;  %v16116_v22 = vunpack.i.h.bf16 %v9902_v59  ;;  %v16117_v4 = vunpack.i.l.bf16 %v9902_v59  ;;  %v16118_v25 = vunpack.i.l.bf16 %v9900_v61 }
 0x163   : > { %v943_v20 = vsel %vm939_vm6, %v7464_v50, %v7468_v14  ;;  %v944_v53 = vsel %vm939_vm6, %v7468_v14, %v16112_v6  ;;  %v1072_v6 = vsel %vm1071_vm7, %v7438_v63, %v7439_v46  ;;  %v10019_v14 = vsel %vm1071_vm7, %v7444_v49, %v7448_v45 }
 0x164   : > { %v10034_v51 = vsel %vm983_vm9, %v16117_v4, %v16116_v22  ;;  %v10037_v63 = vsel %vm1255_vm8, %v679_v19, %v943_v20  ;;  %v10040_v49 = vsel %vm1255_vm8, %v680_v44, %v944_v53  ;;  %v10048_v52 = vsel %vm1071_vm7, %v16118_v25, %v7454_v42 }
 0x165   : > { %16119 = vst [vmem:[#allocation86_spill] sm:$0xff] %v10048_v52  ;;  %v10082_v30 = vsel %vm1071_vm7, %v7454_v42, %v9852_v54 }
 0x166   : > { %1513 = vrot.lane.b32.xlu0 %v1490_v35, %s9193_s14  ;;  %16123 = vst [vmem:[#allocation87_spill] sm:$0xff] %v10082_v30 }
 0x167   : > { %1503 = vrot.lane.b32.xlu1 %v1485_v10, %s9193_s14  ;;  %1505 = vrot.lane.b32.xlu2 %v1486_v16, %s9193_s14 }
 0x168   : > { %v9910_v29 = vpop.permute.xlu0 %7476 }
 0x169   : > { %v9912_v26 = vpop.permute.xlu1 %7456  ;;  %v9914_v13 = vpop.permute.xlu2 %7496  ;;  %v7479_v62 = vunpack.i.h.bf16 %v9910_v29  ;;  %v7478_v52 = vunpack.i.l.bf16 %v9910_v29 }
 0x16a   : > { %v7459_v45 = vunpack.i.h.bf16 %v9912_v26  ;;  %v7458_v48 = vunpack.i.l.bf16 %v9912_v26  ;;  %v7498_v22 = vunpack.i.l.bf16 %v9914_v13  ;;  %v16128_v42 = vunpack.i.h.bf16 %v9914_v13 }
 0x16f   : > { %1509 = vrot.lane.b32.xlu1 %v1488_v37, %s9193_s14  ;;  %1511 = vrot.lane.b32.xlu2 %v1489_v23, %s9193_s14 }
 0x170   : > { %v9920_v58 = vpop.permute.xlu0 %7491 }
 0x171   : > { %v9922_v57 = vpop.permute.xlu1 %7471  ;;  %v9924_v35 = vpop.permute.xlu2 %7501 }
 0x172   : > { %v7504_v4 = vunpack.i.h.bf16 %v9924_v35  ;;  %v7503_v44 = vunpack.i.l.bf16 %v9924_v35 }
 0x174   : > { %v1037_v30 = vsel %vm1036_vm10, %v7503_v44, %v7504_v4  ;;  %v16133_v44 = vunpack.i.h.bf16 %v9886_v5 }
 0x178   : > { %v9926_v10 = vpop.permute.xlu0 %7506 }
 0x179   : > { %v9928_v16 = vpop.permute.xlu1 %7481  ;;  %v9930_v43 = vpop.permute.xlu2 %7516  ;;  %v7508_v35 = vunpack.i.l.bf16 %v9926_v10 }
 0x17a   : > { %v7483_v26 = vunpack.i.l.bf16 %v9928_v16 }
 0x180   : > { %v9932_v11 = vpop.permute.xlu0 %1034 }
 0x181   : > { %v9934_v18 = vpop.permute.xlu1 %981  ;;  %v9936_v8 = vpop.permute.xlu2 %7531 }
 0x182   : > { %16108 = vst [vmem:[#allocation81_spill] sm:$0xff] %v9934_v18 }
 0x188   : > { %v9938_v37 = vpop.permute.xlu0 %7521 }
 0x189   : > { %v9940_v23 = vpop.permute.xlu1 %7511  ;;  %v9944_v9 = vpop.permute.xlu2 %7551  ;;  %v7523_v53 = vunpack.i.l.bf16 %v9938_v37 }
 0x190   : > { %v9942_v17 = vpop.permute.xlu0 %7536 }
 0x191   : > { %v9946_v32 = vpop.permute.xlu1 %7526  ;;  %v9952_v56 = vpop.permute.xlu2 %7561 }
 0x192   : > { %v16125_v18 = vunpack.i.l.bf16 %v9952_v56 }
 0x198   : > { %v9948_v39 = vpop.permute.xlu0 %7541 }
 0x199   : > { %v9950_v38 = vpop.permute.xlu1 %1122  ;;  %v9958_v28 = vpop.permute.xlu2 %1200  ;;  %v16120_v31 = vunpack.i.h.bf16 %v9948_v39  ;;  %v16121_v25 = vunpack.i.l.bf16 %v9948_v39 }
 0x19a   : > { %16109 = vst [vmem:[#allocation82_spill] sm:$0xff] %v9950_v38  ;;  %v16126_v38 = vunpack.i.h.bf16 %v9946_v32 }
 0x19b   : > { %v1170_v12 = vsel %vm842_vm3, %v16121_v25, %v16120_v31  ;;  %v16124_v25 = vunpack.i.h.bf16 %v9952_v56 }
 0x1a0   : > { %v9954_v33 = vpop.permute.xlu0 %1166 }
 0x1a1   : > { %16110 = vst [vmem:[#allocation83_spill] sm:$0xff] %v9954_v33  ;;  %v9956_v2 = vpop.permute.xlu1 %7546  ;;  %v9995_v24 = vpop.permute.xlu2 %1232  ;;  %v1205_v33 = vsel %vm1202_vm13, %v16125_v18, %v16124_v25  ;;  %v940_v18 = vsel %vm939_vm6, %v7458_v48, %v7459_v45 }
 0x1a2   : > { %v1282_v54 = vsel %vm1255_vm8, %v1170_v12, %v1205_v33  ;;  %v7534_v12 = vunpack.i.h.bf16 %v9936_v8  ;;  %v7533_v33 = vunpack.i.l.bf16 %v9936_v8  ;;  %v1256_v5 = vsel %vm1255_vm8, %v9968_v7, %v940_v18 }
 0x1a8   : > { %v9962_v40 = vpop.permute.xlu0 %7566 }
 0x1a9   : > { %v9964_v1 = vpop.permute.xlu1 %7556  ;;  %v10073_v60 = vpop.permute.xlu2 %1238 }
 0x1aa   : > { %v7558_v46 = vunpack.i.l.bf16 %v9964_v1  ;;  %v16122_v3 = vunpack.i.h.bf16 %v9964_v1 }
 0x1ac   : > { %v1203_v20 = vsel %vm1202_vm13, %v7558_v46, %v16122_v3  ;;  %v16127_v3 = vunpack.i.l.bf16 %v9946_v32 }
 0x1ae   : > { %v1127_v46 = vsel %vm1124_vm11, %v16127_v3, %v16126_v38  ;;  %v16130_v38 = vunpack.i.h.bf16 %v9928_v16  ;;  %v16131_v3 = vunpack.i.h.bf16 %v9926_v10 }
 0x1af   : > { %v1274_v48 = vsel %vm1255_vm8, %v10002_v0, %v1127_v46 }
 0x1b0   : > { %v1229_v47 = vpop.permute.xlu0 %1228 }
 0x1b1   : > { %v10015_v50 = vpop.permute.xlu1 %7571 }
 0x1b8   : > { %v1235_v41 = vpop.permute.xlu0 %1234 }
 0x1b9   : > { %v1231_v19 = vpop.permute.xlu1 %1230  ;;  %v1249_v36 = vsel %vm1246_vm12, %v9995_v24, %v1235_v41 }
 0x1ba   : > { %v1247_v31 = vsel %vm1246_vm12, %v1229_v47, %v1231_v19  ;;  %7126 = vmatpush.msk.msra.mxu2 %vm1255_vm8, %v1249_v36  ;;  %v1168_v47 = vsel %vm842_vm3, %v7498_v22, %v16128_v42  ;;  %v16129_v36 = vunpack.i.h.bf16 %v9938_v37  ;;  %v1039_v22 = vsel %vm1036_vm10, %v7508_v35, %v16131_v3 }
 0x1bb   : > { %7122 = vmatpush.msk.msra.mxu1 %vm1255_vm8, %v1247_v31  ;;  %v1280_v25 = vsel %vm1255_vm8, %v1168_v47, %v1203_v20  ;;  %v986_v31 = vsel %vm983_vm9, %v7483_v26, %v16130_v38  ;;  %v7569_v42 = vunpack.i.h.bf16 %v9962_v40  ;;  %v7568_v47 = vunpack.i.l.bf16 %v9962_v40 }
 0x1bc   : > { %v1125_v29 = vsel %vm1124_vm11, %v7523_v53, %v16129_v36  ;;  %1367 = vmatpush.msra.mxu2 %v1282_v54  ;;  %v16132_v53 = vunpack.i.l.bf16 %v9900_v61  ;;  %v984_v36 = vsel %vm983_vm9, %v7478_v52, %v7479_v62  ;;  %v1266_v0 = vsel %vm1255_vm8, %v986_v31, %v1039_v22  ;;  %v1245_v22 = vpop.permute.xlu2 %1244 }
 0x1bd   : > { %1327 = vmatpush.msra.mxu1 %v1280_v25  ;;  %v1272_v54 = vsel %vm1255_vm8, %v1072_v6, %v1125_v29  ;;  %v1264_v25 = vsel %vm1255_vm8, %v984_v36, %v1037_v30  ;;  %v16134_v61 = vunpack.i.l.bf16 %v9871_v55  ;;  %v7549_v38 = vunpack.i.h.bf16 %v9956_v2  ;;  %v10146_v55 = vld [vmem:[#allocation7] sm:$0xff] }
 0x1be   : > { %v10123_v20 = vsel %vm1071_vm7, %v16133_v44, %v16132_v53  ;;  %1368 = vmatpush.msra.mxu2 %v1274_v48  ;;  %v7548_v6 = vunpack.i.l.bf16 %v9956_v2  ;;  %v985_v52 = vsel %vm983_vm9, %v7479_v62, %v7483_v26  ;;  %v1038_v29 = vsel %vm1036_vm10, %v7504_v4, %v7508_v35 }
 0x1bf   : > { %1328 = vmatpush.msra.mxu1 %v1272_v54  ;;  %v10136_v46 = vsel %vm939_vm6, %v7459_v45, %v16134_v61  ;;  %v7514_v30 = vunpack.i.h.bf16 %v9940_v23  ;;  %v7513_v31 = vunpack.i.l.bf16 %v9940_v23  ;;  %v1129_v45 = vsel %vm1124_vm11, %v7533_v33, %v7534_v12 }
 0x1c0   : > { %1369 = vmatpush.msra.mxu2 %v1266_v0  ;;  %v10144_v3 = vpop.permute.xlu0 %1240  ;;  %v16135_v26 = vunpack.i.h.bf16 %v9952_v56  ;;  %v1207_v18 = vsel %vm1202_vm13, %v7568_v47, %v7569_v42  ;;  %v16136_v48 = vunpack.i.l.bf16 %v9952_v56  ;;  %v16138_v53 = vunpack.i.h.bf16 %v9946_v32 }
 0x1c1   : > { %v1237_v7 = vpop.permute.xlu1 %1236  ;;  %1329 = vmatpush.msra.mxu1 %v1264_v25  ;;  %v16139_v54 = vunpack.i.l.bf16 %v9946_v32  ;;  %v16140_v36 = vunpack.i.h.bf16 %v9938_v37  ;;  %v16141_v56 = vunpack.i.h.bf16 %v9948_v39  ;;  %v1172_v32 = vsel %vm842_vm3, %v7548_v6, %v7549_v38 }
 0x1c2   : > { %1370 = vmatpush.msra.mxu2 %v10005_v34  ;;  %v1250_v62 = vsel %vm1246_vm12, %v1235_v41, %v1237_v7  ;;  %v1251_v4 = vsel %vm1246_vm12, %v1237_v7, %v10073_v60  ;;  %v1206_v35 = vsel %vm1202_vm13, %v16135_v26, %v7568_v47  ;;  %v16137_v34 = vunpack.i.h.bf16 %v9964_v1 }
 0x1c3   : > { %1330 = vmatpush.msra.mxu1 %v1256_v5  ;;  %7128 = vmatpush.msk.msra.mxu3 %vm1255_vm8, %v1250_v62  ;;  %v1128_v44 = vsel %vm1124_vm11, %v16138_v53, %v7533_v33  ;;  %v1126_v47 = vsel %vm1124_vm11, %v16140_v36, %v16139_v54  ;;  %v1248_v1 = vsel %vm1246_vm12, %v1231_v19, %v9995_v24  ;;  %v7519_v37 = vunpack.i.h.bf16 %v9930_v43 }
 0x1c4   : > { %v1204_v41 = vsel %vm1202_vm13, %v16137_v34, %v16136_v48  ;;  %7130 = vmatpush.msk.msra.mxu0 %vm1255_vm8, %v1251_v4  ;;  %7123 = vmatmul.msk.f32.vlgmr.msra.gmra.mxu1 %vm1295_vm14, %v10146_v55  ;;  %v1171_v25 = vsel %vm842_vm3, %v16141_v56, %v7548_v6  ;;  %v1284_v0 = vsel %vm1255_vm8, %v1172_v32, %v1207_v18  ;;  %v16142_v24 = vunpack.i.l.bf16 %v9948_v39  ;;  %v10235_v36 = vpop.permute.xlu2 %1501 }
 0x1c5   : > { %7124 = vmatpush.msk.msrb.mxu1 %vm1255_vm8, %v1248_v1  ;;  %7127 = vmatmul.msk.f32.vlgmr.msra.gmra.mxu2 %vm1295_vm14, %v10146_v55  ;;  %v1283_v33 = vsel %vm1255_vm8, %v1171_v25, %v1206_v35  ;;  %v16143_v19 = vunpack.i.h.bf16 %v9914_v13  ;;  %v7518_v61 = vunpack.i.l.bf16 %v9930_v43  ;;  %v16144_v7 = vunpack.i.h.bf16 %v9926_v10  ;;  %v16150_v25 = vld [vmem:[#allocation81_spill] sm:$0xff] }
 0x1c6   : > { %1387 = vmatpush.msra.mxu3 %v1283_v33  ;;  %1407 = vmatpush.msra.mxu0 %v1284_v0  ;;  %v1041_v4 = vsel %vm1036_vm10, %v7513_v31, %v7514_v30  ;;  %v7574_v39 = vunpack.i.h.bf16 %v10015_v50  ;;  %v7573_v13 = vunpack.i.l.bf16 %v10015_v50  ;;  %v1275_v26 = vsel %vm1255_vm8, %v10019_v14, %v1128_v44 }
 0x1c7   : > { %v1169_v5 = vsel %vm842_vm3, %v16143_v19, %v16142_v24  ;;  %v1040_v62 = vsel %vm1036_vm10, %v16144_v7, %v7513_v31  ;;  %v1276_v35 = vsel %vm1255_vm8, %v10024_v27, %v1129_v45  ;;  %v7554_v18 = vunpack.i.h.bf16 %v9944_v9  ;;  %v16152_v24 = vld [vmem:[#allocation87_spill] sm:$0xff] }
 0x1c8   : > { %v1281_v6 = vsel %vm1255_vm8, %v1169_v5, %v1204_v41  ;;  %v7553_v10 = vunpack.i.l.bf16 %v9944_v9  ;;  %1388 = vmatpush.msra.mxu3 %v1275_v26  ;;  %1408 = vmatpush.msra.mxu0 %v1276_v35  ;;  %v1273_v31 = vsel %vm1255_vm8, %v10027_v21, %v1126_v47  ;;  %v16145_v48 = vunpack.i.l.bf16 %v9902_v59  ;;  %v10233_v54 = vpop.permute.xlu0 %1292  ;;  %v16148_v47 = vld [vmem:[#allocation82_spill] sm:$0xff] }
 0x1c9   : > { %1347 = vmatpush.msrb.mxu1 %v1281_v6  ;;  %v16146_v50 = vunpack.i.h.bf16 %v9928_v16  ;;  %v7539_v14 = vunpack.i.h.bf16 %v9942_v17  ;;  %v7538_v41 = vunpack.i.l.bf16 %v9942_v17  ;;  %v1243_v27 = vpop.permute.xlu1 %1242  ;;  %v1268_v9 = vsel %vm1255_vm8, %v10034_v51, %v1041_v4  ;;  %16147 = vst [vmem:[#allocation88_spill] sm:$0xff] %v10233_v54 }
 0x1ca   : > { %1409 = vmatpush.msra.mxu0 %v1268_v9  ;;  %v1265_v21 = vsel %vm1255_vm8, %v985_v52, %v1038_v29  ;;  %v1253_v16 = vsel %vm1246_vm12, %v10144_v3, %v1243_v27  ;;  %v1257_v53 = vsel %vm1255_vm8, %v9991_v15, %v10136_v46  ;;  %v7494_v17 = vunpack.i.h.bf16 %v9920_v58  ;;  %v16162_v9 = vld [vmem:[#allocation45_spill] sm:$0xff] }
 0x1cb   : > { %v987_v34 = vsel %vm983_vm9, %v16146_v50, %v16145_v48  ;;  %1348 = vmatpush.msrb.mxu1 %v1273_v31  ;;  %v7493_v44 = vunpack.i.l.bf16 %v9920_v58  ;;  %7134 = vmatpush.msk.msrb.mxu2 %vm1255_vm8, %v1253_v16  ;;  %v1254_v51 = vsel %vm1246_vm12, %v1243_v27, %v1245_v22  ;;  %v1209_v52 = vsel %vm1202_vm13, %v7573_v13, %v7574_v39  ;;  %v16158_v50 = vld [vmem:[#allocation32_spill] sm:$0xff] }
 0x1cc   : > { %v1267_v45 = vsel %vm1255_vm8, %v987_v34, %v1040_v62  ;;  %v7474_v29 = vunpack.i.h.bf16 %v9922_v57  ;;  %v1044_v15 = vsel %vm1036_vm10, %v7519_v37, %v9932_v11  ;;  %1410 = vmatpush.msra.mxu0 %v10040_v49  ;;  %v1210_v58 = vsel %vm1202_vm13, %v7574_v39, %v9958_v28  ;;  %v16149_v49 = vld [vmem:[#allocation83_spill] sm:$0xff]  ;;  %v1506_v31 = vpop.permute.xlu2 %1505  ;;  %v16159_v34 = vld [vmem:[#allocation24_spill] sm:$0xff] }
 0x1cd   : > { %1389 = vmatpush.msra.mxu3 %v1267_v45  ;;  %1349 = vmatpush.msrb.mxu1 %v1265_v21  ;;  %v1043_v46 = vsel %vm1036_vm10, %v7518_v61, %v7519_v37  ;;  %v7473_v22 = vunpack.i.l.bf16 %v9922_v57  ;;  %v1132_v1 = vsel %vm1124_vm11, %v7539_v14, %v16148_v47  ;;  %v1174_v11 = vsel %vm842_vm3, %v7553_v10, %v7554_v18  ;;  %v16153_v39 = vld [vmem:[#allocation79_spill] sm:$0xff]  ;;  %v16161_v27 = vld [vmem:[#allocation44_spill] sm:$0xff] }
 0x1ce   : > { %v1175_v28 = vsel %vm842_vm3, %v7554_v18, %v16149_v49  ;;  %7131 = vmatmul.msk.f32.vlgmr.msra.gmra.mxu0 %vm1295_vm14, %v10146_v55  ;;  %v1286_v57 = vsel %vm1255_vm8, %v1174_v11, %v1209_v52  ;;  %v1208_v56 = vsel %vm1202_vm13, %v7569_v42, %v7573_v13  ;;  %v991_v32 = vsel %vm983_vm9, %v7494_v17, %v16150_v25  ;;  %v16151_v42 = vld [vmem:[#allocation86_spill] sm:$0xff]  ;;  %v16181_v49 = vld [vmem:[#allocation36_spill] sm:$0xff] }
 0x1cf   : > { %1390 = vmatpush.msra.mxu3 %v10037_v63  ;;  %1350 = vmatpush.msrb.mxu1 %v1257_v53  ;;  %v1131_v63 = vsel %vm1124_vm11, %v7538_v41, %v7539_v14  ;;  %v1252_v37 = vsel %vm1246_vm12, %v10073_v60, %v10144_v3  ;;  %v1287_v33 = vsel %vm1255_vm8, %v1175_v28, %v1210_v58  ;;  %v16154_v43 = vunpack.i.h.bf16 %v9902_v59  ;;  %v16160_v14 = vld [vmem:[#allocation85_spill] sm:$0xff]  ;;  %v16164_v58 = vld [vmem:[#allocation72_spill] sm:$0xff]  ;;  %v16167_v28 = vld [vmem:[#allocation71_spill] sm:$0xff] }
 0x1d0   : > { %7129 = vmatmul.msk.f32.vlgmr.msra.gmra.mxu3 %vm1295_vm14, %v10146_v55  ;;  %7125 = vmatmul.msk.f32.vlgmr.msrb.gmra.mxu1 %vm1295_vm14, %v10146_v55  ;;  %v1173_v40 = vsel %vm842_vm3, %v7549_v38, %v7553_v10  ;;  %v1278_v0 = vsel %vm1255_vm8, %v16151_v42, %v1131_v63  ;;  %v1130_v60 = vsel %vm1124_vm11, %v7534_v12, %v7538_v41  ;;  %v1508_v10 = vpop.permute.xlu0 %1507  ;;  %v16187_v53 = vld [vmem:[#allocation40_spill] sm:$0xff] }
 0x1d1   : > { %7136 = vmatpush.msk.msrb.mxu3 %vm1255_vm8, %v1254_v51  ;;  %1447 = vmatpush.msrb.mxu2 %v1286_v57  ;;  %v1285_v3 = vsel %vm1255_vm8, %v1173_v40, %v1208_v56  ;;  %v1279_v19 = vsel %vm1255_vm8, %v16152_v24, %v1132_v1  ;;  %v1500_v5 = vpop.permute.xlu1 %1499  ;;  %v990_v6 = vsel %vm983_vm9, %v7493_v44, %v7494_v17  ;;  %v16168_v56 = vld [vmem:[#allocation70_spill] sm:$0xff] }
 0x1d2   : > { %7132 = vmatpush.msk.msra.mxu1 %vm1255_vm8, %v1252_v37  ;;  %v946_v2 = vsel %vm939_vm6, %v7473_v22, %v7474_v29  ;;  %v10290_v38 = vsel %vm657_vm0, %v1500_v5, %v10235_v36  ;;  %v10293_v8 = vsel %vm657_vm0, 0.0, %v1500_v5  ;;  %v1270_v12 = vsel %vm1255_vm8, %v990_v6, %v1043_v46  ;;  %v16170_v6 = vld [vmem:[#allocation33_spill] sm:$0xff] }
 0x1d3   : > { %1467 = vmatpush.msrb.mxu3 %v1287_v33  ;;  %1448 = vmatpush.msrb.mxu2 %v1278_v0  ;;  %v1042_v7 = vsel %vm1036_vm10, %v7514_v30, %v7518_v61  ;;  %v1277_v62 = vsel %vm1255_vm8, %v10123_v20, %v1130_v60  ;;  %v1271_v4 = vsel %vm1255_vm8, %v991_v32, %v1044_v15  ;;  %v16155_v30 = vld [vmem:[#allocation84_spill] sm:$0xff]  ;;  %v16182_v0 = vld [vmem:[#allocation37_spill] sm:$0xff] }
 0x1d4   : > { %1427 = vmatpush.msra.mxu1 %v1285_v3  ;;  %v947_v13 = vsel %vm939_vm6, %v7474_v29, %v16153_v39  ;;  %v10308_v26 = vpack.i.bf16 %v10290_v38, %v10293_v8  ;;  %v989_v23 = vsel %vm983_vm9, %v16154_v43, %v7493_v44  ;;  %v1262_v61 = vsel %vm1255_vm8, %v16155_v30, %v946_v2  ;;  %v16156_v20 = vld [vmem:[#allocation80_spill] sm:$0xff]  ;;  %v16163_v29 = vld [vmem:[#allocation69_spill] sm:$0xff]  ;;  %v1512_v11 = vpop.permute.xlu2 %1511  ;;  %v16173_v39 = vld [vmem:[#allocation38_spill] sm:$0xff] }
 0x1d5   : > { %1468 = vmatpush.msrb.mxu3 %v1279_v19  ;;  %1449 = vmatpush.msrb.mxu2 %v1270_v12  ;;  %v16157_v35 = vunpack.i.h.bf16 %v16156_v20  ;;  %v1269_v48 = vsel %vm1255_vm8, %v989_v23, %v1042_v7  ;;  %v681_v59 = vmul.f32 %v16159_v34, %v16158_v50  ;;  %v1263_v41 = vsel %vm1255_vm8, %v16160_v14, %v947_v13  ;;  %v16169_v19 = vld [vmem:[#allocation41_spill] sm:$0xff]  ;;  %v16171_v12 = vld [vmem:[#allocation34_spill] sm:$0xff]  ;;  %v16174_v43 = vld [vmem:[#allocation75_spill] sm:$0xff] }
 0x1d6   : > { %1428 = vmatpush.msra.mxu1 %v1277_v62  ;;  %7577 = vrot.lane.b32.xlu1 %v10308_v26, %s9199_s2  ;;  %v10329_v45 = vmul.f32 %v16161_v27, %v10293_v8  ;;  %v10333_v21 = vmul.f32 %v10290_v38, %v16162_v9  ;;  %v10355_v15 = vmul.f32 %v16163_v29, %v10293_v8  ;;  %v16172_v62 = vld [vmem:[#allocation42_spill] sm:$0xff]  ;;  %v16176_v20 = vld [vmem:[#allocation73_spill] sm:$0xff] }
 0x1d7   : > { %1469 = vmatpush.msrb.mxu3 %v1271_v4  ;;  %v945_v18 = vsel %vm939_vm6, %v16157_v35, %v7473_v22  ;;  %1450 = vmatpush.msrb.mxu2 %v1262_v61  ;;  %v10359_v46 = vmul.f32 %v10290_v38, %v16164_v58  ;;  %v16166_v22 = vld [vmem:[#allocation63_spill] sm:$0xff]  ;;  %v10384_v32 = vsel %vm657_vm0, %v1506_v31, %v1508_v10  ;;  %v16175_v30 = vld [vmem:[#allocation74_spill] sm:$0xff]  ;;  %v16199_v58 = vld [vmem:[#allocation53_spill] sm:$0xff] }
 0x1d8   : > { %1429 = vmatpush.msra.mxu1 %v1269_v48  ;;  %7135 = vmatmul.msk.f32.vlgmr.msrb.gmra.mxu2 %vm1295_vm14, %v10146_v55  ;;  %v1261_v16 = vsel %vm1255_vm8, %v681_v59, %v945_v18  ;;  %v1514_v1 = vpop.permute.xlu0 %1513  ;;  %v1541_v2 = vmul.f32 %v16170_v6, %v10293_v8  ;;  %v1542_v7 = vmul.f32 %v10290_v38, %v16171_v12  ;;  %v16177_v18 = vld [vmem:[#allocation77_spill] sm:$0xff]  ;;  %v16186_v59 = vld [vmem:[#allocation43_spill] sm:$0xff] }
 0x1d9   : > { %1470 = vmatpush.msrb.mxu3 %v1263_v41  ;;  %v1504_v17 = vpop.permute.xlu1 %1503  ;;  %v10387_v33 = vsel %vm657_vm0, %v1512_v11, %v1514_v1  ;;  %v10406_v24 = vsel %vm657_vm0, %v1514_v1, 0.0  ;;  %v10426_v23 = vmul.f32 %v10384_v32, %v16174_v43 }
 0x1da   : > { %1430 = vmatpush.msra.mxu1 %v1261_v16  ;;  %7137 = vmatmul.msk.f32.vlgmr.msrb.gmra.mxu3 %vm1295_vm14, %v10146_v55  ;;  %v10344_v44 = vsel %vm657_vm0, %v10235_v36, %v1504_v17  ;;  %v10347_v51 = vsel %vm657_vm0, %v1504_v17, %v1506_v31  ;;  %v16178_v31 = vld [vmem:[#allocation39_spill] sm:$0xff]  ;;  %v7596_v16 = vpack.i.bf16 %v1542_v7, %v1541_v2  ;;  %v16179_v17 = vld [vmem:[#allocation46_spill] sm:$0xff] }
 0x1db   : > { %7133 = vmatmul.msk.f32.vlgmr.msra.gmra.mxu1 %vm1295_vm14, %v10146_v55  ;;  %v10351_v52 = vpack.i.bf16 %v10347_v51, %v10344_v44  ;;  %v16165_v55 = vld [vmem:[#allocation62_spill] sm:$0xff]  ;;  %v10369_v47 = vmul.f32 %v10347_v51, %v16166_v22  ;;  %v10377_v57 = vmul.f32 %v10344_v44, %v16167_v28  ;;  %v10381_v25 = vmul.f32 %v10347_v51, %v16168_v56  ;;  %v16183_v2 = vld [vmem:[#allocation35_spill] sm:$0xff] }
 0x1dc   : > { %v10365_v36 = vmul.f32 %v10344_v44, %v16165_v55  ;;  %v1543_v5 = vmul.f32 %v10344_v44, %v16169_v19  ;;  %v1544_v4 = vmul.f32 %v10347_v51, %v16172_v62  ;;  %v1545_v48 = vmul.f32 %v10384_v32, %v16178_v31  ;;  %v16197_v31 = vld [vmem:[#allocation58_spill] sm:$0xff] }
 0x1dd   : > { %7582 = vrot.lane.b32.xlu2 %v10351_v52, %s9199_s2  ;;  %v1550_v1 = vmul.f32 %v16179_v17, %v10293_v8  ;;  %v1549_v7 = vmul.f32 %v16183_v2, %v10406_v24  ;;  %v1552_v63 = vmul.f32 %v10344_v44, %v16186_v59  ;;  %v1567_v27 = vmul.f32 %v16199_v58, %v10406_v24 }
 0x1de   : > { %v7601_v14 = vpack.i.bf16 %v1544_v4, %v1543_v5  ;;  %v1548_v5 = vmul.f32 %v10387_v33, %v16182_v0  ;;  %v16196_v0 = vld [vmem:[#allocation60_spill] sm:$0xff] }
 0x1e1   : > { %v1510_v37 = vpop.permute.xlu1 %1509 }
 0x1e2   : > { %v10390_v40 = vsel %vm657_vm0, %v1508_v10, %v1510_v37  ;;  %v10393_v42 = vsel %vm657_vm0, %v1510_v37, %v1512_v11  ;;  %v10438_v10 = vmul.f32 %v10387_v33, %v16177_v18  ;;  %v16180_v11 = vld [vmem:[#allocation49_spill] sm:$0xff]  ;;  %v1553_v18 = vmul.f32 %v10347_v51, %v16187_v53 }
 0x1e3   : > { %v10399_v60 = vpack.i.bf16 %v10387_v33, %v10393_v42  ;;  %v10403_v3 = vpack.i.bf16 %v10390_v40, %v10384_v32  ;;  %v1546_v13 = vmul.f32 %v10390_v40, %v16173_v39  ;;  %v10430_v61 = vmul.f32 %v10390_v40, %v16175_v30 }
 0x1e4   : > { %v10434_v35 = vmul.f32 %v10393_v42, %v16176_v20  ;;  %v1551_v37 = vmul.f32 %v10290_v38, %v16180_v11  ;;  %v1547_v50 = vmul.f32 %v10393_v42, %v16181_v49  ;;  %v16190_v20 = vld [vmem:[#allocation47_spill] sm:$0xff]  ;;  %v1563_v49 = vmul.f32 %v10384_v32, %v16196_v0 }
 0x1e5   : > { %1604 = vrot.lane.b32.xlu2 %v10406_v24, %s9199_s2  ;;  %7592 = vrot.lane.b32.xlu1 %v10399_v60, %s9199_s2  ;;  %v7606_v41 = vpack.i.bf16 %v1546_v13, %v1545_v48  ;;  %v16184_v48 = vld [vmem:[#allocation51_spill] sm:$0xff]  ;;  %v1558_v2 = vmul.f32 %v16190_v20, %v10406_v24  ;;  %v16198_v20 = vld [vmem:[#allocation57_spill] sm:$0xff] }
 0x1e6   : > { %7587 = vrot.lane.b32.xlu0 %v10403_v3, %s9199_s2  ;;  %v7616_v4 = vpack.i.bf16 %v1551_v37, %v1550_v1  ;;  %v7611_v13 = vpack.i.bf16 %v1548_v5, %v1547_v50  ;;  %v16188_v1 = vld [vmem:[#allocation52_spill] sm:$0xff]  ;;  %v16189_v37 = vld [vmem:[#allocation55_spill] sm:$0xff]  ;;  %v1566_v29 = vmul.f32 %v10387_v33, %v16198_v20 }
 0x1e7   : > { %v1554_v50 = vmul.f32 %v10384_v32, %v16188_v1  ;;  %v1557_v5 = vmul.f32 %v10387_v33, %v16189_v37 }
 0x1ed   : > { %7602 = vrot.lane.b32.xlu1 %v7601_v14, %s9200_s6  ;;  %7607 = vrot.lane.b32.xlu2 %v7606_v41, %s9200_s6  ;;  %v1555_v14 = vmul.f32 %v10390_v40, %v16184_v48  ;;  %v16185_v41 = vld [vmem:[#allocation54_spill] sm:$0xff] }
 0x1ee   : > { %7597 = vrot.lane.b32.xlu0 %v7596_v16, %s9200_s6  ;;  %v1556_v16 = vmul.f32 %v10393_v42, %v16185_v41 }
 0x1f5   : > { %1647 = vrot.lane.b32.xlu1 %v1549_v7, %s9200_s6  ;;  %7617 = vrot.lane.b32.xlu2 %v7616_v4, %s9201_s5  ;;  %v7626_v7 = vpack.i.bf16 %v1555_v14, %v1554_v50  ;;  %v7631_v4 = vpack.i.bf16 %v1557_v5, %v1556_v16  ;;  %v16192_v14 = vld [vmem:[#allocation59_spill] sm:$0xff]  ;;  %v16193_v50 = vld [vmem:[#allocation61_spill] sm:$0xff] }
 0x1f6   : > { %7612 = vrot.lane.b32.xlu0 %v7611_v13, %s9200_s6  ;;  %v7621_v13 = vpack.i.bf16 %v1553_v18, %v1552_v63  ;;  %v16191_v63 = vld [vmem:[#allocation56_spill] sm:$0xff]  ;;  %v1562_v16 = vmul.f32 %v10347_v51, %v16192_v14  ;;  %v1564_v5 = vmul.f32 %v10390_v40, %v16193_v50  ;;  %v1565_v50 = vmul.f32 %v10393_v42, %v16197_v31 }
 0x1f7   : > { %v1561_v18 = vmul.f32 %v10344_v44, %v16191_v63 }
 0x1f8   : > { %v7666_v41 = vpack.i.bf16 %v1564_v5, %v1563_v49  ;;  %v7671_v22 = vpack.i.bf16 %v1566_v29, %v1565_v50  ;;  %v16200_v49 = vpack.i.bf16 %v10333_v21, %v10329_v45  ;;  %v16205_v45 = vpack.i.bf16 %v10369_v47, %v10365_v36 }
 0x1f9   : > { %v7661_v37 = vpack.i.bf16 %v1562_v16, %v1561_v18  ;;  %v16203_v16 = vld [vmem:[#allocation67_spill] sm:$0xff]  ;;  %v9206_v21 = vmov 1   ;;  %v16209_v47 = vpack.i.bf16 %v10359_v46, %v10355_v15  ;;  %v2497_v15 = vld [vmem:[%s15616_s8 + $0x8] sm:$0xff] }
 0x1fa   : > { %v1572_v5 = vmul.f32 %v10384_v32, %v16203_v16  ;;  %7736 = vset.pattern.permute.xlu2 %v9206_v21  ;;  %v2496_v46 = vld [vmem:[%s15616_s8] sm:$0xff] }
 0x1fd   : > { %7627 = vrot.lane.b32.xlu1 %v7626_v7, %s9201_s5  ;;  %7632 = vrot.lane.b32.xlu2 %v7631_v4, %s9201_s5  ;;  %v16195_v4 = vld [vmem:[#allocation50_spill] sm:$0xff] }
 0x1fe   : > { %7622 = vrot.lane.b32.xlu0 %v7621_v13, %s9201_s5  ;;  %v1560_v13 = vmul.f32 %v10290_v38, %v16195_v4 }
 0x205   : > { %7637 = vrot.lane.b32.xlu1 %v10308_v26, %s9198_s25  ;;  %7642 = vrot.lane.b32.xlu2 %v10351_v52, %s9198_s25 }
 0x206   : > { %1690 = vrot.lane.b32.xlu0 %v1558_v2, %s9201_s5  ;;  %v16194_v2 = vld [vmem:[#allocation48_spill] sm:$0xff] }
 0x207   : > { %v1559_v7 = vmul.f32 %v16194_v2, %v10293_v8 }
 0x209   : > { %v7656_v39 = vpack.i.bf16 %v1560_v13, %v1559_v7  ;;  %v16204_v7 = vld [vmem:[#allocation68_spill] sm:$0xff] }
 0x20a   : > { %v1575_v29 = vmul.f32 %v10387_v33, %v16204_v7 }
 0x20d   : > { %7652 = vrot.lane.b32.xlu1 %v10399_v60, %s9198_s25  ;;  %1724 = vrot.lane.b32.xlu2 %v10406_v24, %s9198_s25 }
 0x20e   : > { %7647 = vrot.lane.b32.xlu0 %v10403_v3, %s9198_s25 }
 0x215   : > { %7662 = vrot.lane.b32.xlu1 %v7661_v37, %s9202_s18  ;;  %7667 = vrot.lane.b32.xlu2 %v7666_v41, %s9202_s18  ;;  %v16202_v37 = vld [vmem:[#allocation65_spill] sm:$0xff] }
 0x216   : > { %7657 = vrot.lane.b32.xlu0 %v7656_v39, %s9202_s18  ;;  %v16201_v39 = vld [vmem:[#allocation66_spill] sm:$0xff]  ;;  %v1574_v18 = vmul.f32 %v10393_v42, %v16202_v37 }
 0x217   : > { %v1573_v41 = vmul.f32 %v10390_v40, %v16201_v39 }
 0x218   : > { %v7691_v50 = vpack.i.bf16 %v1575_v29, %v1574_v18 }
 0x21d   : > { %1767 = vrot.lane.b32.xlu1 %v1567_v27, %s9202_s18  ;;  %7677 = vrot.lane.b32.xlu2 %v16200_v49, %s9196_s7  ;;  %v7686_v27 = vpack.i.bf16 %v1573_v41, %v1572_v5  ;;  %v16210_v49 = vld [vmem:[#allocation76_spill] sm:$0xff] }
 0x21e   : > { %7672 = vrot.lane.b32.xlu0 %v7671_v22, %s9202_s18  ;;  %v16206_v22 = vld [vmem:[#allocation64_spill] sm:$0xff]  ;;  %v1585_v41 = vmul.f32 %v16210_v49, %v10406_v24 }
 0x21f   : > { %v1576_v13 = vmul.f32 %v16206_v22, %v10406_v24 }
 0x225   : > { %7687 = vrot.lane.b32.xlu1 %v7686_v27, %s9196_s7  ;;  %7692 = vrot.lane.b32.xlu2 %v7691_v50, %s9196_s7 }
 0x226   : > { %7682 = vrot.lane.b32.xlu0 %v16205_v45, %s9196_s7 }
 0x22d   : > { %7697 = vrot.lane.b32.xlu1 %v10308_v26, %s9204_s26  ;;  %7702 = vrot.lane.b32.xlu2 %v10351_v52, %s9204_s26  ;;  %v16207_v26 = vpack.i.bf16 %v10381_v25, %v10377_v57  ;;  %v16208_v52 = vpack.i.bf16 %v10430_v61, %v10426_v23  ;;  %v16211_v57 = vld [vmem:[#allocation78_spill] sm:$0xff]  ;;  %v16212_v25 = vpack.i.bf16 %v10438_v10, %v10434_v35  ;;  %v16213_v35 = vmov 0  }
 0x22e   : > { %1810 = vrot.lane.b32.xlu0 %v1576_v13, %s9196_s7 }
 0x235   : > { %7712 = vrot.lane.b32.xlu1 %v10399_v60, %s9204_s26  ;;  %1844 = vrot.lane.b32.xlu2 %v10406_v24, %s9204_s26  ;;  %v2498_v24 = vld [vmem:[%s15616_s8 + $0x10] sm:$0xff] }
 0x236   : > { %7707 = vrot.lane.b32.xlu0 %v10403_v3, %s9204_s26 }
 0x237   : > { %v10544_v36 = vpop.permute.xlu2 %7582 }
 0x23d   : > { %7722 = vrot.lane.b32.xlu1 %v16207_v26, %s9205_s11  ;;  %7727 = vrot.lane.b32.xlu2 %v16208_v52, %s9205_s11 }
 0x23e   : > { %7717 = vrot.lane.b32.xlu0 %v16209_v47, %s9205_s11 }
 0x23f   : > { %v10558_v60 = vpop.permute.xlu2 %1604 }
 0x241   : > { %v1332_v3 = vpop.f32.mrf.mxu1 }
 0x242   : > { %v10586_v27 = vadd.f32 %v1332_v3, %v10233_v54 }
 0x244   : > { %16215 = vst [vmem:[#allocation83_spill] sm:$0xff] %v10586_v27  ;;  %v15735_v52 = vmax.f32 %v10586_v27, 0.0 }
 0x245   : > { %1887 = vrot.lane.b32.xlu1 %v1585_v41, %s9205_s11  ;;  %1907 = vperm.xlu2 %7736, %v16211_v57  }
 0x246   : > { %7732 = vrot.lane.b32.xlu0 %v16212_v25, %s9205_s11 }
 0x247   : > { %v10568_v23 = vpop.permute.xlu2 %7607 }
 0x248   : > { %v1372_v5 = vpop.f32.mrf.mxu2  ;;  %v10580_v10 = vpop.permute.xlu1 %7577 }
 0x249   : > { %v10589_v50 = vadd.f32 %v1372_v5, %v10233_v54 }
 0x24b   : > { %v1412_v61 = vpop.f32.mrf.mxu0  ;;  %16216 = vst [vmem:[#allocation81_spill] sm:$0xff] %v10589_v50  ;;  %v15736_v47 = vmax.f32 %v10589_v50, 0.0 }
 0x24c   : > { %v10583_v29 = vadd.f32 %v1412_v61, %v10233_v54 }
 0x24d   : > { %v1352_v18 = vpop.f32.mrf.mxu1  ;;  %2509 = vperm.xlu1 %7737, %v2497_v15   ;;  %7738 = vset.pattern.permute.xlu2 %v16213_v35 }
 0x24e   : > { %2504 = vperm.xlu0 %7575, %v2496_v46   ;;  %2514 = vperm.xlu2 %7738, %v2498_v24   ;;  %16214 = vst [vmem:[#allocation82_spill] sm:$0xff] %v10583_v29  ;;  %v15733_v26 = vmax.f32 %v10583_v29, 0.0  ;;  %v10606_v3 = vadd.f32 %v1352_v18, %v10233_v54 }
 0x24f   : > { %v10591_v45 = vpop.permute.xlu2 %7617 }
 0x250   : > { %16217 = vst [vmem:[#allocation86_spill] sm:$0xff] %v10606_v3  ;;  %v15734_v24 = vmax.f32 %v10606_v3, 0.0 }
 0x253   : > { %v1392_v13 = vpop.f32.mrf.mxu3 }
 0x254   : > { %v10611_v25 = vadd.f32 %v1392_v13, %v10233_v54 }
 0x255   : > { %2098 = vrot.lane.b32.xlu1 %v15733_v26, %s9193_s14 }
 0x256   : > { %2090 = vrot.lane.b32.xlu0 %v15735_v52, %s9193_s14  ;;  %2094 = vrot.lane.b32.xlu2 %v15736_v47, %s9193_s14  ;;  %16218 = vst [vmem:[#allocation87_spill] sm:$0xff] %v10611_v25  ;;  %v15738_v61 = vmax.f32 %v10611_v25, 0.0 }
 0x257   : > { %v10608_v57 = vpop.permute.xlu1 %7592  ;;  %8059 = vset.pattern.permute.xlu0 %v9206_v21  ;;  %8061 = vset.pattern.permute.xlu2 %v9206_v21  ;;  %v10621_v5 = vpop.permute.xlu2 %7632 }
 0x258   : > { %v1432_v41 = vpop.f32.mrf.mxu1  ;;  %v10616_v46 = vpop.permute.xlu0 %7587  ;;  %8060 = vset.pattern.permute.xlu1 %v9206_v21 }
 0x259   : > { %v10614_v15 = vadd.f32 %v1432_v41, %v10233_v54 }
 0x25b   : > { %16219 = vst [vmem:[#allocation79_spill] sm:$0xff] %v10614_v15  ;;  %v15737_v18 = vmax.f32 %v10614_v15, 0.0 }
 0x25d   : > { %v1472_v35 = vpop.f32.mrf.mxu3  ;;  %2092 = vrot.lane.b32.xlu1 %v15734_v24, %s9193_s14 }
 0x25e   : > { %2096 = vrot.lane.b32.xlu0 %v15738_v61, %s9193_s14  ;;  %2100 = vrot.lane.b32.xlu2 %v15737_v18, %s9193_s14  ;;  %v10633_v21 = vadd.f32 %v1472_v35, %v10233_v54 }
 0x25f   : > { %v10635_v13 = vpop.permute.xlu1 %7602  ;;  %v10643_v24 = vpop.permute.xlu2 %7642 }
 0x260   : > { %16220 = vst [vmem:[#allocation84_spill] sm:$0xff] %v10633_v21  ;;  %v10637_v41 = vpop.permute.xlu0 %7597  ;;  %v15743_v26 = vmax.f32 %v10633_v21, 0.0 }
 0x265   : > { %2104 = vrot.lane.b32.xlu1 %v15743_v26, %s9193_s14 }
 0x267   : > { %v10645_v52 = vpop.permute.xlu1 %1647  ;;  %v10651_v35 = vpop.permute.xlu2 %1724 }
 0x268   : > { %v10647_v47 = vpop.permute.xlu0 %7612 }
 0x26f   : > { %v10649_v18 = vpop.permute.xlu1 %7627  ;;  %v10659_v15 = vpop.permute.xlu2 %7667 }
 0x270   : > { %v10653_v61 = vpop.permute.xlu0 %7622 }
 0x277   : > { %v10655_v29 = vpop.permute.xlu1 %7637  ;;  %v10665_v27 = vpop.permute.xlu2 %7677 }
 0x278   : > { %v10657_v3 = vpop.permute.xlu0 %1690  ;;  %v7680_v1 = vunpack.i.h.bf16 %v10665_v27  ;;  %v7679_v19 = vunpack.i.l.bf16 %v10665_v27 }
 0x27f   : > { %v10661_v21 = vpop.permute.xlu1 %7652  ;;  %v10671_v49 = vpop.permute.xlu2 %7692 }
 0x280   : > { %v10663_v26 = vpop.permute.xlu0 %7647 }
 0x287   : > { %v10667_v50 = vpop.permute.xlu1 %7662  ;;  %v7703_v20 = vpop.permute.xlu2 %7702 }
 0x288   : > { %v10669_v25 = vpop.permute.xlu0 %7657  ;;  %v7705_v11 = vunpack.i.h.bf16 %v7703_v20  ;;  %v7704_v53 = vunpack.i.l.bf16 %v7703_v20 }
 0x289   : > { %v7660_v27 = vunpack.i.h.bf16 %v10669_v25 }
 0x28f   : > { %v10673_v58 = vpop.permute.xlu1 %1767  ;;  %v10681_v55 = vpop.permute.xlu2 %1844 }
 0x290   : > { %v10675_v7 = vpop.permute.xlu0 %7672 }
 0x297   : > { %v10677_v37 = vpop.permute.xlu1 %7687  ;;  %v10687_v9 = vpop.permute.xlu2 %7727 }
 0x298   : > { %v7683_v31 = vpop.permute.xlu0 %7682  ;;  %v15748_v59 = vunpack.i.l.bf16 %v10687_v9 }
 0x299   : > { %v7685_v48 = vunpack.i.h.bf16 %v7683_v31  ;;  %v7684_v14 = vunpack.i.l.bf16 %v7683_v31  ;;  %v1848_v31 = vsel %vm1202_vm13, %v7704_v53, %v7705_v11 }
 0x29f   : > { %v7698_v0 = vpop.permute.xlu1 %7697 }
 0x2a0   : > { %v10679_v22 = vpop.permute.xlu0 %1810  ;;  %v7700_v39 = vunpack.i.h.bf16 %v7698_v0  ;;  %v7699_v17 = vunpack.i.l.bf16 %v7698_v0  ;;  %v7665_v0 = vunpack.i.h.bf16 %v10667_v50 }
 0x2a7   : > { %v10683_v56 = vpop.permute.xlu1 %7712 }
 0x2a8   : > { %v10685_v28 = vpop.permute.xlu0 %7707 }
 0x2af   : > { %v7723_v62 = vpop.permute.xlu1 %7722 }
 0x2b0   : > { %v7718_v12 = vpop.permute.xlu0 %7717  ;;  %v7725_v54 = vunpack.i.h.bf16 %v7723_v62  ;;  %v7724_v2 = vunpack.i.l.bf16 %v7723_v62 }
 0x2b1   : > { %v7720_v16 = vunpack.i.h.bf16 %v7718_v12  ;;  %v7719_v4 = vunpack.i.l.bf16 %v7718_v12  ;;  %v7664_v12 = vunpack.i.l.bf16 %v10667_v50  ;;  %v1814_v50 = vsel %vm842_vm3, %v7684_v14, %v7685_v48 }
 0x2b2   : > { %v1891_v63 = vsel %vm1246_vm12, %v7724_v2, %v7725_v54  ;;  %v1892_v20 = vsel %vm1246_vm12, %v7725_v54, %v15748_v59  ;;  %v16221_v54 = vunpack.i.l.bf16 %v10685_v28 }
 0x2b3   : > { %v1889_v6 = vsel %vm1246_vm12, %v7719_v4, %v7720_v16  ;;  %v1890_v62 = vsel %vm1246_vm12, %v7720_v16, %v7724_v2  ;;  %1961 = vmatpush.msra.mxu2 %v1891_v63  ;;  %1981 = vmatpush.msra.mxu3 %v1892_v20  ;;  %v7659_v4 = vunpack.i.l.bf16 %v10669_v25  ;;  %v1846_v2 = vsel %vm1202_vm13, %v7699_v17, %v7700_v39 }
 0x2b4   : > { %1921 = vmatpush.msrb.mxu0 %v1889_v6  ;;  %1941 = vmatpush.msrb.mxu1 %v1890_v62  ;;  %v1849_v59 = vsel %vm1202_vm13, %v7705_v11, %v16221_v54  ;;  %v1847_v63 = vsel %vm1202_vm13, %v7700_v39, %v7704_v53  ;;  %v7629_v16 = vunpack.i.l.bf16 %v10649_v18  ;;  %v7649_v6 = vunpack.i.l.bf16 %v10663_v26 }
 0x2b5   : > { %1962 = vmatpush.msra.mxu2 %v1848_v31  ;;  %1982 = vmatpush.msra.mxu3 %v1849_v59  ;;  %v16222_v11 = vunpack.i.l.bf16 %v10677_v37  ;;  %v7640_v25 = vunpack.i.h.bf16 %v10655_v29  ;;  %v7639_v17 = vunpack.i.l.bf16 %v10655_v29  ;;  %v1812_v53 = vsel %vm842_vm3, %v7679_v19, %v7680_v1 }
 0x2b6   : > { %1922 = vmatpush.msrb.mxu0 %v1846_v2  ;;  %1942 = vmatpush.msrb.mxu1 %v1847_v63  ;;  %v1813_v59 = vsel %vm842_vm3, %v7680_v1, %v7684_v14  ;;  %v7625_v39 = vunpack.i.h.bf16 %v10653_v61  ;;  %v7624_v62 = vunpack.i.l.bf16 %v10653_v61  ;;  %v1771_v31 = vsel %vm1124_vm11, %v7664_v12, %v7665_v0 }
 0x2b7   : > { %v1815_v20 = vsel %vm842_vm3, %v7685_v48, %v16222_v11  ;;  %1963 = vmatpush.msra.mxu2 %v1814_v50  ;;  %v16223_v48 = vunpack.i.l.bf16 %v10659_v15  ;;  %v7620_v29 = vunpack.i.h.bf16 %v10591_v45  ;;  %v7619_v19 = vunpack.i.l.bf16 %v10591_v45 }
 0x2b8   : > { %1983 = vmatpush.msra.mxu3 %v1815_v20  ;;  %1923 = vmatpush.msrb.mxu0 %v1812_v53  ;;  %v1769_v1 = vsel %vm1124_vm11, %v7659_v4, %v7660_v27  ;;  %v1770_v14 = vsel %vm1124_vm11, %v7660_v27, %v7664_v12  ;;  %v7605_v61 = vunpack.i.h.bf16 %v10635_v13  ;;  %v7604_v2 = vunpack.i.l.bf16 %v10635_v13  ;;  %v10737_v63 = vpop.permute.xlu0 %7732 }
 0x2b9   : > { %1943 = vmatpush.msrb.mxu1 %v1813_v59  ;;  %v1772_v54 = vsel %vm1124_vm11, %v7665_v0, %v16223_v48  ;;  %1964 = vmatpush.msra.mxu2 %v1771_v31  ;;  %v16224_v0 = vunpack.i.h.bf16 %v10643_v24  ;;  %v16225_v50 = vunpack.i.l.bf16 %v10643_v24  ;;  %v7600_v4 = vunpack.i.h.bf16 %v10637_v41  ;;  %v10757_v48 = vpop.permute.xlu2 %1907 }
 0x2ba   : > { %1984 = vmatpush.msra.mxu3 %v1772_v54  ;;  %1924 = vmatpush.msrb.mxu0 %v1769_v1  ;;  %v7599_v13 = vunpack.i.l.bf16 %v10637_v41  ;;  %v1726_v11 = vsel %vm1071_vm7, %v7639_v17, %v7640_v25  ;;  %v7609_v59 = vunpack.i.l.bf16 %v10568_v23  ;;  %v7589_v31 = vunpack.i.l.bf16 %v10616_v46 }
 0x2bb   : > { %1944 = vmatpush.msrb.mxu1 %v1770_v14  ;;  %v1728_v45 = vsel %vm1071_vm7, %v16225_v50, %v16224_v0  ;;  %v16226_v12 = vmov %v16224_v0  ;;  %v16227_v20 = vmov %v16225_v50  ;;  %v1694_v54 = vsel %vm1036_vm10, %v7624_v62, %v7625_v39 }
 0x2bc   : > { %v1729_v27 = vsel %vm1071_vm7, %v16226_v12, %v7649_v6  ;;  %v1727_v53 = vsel %vm1071_vm7, %v7640_v25, %v16227_v20  ;;  %1965 = vmatpush.msra.mxu2 %v1728_v45  ;;  %1925 = vmatpush.msrb.mxu0 %v1726_v11  ;;  %v1695_v41 = vsel %vm1036_vm10, %v7625_v39, %v7629_v16  ;;  %v7580_v24 = vunpack.i.h.bf16 %v10580_v10  ;;  %v16234_v11 = vld [vmem:[#allocation26_spill] sm:$0xff] }
 0x2bd   : > { %1985 = vmatpush.msra.mxu3 %v1729_v27  ;;  %1945 = vmatpush.msrb.mxu1 %v1727_v53  ;;  %v7579_v25 = vunpack.i.l.bf16 %v10580_v10  ;;  %v1692_v17 = vsel %vm1036_vm10, %v7619_v19, %v7620_v29  ;;  %v1693_v1 = vsel %vm1036_vm10, %v7620_v29, %v7624_v62  ;;  %v1651_v14 = vsel %vm983_vm9, %v7604_v2, %v7605_v61  ;;  %v16228_v10 = vld [vmem:[#allocation28_spill] sm:$0xff] }
 0x2be   : > { %1966 = vmatpush.msra.mxu2 %v1694_v54  ;;  %1926 = vmatpush.msrb.mxu0 %v1692_v17  ;;  %v1652_v0 = vsel %vm983_vm9, %v7605_v61, %v7609_v59  ;;  %v1649_v39 = vsel %vm983_vm9, %v7599_v13, %v7600_v4  ;;  %v1650_v50 = vsel %vm983_vm9, %v7600_v4, %v7604_v2  ;;  %v16229_v62 = vunpack.i.h.bf16 %v10544_v36  ;;  %v16232_v2 = vld [vmem:[#allocation27_spill] sm:$0xff]  ;;  %v10797_v17 = vld [vmem:[#allocation8] sm:$0xff] }
 0x2bf   : > { %1986 = vmatpush.msra.mxu3 %v1695_v41  ;;  %1946 = vmatpush.msrb.mxu1 %v1693_v1  ;;  %v1533_v19 = vmul.f32 %v16228_v10, %v10293_v8  ;;  %v16230_v29 = vunpack.i.l.bf16 %v10544_v36  ;;  %v1535_v27 = vmul.f32 %v16232_v2, %v10344_v44  ;;  %v1606_v4 = vsel %vm939_vm6, %v7579_v25, %v7580_v24  ;;  %v16235_v41 = vld [vmem:[#allocation29_spill] sm:$0xff]  ;;  %v1888_v25 = vpop.permute.xlu1 %1887 }
 0x2c0   : > { %1967 = vmatpush.msra.mxu2 %v1651_v14  ;;  %1927 = vmatpush.msrb.mxu0 %v1649_v39  ;;  %v16231_v61 = vmov %v16229_v62  ;;  %v1536_v20 = vmul.f32 %v16234_v11, %v10347_v51  ;;  %v7730_v53 = vunpack.i.h.bf16 %v10687_v9  ;;  %v7734_v54 = vunpack.i.l.bf16 %v10737_v63  ;;  %v10802_v1 = vpop.permute.xlu0 %2504  ;;  %v16294_v11 = vld [vmem:[#allocation37_spill] sm:$0xff] }
 0x2c1   : > { %1987 = vmatpush.msra.mxu3 %v1652_v0  ;;  %1947 = vmatpush.msrb.mxu1 %v1650_v50  ;;  %v1608_v45 = vsel %vm939_vm6, %v16230_v29, %v16229_v62  ;;  %v1609_v12 = vsel %vm939_vm6, %v16231_v61, %v7589_v31  ;;  %v16233_v8 = vmov %v16230_v29  ;;  %v1534_v44 = vmul.f32 %v16235_v41, %v10290_v38 }
 0x2c2   : > { %v1607_v13 = vsel %vm939_vm6, %v7580_v24, %v16233_v8  ;;  %1968 = vmatpush.msra.mxu2 %v1608_v45  ;;  %1928 = vmatpush.msrb.mxu0 %v1606_v4  ;;  %v7735_v36 = vunpack.i.h.bf16 %v10737_v63  ;;  %v7710_v24 = vunpack.i.h.bf16 %v10685_v28  ;;  %v7714_v51 = vunpack.i.l.bf16 %v10683_v56  ;;  %16236 = vst [vmem:[#allocation80_spill] sm:$0xff] %v10802_v1  ;;  %v10810_v63 = vpop.permute.xlu2 %2514 }
 0x2c3   : > { %1988 = vmatpush.msra.mxu3 %v1609_v12  ;;  %1948 = vmatpush.msrb.mxu1 %v1607_v13  ;;  %v7715_v14 = vunpack.i.h.bf16 %v10683_v56  ;;  %v7690_v38 = vunpack.i.h.bf16 %v10677_v37  ;;  %16237 = vst [vmem:[#allocation32_spill] sm:$0xff] %v10810_v63  ;;  %v16238_v0 = vunpack.i.l.bf16 %v10687_v9  ;;  %v1894_v39 = vsel %vm1246_vm12, %v7730_v53, %v7734_v54 }
 0x2c4   : > { %1969 = vmatpush.msra.mxu2 %v1535_v27  ;;  %1929 = vmatpush.msrb.mxu0 %v1533_v19  ;;  %v7695_v50 = vunpack.i.h.bf16 %v10671_v49  ;;  %v7694_v19 = vunpack.i.l.bf16 %v10671_v49  ;;  %v1896_v62 = vsel %vm1246_vm12, %v7735_v36, %v1888_v25  ;;  %v1895_v29 = vsel %vm1246_vm12, %v7734_v54, %v7735_v36 }
 0x2c5   : > { %1989 = vmatpush.msra.mxu3 %v1536_v20  ;;  %1949 = vmatpush.msrb.mxu1 %v1534_v44  ;;  %v1893_v56 = vsel %vm1246_vm12, %v16238_v0, %v7730_v53  ;;  %v7670_v45 = vunpack.i.h.bf16 %v10659_v15  ;;  %v7674_v61 = vunpack.i.l.bf16 %v10675_v7  ;;  %v16239_v9 = vunpack.i.l.bf16 %v10685_v28 }
 0x2c6   : > { %7138 = vmatmul.msk.f32.vlgmr.msrb.gmra.mxu0 %vm1910_vm15, %v10797_v17  ;;  %7139 = vmatmul.msk.f32.vlgmr.msrb.gmra.mxu1 %vm1910_vm15, %v10797_v17  ;;  %v1851_v27 = vsel %vm1202_vm13, %v7710_v24, %v7714_v51  ;;  %v7675_v49 = vunpack.i.h.bf16 %v10675_v7  ;;  %v1852_v4 = vsel %vm1202_vm13, %v7714_v51, %v7715_v14  ;;  %v1853_v8 = vsel %vm1202_vm13, %v7715_v14, %v10681_v55 }
 0x2c7   : > { %7140 = vmatmul.msk.f32.vlgmr.msra.gmra.mxu2 %vm1910_vm15, %v10797_v17  ;;  %7141 = vmatmul.msk.f32.vlgmr.msra.gmra.mxu3 %vm1910_vm15, %v10797_v17  ;;  %v1850_v12 = vsel %vm1202_vm13, %v16239_v9, %v7710_v24  ;;  %v7650_v13 = vunpack.i.h.bf16 %v10663_v26  ;;  %v7654_v20 = vunpack.i.l.bf16 %v10661_v21  ;;  %v16240_v28 = vunpack.i.l.bf16 %v10677_v37 }
 0x2c8   : > { %2001 = vmatpush.msra.mxu0 %v1893_v56  ;;  %2021 = vmatpush.msra.mxu1 %v1894_v39  ;;  %v1817_v54 = vsel %vm842_vm3, %v7690_v38, %v7694_v19  ;;  %v7655_v7 = vunpack.i.h.bf16 %v10661_v21  ;;  %v1818_v44 = vsel %vm842_vm3, %v7694_v19, %v7695_v50  ;;  %v1819_v55 = vsel %vm842_vm3, %v7695_v50, %v10679_v22  ;;  %v10858_v56 = vpop.permute.xlu0 %2090 }
 0x2c9   : > { %2041 = vmatpush.msrb.mxu2 %v1895_v29  ;;  %2061 = vmatpush.msrb.mxu3 %v1896_v62  ;;  %v1816_v53 = vsel %vm842_vm3, %v16240_v28, %v7690_v38  ;;  %v7630_v36 = vunpack.i.h.bf16 %v10649_v18  ;;  %v16241_v24 = vunpack.i.l.bf16 %v10659_v15  ;;  %v1774_v51 = vsel %vm1124_vm11, %v7670_v45, %v7674_v61  ;;  %v10856_v15 = vpop.permute.xlu1 %2509  ;;  %v16248_v28 = vld [vmem:[#allocation52_spill] sm:$0xff] }
 0x2ca   : > { %2002 = vmatpush.msra.mxu0 %v1850_v12  ;;  %2022 = vmatpush.msra.mxu1 %v1851_v27  ;;  %v7635_v25 = vunpack.i.h.bf16 %v10621_v5  ;;  %v7634_v21 = vunpack.i.l.bf16 %v10621_v5  ;;  %v1775_v14 = vsel %vm1124_vm11, %v7674_v61, %v7675_v49  ;;  %v1776_v22 = vsel %vm1124_vm11, %v7675_v49, %v10673_v58  ;;  %16242 = vst [vmem:[#allocation85_spill] sm:$0xff] %v10856_v15 }
 0x2cb   : > { %2042 = vmatpush.msrb.mxu2 %v1852_v4  ;;  %2062 = vmatpush.msrb.mxu3 %v1853_v8  ;;  %v1773_v37 = vsel %vm1124_vm11, %v16241_v24, %v7670_v45  ;;  %v7610_v38 = vunpack.i.h.bf16 %v10568_v23  ;;  %v7614_v0 = vunpack.i.l.bf16 %v10647_v47  ;;  %v1730_v5 = vsel %vm1071_vm7, %v7649_v6, %v7650_v13  ;;  %v10870_v45 = vpop.permute.xlu2 %2094  ;;  %v16243_v23 = vld [vmem:[#allocation25_spill] sm:$0xff]  ;;  %v16245_v4 = vld [vmem:[#allocation30_spill] sm:$0xff] }
 0x2cc   : > { %2003 = vmatpush.msra.mxu0 %v1816_v53  ;;  %2023 = vmatpush.msra.mxu1 %v1817_v54  ;;  %v1731_v39 = vsel %vm1071_vm7, %v7650_v13, %v7654_v20  ;;  %v7615_v50 = vunpack.i.h.bf16 %v10647_v47  ;;  %v1732_v58 = vsel %vm1071_vm7, %v7654_v20, %v7655_v7  ;;  %v1733_v19 = vsel %vm1071_vm7, %v7655_v7, %v10651_v35  ;;  %v16250_v7 = vld [vmem:[#allocation67_spill] sm:$0xff] }
 0x2cd   : > { %2043 = vmatpush.msrb.mxu2 %v1818_v44  ;;  %2063 = vmatpush.msrb.mxu3 %v1819_v55  ;;  %v7590_v62 = vunpack.i.h.bf16 %v10616_v46  ;;  %v7594_v29 = vunpack.i.l.bf16 %v10608_v57  ;;  %v1696_v26 = vsel %vm1036_vm10, %v7629_v16, %v7630_v36  ;;  %v1697_v47 = vsel %vm1036_vm10, %v7630_v36, %v7634_v21  ;;  %v16244_v46 = vld [vmem:[#allocation31_spill] sm:$0xff]  ;;  %v16251_v55 = vld [vmem:[#allocation66_spill] sm:$0xff] }
 0x2ce   : > { %2004 = vmatpush.msra.mxu0 %v1773_v37  ;;  %2024 = vmatpush.msra.mxu1 %v1774_v51  ;;  %v7595_v6 = vunpack.i.h.bf16 %v10608_v57  ;;  %v1698_v35 = vsel %vm1036_vm10, %v7634_v21, %v7635_v25  ;;  %v1699_v61 = vsel %vm1036_vm10, %v7635_v25, %v10657_v3  ;;  %v1653_v9 = vsel %vm983_vm9, %v7609_v59, %v7610_v38  ;;  %v1452_v25 = vpop.f32.mrf.mxu2  ;;  %v16278_v37 = vld [vmem:[#allocation71_spill] sm:$0xff] }
 0x2cf   : > { %2044 = vmatpush.msrb.mxu2 %v1775_v14  ;;  %2064 = vmatpush.msrb.mxu3 %v1776_v22  ;;  %v1654_v18 = vsel %vm983_vm9, %v7610_v38, %v7614_v0  ;;  %v1655_v16 = vsel %vm983_vm9, %v7614_v0, %v7615_v50  ;;  %v1656_v57 = vsel %vm983_vm9, %v7615_v50, %v10645_v52  ;;  %v16253_v38 = vld [vmem:[#allocation88_spill] sm:$0xff] }
 0x2d0   : > { %2005 = vmatpush.msra.mxu0 %v1730_v5  ;;  %2025 = vmatpush.msra.mxu1 %v1731_v39  ;;  %v1610_v3 = vsel %vm939_vm6, %v7589_v31, %v7590_v62  ;;  %v1611_v12 = vsel %vm939_vm6, %v7590_v62, %v7594_v29  ;;  %v1537_v59 = vmul.f32 %v16243_v23, %v10384_v32  ;;  %v2097_v13 = vpop.permute.xlu0 %2096 }
 0x2d1   : > { %2045 = vmatpush.msrb.mxu2 %v1732_v58  ;;  %2065 = vmatpush.msrb.mxu3 %v1733_v19  ;;  %v1612_v27 = vsel %vm939_vm6, %v7594_v29, %v7595_v6  ;;  %v1613_v49 = vsel %vm939_vm6, %v7595_v6, %v10558_v60  ;;  %v1538_v52 = vmul.f32 %v16159_v34, %v10390_v40  ;;  %v2099_v32 = vpop.permute.xlu1 %2098  ;;  %v16293_v34 = vld [vmem:[#allocation36_spill] sm:$0xff] }
 0x2d2   : > { %2006 = vmatpush.msra.mxu0 %v1696_v26  ;;  %2026 = vmatpush.msra.mxu1 %v1697_v47  ;;  %v1539_v31 = vmul.f32 %v16244_v46, %v10393_v42  ;;  %v1540_v8 = vmul.f32 %v16245_v4, %v10387_v33  ;;  %v10917_v42 = vsel %vm657_vm0, %v2097_v13, %v2099_v32  ;;  %v16292_v4 = vld [vmem:[#allocation55_spill] sm:$0xff]  ;;  %v16295_v46 = vld [vmem:[#allocation60_spill] sm:$0xff] }
 0x2d3   : > { %2046 = vmatpush.msrb.mxu2 %v1698_v35  ;;  %2066 = vmatpush.msrb.mxu3 %v1699_v61  ;;  %v10906_v40 = vpop.permute.xlu2 %2100  ;;  %16247 = vst [vmem:[#allocation89_spill] sm:$0xff] %v10917_v42  ;;  %v10921_v60 = vmul.f32 %v10917_v42, %v16174_v43  ;;  %v10929_v53 = vmul.f32 %v10917_v42, %v16248_v28 }
 0x2d4   : > { %2007 = vmatpush.msra.mxu0 %v1653_v9  ;;  %2027 = vmatpush.msra.mxu1 %v1654_v18  ;;  %v10914_v33 = vsel %vm657_vm0, %v2099_v32, %v10906_v40  ;;  %v10937_v44 = vmul.f32 %v10917_v42, %v16250_v7  ;;  %v10957_v0 = vadd.f32 %v1452_v25, %v16253_v38 }
 0x2d5   : > { %2047 = vmatpush.msrb.mxu2 %v1655_v16  ;;  %2067 = vmatpush.msrb.mxu3 %v1656_v57  ;;  %16246 = vst [vmem:[#allocation78_spill] sm:$0xff] %v10914_v33  ;;  %v10925_v20 = vmul.f32 %v10914_v33, %v16175_v30  ;;  %v10941_v36 = vmul.f32 %v10914_v33, %v16251_v55 }
 0x2d6   : > { %2008 = vmatpush.msra.mxu0 %v1610_v3  ;;  %2028 = vmatpush.msra.mxu1 %v1611_v12  ;;  %16254 = vst [vmem:[#allocation88_spill] sm:$0xff] %v10957_v0  ;;  %v15755_v58 = vmax.f32 %v10957_v0, 0.0 }
 0x2d7   : > { %2048 = vmatpush.msrb.mxu2 %v1612_v27  ;;  %2068 = vmatpush.msrb.mxu3 %v1613_v49  ;;  %v11003_v27 = vsel %vm657_vm0, 0.0, %v10858_v56 }
 0x2d8   : > { %2009 = vmatpush.msra.mxu0 %v1537_v59  ;;  %2029 = vmatpush.msra.mxu1 %v1538_v52  ;;  %16262 = vst [vmem:[#allocation98_spill] sm:$0xff] %v11003_v27 }
 0x2d9   : > { %2049 = vmatpush.msrb.mxu2 %v1539_v31  ;;  %2069 = vmatpush.msrb.mxu3 %v1540_v8  ;;  %v2093_v16 = vpop.permute.xlu1 %2092 }
 0x2da   : > { %7142 = vmatmul.msk.f32.vlgmr.msra.gmra.mxu0 %vm1910_vm15, %v10797_v17  ;;  %7143 = vmatmul.msk.f32.vlgmr.msra.gmra.mxu1 %vm1910_vm15, %v10797_v17  ;;  %v10996_v12 = vsel %vm657_vm0, %v10858_v56, %v2093_v16  ;;  %v11018_v56 = vsel %vm657_vm0, %v10870_v45, %v2097_v13  ;;  %v11022_v32 = vsel %vm657_vm0, %v2093_v16, %v10870_v45  ;;  %v16265_v13 = vld [vmem:[#allocation34_spill] sm:$0xff] }
 0x2db   : > { %7144 = vmatmul.msk.f32.vlgmr.msrb.gmra.mxu2 %vm1910_vm15, %v10797_v17  ;;  %7145 = vmatmul.msk.f32.vlgmr.msrb.gmra.mxu3 %vm1910_vm15, %v10797_v17  ;;  %v16249_v17 = vld [vmem:[#allocation51_spill] sm:$0xff]  ;;  %16260 = vst [vmem:[#allocation96_spill] sm:$0xff] %v10996_v12  ;;  %v7739_v31 = vpack.i.bf16 %v10996_v12, %v11003_v27  ;;  %v2133_v45 = vmul.f32 %v10996_v12, %v16265_v13 }
 0x2dc   : > { %v10933_v54 = vmul.f32 %v10914_v33, %v16249_v17  ;;  %16263 = vst [vmem:[#allocation99_spill] sm:$0xff] %v11018_v56  ;;  %v2170_v24 = vmul.f32 %v11022_v32, %v16278_v37 }
 0x343   : > { %v1931_v21 = vpop.f32.mrf.mxu0  ;;  %v1951_v19 = vpop.f32.mrf.mxu1 }
 0x344   : > { %v10950_v14 = vadd.f32 %v1931_v21, %v10757_v48  ;;  %v10992_v57 = vadd.f32 %v1951_v19, %v10757_v48  ;;  %v7744_v21 = vpack.i.bf16 %v11018_v56, %v11022_v32 }
 0x346   : > { %16252 = vst [vmem:[#allocation90_spill] sm:$0xff] %v10950_v14  ;;  %v15752_v22 = vmax.f32 %v10950_v14, 0.0  ;;  %v15756_v52 = vmax.f32 %v10992_v57, 0.0 }
 0x347   : > { %16259 = vst [vmem:[#allocation95_spill] sm:$0xff] %v10992_v57 }
 0x348   : > { %2838 = vrot.lane.b32.xlu0 %v15752_v22, %s9193_s14 }
 0x34a   : > { %v1971_v5 = vpop.f32.mrf.mxu2  ;;  %v1991_v62 = vpop.f32.mrf.mxu3 }
 0x34b   : > { %v10960_v39 = vadd.f32 %v1971_v5, %v10757_v48  ;;  %v10971_v29 = vadd.f32 %v1991_v62, %v10757_v48  ;;  %v16266_v5 = vld [vmem:[#allocation33_spill] sm:$0xff] }
 0x34c   : > { %v16267_v62 = vld [vmem:[#allocation41_spill] sm:$0xff] }
 0x34d   : > { %16255 = vst [vmem:[#allocation91_spill] sm:$0xff] %v10960_v39  ;;  %v15757_v50 = vmax.f32 %v10960_v39, 0.0  ;;  %v15750_v26 = vmax.f32 %v10971_v29, 0.0 }
 0x34e   : > { %16256 = vst [vmem:[#allocation92_spill] sm:$0xff] %v10971_v29 }
 0x34f   : > { %2842 = vrot.lane.b32.xlu2 %v15757_v50, %s9193_s14  ;;  %v16277_v50 = vld [vmem:[#allocation45_spill] sm:$0xff] }
 0x350   : > { %2102 = vrot.lane.b32.xlu0 %v15755_v58, %s9193_s14  ;;  %v16274_v58 = vld [vmem:[#allocation50_spill] sm:$0xff]  ;;  %v2160_v51 = vmul.f32 %v10996_v12, %v16277_v50 }
 0x357   : > { %v2011_v47 = vpop.f32.mrf.mxu0  ;;  %v2031_v6 = vpop.f32.mrf.mxu1 }
 0x358   : > { %v10975_v35 = vadd.f32 %v2011_v47, %v10757_v48  ;;  %v10978_v61 = vadd.f32 %v2031_v6, %v10757_v48  ;;  %2844 = vrot.lane.b32.xlu0 %v15750_v26, %s9193_s14  ;;  %v2134_v47 = vmul.f32 %v11022_v32, %v16267_v62  ;;  %v16268_v6 = vld [vmem:[#allocation42_spill] sm:$0xff] }
 0x359   : > { %v2135_v16 = vmul.f32 %v11018_v56, %v16268_v6 }
 0x35a   : > { %16257 = vst [vmem:[#allocation93_spill] sm:$0xff] %v10975_v35  ;;  %v15753_v9 = vmax.f32 %v10975_v35, 0.0  ;;  %v15754_v18 = vmax.f32 %v10978_v61, 0.0  ;;  %v2105_v35 = vpop.permute.xlu1 %2104 }
 0x35b   : > { %16258 = vst [vmem:[#allocation94_spill] sm:$0xff] %v10978_v61  ;;  %v16284_v61 = vld [vmem:[#allocation69_spill] sm:$0xff]  ;;  %v11088_v57 = vsel %vm657_vm0, %v2105_v35, 0.0 }
 0x35c   : > { %2848 = vrot.lane.b32.xlu2 %v15754_v18, %s9193_s14  ;;  %2846 = vrot.lane.b32.xlu1 %v15753_v9, %s9193_s14  ;;  %v16273_v9 = vld [vmem:[#allocation59_spill] sm:$0xff]  ;;  %v2168_v0 = vmul.f32 %v16284_v61, %v11003_v27 }
 0x35d   : > { %v2153_v18 = vmul.f32 %v11018_v56, %v16273_v9 }
 0x35e   : > { %v2051_v3 = vpop.f32.mrf.mxu2  ;;  %v2071_v8 = vpop.f32.mrf.mxu3 }
 0x35f   : > { %v10999_v59 = vadd.f32 %v2051_v3, %v10757_v48  ;;  %v11025_v25 = vadd.f32 %v2071_v8, %v10757_v48  ;;  %v2132_v48 = vmul.f32 %v16266_v5, %v11003_v27  ;;  %v16269_v3 = vld [vmem:[#allocation43_spill] sm:$0xff] }
 0x360   : > { %v2143_v8 = vmul.f32 %v11022_v32, %v16269_v3 }
 0x361   : > { %16261 = vst [vmem:[#allocation97_spill] sm:$0xff] %v10999_v59  ;;  %v15749_v49 = vmax.f32 %v10999_v59, 0.0  ;;  %v15751_v38 = vmax.f32 %v11025_v25, 0.0  ;;  %v7769_v19 = vpack.i.bf16 %v2133_v45, %v2132_v48  ;;  %v16279_v59 = vld [vmem:[#allocation70_spill] sm:$0xff] }
 0x362   : > { %16264 = vst [vmem:[#allocation100_spill] sm:$0xff] %v11025_v25  ;;  %v2171_v29 = vmul.f32 %v11018_v56, %v16279_v59  ;;  %v16280_v25 = vld [vmem:[#allocation62_spill] sm:$0xff] }
 0x363   : > { %2850 = vrot.lane.b32.xlu0 %v15749_v49, %s9193_s14  ;;  %v16270_v49 = vld [vmem:[#allocation40_spill] sm:$0xff] }
 0x364   : > { %2840 = vrot.lane.b32.xlu1 %v15756_v52, %s9193_s14  ;;  %7740 = vrot.lane.b32.xlu2 %v7739_v31, %s9199_s2  ;;  %v2144_v26 = vmul.f32 %v11018_v56, %v16270_v49  ;;  %v2151_v52 = vmul.f32 %v10996_v12, %v16274_v58 }
 0x366   : > { %v7784_v45 = vpack.i.bf16 %v2144_v26, %v2143_v8  ;;  %v16275_v26 = vld [vmem:[#allocation46_spill] sm:$0xff] }
 0x36b   : > { %7745 = vrot.lane.b32.xlu0 %v7744_v21, %s9199_s2 }
 0x36c   : > { %2852 = vrot.lane.b32.xlu1 %v15751_v38, %s9193_s14  ;;  %7750 = vrot.lane.b32.xlu2 %v7739_v31, %s9198_s25  ;;  %v7774_v38 = vpack.i.bf16 %v2135_v16, %v2134_v47  ;;  %v2141_v47 = vmul.f32 %v16275_v26, %v11003_v27 }
 0x373   : > { %7755 = vrot.lane.b32.xlu0 %v7744_v21, %s9198_s25 }
 0x374   : > { %7760 = vrot.lane.b32.xlu2 %v7739_v31, %s9204_s26  ;;  %7770 = vrot.lane.b32.xlu1 %v7769_v19, %s9200_s6  ;;  %v16271_v31 = vld [vmem:[#allocation49_spill] sm:$0xff]  ;;  %v16272_v19 = vld [vmem:[#allocation56_spill] sm:$0xff] }
 0x375   : > { %v2142_v48 = vmul.f32 %v10996_v12, %v16271_v31  ;;  %v2152_v22 = vmul.f32 %v11022_v32, %v16272_v19  ;;  %v16297_v19 = vld [vmem:[#allocation57_spill] sm:$0xff] }
 0x377   : > { %v7779_v16 = vpack.i.bf16 %v2142_v48, %v2141_v47  ;;  %v7794_v8 = vpack.i.bf16 %v2153_v18, %v2152_v22  ;;  %v2161_v48 = vmul.f32 %v11022_v32, %v16280_v25  ;;  %v16281_v22 = vld [vmem:[#allocation63_spill] sm:$0xff]  ;;  %v16296_v25 = vld [vmem:[#allocation58_spill] sm:$0xff] }
 0x378   : > { %v2162_v18 = vmul.f32 %v11018_v56, %v16281_v22 }
 0x37b   : > { %7765 = vrot.lane.b32.xlu0 %v7744_v21, %s9204_s26  ;;  %v16276_v21 = vld [vmem:[#allocation48_spill] sm:$0xff] }
 0x37c   : > { %7775 = vrot.lane.b32.xlu2 %v7774_v38, %s9200_s6  ;;  %7785 = vrot.lane.b32.xlu1 %v7784_v45, %s9201_s5  ;;  %v2150_v38 = vmul.f32 %v16276_v21, %v11003_v27 }
 0x37e   : > { %v7789_v45 = vpack.i.bf16 %v2151_v52, %v2150_v38  ;;  %v16282_v52 = vld [vmem:[#allocation44_spill] sm:$0xff] }
 0x37f   : > { %v2159_v47 = vmul.f32 %v16282_v52, %v11003_v27  ;;  %v16299_v27 = vld [vmem:[#allocation61_spill] sm:$0xff] }
 0x381   : > { %v7799_v38 = vpack.i.bf16 %v2160_v51, %v2159_v47  ;;  %v16285_v51 = vld [vmem:[#allocation47_spill] sm:$0xff] }
 0x383   : > { %7780 = vrot.lane.b32.xlu0 %v7779_v16, %s9201_s5  ;;  %v7814_v16 = vpack.i.bf16 %v2171_v29, %v2170_v24  ;;  %v7819_v24 = vpack.i.bf16 %v10914_v33, %v10917_v42  ;;  %v2149_v29 = vmul.f32 %v16285_v51, %v11088_v57 }
 0x384   : > { %7795 = vrot.lane.b32.xlu2 %v7794_v8, %s9202_s18  ;;  %7790 = vrot.lane.b32.xlu1 %v7789_v45, %s9202_s18  ;;  %v7804_v8 = vpack.i.bf16 %v2162_v18, %v2161_v48  ;;  %v16283_v45 = vld [vmem:[#allocation72_spill] sm:$0xff] }
 0x385   : > { %v2169_v14 = vmul.f32 %v10996_v12, %v16283_v45  ;;  %v16298_v12 = vld [vmem:[#allocation35_spill] sm:$0xff] }
 0x386   : > { %v2140_v10 = vmul.f32 %v16298_v12, %v11088_v57  ;;  %v16300_v12 = vld [vmem:[#allocation65_spill] sm:$0xff] }
 0x387   : > { %v7809_v39 = vpack.i.bf16 %v2169_v14, %v2168_v0  ;;  %v16286_v14 = vld [vmem:[#allocation39_spill] sm:$0xff] }
 0x388   : > { %v2136_v0 = vmul.f32 %v10917_v42, %v16286_v14 }
 0x38b   : > { %7800 = vrot.lane.b32.xlu0 %v7799_v38, %s9196_s7  ;;  %v16288_v38 = vld [vmem:[#allocation64_spill] sm:$0xff] }
 0x38c   : > { %7815 = vrot.lane.b32.xlu2 %v7814_v16, %s9205_s11  ;;  %7805 = vrot.lane.b32.xlu1 %v7804_v8, %s9196_s7  ;;  %v2167_v16 = vmul.f32 %v16288_v38, %v11088_v57  ;;  %v2154_v38 = vmul.f32 %v10917_v42, %v16295_v46 }
 0x393   : > { %2195 = vrot.lane.b32.xlu0 %v11088_v57, %s9199_s2 }
 0x394   : > { %7810 = vrot.lane.b32.xlu1 %v7809_v39, %s9205_s11  ;;  %v16287_v39 = vld [vmem:[#allocation38_spill] sm:$0xff] }
 0x395   : > { %v2137_v48 = vmul.f32 %v10914_v33, %v16287_v39 }
 0x397   : > { %v7849_v18 = vpack.i.bf16 %v2137_v48, %v2136_v0 }
 0x39b   : > { %2315 = vrot.lane.b32.xlu0 %v11088_v57, %s9198_s25 }
 0x39c   : > { %7820 = vrot.lane.b32.xlu1 %v7819_v24, %s9199_s2 }
 0x3a3   : > { %2435 = vrot.lane.b32.xlu0 %v11088_v57, %s9204_s26 }
 0x3a4   : > { %2281 = vrot.lane.b32.xlu1 %v2149_v29, %s9201_s5 }
 0x3a9   : > { %v2843_v47 = vpop.permute.xlu2 %2842 }
 0x3ab   : > { %7850 = vrot.lane.b32.xlu0 %v7849_v18, %s9200_s6 }
 0x3ac   : > { %7830 = vrot.lane.b32.xlu1 %v7819_v24, %s9198_s25 }
 0x3b4   : > { %2401 = vrot.lane.b32.xlu1 %v2167_v16, %s9196_s7  ;;  %v16291_v16 = vld [vmem:[#allocation54_spill] sm:$0xff] }
 0x3b6   : > { %v11112_v8 = vpop.permute.xlu2 %2848 }
 0x3ba   : > { %v2839_v29 = vpop.permute.xlu0 %2838 }
 0x3bc   : > { %7840 = vrot.lane.b32.xlu1 %v7819_v24, %s9204_s26 }
 0x3be   : > { %v11115_v63 = vpop.permute.xlu2 %7740 }
 0x3c2   : > { %v2103_v15 = vpop.permute.xlu0 %2102 }
 0x3c3   : > { %v11119_v0 = vsel %vm657_vm0, %v10906_v40, %v2103_v15  ;;  %v11122_v48 = vsel %vm657_vm0, %v2103_v15, %v2105_v35 }
 0x3c4   : > { %16289 = vst [vmem:[#allocation101_spill] sm:$0xff] %v11119_v0  ;;  %v11126_v18 = vpack.i.bf16 %v11122_v48, %v11119_v0  ;;  %v2147_v1 = vmul.f32 %v11119_v0, %v16291_v16  ;;  %v2148_v24 = vmul.f32 %v11122_v48, %v16292_v4  ;;  %v2138_v23 = vmul.f32 %v11119_v0, %v16293_v34 }
 0x3c5   : > { %16290 = vst [vmem:[#allocation102_spill] sm:$0xff] %v11122_v48  ;;  %v2139_v40 = vmul.f32 %v11122_v48, %v16294_v11  ;;  %v2156_v9 = vmul.f32 %v11119_v0, %v16296_v25  ;;  %v2157_v41 = vmul.f32 %v11122_v48, %v16297_v19 }
 0x3c6   : > { %v11136_v56 = vpop.permute.xlu2 %7750  ;;  %7825 = vrot.lane.b32.xlu2 %v11126_v18, %s9199_s2  ;;  %v7864_v15 = vpack.i.bf16 %v2148_v24, %v2147_v1  ;;  %v2155_v1 = vmul.f32 %v10914_v33, %v16299_v27  ;;  %v2165_v33 = vmul.f32 %v11119_v0, %v16300_v12  ;;  %v16301_v27 = vld [vmem:[#allocation68_spill] sm:$0xff] }
 0x3c7   : > { %v7854_v35 = vpack.i.bf16 %v2139_v40, %v2138_v23  ;;  %v7874_v42 = vpack.i.bf16 %v2157_v41, %v2156_v9  ;;  %v2166_v46 = vmul.f32 %v11122_v48, %v16301_v27  ;;  %v16304_v9 = vld [vmem:[#allocation77_spill] sm:$0xff] }
 0x3c8   : > { %7865 = vrot.lane.b32.xlu0 %v7864_v15, %s9201_s5  ;;  %v7869_v40 = vpack.i.bf16 %v2155_v1, %v2154_v38 }
 0x3c9   : > { %7855 = vrot.lane.b32.xlu1 %v7854_v35, %s9200_s6 }
 0x3ca   : > { %v2845_v22 = vpop.permute.xlu0 %2844 }
 0x3ce   : > { %v11152_v23 = vpop.permute.xlu2 %7760  ;;  %v2847_v24 = vpop.permute.xlu1 %2846  ;;  %2238 = vrot.lane.b32.xlu2 %v2140_v10, %s9200_s6  ;;  %v16302_v10 = vld [vmem:[#allocation73_spill] sm:$0xff] }
 0x3cf   : > { %v11156_v15 = vsel %vm657_vm0, %v2845_v22, %v2847_v24  ;;  %v11160_v35 = vsel %vm657_vm0, %v2847_v24, %v11112_v8  ;;  %v2174_v38 = vmul.f32 %v11119_v0, %v16302_v10  ;;  %v2175_v24 = vmul.f32 %v11122_v48, %v16304_v9 }
 0x3d0   : > { %7870 = vrot.lane.b32.xlu0 %v7869_v40, %s9202_s18  ;;  %v11172_v1 = vmul.f32 %v11156_v15, %v16248_v28  ;;  %v11176_v41 = vmul.f32 %v11160_v35, %v16249_v17  ;;  %v11186_v40 = vmul.f32 %v11160_v35, %v16251_v55  ;;  %v11190_v0 = vmul.f32 %v11156_v15, %v16174_v43 }
 0x3d1   : > { %7875 = vrot.lane.b32.xlu1 %v7874_v42, %s9202_s18  ;;  %v11180_v42 = vmul.f32 %v11156_v15, %v16250_v7  ;;  %v11194_v28 = vmul.f32 %v11160_v35, %v16175_v30  ;;  %v7884_v43 = vpack.i.bf16 %v2166_v46, %v2165_v33  ;;  %v7894_v12 = vpack.i.bf16 %v2175_v24, %v2174_v38  ;;  %v16310_v46 = vld [vmem:[#allocation53_spill] sm:$0xff] }
 0x3d2   : > { %16305 = vst [vmem:[#allocation104_spill] sm:$0xff] %v11186_v40  ;;  %v11212_v10 = vsel %vm657_vm0, 0.0, %v2839_v29  ;;  %v2158_v33 = vmul.f32 %v16310_v46, %v11088_v57  ;;  %v16311_v24 = vpack.i.bf16 %v10925_v20, %v10921_v60 }
 0x3d3   : > { %16303 = vst [vmem:[#allocation103_spill] sm:$0xff] %v11180_v42  ;;  %v11259_v60 = vmul.f32 %v16284_v61, %v11212_v10 }
 0x3d4   : > { %16306 = vst [vmem:[#allocation105_spill] sm:$0xff] %v11190_v0  ;;  %v11220_v0 = vsel %vm657_vm0, %v2843_v47, %v2845_v22 }
 0x3d5   : > { %16307 = vst [vmem:[#allocation106_spill] sm:$0xff] %v11194_v28  ;;  %v2851_v7 = vpop.permute.xlu0 %2850 }
 0x3d6   : > { %v11202_v55 = vpop.permute.xlu2 %7775  ;;  %v2841_v9 = vpop.permute.xlu1 %2840  ;;  %7835 = vrot.lane.b32.xlu2 %v11126_v18, %s9198_s25  ;;  %16309 = vst [vmem:[#allocation108_spill] sm:$0xff] %v11212_v10 }
 0x3d7   : > { %v11207_v30 = vsel %vm657_vm0, %v2839_v29, %v2841_v9  ;;  %v11215_v48 = vsel %vm657_vm0, %v2841_v9, %v2843_v47 }
 0x3d8   : > { %16308 = vst [vmem:[#allocation107_spill] sm:$0xff] %v11207_v30  ;;  %7885 = vrot.lane.b32.xlu0 %v7884_v43, %s9196_s7  ;;  %v2881_v17 = vmul.f32 %v11207_v30, %v16265_v13  ;;  %v2880_v43 = vmul.f32 %v16266_v5, %v11212_v10  ;;  %v11237_v22 = vmul.f32 %v11207_v30, %v16277_v50 }
 0x3d9   : > { %7895 = vrot.lane.b32.xlu1 %v7894_v12, %s9205_s11  ;;  %v11230_v12 = vpack.i.bf16 %v11220_v0, %v11215_v48  ;;  %v11245_v5 = vmul.f32 %v16282_v52, %v11212_v10  ;;  %v11249_v13 = vmul.f32 %v11207_v30, %v16283_v45  ;;  %v2891_v20 = vmul.f32 %v11215_v48, %v16269_v3 }
 0x3da   : > { %v7919_v47 = vpack.i.bf16 %v2881_v17, %v2880_v43  ;;  %v11265_v43 = vsel %vm657_vm0, %v11112_v8, %v2851_v7  ;;  %v11275_v17 = vmul.f32 %v11220_v0, %v16279_v59  ;;  %v2892_v52 = vmul.f32 %v11220_v0, %v16270_v49  ;;  %v16313_v59 = vld [vmem:[#allocation76_spill] sm:$0xff] }
 0x3db   : > { %v2176_v28 = vmul.f32 %v16313_v59, %v11088_v57 }
 0x3dc   : > { %v7934_v49 = vpack.i.bf16 %v2892_v52, %v2891_v20  ;;  %v2898_v52 = vmul.f32 %v16276_v21, %v11212_v10  ;;  %v7763_v21 = vunpack.i.h.bf16 %v11152_v23 }
 0x3dd   : > { %v11224_v38 = vpop.permute.xlu0 %7745 }
 0x3de   : > { %v11232_v29 = vpop.permute.xlu2 %7795  ;;  %v2853_v9 = vpop.permute.xlu1 %2852  ;;  %2358 = vrot.lane.b32.xlu2 %v2158_v33, %s9202_s18 }
 0x3df   : > { %v11253_v33 = vsel %vm657_vm0, %v2851_v7, %v2853_v9  ;;  %v11283_v7 = vpack.i.bf16 %v11207_v30, %v11212_v10 }
 0x3e0   : > { %7890 = vrot.lane.b32.xlu0 %v16311_v24, %s9205_s11  ;;  %16312 = vst [vmem:[#allocation109_spill] sm:$0xff] %v11253_v33  ;;  %v11271_v24 = vmul.f32 %v11215_v48, %v16278_v37  ;;  %v11287_v8 = vpack.i.bf16 %v11253_v33, %v11265_v43 }
 0x3e1   : > { %7920 = vrot.lane.b32.xlu1 %v7919_v47, %s9200_s6 }
 0x3e5   : > { %v11277_v61 = vpop.permute.xlu0 %7755 }
 0x3e6   : > { %v11289_v47 = vpop.permute.xlu2 %7815  ;;  %v11291_v37 = vpop.permute.xlu1 %7770  ;;  %7845 = vrot.lane.b32.xlu2 %v11126_v18, %s9204_s26  ;;  %v2899_v18 = vmul.f32 %v11207_v30, %v16274_v58 }
 0x3e7   : > { %v15798_v45 = vunpack.i.h.bf16 %v11289_v47  ;;  %v15801_v50 = vunpack.i.l.bf16 %v11289_v47 }
 0x3e8   : > { %7905 = vrot.lane.b32.xlu0 %v11230_v12, %s9199_s2 }
 0x3e9   : > { %v2482_v3 = vsel %vm1246_vm12, %v15801_v50, %v15798_v45  ;;  %7935 = vrot.lane.b32.xlu1 %v7934_v49, %s9201_s5  ;;  %v7939_v49 = vpack.i.bf16 %v2899_v18, %v2898_v52  ;;  %v2889_v45 = vmul.f32 %v16275_v26, %v11212_v10  ;;  %v16314_v18 = vpack.i.bf16 %v10933_v54, %v10929_v53 }
 0x3ea   : > { %2585 = vmatpush.msra.mxu2 %v2482_v3  ;;  %v2890_v3 = vmul.f32 %v11207_v30, %v16271_v31  ;;  %v16315_v53 = vpack.i.bf16 %v10941_v36, %v10937_v44  ;;  %v15807_v54 = vunpack.i.l.bf16 %v11232_v29  ;;  %v15809_v50 = vunpack.i.l.bf16 %v11277_v61 }
 0x3eb   : > { %v15813_v36 = vunpack.i.h.bf16 %v11224_v38  ;;  %v16318_v30 = vunpack.i.l.bf16 %v11289_v47 }
 0x3ec   : > { %v7929_v52 = vpack.i.bf16 %v2890_v3, %v2889_v45  ;;  %v11356_v45 = vsel %vm657_vm0, %v2853_v9, 0.0  ;;  %v2884_v9 = vmul.f32 %v11156_v15, %v16286_v14 }
 0x3ed   : > { %v11311_v42 = vpop.permute.xlu0 %7765 }
 0x3ee   : > { %v15799_v20 = vunpack.i.h.bf16 %v11311_v42  ;;  %v15800_v40 = vunpack.i.l.bf16 %v11311_v42  ;;  %v11317_v46 = vpop.permute.xlu1 %7785  ;;  %2478 = vrot.lane.b32.xlu2 %v2176_v28, %s9205_s11 }
 0x3f0   : > { %v2439_v57 = vsel %vm1202_vm13, %v15800_v40, %v15799_v20  ;;  %7915 = vrot.lane.b32.xlu0 %v11230_v12, %s9198_s25  ;;  %v11340_v20 = vpack.i.bf16 %v11160_v35, %v11156_v15 }
 0x3f1   : > { %2586 = vmatpush.msra.mxu2 %v2439_v57  ;;  %7940 = vrot.lane.b32.xlu1 %v7939_v49, %s9202_s18  ;;  %v15806_v57 = vunpack.i.h.bf16 %v11232_v29 }
 0x3f5   : > { %v11345_v49 = vpop.permute.xlu0 %7780 }
 0x3f6   : > { %v11332_v28 = vpop.permute.xlu1 %7790  ;;  %7860 = vrot.lane.b32.xlu2 %v16314_v18, %s9201_s5 }
 0x3f8   : > { %7930 = vrot.lane.b32.xlu0 %v7929_v52, %s9201_s5  ;;  %v15808_v52 = vunpack.i.h.bf16 %v11277_v61 }
 0x3f9   : > { %7950 = vrot.lane.b32.xlu1 %v11340_v20, %s9199_s2 }
 0x3fd   : > { %v7801_v58 = vpop.permute.xlu0 %7800 }
 0x3fe   : > { %v11348_v40 = vpop.permute.xlu1 %7805  ;;  %7880 = vrot.lane.b32.xlu2 %v16315_v53, %s9196_s7  ;;  %v2362_v53 = vsel %vm1124_vm11, %v15807_v54, %v15806_v57  ;;  %v16316_v54 = vunpack.i.h.bf16 %v11317_v46  ;;  %v7802_v31 = vunpack.i.l.bf16 %v7801_v58 }
 0x3ff   : > { %v15802_v3 = vunpack.i.h.bf16 %v11348_v40  ;;  %v7807_v18 = vunpack.i.l.bf16 %v11348_v40 }
 0x400   : > { %2943 = vrot.lane.b32.xlu0 %v11356_v45, %s9199_s2 }
 0x401   : > { %v2405_v44 = vsel %vm842_vm3, %v7807_v18, %v15802_v3  ;;  %7960 = vrot.lane.b32.xlu1 %v11340_v20, %s9198_s25  ;;  %v2319_v3 = vsel %vm1071_vm7, %v15809_v50, %v15808_v52  ;;  %v16317_v52 = vunpack.i.l.bf16 %v11317_v46 }
 0x402   : > { %2587 = vmatpush.msra.mxu2 %v2405_v44  ;;  %v7762_v44 = vunpack.i.l.bf16 %v11152_v23  ;;  %v2897_v23 = vmul.f32 %v16285_v51, %v11356_v45 }
 0x403   : > { %v2285_v50 = vsel %vm1036_vm10, %v16317_v52, %v16316_v54  ;;  %v16319_v54 = vunpack.i.h.bf16 %v11202_v55  ;;  %v16320_v52 = vunpack.i.l.bf16 %v11202_v55 }
 0x404   : > { %2588 = vmatpush.msra.mxu2 %v2362_v53 }
 0x406   : > { %v7811_v26 = vpop.permute.xlu1 %7810  ;;  %2589 = vmatpush.msra.mxu2 %v2319_v3  ;;  %7900 = vrot.lane.b32.xlu2 %v11283_v7, %s9199_s2  ;;  %v7803_v3 = vunpack.i.h.bf16 %v7801_v58  ;;  %v2885_v58 = vmul.f32 %v11160_v35, %v16287_v39 }
 0x407   : > { %v7813_v53 = vunpack.i.h.bf16 %v7811_v26  ;;  %v7812_v57 = vunpack.i.l.bf16 %v7811_v26 }
 0x408   : > { %2590 = vmatpush.msra.mxu2 %v2285_v50  ;;  %3063 = vrot.lane.b32.xlu0 %v11356_v45, %s9198_s25  ;;  %v2242_v50 = vsel %vm983_vm9, %v16320_v52, %v16319_v54  ;;  %v16322_v54 = vunpack.i.l.bf16 %v11224_v38 }
 0x409   : > { %v2480_v26 = vsel %vm1246_vm12, %v7812_v57, %v7813_v53  ;;  %v2481_v10 = vsel %vm1246_vm12, %v7813_v53, %v16318_v30  ;;  %3029 = vrot.lane.b32.xlu1 %v2897_v23, %s9201_s5  ;;  %v7793_v57 = vunpack.i.h.bf16 %v11332_v28  ;;  %v7792_v30 = vunpack.i.l.bf16 %v11332_v28 }
 0x40a   : > { %2533 = vmatpush.msrb.mxu0 %v2480_v26  ;;  %2559 = vmatpush.msrb.mxu1 %v2481_v10  ;;  %v2437_v53 = vsel %vm1202_vm13, %v7762_v44, %v7763_v21  ;;  %v16321_v10 = vunpack.i.l.bf16 %v11311_v42  ;;  %v7753_v26 = vunpack.i.h.bf16 %v11136_v56  ;;  %v2199_v52 = vsel %vm939_vm6, %v16322_v54, %v15813_v36 }
 0x40b   : > { %2591 = vmatpush.msra.mxu2 %v2242_v50  ;;  %v2126_v28 = vmul.f32 %v16232_v2, %v11022_v32  ;;  %v2887_v44 = vmul.f32 %v11253_v33, %v16294_v11  ;;  %v7752_v50 = vunpack.i.l.bf16 %v11136_v56  ;;  %v2886_v32 = vmul.f32 %v11265_v43, %v16293_v34 }
 0x40c   : > { %v2438_v23 = vsel %vm1202_vm13, %v7763_v21, %v16321_v10  ;;  %2534 = vmatpush.msrb.mxu0 %v2437_v53  ;;  %v2403_v21 = vsel %vm842_vm3, %v7802_v31, %v7803_v3  ;;  %v2404_v53 = vsel %vm842_vm3, %v7803_v3, %v7807_v18  ;;  %v11434_v10 = vld [vmem:[%s15612_s4] sm:$0xff]  ;;  %v7783_v54 = vunpack.i.h.bf16 %v11345_v49 }
 0x40d   : > { %2560 = vmatpush.msrb.mxu1 %v2438_v23  ;;  %2592 = vmatpush.msra.mxu2 %v2199_v52  ;;  %v7782_v56 = vunpack.i.l.bf16 %v11345_v49  ;;  %v2360_v31 = vsel %vm1124_vm11, %v7792_v30, %v7793_v57  ;;  %v7969_v18 = vpack.i.bf16 %v2885_v58, %v2884_v9  ;;  %v16323_v3 = vunpack.i.l.bf16 %v11232_v29 }
 0x40e   : > { %v11436_v23 = vpop.permute.xlu1 %7820  ;;  %2535 = vmatpush.msrb.mxu0 %v2403_v21  ;;  %7910 = vrot.lane.b32.xlu2 %v11283_v7, %s9198_s25  ;;  %v7974_v21 = vpack.i.bf16 %v2887_v44, %v2886_v32  ;;  %v7772_v49 = vunpack.i.l.bf16 %v11291_v37  ;;  %v2317_v30 = vsel %vm1071_vm7, %v7752_v50, %v7753_v26  ;;  %v2882_v9 = vmul.f32 %v11215_v48, %v16267_v62 }
 0x40f   : > { %2561 = vmatpush.msrb.mxu1 %v2404_v53  ;;  %2593 = vmatpush.msra.mxu2 %v2126_v28  ;;  %v2361_v52 = vsel %vm1124_vm11, %v7793_v57, %v16323_v3  ;;  %v7773_v53 = vunpack.i.h.bf16 %v11291_v37  ;;  %v7743_v58 = vunpack.i.h.bf16 %v11115_v63  ;;  %v16324_v28 = vunpack.i.l.bf16 %v11277_v61 }
 0x410   : > { %7152 = vmatmul.msk.f32.vlgmr.msra.gmra.mxu2 %vm1910_vm15, %v11434_v10  ;;  %2536 = vmatpush.msrb.mxu0 %v2360_v31  ;;  %v7742_v44 = vunpack.i.l.bf16 %v11115_v63  ;;  %v2283_v37 = vsel %vm1036_vm10, %v7782_v56, %v7783_v54  ;;  %v2883_v50 = vmul.f32 %v11220_v0, %v16268_v6  ;;  %v2896_v32 = vmul.f32 %v11253_v33, %v16292_v4  ;;  %v11467_v31 = vpop.permute.xlu0 %2195  ;;  %v11478_v56 = vld [vmem:[%s15612_s4 + $0x8] sm:$0xff] }
 0x411   : > { %2562 = vmatpush.msrb.mxu1 %v2361_v52  ;;  %7970 = vrot.lane.b32.xlu0 %v7969_v18, %s9200_s6  ;;  %v2318_v57 = vsel %vm1071_vm7, %v7753_v26, %v16324_v28  ;;  %v16325_v18 = vunpack.i.l.bf16 %v11317_v46  ;;  %v2905_v3 = vmul.f32 %v11253_v33, %v16297_v19  ;;  %v2240_v63 = vsel %vm983_vm9, %v7772_v49, %v7773_v53 }
 0x412   : > { %2537 = vmatpush.msrb.mxu0 %v2317_v30  ;;  %7975 = vrot.lane.b32.xlu1 %v7974_v21, %s9200_s6  ;;  %v7924_v52 = vpack.i.bf16 %v2883_v50, %v2882_v9  ;;  %v2895_v21 = vmul.f32 %v11265_v43, %v16291_v16  ;;  %v2197_v49 = vsel %vm939_vm6, %v7742_v44, %v7743_v58  ;;  %v16327_v9 = vunpack.i.l.bf16 %v11224_v38  ;;  %v16332_v44 = vld [vmem:[#allocation56_spill] sm:$0xff] }
 0x413   : > { %2563 = vmatpush.msrb.mxu1 %v2318_v57  ;;  %v2284_v26 = vsel %vm1036_vm10, %v7783_v54, %v16325_v18  ;;  %v16326_v54 = vunpack.i.l.bf16 %v11202_v55  ;;  %v2904_v57 = vmul.f32 %v11265_v43, %v16296_v25  ;;  %v16328_v18 = vld [vmem:[#allocation98_spill] sm:$0xff] }
 0x414   : > { %2538 = vmatpush.msrb.mxu0 %v2283_v37  ;;  %v7984_v37 = vpack.i.bf16 %v2896_v32, %v2895_v21  ;;  %v2198_v50 = vsel %vm939_vm6, %v7743_v58, %v16327_v9  ;;  %v2900_v32 = vmul.f32 %v11215_v48, %v16332_v44  ;;  %v16333_v58 = vld [vmem:[#allocation59_spill] sm:$0xff] }
 0x415   : > { %2564 = vmatpush.msrb.mxu1 %v2284_v26  ;;  %v2241_v28 = vsel %vm983_vm9, %v7773_v53, %v16326_v54  ;;  %v16329_v26 = vld [vmem:[#allocation28_spill] sm:$0xff] }
 0x416   : > { %v11482_v30 = vpop.permute.xlu1 %2281  ;;  %2539 = vmatpush.msrb.mxu0 %v2240_v63  ;;  %7925 = vrot.lane.b32.xlu2 %v7924_v52, %s9200_s6  ;;  %v2124_v53 = vmul.f32 %v16329_v26, %v16328_v18  ;;  %v7994_v63 = vpack.i.bf16 %v2905_v3, %v2904_v57  ;;  %v16330_v54 = vld [vmem:[#allocation96_spill] sm:$0xff]  ;;  %v2901_v52 = vmul.f32 %v11220_v0, %v16333_v58  ;;  %v16335_v57 = vld [vmem:[#allocation61_spill] sm:$0xff] }
 0x417   : > { %2565 = vmatpush.msrb.mxu1 %v2241_v28  ;;  %v16331_v28 = vld [vmem:[#allocation29_spill] sm:$0xff]  ;;  %v16334_v3 = vld [vmem:[#allocation60_spill] sm:$0xff] }
 0x418   : > { %7153 = vmatmul.msk.f32.gmra.mxu2 %vm1910_vm15, %v11478_v56  ;;  %2540 = vmatpush.msrb.mxu0 %v2197_v49  ;;  %v2125_v36 = vmul.f32 %v16331_v28, %v16330_v54  ;;  %v2902_v21 = vmul.f32 %v11156_v15, %v16334_v3  ;;  %v2903_v49 = vmul.f32 %v11160_v35, %v16335_v57  ;;  %v11521_v18 = vpop.permute.xlu0 %2315  ;;  %v16344_v57 = vld [vmem:[#allocation73_spill] sm:$0xff] }
 0x419   : > { %2566 = vmatpush.msrb.mxu1 %v2198_v50  ;;  %7985 = vrot.lane.b32.xlu0 %v7984_v37, %s9201_s5  ;;  %v16336_v37 = vld [vmem:[#allocation62_spill] sm:$0xff]  ;;  %v7944_v50 = vpack.i.bf16 %v2901_v52, %v2900_v32  ;;  %v16345_v3 = vpack.i.bf16 %v11176_v41, %v11172_v1 }
 0x41a   : > { %2541 = vmatpush.msrb.mxu0 %v2124_v53  ;;  %7995 = vrot.lane.b32.xlu1 %v7994_v63, %s9202_s18  ;;  %v2909_v9 = vmul.f32 %v11215_v48, %v16336_v37  ;;  %v16337_v53 = vld [vmem:[#allocation63_spill] sm:$0xff]  ;;  %v7989_v19 = vpack.i.bf16 %v2903_v49, %v2902_v21  ;;  %v16338_v21 = vld [vmem:[#allocation64_spill] sm:$0xff] }
 0x41b   : > { %2567 = vmatpush.msrb.mxu1 %v2125_v36  ;;  %7146 = vmatmul.msk.f32.vlgmr.msrb.gmra.mxu0 %vm1910_vm15, %v11434_v10  ;;  %v11519_v36 = vld [vmem:[%s15612_s4 + $0x10] sm:$0xff]  ;;  %v2910_v63 = vmul.f32 %v11220_v0, %v16337_v53  ;;  %v2915_v49 = vmul.f32 %v16338_v21, %v11356_v45 }
 0x41c   : > { %7149 = vmatmul.msk.f32.vlgmr.msrb.gmra.mxu1 %vm1910_vm15, %v11434_v10 }
 0x41d   : > { %v8004_v58 = vpack.i.bf16 %v2910_v63, %v2909_v9 }
 0x41e   : > { %v11525_v54 = vpop.permute.xlu1 %7830  ;;  %7945 = vrot.lane.b32.xlu2 %v7944_v50, %s9202_s18  ;;  %v16340_v50 = vld [vmem:[#allocation65_spill] sm:$0xff] }
 0x41f   : > { %v2913_v63 = vmul.f32 %v11265_v43, %v16340_v50 }
 0x420   : > { %7154 = vmatmul.msk.f32.gmra.mxu2 %vm1910_vm15, %v11519_v36  ;;  %v11530_v25 = vpop.permute.xlu2 %7825  ;;  %v11540_v32 = vpop.permute.xlu0 %2435 }
 0x421   : > { %7990 = vrot.lane.b32.xlu0 %v7989_v19, %s9202_s18  ;;  %v16339_v19 = vpack.i.bf16 %v11237_v22, %v11245_v5 }
 0x422   : > { %8005 = vrot.lane.b32.xlu1 %v8004_v58, %s9196_s7  ;;  %v2914_v58 = vmul.f32 %v11253_v33, %v16301_v27 }
 0x423   : > { %7147 = vmatmul.msk.f32.gmra.mxu0 %vm1910_vm15, %v11478_v56 }
 0x424   : > { %7150 = vmatmul.msk.f32.gmra.mxu1 %vm1910_vm15, %v11478_v56  ;;  %v8014_v53 = vpack.i.bf16 %v2914_v58, %v2913_v63  ;;  %v16343_v63 = vld [vmem:[#allocation77_spill] sm:$0xff] }
 0x425   : > { %v2923_v27 = vmul.f32 %v11253_v33, %v16343_v63  ;;  %v16347_v63 = vld [vmem:[#allocation53_spill] sm:$0xff] }
 0x426   : > { %7955 = vrot.lane.b32.xlu2 %v11287_v8, %s9199_s2  ;;  %v11546_v9 = vpop.permute.xlu1 %2401 }
 0x428   : > { %v11542_v52 = vpop.permute.xlu2 %2238  ;;  %v11566_v22 = vpop.permute.xlu0 %7850 }
 0x429   : > { %8000 = vrot.lane.b32.xlu0 %v16339_v19, %s9196_s7  ;;  %v16341_v19 = vld [vmem:[#allocation35_spill] sm:$0xff] }
 0x42a   : > { %3149 = vrot.lane.b32.xlu1 %v2915_v49, %s9196_s7  ;;  %v2888_v21 = vmul.f32 %v16341_v19, %v11356_v45  ;;  %v16349_v19 = vld [vmem:[#allocation103_spill] sm:$0xff] }
 0x42b   : > { %7148 = vmatmul.msk.f32.gmra.mxu0 %vm1910_vm15, %v11519_v36 }
 0x42c   : > { %7151 = vmatmul.msk.f32.gmra.mxu1 %vm1910_vm15, %v11519_v36 }
 0x42e   : > { %7965 = vrot.lane.b32.xlu2 %v11287_v8, %s9198_s25  ;;  %v11570_v49 = vpop.permute.xlu1 %7840 }
 0x430   : > { %v11563_v5 = vpop.permute.xlu2 %7835 }
 0x431   : > { %8015 = vrot.lane.b32.xlu0 %v8014_v53, %s9196_s7  ;;  %v16342_v53 = vpack.i.bf16 %v11249_v13, %v11259_v60  ;;  %v16346_v13 = vpack.i.bf16 %v11275_v17, %v11271_v24  ;;  %v16355_v17 = vunpack.i.h.bf16 %v11289_v47 }
 0x432   : > { %8030 = vrot.lane.b32.xlu1 %v11340_v20, %s9204_s26 }
 0x436   : > { %2986 = vrot.lane.b32.xlu2 %v2888_v21, %s9200_s6  ;;  %v2922_v21 = vmul.f32 %v11265_v43, %v16344_v57  ;;  %v2906_v57 = vmul.f32 %v16347_v63, %v11356_v45 }
 0x438   : > { %v11575_v50 = vpop.permute.xlu2 %2358  ;;  %v8054_v51 = vpack.i.bf16 %v2923_v27, %v2922_v21 }
 0x439   : > { %8025 = vrot.lane.b32.xlu0 %v11230_v12, %s9204_s26 }
 0x43a   : > { %8045 = vrot.lane.b32.xlu1 %v16342_v53, %s9205_s11  ;;  %v11583_v58 = vpop.permute.xlu0 %7865 }
 0x43b   : > { %v11585_v20 = vpop.permute.xlu1 %7855 }
 0x43e   : > { %7980 = vrot.lane.b32.xlu2 %v16345_v3, %s9201_s5 }
 0x440   : > { %v11595_v12 = vpop.permute.xlu2 %7845 }
 0x441   : > { %8040 = vrot.lane.b32.xlu0 %v16346_v13, %s9205_s11  ;;  %v7847_v24 = vunpack.i.l.bf16 %v11595_v12  ;;  %v16351_v21 = vunpack.i.h.bf16 %v11595_v12 }
 0x442   : > { %8055 = vrot.lane.b32.xlu1 %v8054_v51, %s9205_s11  ;;  %v11602_v60 = vpop.permute.xlu0 %7870  ;;  %v8884_v51 = vld [vmem:[%s15616_s8 + $0x8] sm:$0xff] }
 0x443   : > { %v11604_v53 = vpop.permute.xlu1 %7875  ;;  %v2443_v11 = vsel %vm1202_vm13, %v7847_v24, %v16351_v21 }
 0x444   : > { %v16353_v14 = vunpack.i.h.bf16 %v11604_v53  ;;  %v16354_v37 = vunpack.i.l.bf16 %v11604_v53 }
 0x446   : > { %3106 = vrot.lane.b32.xlu2 %v2906_v57, %s9202_s18  ;;  %v2366_v6 = vsel %vm1124_vm11, %v16354_v37, %v16353_v14  ;;  %v16357_v14 = vunpack.i.l.bf16 %v11563_v5  ;;  %v7827_v37 = vunpack.i.l.bf16 %v11530_v25 }
 0x448   : > { %v11609_v1 = vpop.permute.xlu2 %2478 }
 0x449   : > { %3183 = vrot.lane.b32.xlu0 %v11356_v45, %s9204_s26 }
 0x44a   : > { %v11613_v27 = vpop.permute.xlu0 %7885  ;;  %3252 = vperm.xlu1 %8060, %v8884_v51   ;;  %v16348_v51 = vld [vmem:[#allocation104_spill] sm:$0xff] }
 0x44b   : > { %v11618_v41 = vpop.permute.xlu1 %7895  ;;  %v7887_v13 = vunpack.i.l.bf16 %v11613_v27  ;;  %v16350_v44 = vpack.i.bf16 %v16348_v51, %v16349_v19  ;;  %v7842_v19 = vunpack.i.l.bf16 %v11570_v49 }
 0x44c   : > { %v15821_v3 = vunpack.i.h.bf16 %v11618_v41  ;;  %v7897_v57 = vunpack.i.l.bf16 %v11618_v41 }
 0x44e   : > { %v2486_v63 = vsel %vm1246_vm12, %v7897_v57, %v15821_v3  ;;  %8010 = vrot.lane.b32.xlu2 %v16350_v44, %s9196_s7  ;;  %v8885_v3 = vld [vmem:[%s15616_s8] sm:$0xff] }
 0x44f   : > { %2689 = vmatpush.msrb.mxu2 %v2486_v63  ;;  %v16352_v63 = vunpack.i.h.bf16 %v11613_v27 }
 0x450   : > { %v11635_v16 = vpop.permute.xlu2 %7860 }
 0x451   : > { %2690 = vmatpush.msrb.mxu2 %v2443_v11  ;;  %3248 = vperm.xlu0 %8059, %v8885_v3   ;;  %v2409_v51 = vsel %vm842_vm3, %v7887_v13, %v16352_v63  ;;  %v7843_v11 = vunpack.i.h.bf16 %v11570_v49  ;;  %v7867_v63 = vunpack.i.l.bf16 %v11583_v58  ;;  %v7858_v49 = vunpack.i.h.bf16 %v11585_v20 }
 0x452   : > { %v7891_v44 = vpop.permute.xlu0 %7890 }
 0x453   : > { %v7893_v34 = vunpack.i.h.bf16 %v7891_v44  ;;  %v7892_v39 = vunpack.i.l.bf16 %v7891_v44  ;;  %v11649_v21 = vpop.permute.xlu1 %7920  ;;  %2691 = vmatpush.msrb.mxu2 %v2409_v51 }
 0x455   : > { %2692 = vmatpush.msrb.mxu2 %v2366_v6  ;;  %v2483_v44 = vsel %vm1246_vm12, %v16355_v17, %v7892_v39  ;;  %v2484_v4 = vsel %vm1246_vm12, %v7892_v39, %v7893_v34  ;;  %v2485_v51 = vsel %vm1246_vm12, %v7893_v34, %v7897_v57  ;;  %v16356_v6 = vunpack.i.h.bf16 %v11563_v5 }
 0x456   : > { %2611 = vmatpush.msra.mxu3 %v2483_v44  ;;  %2637 = vmatpush.msra.mxu0 %v2484_v4  ;;  %v16358_v39 = vunpack.i.h.bf16 %v11311_v42  ;;  %v7828_v4 = vunpack.i.h.bf16 %v11530_v25  ;;  %v2442_v57 = vsel %vm1202_vm13, %v7843_v11, %v7847_v24  ;;  %v7872_v44 = vunpack.i.l.bf16 %v11602_v60 }
 0x457   : > { %8020 = vrot.lane.b32.xlu2 %v11283_v7, %s9204_s26  ;;  %2663 = vmatpush.msra.mxu1 %v2485_v51  ;;  %v2323_v47 = vsel %vm1071_vm7, %v16357_v14, %v16356_v6  ;;  %v2441_v7 = vsel %vm1202_vm13, %v7842_v19, %v7843_v11  ;;  %v16359_v42 = vunpack.i.h.bf16 %v11583_v58  ;;  %v7873_v14 = vunpack.i.h.bf16 %v11602_v60 }
 0x458   : > { %v2440_v34 = vsel %vm1202_vm13, %v16358_v39, %v7842_v19  ;;  %2693 = vmatpush.msrb.mxu2 %v2323_v47  ;;  %v7881_v17 = vpop.permute.xlu2 %7880  ;;  %2638 = vmatpush.msra.mxu0 %v2441_v7  ;;  %v16360_v24 = vunpack.i.l.bf16 %v11585_v20  ;;  %v16361_v39 = vunpack.i.h.bf16 %v11348_v40  ;;  %v7832_v7 = vunpack.i.l.bf16 %v11525_v54 }
 0x459   : > { %2612 = vmatpush.msra.mxu3 %v2440_v34  ;;  %v7883_v51 = vunpack.i.h.bf16 %v7881_v17  ;;  %v7882_v3 = vunpack.i.l.bf16 %v7881_v17  ;;  %2664 = vmatpush.msra.mxu1 %v2442_v57  ;;  %v2289_v6 = vsel %vm1036_vm10, %v7867_v63, %v16359_v42  ;;  %v7833_v57 = vunpack.i.h.bf16 %v11525_v54  ;;  %v16364_v54 = vld [vmem:[#allocation31_spill] sm:$0xff] }
 0x45a   : > { %2694 = vmatpush.msrb.mxu2 %v2289_v6  ;;  %v11687_v47 = vpop.permute.xlu0 %7905  ;;  %v2246_v11 = vsel %vm983_vm9, %v16360_v24, %v7858_v49  ;;  %v2203_v40 = vsel %vm939_vm6, %v7827_v37, %v7828_v4  ;;  %v16362_v42 = vunpack.i.h.bf16 %v11232_v29  ;;  %v7862_v6 = vunpack.i.l.bf16 %v11635_v16 }
 0x45b   : > { %v11689_v19 = vpop.permute.xlu1 %7935  ;;  %v2406_v34 = vsel %vm842_vm3, %v16361_v39, %v7882_v3  ;;  %v2407_v17 = vsel %vm842_vm3, %v7882_v3, %v7883_v51  ;;  %v2408_v60 = vsel %vm842_vm3, %v7883_v51, %v7887_v13  ;;  %v2364_v13 = vsel %vm1124_vm11, %v7872_v44, %v7873_v14  ;;  %v16363_v51 = vld [vmem:[#allocation101_spill] sm:$0xff] }
 0x45c   : > { %2695 = vmatpush.msrb.mxu2 %v2246_v11  ;;  %2613 = vmatpush.msra.mxu3 %v2406_v34  ;;  %v2363_v3 = vsel %vm1124_vm11, %v16362_v42, %v7872_v44  ;;  %v2130_v24 = vmul.f32 %v16364_v54, %v16363_v51  ;;  %v7863_v11 = vunpack.i.h.bf16 %v11635_v16  ;;  %v16365_v39 = vunpack.i.l.bf16 %v11604_v53 }
 0x45d   : > { %2639 = vmatpush.msra.mxu0 %v2407_v17  ;;  %2665 = vmatpush.msra.mxu1 %v2408_v60  ;;  %v7852_v34 = vunpack.i.l.bf16 %v11566_v22  ;;  %v16366_v44 = vunpack.i.h.bf16 %v11277_v61  ;;  %v7853_v16 = vunpack.i.h.bf16 %v11566_v22  ;;  %v7822_v42 = vunpack.i.l.bf16 %v11436_v23 }
 0x45e   : > { %2696 = vmatpush.msrb.mxu2 %v2203_v40  ;;  %2614 = vmatpush.msra.mxu3 %v2363_v3  ;;  %v2365_v29 = vsel %vm1124_vm11, %v7873_v14, %v16365_v39  ;;  %v16367_v14 = vunpack.i.l.bf16 %v11563_v5  ;;  %v16368_v61 = vunpack.i.h.bf16 %v11317_v46 }
 0x45f   : > { %8035 = vrot.lane.b32.xlu2 %v11287_v8, %s9204_s26  ;;  %2640 = vmatpush.msra.mxu0 %v2364_v13  ;;  %v2320_v60 = vsel %vm1071_vm7, %v16366_v44, %v7832_v7  ;;  %v2321_v8 = vsel %vm1071_vm7, %v7832_v7, %v7833_v57  ;;  %v7823_v13 = vunpack.i.h.bf16 %v11436_v23  ;;  %v2287_v7 = vsel %vm1036_vm10, %v7862_v6, %v7863_v11 }
 0x460   : > { %2666 = vmatpush.msra.mxu1 %v2365_v29  ;;  %2697 = vmatpush.msrb.mxu2 %v2130_v24  ;;  %v11722_v17 = vpop.permute.xlu2 %7900  ;;  %v2322_v40 = vsel %vm1071_vm7, %v7833_v57, %v16367_v14  ;;  %v2286_v22 = vsel %vm1036_vm10, %v16368_v61, %v7862_v6  ;;  %v2288_v57 = vsel %vm1036_vm10, %v7863_v11, %v7867_v63  ;;  %v16369_v24 = vunpack.i.h.bf16 %v11202_v55  ;;  %v16372_v63 = vld [vmem:[#allocation106_spill] sm:$0xff]  ;;  %v16373_v11 = vld [vmem:[#allocation105_spill] sm:$0xff] }
 0x461   : > { %7164 = vmatmul.msk.f32.vlgmr.msrb.gmra.mxu2 %vm1910_vm15, %v11434_v10  ;;  %2615 = vmatpush.msra.mxu3 %v2320_v60  ;;  %v2244_v46 = vsel %vm983_vm9, %v7852_v34, %v7853_v16  ;;  %v16370_v23 = vunpack.i.l.bf16 %v11585_v20  ;;  %v16371_v6 = vunpack.i.h.bf16 %v11224_v38  ;;  %v16374_v60 = vpack.i.bf16 %v16372_v63, %v16373_v11  ;;  %v16377_v38 = vld [vmem:[#allocation89_spill] sm:$0xff]  ;;  %v16388_v20 = vld [vmem:[#allocation102_spill] sm:$0xff] }
 0x462   : > { %2641 = vmatpush.msra.mxu0 %v2321_v8  ;;  %2667 = vmatpush.msra.mxu1 %v2322_v40  ;;  %v11735_v3 = vpop.permute.xlu0 %7915  ;;  %v2243_v39 = vsel %vm983_vm9, %v16369_v24, %v7852_v34  ;;  %v2201_v55 = vsel %vm939_vm6, %v7822_v42, %v7823_v13  ;;  %v2202_v34 = vsel %vm939_vm6, %v7823_v13, %v7827_v37  ;;  %v16375_v8 = vld [vmem:[#allocation99_spill] sm:$0xff]  ;;  %v16378_v40 = vld [vmem:[#allocation25_spill] sm:$0xff]  ;;  %v16381_v13 = vunpack.i.h.bf16 %v11618_v41 }
 0x463   : > { %v11741_v51 = vpop.permute.xlu1 %7940  ;;  %2616 = vmatpush.msra.mxu3 %v2286_v22  ;;  %v2245_v29 = vsel %vm983_vm9, %v7853_v16, %v16370_v23  ;;  %v2200_v44 = vsel %vm939_vm6, %v16371_v6, %v7822_v42  ;;  %v16376_v16 = vld [vmem:[#allocation26_spill] sm:$0xff]  ;;  %v2128_v61 = vmul.f32 %v16378_v40, %v16377_v38  ;;  %v15836_v42 = vunpack.i.l.bf16 %v11689_v19 }
 0x464   : > { %2642 = vmatpush.msra.mxu0 %v2287_v7  ;;  %2668 = vmatpush.msra.mxu1 %v2288_v57  ;;  %v2127_v14 = vmul.f32 %v16376_v16, %v16375_v8  ;;  %v16379_v22 = vld [vmem:[#allocation78_spill] sm:$0xff]  ;;  %v16380_v7 = vld [vmem:[#allocation24_spill] sm:$0xff]  ;;  %v16383_v41 = vunpack.i.h.bf16 %v11613_v27  ;;  %v16386_v27 = vunpack.i.h.bf16 %v11563_v5  ;;  %v8886_v5 = vld [vmem:[%s15616_s8 + $0x10] sm:$0xff]  ;;  %v15837_v38 = vunpack.i.h.bf16 %v11735_v3 }
 0x465   : > { %2617 = vmatpush.msra.mxu3 %v2243_v39  ;;  %v2129_v57 = vmul.f32 %v16380_v7, %v16379_v22  ;;  %v2487_v39 = vsel %vm1246_vm12, %v16381_v13, %v11609_v1 }
 0x466   : > { %2643 = vmatpush.msra.mxu0 %v2244_v46  ;;  %2669 = vmatpush.msra.mxu1 %v2245_v29  ;;  %v16382_v29 = vunpack.i.h.bf16 %v11595_v12  ;;  %v2410_v63 = vsel %vm842_vm3, %v16383_v41, %v11546_v9  ;;  %v15835_v9 = vunpack.i.h.bf16 %v11687_v47 }
 0x467   : > { %8050 = vrot.lane.b32.xlu2 %v16374_v60, %s9205_s11  ;;  %2618 = vmatpush.msra.mxu3 %v2200_v44  ;;  %v2924_v44 = vmul.f32 %v16313_v59, %v11356_v45  ;;  %v16384_v45 = vunpack.i.h.bf16 %v11604_v53  ;;  %v2324_v53 = vsel %vm1071_vm7, %v16386_v27, %v11521_v18  ;;  %v2247_v18 = vsel %vm983_vm9, %v7858_v49, %v11542_v52  ;;  %v16389_v52 = vld [vmem:[#allocation30_spill] sm:$0xff] }
 0x468   : > { %2644 = vmatpush.msra.mxu0 %v2201_v55  ;;  %2670 = vmatpush.msra.mxu1 %v2202_v34  ;;  %v11773_v24 = vpop.permute.xlu2 %7910  ;;  %v2444_v6 = vsel %vm1202_vm13, %v16382_v29, %v11540_v32  ;;  %v2131_v49 = vmul.f32 %v16389_v52, %v16388_v20  ;;  %v7943_v52 = vunpack.i.h.bf16 %v11741_v51 }
 0x469   : > { %7165 = vmatmul.msk.f32.gmra.mxu2 %vm1910_vm15, %v11478_v56  ;;  %2619 = vmatpush.msra.mxu3 %v2127_v14  ;;  %v2367_v12 = vsel %vm1124_vm11, %v16384_v45, %v11575_v50  ;;  %v16387_v50 = vunpack.i.h.bf16 %v11583_v58  ;;  %v2204_v58 = vsel %vm939_vm6, %v7828_v4, %v11467_v31 }
 0x46a   : > { %2645 = vmatpush.msra.mxu0 %v2128_v61  ;;  %2671 = vmatpush.msra.mxu1 %v2129_v57  ;;  %v11775_v37 = vpop.permute.xlu0 %7930 }
 0x46b   : > { %7155 = vmatmul.msk.f32.vlgmr.msra.gmra.mxu3 %vm1910_vm15, %v11434_v10  ;;  %7158 = vmatmul.msk.f32.vlgmr.msra.gmra.mxu0 %vm1910_vm15, %v11434_v10  ;;  %v15838_v46 = vunpack.i.h.bf16 %v11775_v37  ;;  %v11787_v23 = vpop.permute.xlu1 %7950  ;;  %v2290_v34 = vsel %vm1036_vm10, %v16387_v50, %v11482_v30 }
 0x46c   : > { %7161 = vmatmul.msk.f32.vlgmr.msra.gmra.mxu1 %vm1910_vm15, %v11434_v10  ;;  %2715 = vmatpush.msrb.mxu3 %v2487_v39  ;;  %v15827_v32 = vunpack.i.l.bf16 %v11787_v23 }
 0x46d   : > { %v11802_v1 = vsel %vm1036_vm10, %v15838_v46, %v15836_v42 }
 0x46e   : > { %2716 = vmatpush.msrb.mxu3 %v2444_v6  ;;  %v11842_v8 = vsel %vm939_vm6, %v15835_v9, %v15827_v32 }
 0x46f   : > { %3226 = vrot.lane.b32.xlu2 %v2924_v44, %s9205_s11 }
 0x470   : > { %2717 = vmatpush.msrb.mxu3 %v2410_v63  ;;  %v11816_v11 = vpop.permute.xlu2 %7925 }
 0x471   : > { %7166 = vmatmul.msk.f32.gmra.mxu2 %vm1910_vm15, %v11519_v36 }
 0x472   : > { %2718 = vmatpush.msrb.mxu3 %v2367_v12  ;;  %v11818_v60 = vpop.permute.xlu0 %2943 }
 0x473   : > { %16385 = vst [vmem:[#allocation98_spill] sm:$0xff] %v11818_v60  ;;  %7156 = vmatmul.msk.f32.gmra.mxu3 %vm1910_vm15, %v11478_v56  ;;  %7159 = vmatmul.msk.f32.gmra.mxu0 %vm1910_vm15, %v11478_v56  ;;  %v11829_v55 = vpop.permute.xlu1 %7960 }
 0x474   : > { %7162 = vmatmul.msk.f32.gmra.mxu1 %vm1910_vm15, %v11478_v56  ;;  %2719 = vmatpush.msrb.mxu3 %v2324_v53  ;;  %v15833_v30 = vunpack.i.l.bf16 %v11829_v55  ;;  %v15834_v41 = vunpack.i.h.bf16 %v11829_v55 }
 0x476   : > { %2720 = vmatpush.msrb.mxu3 %v2290_v34  ;;  %v11872_v31 = vsel %vm1071_vm7, %v15837_v38, %v15833_v30 }
 0x477   : > { %3256 = vperm.xlu2 %8061, %v8886_v5  }
 0x478   : > { %2721 = vmatpush.msrb.mxu3 %v2247_v18  ;;  %v11856_v14 = vpop.permute.xlu2 %7945 }
 0x47a   : > { %2722 = vmatpush.msrb.mxu3 %v2204_v58  ;;  %v3064_v61 = vpop.permute.xlu0 %3063 }
 0x47b   : > { %7157 = vmatmul.msk.f32.gmra.mxu3 %vm1910_vm15, %v11519_v36  ;;  %7160 = vmatmul.msk.f32.gmra.mxu0 %vm1910_vm15, %v11519_v36  ;;  %v3030_v25 = vpop.permute.xlu1 %3029 }
 0x47c   : > { %7163 = vmatmul.msk.f32.gmra.mxu1 %vm1910_vm15, %v11519_v36  ;;  %2723 = vmatpush.msrb.mxu3 %v2131_v49 }
 0x480   : > { %v11874_v4 = vpop.permute.xlu2 %7955 }
 0x483   : > { %7167 = vmatmul.msk.f32.vlgmr.msrb.gmra.mxu3 %vm1910_vm15, %v11434_v10  ;;  %v11878_v22 = vpop.permute.xlu0 %7970 }
 0x484   : > { %v11880_v57 = vpop.permute.xlu1 %7975  ;;  %v15829_v13 = vunpack.i.h.bf16 %v11878_v22 }
 0x485   : > { %v15826_v39 = vunpack.i.l.bf16 %v11880_v57 }
 0x487   : > { %v11893_v6 = vsel %vm983_vm9, %v15829_v13, %v15826_v39 }
 0x488   : > { %v11884_v29 = vpop.permute.xlu2 %7965 }
 0x489   : > { %v15830_v10 = vunpack.i.l.bf16 %v11884_v29  ;;  %v15831_v45 = vunpack.i.h.bf16 %v11884_v29 }
 0x48b   : > { %7168 = vmatmul.msk.f32.gmra.mxu3 %vm1910_vm15, %v11478_v56  ;;  %v11896_v44 = vpop.permute.xlu0 %7985  ;;  %v11904_v56 = vsel %vm1071_vm7, %v15834_v41, %v15830_v10  ;;  %v11915_v53 = vsel %vm1071_vm7, %v15831_v45, %v3064_v61 }
 0x48c   : > { %v15828_v12 = vunpack.i.h.bf16 %v11896_v44  ;;  %v11910_v27 = vpop.permute.xlu1 %7995  ;;  %16390 = vst [vmem:[#allocation96_spill] sm:$0xff] %v11915_v53 }
 0x48e   : > { %v11924_v18 = vsel %vm1036_vm10, %v15828_v12, %v3030_v25 }
 0x48f   : > { %16391 = vst [vmem:[#allocation104_spill] sm:$0xff] %v11924_v18 }
 0x490   : > { %v2987_v63 = vpop.permute.xlu2 %2986 }
 0x493   : > { %7169 = vmatmul.msk.f32.gmra.mxu3 %vm1910_vm15, %v11519_v36  ;;  %v11917_v50 = vpop.permute.xlu0 %7990  ;;  %v15832_v36 = vunpack.i.h.bf16 %v11880_v57 }
 0x494   : > { %v11932_v58 = vpop.permute.xlu1 %8005 }
 0x495   : > { %v11930_v5 = vsel %vm983_vm9, %v15832_v36, %v2987_v63 }
 0x496   : > { %16392 = vst [vmem:[#allocation103_spill] sm:$0xff] %v11930_v5  ;;  %v7942_v5 = vunpack.i.l.bf16 %v11741_v51  ;;  %v7947_v51 = vunpack.i.l.bf16 %v11856_v14 }
 0x498   : > { %v11919_v34 = vpop.permute.xlu2 %7980 }
 0x49b   : > { %v8001_v49 = vpop.permute.xlu0 %8000 }
 0x49c   : > { %v11938_v39 = vpop.permute.xlu1 %3149  ;;  %v8003_v41 = vunpack.i.h.bf16 %v8001_v49  ;;  %v8002_v38 = vunpack.i.l.bf16 %v8001_v49  ;;  %v7913_v49 = vunpack.i.h.bf16 %v11773_v24 }
 0x49d   : > { %16394 = vst [vmem:[#allocation106_spill] sm:$0xff] %v11938_v39 }
 0x4a0   : > { %v11934_v20 = vpop.permute.xlu2 %3106 }
 0x4a1   : > { %16393 = vst [vmem:[#allocation101_spill] sm:$0xff] %v11934_v20 }
 0x4a3   : > { %v11940_v32 = vpop.permute.xlu0 %8015 }
 0x4a4   : > { %v11942_v12 = vpop.permute.xlu1 %8030 }
 0x4a8   : > { %v11936_v61 = vpop.permute.xlu2 %8010 }
 0x4ab   : > { %v8026_v13 = vpop.permute.xlu0 %8025 }
 0x4ac   : > { %v8046_v45 = vpop.permute.xlu1 %8045  ;;  %v8028_v33 = vunpack.i.h.bf16 %v8026_v13  ;;  %v8027_v60 = vunpack.i.l.bf16 %v8026_v13 }
 0x4ad   : > { %v8048_v36 = vunpack.i.h.bf16 %v8046_v45  ;;  %v8047_v30 = vunpack.i.l.bf16 %v8046_v45 }
 0x4af   : > { %v3228_v46 = vsel %vm1246_vm12, %v8047_v30, %v8048_v36  ;;  %v8008_v30 = vunpack.i.h.bf16 %v11932_v58 }
 0x4b0   : > { %3275 = vmatpush.msrb.mxu0 %v3228_v46  ;;  %v7912_v46 = vunpack.i.l.bf16 %v11773_v24  ;;  %v7932_v24 = vunpack.i.l.bf16 %v11775_v37 }
 0x4b1   : > { %v8021_v25 = vpop.permute.xlu2 %8020 }
 0x4b2   : > { %v8023_v9 = vunpack.i.h.bf16 %v8021_v25  ;;  %v8022_v42 = vunpack.i.l.bf16 %v8021_v25  ;;  %v8007_v25 = vunpack.i.l.bf16 %v11932_v58  ;;  %v3108_v58 = vsel %vm1124_vm11, %v7942_v5, %v7943_v52 }
 0x4b3   : > { %v8041_v63 = vpop.permute.xlu0 %8040  ;;  %v3065_v39 = vsel %vm1071_vm7, %v7912_v46, %v7913_v49  ;;  %v3109_v5 = vsel %vm1124_vm11, %v7943_v52, %v7947_v51  ;;  %v7927_v46 = vunpack.i.l.bf16 %v11816_v11 }
 0x4b4   : > { %v8043_v59 = vunpack.i.h.bf16 %v8041_v63  ;;  %v8042_v62 = vunpack.i.l.bf16 %v8041_v63  ;;  %v3185_v18 = vsel %vm1202_vm13, %v8022_v42, %v8023_v9  ;;  %v3151_v42 = vsel %vm842_vm3, %v8002_v38, %v8003_v41 }
 0x4b5   : > { %3276 = vmatpush.msrb.mxu0 %v3185_v18  ;;  %v3186_v13 = vsel %vm1202_vm13, %v8023_v9, %v8027_v60  ;;  %v3187_v63 = vsel %vm1202_vm13, %v8027_v60, %v8028_v33  ;;  %v3152_v38 = vsel %vm842_vm3, %v8003_v41, %v8007_v25  ;;  %v8032_v9 = vunpack.i.l.bf16 %v11942_v12 }
 0x4b6   : > { %v3229_v53 = vsel %vm1246_vm12, %v8048_v36, %v8042_v62  ;;  %v3230_v45 = vsel %vm1246_vm12, %v8042_v62, %v8043_v59  ;;  %v7923_v62 = vunpack.i.h.bf16 %v11649_v21  ;;  %v7948_v36 = vunpack.i.h.bf16 %v11856_v14 }
 0x4b7   : > { %3301 = vmatpush.msrb.mxu1 %v3229_v53  ;;  %3327 = vmatpush.msra.mxu2 %v3230_v45  ;;  %v7917_v53 = vunpack.i.l.bf16 %v11735_v3  ;;  %v8012_v45 = vunpack.i.l.bf16 %v11936_v61  ;;  %v3153_v14 = vsel %vm842_vm3, %v8007_v25, %v8008_v30  ;;  %v7903_v41 = vunpack.i.h.bf16 %v11722_v17 }
 0x4b8   : > { %3277 = vmatpush.msrb.mxu0 %v3151_v42  ;;  %v7922_v42 = vunpack.i.l.bf16 %v11649_v21  ;;  %v3110_v25 = vsel %vm1124_vm11, %v7947_v51, %v7948_v36  ;;  %v7902_v21 = vunpack.i.l.bf16 %v11722_v17  ;;  %v16396_v51 = vunpack.i.h.bf16 %v11735_v3 }
 0x4b9   : > { %v11944_v10 = vpop.permute.xlu2 %8035  ;;  %3302 = vmatpush.msrb.mxu1 %v3186_v13  ;;  %3328 = vmatpush.msra.mxu2 %v3187_v63  ;;  %v7938_v13 = vunpack.i.h.bf16 %v11689_v19  ;;  %v7992_v63 = vunpack.i.l.bf16 %v11917_v50  ;;  %v3154_v17 = vsel %vm842_vm3, %v8008_v30, %v8012_v45  ;;  %v16397_v3 = vunpack.i.l.bf16 %v11689_v19 }
 0x4ba   : > { %3278 = vmatpush.msrb.mxu0 %v3108_v58  ;;  %v16395_v58 = vunpack.i.h.bf16 %v11775_v37  ;;  %v2988_v37 = vsel %vm983_vm9, %v7922_v42, %v7923_v62  ;;  %v7997_v19 = vunpack.i.l.bf16 %v11910_v27 }
 0x4bb   : > { %3303 = vmatpush.msrb.mxu1 %v3152_v38  ;;  %3329 = vmatpush.msra.mxu2 %v3153_v14  ;;  %v3066_v38 = vsel %vm1071_vm7, %v7913_v49, %v7917_v53  ;;  %v7907_v49 = vunpack.i.l.bf16 %v11687_v47  ;;  %v3111_v30 = vsel %vm1124_vm11, %v7948_v36, %v7992_v63  ;;  %v12008_v14 = vpop.permute.xlu1 %8055  ;;  %v8033_v36 = vunpack.i.h.bf16 %v11942_v12 }
 0x4bc   : > { %3279 = vmatpush.msrb.mxu0 %v3065_v39  ;;  %v3031_v52 = vsel %vm1036_vm10, %v7932_v24, %v16395_v58  ;;  %v7928_v39 = vunpack.i.h.bf16 %v11816_v11  ;;  %v8057_v58 = vunpack.i.l.bf16 %v12008_v14 }
 0x4bd   : > { %3304 = vmatpush.msrb.mxu1 %v3109_v5  ;;  %3330 = vmatpush.msra.mxu2 %v3110_v25  ;;  %v12017_v25 = vld [vmem:[#allocation10] sm:$0xff] }
 0x4be   : > { %3280 = vmatpush.msrb.mxu0 %v3031_v52  ;;  %v2990_v5 = vsel %vm983_vm9, %v7927_v46, %v7928_v39  ;;  %v16399_v52 = vunpack.i.h.bf16 %v11687_v47  ;;  %v8038_v47 = vunpack.i.h.bf16 %v11944_v10 }
 0x4bf   : > { %3305 = vmatpush.msrb.mxu1 %v3066_v38  ;;  %v16400_v38 = vld [vmem:[#allocation107_spill] sm:$0xff] }
 0x4c0   : > { %3281 = vmatpush.msrb.mxu0 %v2988_v37  ;;  %v7993_v37 = vunpack.i.h.bf16 %v11917_v50  ;;  %v16402_v50 = vunpack.i.l.bf16 %v11829_v55 }
 0x4c1   : > { %v11952_v20 = vpop.permute.xlu2 %8050  ;;  %3306 = vmatpush.msrb.mxu1 %v11802_v1  ;;  %v16398_v1 = vld [vmem:[#allocation108_spill] sm:$0xff] }
 0x4c2   : > { %v8052_v18 = vunpack.i.l.bf16 %v11952_v20  ;;  %v8053_v24 = vunpack.i.h.bf16 %v11952_v20  ;;  %v2945_v20 = vsel %vm939_vm6, %v7902_v21, %v7903_v41  ;;  %v2872_v42 = vmul.f32 %v16329_v26, %v16398_v1 }
 0x4c3   : > { %3282 = vmatpush.msrb.mxu0 %v2945_v20  ;;  %v3112_v1 = vsel %vm1124_vm11, %v7992_v63, %v7993_v37 }
 0x4c4   : > { %v3231_v60 = vsel %vm1246_vm12, %v8043_v59, %v8052_v18  ;;  %v3188_v59 = vsel %vm1202_vm13, %v8028_v33, %v8032_v9  ;;  %v3067_v33 = vsel %vm1071_vm7, %v7917_v53, %v16396_v51  ;;  %v3033_v53 = vsel %vm1036_vm10, %v16397_v3, %v7938_v13 }
 0x4c5   : > { %3353 = vmatpush.msra.mxu3 %v3231_v60  ;;  %3331 = vmatpush.msra.mxu2 %v3067_v33  ;;  %v2989_v60 = vsel %vm983_vm9, %v7923_v62, %v7927_v46  ;;  %v3232_v21 = vsel %vm1246_vm12, %v8052_v18, %v8053_v24  ;;  %v8058_v62 = vunpack.i.h.bf16 %v12008_v14  ;;  %v2947_v46 = vsel %vm939_vm6, %v7907_v49, %v16399_v52 }
 0x4c6   : > { %3307 = vmatpush.msrb.mxu1 %v2989_v60  ;;  %3283 = vmatpush.msrb.mxu0 %v2872_v42  ;;  %v2873_v51 = vmul.f32 %v16331_v28, %v16400_v38  ;;  %v7982_v33 = vunpack.i.l.bf16 %v11919_v34  ;;  %v7972_v18 = vunpack.i.l.bf16 %v11878_v22  ;;  %v12063_v60 = vld [vmem:[#allocation10 + $0x8] sm:$0xff]  ;;  %v16403_v52 = vunpack.i.h.bf16 %v11884_v29 }
 0x4c7   : > { %3354 = vmatpush.msra.mxu3 %v3188_v59  ;;  %3332 = vmatpush.msra.mxu2 %v3033_v53  ;;  %v2946_v59 = vsel %vm939_vm6, %v7903_v41, %v7907_v49  ;;  %v8013_v41 = vunpack.i.h.bf16 %v11936_v61  ;;  %v3189_v49 = vsel %vm1202_vm13, %v8032_v9, %v8033_v36  ;;  %v3234_v3 = vsel %vm1246_vm12, %v8057_v58, %v8058_v62 }
 0x4c8   : > { %3308 = vmatpush.msrb.mxu1 %v2946_v59  ;;  %7170 = vmatmul.msk.f32.vlgmr.msrb.gmra.mxu0 %vm1910_vm15, %v12017_v25  ;;  %v8018_v53 = vunpack.i.h.bf16 %v11940_v32  ;;  %v3034_v9 = vsel %vm1036_vm10, %v7938_v13, %v7982_v33  ;;  %v2991_v61 = vsel %vm983_vm9, %v7928_v39, %v7972_v18  ;;  %v7983_v13 = vunpack.i.h.bf16 %v11919_v34 }
 0x4c9   : > { %3355 = vmatpush.msra.mxu3 %v3154_v17  ;;  %3333 = vmatpush.msra.mxu2 %v2990_v5  ;;  %v8037_v17 = vunpack.i.l.bf16 %v11944_v10  ;;  %v3155_v12 = vsel %vm842_vm3, %v8012_v45, %v8013_v41  ;;  %v7998_v45 = vunpack.i.h.bf16 %v11910_v27  ;;  %v12075_v5 = vpop.f32.mrf.mxu0  ;;  %v16401_v34 = vunpack.i.h.bf16 %v11829_v55  ;;  %v2569_v55 = vpop.f32.mrf.mxu1  ;;  %v16412_v10 = vld [vmem:[#allocation80_spill] sm:$0xff] }
 0x4ca   : > { %3379 = vmatpush.msra.mxu0 %v3232_v21  ;;  %3309 = vmatpush.msrb.mxu1 %v2873_v51  ;;  %v3113_v39 = vsel %vm1124_vm11, %v7993_v37, %v7997_v19  ;;  %v3035_v21 = vsel %vm1036_vm10, %v7982_v33, %v7983_v13  ;;  %v16405_v51 = vunpack.i.h.bf16 %v11878_v22  ;;  %v16407_v22 = vunpack.i.l.bf16 %v11787_v23  ;;  %v16414_v27 = vld [vmem:[#allocation104_spill] sm:$0xff] }
 0x4cb   : > { %3356 = vmatpush.msra.mxu3 %v3111_v30  ;;  %3334 = vmatpush.msra.mxu2 %v2947_v46  ;;  %v8017_v30 = vunpack.i.l.bf16 %v11940_v32  ;;  %v3191_v20 = vsel %vm1202_vm13, %v8037_v17, %v8038_v47  ;;  %v3069_v63 = vsel %vm1071_vm7, %v16402_v50, %v16401_v34  ;;  %v3114_v59 = vsel %vm1124_vm11, %v7997_v19, %v7998_v45  ;;  %v16413_v19 = vld [vmem:[#allocation96_spill] sm:$0xff]  ;;  %v16415_v34 = vld [vmem:[#allocation103_spill] sm:$0xff] }
 0x4cc   : > { %7173 = vmatmul.msk.f32.vlgmr.msrb.gmra.mxu1 %vm1910_vm15, %v12017_v25  ;;  %3380 = vmatpush.msra.mxu0 %v3189_v49  ;;  %v16404_v46 = vunpack.i.l.bf16 %v11884_v29  ;;  %v2992_v33 = vsel %vm983_vm9, %v7972_v18, %v16405_v51  ;;  %v16406_v29 = vunpack.i.h.bf16 %v11896_v44  ;;  %v12115_v49 = vld [vmem:[#allocation10 + $0x10] sm:$0xff]  ;;  %v2570_v32 = vadd.f32 %v2569_v55, %v16412_v10 }
 0x4cd   : > { %3357 = vmatpush.msra.mxu3 %v11872_v31  ;;  %v2874_v31 = vmul.f32 %v16232_v2, %v11215_v48  ;;  %v3233_v48 = vsel %vm1246_vm12, %v8053_v24, %v8057_v58  ;;  %v3190_v24 = vsel %vm1202_vm13, %v8033_v36, %v8037_v17  ;;  %v3156_v42 = vsel %vm842_vm3, %v8013_v41, %v8017_v30 }
 0x4ce   : > { %3405 = vmatpush.msra.mxu1 %v3233_v48  ;;  %3381 = vmatpush.msra.mxu0 %v3155_v12  ;;  %v3157_v11 = vsel %vm842_vm3, %v8017_v30, %v8018_v53  ;;  %v7987_v36 = vunpack.i.l.bf16 %v11896_v44  ;;  %v7953_v58 = vunpack.i.h.bf16 %v11787_v23  ;;  %v3071_v38 = vsel %vm1071_vm7, %v16404_v46, %v16403_v52  ;;  %v3184_v30 = vpop.permute.xlu0 %3183 }
 0x4cf   : > { %3335 = vmatpush.msra.mxu2 %v2874_v31  ;;  %3358 = vmatpush.msra.mxu3 %v3034_v9  ;;  %v7957_v41 = vunpack.i.l.bf16 %v11874_v4  ;;  %v2595_v31 = vpop.f32.mrf.mxu2  ;;  %v2876_v48 = vmul.f32 %v16378_v40, %v11156_v15  ;;  %v16409_v44 = vunpack.i.l.bf16 %v11880_v57 }
 0x4d0   : > { %7176 = vmatmul.msk.f32.vlgmr.msra.gmra.mxu2 %vm1910_vm15, %v12017_v25  ;;  %3406 = vmatpush.msra.mxu1 %v3190_v24  ;;  %v3036_v17 = vsel %vm1036_vm10, %v7983_v13, %v7987_v36  ;;  %v3037_v37 = vsel %vm1036_vm10, %v7987_v36, %v16406_v29  ;;  %v2949_v18 = vsel %vm939_vm6, %v16407_v22, %v7953_v58  ;;  %v16410_v24 = vld [vmem:[#allocation106_spill] sm:$0xff] }
 0x4d1   : > { %3431 = vmatpush.msrb.mxu2 %v3234_v3  ;;  %3382 = vmatpush.msra.mxu0 %v3112_v1  ;;  %v2546_v3 = vpop.f32.mrf.mxu0  ;;  %v2950_v12 = vsel %vm939_vm6, %v7953_v58, %v7957_v41  ;;  %v2572_v14 = vpop.f32.mrf.mxu1  ;;  %v2596_v50 = vadd.f32 %v2595_v31, %v16412_v10 }
 0x4d2   : > { %3359 = vmatpush.msra.mxu3 %v2991_v61  ;;  %7171 = vmatmul.msk.f32.gmra.mxu0 %vm1910_vm15, %v12063_v60 }
 0x4d3   : > { %3432 = vmatpush.msrb.mxu2 %v3191_v20  ;;  %3407 = vmatpush.msra.mxu1 %v3156_v42  ;;  %v2736_v46 = vmul.f32 0.5, %v2596_v50 }
 0x4d4   : > { %3383 = vmatpush.msra.mxu0 %v3069_v63  ;;  %3360 = vmatpush.msra.mxu3 %v11842_v8  ;;  %v2875_v8 = vmul.f32 %v16376_v16, %v11220_v0  ;;  %v7958_v0 = vunpack.i.h.bf16 %v11874_v4  ;;  %v16408_v4 = vunpack.i.h.bf16 %v11880_v57  ;;  %v2878_v57 = vmul.f32 %v16364_v54, %v11265_v43  ;;  %v16411_v43 = vld [vmem:[#allocation101_spill] sm:$0xff]  ;;  %v16416_v63 = vld [vmem:[#allocation98_spill] sm:$0xff] }
 0x4d5   : > { %3433 = vmatpush.msrb.mxu2 %v3157_v11  ;;  %3408 = vmatpush.msra.mxu1 %v3113_v39  ;;  %v3115_v61 = vsel %vm1124_vm11, %v7998_v45, %v16411_v43  ;;  %v9207_v45 = vmov 5   ;;  %v2735_v11 = vmul.f32 0.5, %v2570_v32 }
 0x4d6   : > { %3384 = vmatpush.msra.mxu0 %v3035_v21  ;;  %7174 = vmatmul.msk.f32.gmra.mxu1 %vm1910_vm15, %v12063_v60  ;;  %v2994_v23 = vsel %vm983_vm9, %v16409_v44, %v16408_v4  ;;  %v2951_v9 = vsel %vm939_vm6, %v7957_v41, %v7958_v0  ;;  %v2952_v39 = vsel %vm939_vm6, %v7958_v0, %v16416_v63  ;;  %v16418_v21 = vld [vmem:[#allocation30_spill] sm:$0xff] }
 0x4d7   : > { %3434 = vmatpush.msrb.mxu2 %v3114_v59  ;;  %3409 = vmatpush.msra.mxu1 %v11904_v56  ;;  %v3227_v56 = vpop.permute.xlu2 %3226  ;;  %v2598_v20 = vpop.f32.mrf.mxu2  ;;  %v16417_v59 = vld [vmem:[#allocation109_spill] sm:$0xff] }
 0x4d8   : > { %7177 = vmatmul.msk.f32.gmra.mxu2 %vm1910_vm15, %v12063_v60  ;;  %3385 = vmatpush.msra.mxu0 %v2992_v33  ;;  %v3235_v15 = vsel %vm1246_vm12, %v8058_v62, %v3227_v56  ;;  %v3192_v62 = vsel %vm1202_vm13, %v8038_v47, %v3184_v30  ;;  %v2544_v47 = vadd.f32 %v12075_v5, %v16412_v10  ;;  %v12174_v5 = vld [vmem:[#allocation13] sm:$0xff] }
 0x4d9   : > { %3435 = vmatpush.msrb.mxu2 %v3071_v38  ;;  %3361 = vmatpush.msra.mxu3 %v2875_v8  ;;  %v12172_v1 = vpop.f32.mrf.mxu1  ;;  %v2879_v58 = vmul.f32 %v16418_v21, %v16417_v59  ;;  %v16419_v38 = vld [vmem:[#allocation85_spill] sm:$0xff] }
 0x4da   : > { %3410 = vmatpush.msra.mxu1 %v3036_v17  ;;  %3386 = vmatpush.msra.mxu0 %v2949_v18  ;;  %v2734_v13 = vmul.f32 0.5, %v2544_v47  ;;  %v2547_v8 = vadd.f32 %v2546_v3, %v16419_v38  ;;  %v2573_v51 = vadd.f32 %v2572_v14, %v16419_v38  ;;  %v2599_v29 = vadd.f32 %v2598_v20, %v16419_v38 }
 0x4db   : > { %3436 = vmatpush.msrb.mxu2 %v3037_v37  ;;  %7179 = vmatmul.msk.f32.vlgmr.msra.gmra.mxu3 %vm1910_vm15, %v12017_v25 }
 0x4dc   : > { %7172 = vmatmul.msk.f32.gmra.mxu0 %vm1910_vm15, %v12115_v49  ;;  %3411 = vmatpush.msra.mxu1 %v11893_v6  ;;  %v2877_v6 = vmul.f32 %v16380_v7, %v11160_v35  ;;  %v3158_v35 = vsel %vm842_vm3, %v8018_v53, %v16410_v24  ;;  %v12164_v53 = vpop.f32.mrf.mxu0  ;;  %8428 = vtanh.f32 %v2734_v13  ;;  %v2742_v37 = vmul.f32 0.5, %v2547_v8 }
 0x4dd   : > { %3437 = vmatpush.msrb.mxu2 %v2994_v23  ;;  %3387 = vmatpush.msra.mxu0 %v2876_v48  ;;  %8430 = vtanh.f32 %v2735_v11  ;;  %v2743_v56 = vmul.f32 0.5, %v2573_v51  ;;  %v2744_v3 = vmul.f32 0.5, %v2599_v29 }
 0x4de   : > { %3412 = vmatpush.msra.mxu1 %v2950_v12  ;;  %3457 = vmatpush.msrb.mxu3 %v3235_v15  ;;  %8432 = vtanh.f32 %v2736_v46 }
 0x4df   : > { %3438 = vmatpush.msrb.mxu2 %v2951_v9  ;;  %7175 = vmatmul.msk.f32.gmra.mxu1 %vm1910_vm15, %v12115_v49  ;;  %v12185_v36 = vpop.f32.mrf.mxu2 }
 0x4e0   : > { %7178 = vmatmul.msk.f32.gmra.mxu2 %vm1910_vm15, %v12115_v49  ;;  %3413 = vmatpush.msra.mxu1 %v2877_v6 }
 0x4e1   : > { %3439 = vmatpush.msrb.mxu2 %v2878_v57  ;;  %3458 = vmatpush.msrb.mxu3 %v3192_v62 }
 0x4e2   : > { %8065 = vset.pattern.permute.xlu2 %v9207_v45  ;;  %v8429_v17 = vpop.eup %8428 }
 0x4e3   : > { %3459 = vmatpush.msrb.mxu3 %v3158_v35  ;;  %5709 = vperm.xlu2 %8065, %v12174_v5   ;;  %v8431_v0 = vpop.eup %8430  ;;  %v2782_v44 = vmul.f32 0.5, %v8429_v17 }
 0x4e4   : > { %7182 = vmatmul.msk.f32.vlgmr.msra.gmra.mxu0 %vm1910_vm15, %v12017_v25  ;;  %7180 = vmatmul.msk.f32.gmra.mxu3 %vm1910_vm15, %v12063_v60  ;;  %v2783_v23 = vmul.f32 0.5, %v8431_v0  ;;  %v8433_v30 = vpop.eup %8432 }
 0x4e5   : > { %3460 = vmatpush.msrb.mxu3 %v3115_v61  ;;  %v12208_v6 = vadd.f32 0.5, %v2782_v44  ;;  %v2784_v24 = vmul.f32 0.5, %v8433_v30 }
 0x4e6   : > { %v12210_v57 = vadd.f32 0.5, %v2783_v23 }
 0x4e7   : > { %3461 = vmatpush.msrb.mxu3 %v16413_v19  ;;  %7185 = vmatmul.msk.f32.vlgmr.msra.gmra.mxu1 %vm1910_vm15, %v12017_v25  ;;  %v2699_v22 = vpop.f32.mrf.mxu2  ;;  %v12220_v45 = vmul.f32 %v12208_v6, %v12208_v6  ;;  %v12227_v11 = vadd.f32 0.5, %v2784_v24  ;;  %v12257_v44 = vsub.f32 1.0, %v12208_v6 }
 0x4e8   : > { %7188 = vmatmul.msk.f32.vlgmr.msrb.gmra.mxu2 %vm1910_vm15, %v12017_v25  ;;  %v2647_v52 = vpop.f32.mrf.mxu0  ;;  %v2700_v15 = vadd.f32 %v2699_v22, %v16412_v10  ;;  %v12260_v23 = vsub.f32 1.0, %v12210_v57 }
 0x4e9   : > { %3462 = vmatpush.msrb.mxu3 %v16414_v27  ;;  %v2673_v41 = vpop.f32.mrf.mxu1  ;;  %v2648_v31 = vadd.f32 %v2647_v52, %v16412_v10  ;;  %v9208_v27 = vmov 3   ;;  %16420 = vst [vmem:[#allocation105_spill] sm:$0xff] %v12227_v11  ;;  %v12251_v22 = vsub.f32 1.0, %v12227_v11 }
 0x4ea   : > { %v2674_v4 = vadd.f32 %v2673_v41, %v16412_v10  ;;  %v2740_v20 = vmul.f32 0.5, %v2700_v15  ;;  %8063 = vset.pattern.permute.xlu1 %v9208_v27  ;;  %v12295_v27 = vmul.f32 %v12260_v23, %v12260_v23 }
 0x4eb   : > { %3463 = vmatpush.msrb.mxu3 %v16415_v34  ;;  %v2738_v48 = vmul.f32 0.5, %v2648_v31  ;;  %4635 = vperm.xlu1 %8063, %v12174_v5   ;;  %16424 = vst [vmem:[#allocation102_spill] sm:$0xff] %v12251_v22 }
 0x4ec   : > { %7183 = vmatmul.msk.f32.gmra.mxu0 %vm1910_vm15, %v12063_v60  ;;  %7181 = vmatmul.msk.f32.gmra.mxu3 %vm1910_vm15, %v12115_v49  ;;  %v2739_v9 = vmul.f32 0.5, %v2674_v4 }
 0x4ed   : > { %3464 = vmatpush.msrb.mxu3 %v2952_v39 }
 0x4ee   : > { %v2621_v42 = vpop.f32.mrf.mxu3 }
 0x4ef   : > { %v2622_v55 = vadd.f32 %v2621_v42, %v16412_v10  ;;  %3465 = vmatpush.msrb.mxu3 %v2879_v58  ;;  %7186 = vmatmul.msk.f32.gmra.mxu1 %vm1910_vm15, %v12063_v60  ;;  %v2702_v32 = vpop.f32.mrf.mxu2 }
 0x4f0   : > { %7189 = vmatmul.msk.f32.gmra.mxu2 %vm1910_vm15, %v12063_v60  ;;  %v2703_v59 = vadd.f32 %v2702_v32, %v16419_v38  ;;  %v12287_v32 = vmul.f32 %v12251_v22, %v12251_v22 }
 0x4f1   : > { %v2737_v33 = vmul.f32 0.5, %v2622_v55  ;;  %v2676_v62 = vpop.f32.mrf.mxu1 }
 0x4f2   : > { %v2677_v19 = vadd.f32 %v2676_v62, %v16419_v38  ;;  %v2748_v29 = vmul.f32 0.5, %v2703_v59 }
 0x4f3   : > { %8434 = vtanh.f32 %v2737_v33  ;;  %v12239_v33 = vmul.f32 %v12227_v11, %v12227_v11 }
 0x4f4   : > { %7184 = vmatmul.msk.f32.gmra.mxu0 %vm1910_vm15, %v12115_v49  ;;  %7191 = vmatmul.msk.f32.vlgmr.msrb.gmra.mxu3 %vm1910_vm15, %v12017_v25  ;;  %8436 = vtanh.f32 %v2742_v37  ;;  %v2650_v25 = vpop.f32.mrf.mxu0  ;;  %v2747_v55 = vmul.f32 0.5, %v2677_v19  ;;  %v12291_v19 = vmul.f32 %v12257_v44, %v12257_v44 }
 0x4f5   : > { %8438 = vtanh.f32 %v2743_v56  ;;  %v2651_v14 = vadd.f32 %v2650_v25, %v16419_v38 }
 0x4f6   : > { %v2624_v18 = vpop.f32.mrf.mxu3  ;;  %8440 = vtanh.f32 %v2738_v48 }
 0x4f7   : > { %7187 = vmatmul.msk.f32.gmra.mxu1 %vm1910_vm15, %v12115_v49  ;;  %8442 = vtanh.f32 %v2744_v3  ;;  %v2746_v13 = vmul.f32 0.5, %v2651_v14  ;;  %v2625_v50 = vadd.f32 %v2624_v18, %v16419_v38 }
 0x4f8   : > { %7190 = vmatmul.msk.f32.gmra.mxu2 %vm1910_vm15, %v12115_v49  ;;  %8444 = vtanh.f32 %v2739_v9 }
 0x4f9   : > { %v8435_v12 = vpop.eup %8434  ;;  %8446 = vtanh.f32 %v2740_v20  ;;  %v2745_v52 = vmul.f32 0.5, %v2625_v50 }
 0x4fa   : > { %v8437_v35 = vpop.eup %8436  ;;  %v2785_v43 = vmul.f32 0.5, %v8435_v12  ;;  %8448 = vtanh.f32 %v2746_v13 }
 0x4fb   : > { %v8439_v47 = vpop.eup %8438  ;;  %v2790_v34 = vmul.f32 0.5, %v8437_v35  ;;  %8450 = vtanh.f32 %v2745_v52 }
 0x4fc   : > { %7192 = vmatmul.msk.f32.gmra.mxu3 %vm1910_vm15, %v12063_v60  ;;  %v12224_v60 = vmul.f32 %v12210_v57, %v12210_v57  ;;  %v8441_v42 = vpop.eup %8440  ;;  %v2791_v39 = vmul.f32 0.5, %v8439_v47  ;;  %v12231_v58 = vadd.f32 0.5, %v2785_v43  ;;  %8452 = vtanh.f32 %v2747_v55 }
 0x4fd   : > { %v8443_v63 = vpop.eup %8442  ;;  %v2786_v8 = vmul.f32 0.5, %v8441_v42  ;;  %v12241_v31 = vadd.f32 0.5, %v2790_v34  ;;  %8454 = vtanh.f32 %v2748_v29 }
 0x4fe   : > { %v12215_v61 = vpop.f32.mrf.mxu3  ;;  %16421 = vst [vmem:[#allocation99_spill] sm:$0xff] %v12231_v58  ;;  %v4477_v46 = vadd.f32 %v12224_v60, %v12220_v45  ;;  %v8445_v51 = vpop.eup %8444  ;;  %v2792_v41 = vmul.f32 0.5, %v8443_v63  ;;  %v12243_v17 = vadd.f32 0.5, %v2791_v39  ;;  %v12247_v37 = vmul.f32 %v12231_v58, %v12231_v58 }
 0x4ff   : > { %16422 = vst [vmem:[#allocation89_spill] sm:$0xff] %v12241_v31  ;;  %v8447_v56 = vpop.eup %8446  ;;  %v12253_v18 = vadd.f32 0.5, %v2786_v8  ;;  %v2787_v48 = vmul.f32 0.5, %v8445_v51  ;;  %v12274_v14 = vsub.f32 1.0, %v12241_v31 }
 0x500   : > { %16423 = vst [vmem:[#allocation78_spill] sm:$0xff] %v12243_v17  ;;  %v4478_v4 = vadd.f32 %v4477_v46, %v12239_v33  ;;  %v12262_v3 = vadd.f32 0.5, %v2792_v41  ;;  %v8449_v30 = vpop.eup %8448  ;;  %v12270_v15 = vmul.f32 %v12243_v17, %v12243_v17  ;;  %v12277_v62 = vsub.f32 1.0, %v12243_v17 }
 0x501   : > { %16425 = vst [vmem:[#allocation108_spill] sm:$0xff] %v12253_v18  ;;  %v8451_v9 = vpop.eup %8450  ;;  %v2788_v24 = vmul.f32 0.5, %v8447_v56  ;;  %v12281_v35 = vmul.f32 %v12253_v18, %v12253_v18  ;;  %v12283_v20 = vadd.f32 0.5, %v2787_v48  ;;  %v2794_v13 = vmul.f32 0.5, %v8449_v30 }
 0x502   : > { %16426 = vst [vmem:[#allocation107_spill] sm:$0xff] %v12262_v3  ;;  %v4479_v12 = vadd.f32 %v4478_v4, %v12247_v37  ;;  %v2793_v43 = vmul.f32 0.5, %v8451_v9  ;;  %v8453_v47 = vpop.eup %8452  ;;  %v12299_v42 = vmul.f32 %v12262_v3, %v12262_v3  ;;  %v12308_v59 = vmul.f32 %v12274_v14, %v12274_v14 }
 0x503   : > { %16427 = vst [vmem:[#allocation106_spill] sm:$0xff] %v12274_v14  ;;  %v12312_v55 = vmul.f32 %v12277_v62, %v12277_v62  ;;  %v12314_v52 = vadd.f32 0.5, %v2788_v24  ;;  %v8455_v8 = vpop.eup %8454  ;;  %v12319_v51 = vmul.f32 %v12283_v20, %v12283_v20  ;;  %v12322_v41 = vsub.f32 1.0, %v12231_v58 }
 0x504   : > { %7193 = vmatmul.msk.f32.gmra.mxu3 %vm1910_vm15, %v12115_v49  ;;  %16428 = vst [vmem:[#allocation101_spill] sm:$0xff] %v12277_v62  ;;  %v12303_v50 = vadd.f32 0.5, %v2793_v43  ;;  %v4480_v39 = vadd.f32 %v4479_v12, %v12281_v35  ;;  %v2795_v29 = vmul.f32 0.5, %v8453_v47  ;;  %v4537_v56 = vadd.f32 %v12295_v27, %v12291_v19 }
 0x505   : > { %16429 = vst [vmem:[#allocation80_spill] sm:$0xff] %v12283_v20  ;;  %v12331_v48 = vsub.f32 1.0, %v12262_v3  ;;  %v5620_v24 = vadd.f32 %v12312_v55, %v12308_v59  ;;  %v12344_v43 = vmul.f32 %v12314_v52, %v12314_v52  ;;  %v2796_v47 = vmul.f32 0.5, %v8455_v8 }
 0x506   : > { %v2725_v0 = vpop.f32.mrf.mxu3  ;;  %16430 = vst [vmem:[#allocation96_spill] sm:$0xff] %v12303_v50  ;;  %v4481_v12 = vadd.f32 %v4480_v39, %v12319_v51  ;;  %v4538_v8 = vadd.f32 %v4537_v56, %v12287_v32 }
 0x507   : > { %v2726_v49 = vadd.f32 %v2725_v0, %v16412_v10  ;;  %v12266_v10 = vmul.f32 %v12241_v31, %v12241_v31  ;;  %16431 = vst [vmem:[#allocation104_spill] sm:$0xff] %v12314_v52  ;;  %v12326_v0 = vmul.f32 %v12303_v50, %v12303_v50  ;;  %v12376_v54 = vadd.f32 0.5, %v2796_v47 }
 0x508   : > { %16432 = vst [vmem:[#allocation103_spill] sm:$0xff] %v12322_v41 }
 0x509   : > { %v2741_v25 = vmul.f32 0.5, %v2726_v49  ;;  %v5560_v34 = vadd.f32 %v12270_v15, %v12266_v10  ;;  %16433 = vst [vmem:[#allocation98_spill] sm:$0xff] %v12331_v48 }
 0x50a   : > { %16439 = vst [vmem:[#allocation113_spill] sm:$0xff] %v12376_v54 }
 0x50b   : > { %8456 = vtanh.f32 %v2741_v25  ;;  %v12336_v25 = vsub.f32 1.0, %v12303_v50  ;;  %v5561_v9 = vadd.f32 %v5560_v34, %v12299_v42  ;;  %v12357_v34 = vmul.f32 %v12331_v48, %v12331_v48 }
 0x50d   : > { %16435 = vst [vmem:[#allocation85_spill] sm:$0xff] %v12336_v25  ;;  %v5562_v39 = vadd.f32 %v5561_v9, %v12326_v0  ;;  %v4482_v9 = vadd.f32 %v4481_v12, %v12344_v43  ;;  %v5621_v21 = vadd.f32 %v5620_v24, %v12357_v34  ;;  %v12390_v12 = vsub.f32 1.0, %v12283_v20 }
 0x50e   : > { %v2728_v63 = vpop.f32.mrf.mxu3  ;;  %v4090_v20 = vrot.slane %v12295_v27, 4  ;;  %v5226_v17 = vrot.slane %v12357_v34, 4 }
 0x50f   : > { %v2729_v46 = vadd.f32 %v2728_v63, %v16419_v38  ;;  %v12333_v38 = vadd.f32 0.5, %v2794_v13  ;;  %v12348_v13 = vmul.f32 %v12322_v41, %v12322_v41  ;;  %v12350_v63 = vadd.f32 0.5, %v2795_v29  ;;  %16441 = vst [vmem:[#allocation115_spill] sm:$0xff] %v12390_v12  ;;  %v16448_v41 = vld [vmem:[#allocation32_spill] sm:$0xff] }
 0x510   : > { %v12369_v29 = vmul.f32 %v12336_v25, %v12336_v25  ;;  %v2602_v58 = vadd.f32 %v12185_v36, %v16448_v41  ;;  %v5214_v36 = vrot.slane %v12308_v59, 4 }
 0x511   : > { %v8457_v49 = vpop.eup %8456  ;;  %16434 = vst [vmem:[#allocation109_spill] sm:$0xff] %v12333_v38  ;;  %v2749_v4 = vmul.f32 0.5, %v2729_v46  ;;  %v12381_v56 = vsub.f32 1.0, %v12333_v38  ;;  %v12385_v2 = vmul.f32 %v12350_v63, %v12350_v63  ;;  %v4539_v40 = vadd.f32 %v4538_v8, %v12348_v13 }
 0x512   : > { %v2789_v30 = vmul.f32 0.5, %v8457_v49  ;;  %16436 = vst [vmem:[#allocation110_spill] sm:$0xff] %v12350_v63  ;;  %v12361_v49 = vmul.f32 %v12333_v38, %v12333_v38  ;;  %v5622_v28 = vadd.f32 %v5621_v21, %v12369_v29  ;;  %v12400_v38 = vmul.f32 %v12376_v54, %v12376_v54 }
 0x513   : > { %8458 = vtanh.f32 %v2749_v4  ;;  %v12365_v4 = vsub.f32 1.0, %v12253_v18  ;;  %16440 = vst [vmem:[#allocation114_spill] sm:$0xff] %v12381_v56  ;;  %v12404_v8 = vmul.f32 %v12381_v56, %v12381_v56 }
 0x514   : > { %v12352_v46 = vadd.f32 0.5, %v2789_v30  ;;  %v5563_v7 = vadd.f32 %v5562_v39, %v12361_v49 }
 0x515   : > { %16438 = vst [vmem:[#allocation112_spill] sm:$0xff] %v12365_v4  ;;  %v12394_v47 = vmul.f32 %v12365_v4, %v12365_v4 }
 0x516   : > { %16437 = vst [vmem:[#allocation111_spill] sm:$0xff] %v12352_v46  ;;  %v12373_v30 = vmul.f32 %v12352_v46, %v12352_v46  ;;  %v5564_v39 = vadd.f32 %v5563_v7, %v12385_v2  ;;  %v12417_v7 = vmul.f32 %v12390_v12, %v12390_v12  ;;  %v12420_v21 = vsub.f32 1.0, %v12352_v46 }
 0x518   : > { %v4483_v16 = vadd.f32 %v4482_v9, %v12373_v30  ;;  %v12407_v9 = vsub.f32 1.0, %v12350_v63  ;;  %16445 = vst [vmem:[#allocation119_spill] sm:$0xff] %v12420_v21  ;;  %v5565_v63 = vadd.f32 %v5564_v39, %v12400_v38 }
 0x519   : > { %v8459_v26 = vpop.eup %8458 }
 0x51a   : > { %v2797_v24 = vmul.f32 0.5, %v8459_v26  ;;  %4484 = vadd.xlane.f32.xlu2 %v4483_v16  ;;  %16442 = vst [vmem:[#allocation116_spill] sm:$0xff] %v12407_v9  ;;  %v4540_v26 = vadd.f32 %v4539_v40, %v12394_v47  ;;  %v12413_v16 = vsub.f32 1.0, %v12314_v52  ;;  %v12429_v40 = vsub.f32 1.0, %v12376_v54 }
 0x51b   : > { %v12433_v50 = vmul.f32 %v12407_v9, %v12407_v9 }
 0x51c   : > { %v12409_v25 = vadd.f32 0.5, %v2797_v24  ;;  %16444 = vst [vmem:[#allocation118_spill] sm:$0xff] %v12413_v16  ;;  %v5623_v24 = vadd.f32 %v5622_v28, %v12404_v8  ;;  %v4541_v46 = vadd.f32 %v4540_v26, %v12417_v7  ;;  %v12442_v12 = vmul.f32 %v12413_v16, %v12413_v16 }
 0x51d   : > { %16446 = vst [vmem:[#allocation120_spill] sm:$0xff] %v12429_v40  ;;  %v12446_v28 = vmul.f32 %v12420_v21, %v12420_v21  ;;  %v12451_v54 = vmul.f32 %v12429_v40, %v12429_v40  ;;  %v3648_v21 = vrot.slane %v12239_v33, 4  ;;  %v3642_v16 = vrot.slane %v12224_v60, 4 }
 0x51e   : > { %16443 = vst [vmem:[#allocation117_spill] sm:$0xff] %v12409_v25  ;;  %v12424_v56 = vmul.f32 %v12409_v25, %v12409_v25  ;;  %v12436_v52 = vsub.f32 1.0, %v12409_v25  ;;  %v5624_v39 = vadd.f32 %v5623_v24, %v12433_v50  ;;  %v4542_v25 = vadd.f32 %v4541_v46, %v12442_v12 }
 0x51f   : > { %v3636_v24 = vrot.slane %v12220_v45, 4  ;;  %v4084_v46 = vrot.slane %v12291_v19, 4  ;;  %v3643_v4 = vadd.f32 %v3642_v16, %v12224_v60 }
 0x520   : > { %16447 = vst [vmem:[#allocation121_spill] sm:$0xff] %v12436_v52  ;;  %v5566_v48 = vadd.f32 %v5565_v63, %v12424_v56  ;;  %v12456_v63 = vmul.f32 %v12436_v52, %v12436_v52  ;;  %v4543_v26 = vadd.f32 %v4542_v25, %v12446_v28  ;;  %v5625_v9 = vadd.f32 %v5624_v39, %v12451_v54 }
 0x521   : > { %v3649_v25 = vadd.f32 %v3648_v21, %v12239_v33  ;;  %v4778_v39 = vrot.slane %v12299_v42, 4  ;;  %v3637_v3 = vadd.f32 %v3636_v24, %v12220_v45  ;;  %v4085_v18 = vadd.f32 %v4084_v46, %v12291_v19 }
 0x522   : > { %5567 = vadd.xlane.f32.xlu2 %v5566_v48  ;;  %v4096_v48 = vrot.slane %v12287_v32, 4  ;;  %v5626_v40 = vadd.f32 %v5625_v9, %v12456_v63  ;;  %4544 = vadd.xlane.f32.xlu1 %v4543_v26  ;;  %v4091_v9 = vadd.f32 %v4090_v20, %v12295_v27  ;;  %v3644_v21 = vrot.slane %v3643_v4, 2 }
 0x523   : > { %v3650_v62 = vrot.slane %v3649_v25, 2  ;;  %v3638_v33 = vrot.slane %v3637_v3, 2  ;;  %v2752_v45 = vmul.f32 0.5, %v2602_v58  ;;  %v4766_v19 = vrot.slane %v12266_v10, 4 }
 0x524   : > { %v4097_v52 = vadd.f32 %v4096_v48, %v12287_v32  ;;  %v4086_v32 = vrot.slane %v4085_v18, 2  ;;  %v4092_v48 = vrot.slane %v4091_v9, 2  ;;  %v3645_v27 = vadd.f32 %v3644_v21, %v3643_v4 }
 0x525   : > { %v3651_v24 = vadd.f32 %v3650_v62, %v3649_v25  ;;  %v3639_v20 = vadd.f32 %v3638_v33, %v3637_v3  ;;  %v5227_v46 = vadd.f32 %v5226_v17, %v12357_v34  ;;  %8460 = vtanh.f32 %v2752_v45 }
 0x526   : > { %v4098_v26 = vrot.slane %v4097_v52, 2  ;;  %v4093_v14 = vadd.f32 %v4092_v48, %v4091_v9  ;;  %v4767_v58 = vadd.f32 %v4766_v19, %v12266_v10  ;;  %v3646_v11 = vrot.slane %v3645_v27, 1 }
 0x527   : > { %v3652_v22 = vrot.slane %v3651_v24, 1  ;;  %v3640_v25 = vrot.slane %v3639_v20, 1  ;;  %v5228_v3 = vrot.slane %v5227_v46, 2 }
 0x528   : > { %v4099_v16 = vadd.f32 %v4098_v26, %v4097_v52  ;;  %v5215_v52 = vadd.f32 %v5214_v36, %v12308_v59  ;;  %v5220_v26 = vrot.slane %v12312_v55, 4  ;;  %v4094_v34 = vrot.slane %v4093_v14, 1 }
 0x529   : > { %v12486_v33 = vadd.f32 %v3652_v22, %v3651_v24  ;;  %v4768_v9 = vrot.slane %v4767_v58, 2  ;;  %v12494_v59 = vadd.f32 %v3646_v11, %v3645_v27  ;;  %v2576_v22 = vadd.f32 %v12172_v1, %v16448_v41 }
 0x52a   : > { %5627 = vadd.xlane.f32.xlu2 %v5626_v40  ;;  %v4779_v40 = vadd.f32 %v4778_v39, %v12299_v42  ;;  %v4772_v42 = vrot.slane %v12270_v15, 4  ;;  %v4087_v39 = vadd.f32 %v4086_v32, %v4085_v18  ;;  %v4100_v62 = vrot.slane %v4099_v16, 1 }
 0x52b   : > { %16449 = vst [vmem:[#allocation122_spill] sm:$0xff] %v12486_v33  ;;  %v8461_v10 = vpop.eup %8460  ;;  %v12492_v32 = vadd.f32 %v3640_v25, %v3639_v20  ;;  %v5216_v48 = vrot.slane %v5215_v52, 2  ;;  %v12501_v19 = vadd.f32 %v4094_v34, %v4093_v14  ;;  %v4769_v11 = vadd.f32 %v4768_v9, %v4767_v58 }
 0x52c   : > { %v4780_v60 = vrot.slane %v4779_v40, 2  ;;  %v4773_v4 = vadd.f32 %v4772_v42, %v12270_v15  ;;  %v4088_v17 = vrot.slane %v4087_v39, 1  ;;  %v12490_v21 = vadd.f32 %v4100_v62, %v4099_v16 }
 0x52d   : > { %v5229_v15 = vadd.f32 %v5228_v3, %v5227_v46  ;;  %v4120_v16 = vrot.slane %v12442_v12, 4  ;;  %v2800_v27 = vmul.f32 0.5, %v8461_v10  ;;  %v5217_v46 = vadd.f32 %v5216_v48, %v5215_v52 }
 0x52e   : > { %v4781_v31 = vadd.f32 %v4780_v60, %v4779_v40  ;;  %v2550_v40 = vadd.f32 %v12164_v53, %v16448_v41  ;;  %16450 = vst [vmem:[#allocation123_spill] sm:$0xff] %v12490_v21  ;;  %v4774_v45 = vrot.slane %v4773_v4, 2  ;;  %v5221_v60 = vadd.f32 %v5220_v26, %v12312_v55 }
 0x52f   : > { %v12499_v24 = vadd.f32 %v4088_v17, %v4087_v39  ;;  %v3672_v53 = vrot.slane %v12344_v43, 4  ;;  %v3660_v42 = vrot.slane %v12281_v35, 4  ;;  %v4108_v55 = vrot.slane %v12394_v47, 4  ;;  %v12510_v39 = vpop.f32.mrf.mxu0  ;;  %v12516_v17 = vpop.f32.mrf.mxu1 }
 0x530   : > { %v4782_v18 = vrot.slane %v4781_v31, 1  ;;  %v2750_v36 = vmul.f32 0.5, %v2550_v40  ;;  %v3666_v1 = vrot.slane %v12319_v51, 4  ;;  %v5230_v14 = vrot.slane %v5229_v15, 1 }
 0x531   : > { %v4775_v62 = vadd.f32 %v4774_v45, %v4773_v4  ;;  %v5222_v25 = vrot.slane %v5221_v60, 2  ;;  %v2751_v3 = vmul.f32 0.5, %v2576_v22  ;;  %v3673_v26 = vadd.f32 %v3672_v53, %v12344_v43 }
 0x532   : > { %v12505_v20 = vadd.f32 %v4782_v18, %v4781_v31  ;;  %v4121_v31 = vadd.f32 %v4120_v16, %v12442_v12  ;;  %v4114_v58 = vrot.slane %v12417_v7, 4  ;;  %v4802_v52 = vrot.slane %v12400_v38, 4 }
 0x533   : > { %v4770_v34 = vrot.slane %v4769_v11, 1  ;;  %8462 = vtanh.f32 %v2750_v36  ;;  %v5250_v18 = vrot.slane %v12451_v54, 4  ;;  %v3654_v9 = vrot.slane %v12247_v37, 4 }
 0x534   : > { %16451 = vst [vmem:[#allocation124_spill] sm:$0xff] %v12505_v20  ;;  %v5218_v40 = vrot.slane %v5217_v46, 1  ;;  %v3661_v4 = vadd.f32 %v3660_v42, %v12281_v35  ;;  %v4109_v10 = vadd.f32 %v4108_v55, %v12394_v47  ;;  %v3667_v43 = vadd.f32 %v3666_v1, %v12319_v51  ;;  %v12527_v20 = vpop.permute.xlu0 %3248 }
 0x535   : > { %v4776_v12 = vrot.slane %v4775_v62, 1  ;;  %v5223_v48 = vadd.f32 %v5222_v25, %v5221_v60  ;;  %v12523_v45 = vadd.f32 0.5, %v2800_v27  ;;  %8464 = vtanh.f32 %v2751_v3  ;;  %16453 = vst [vmem:[#allocation126_spill] sm:$0xff] %v12527_v20 }
 0x536   : > { %v3674_v22 = vrot.slane %v3673_v26, 2  ;;  %v4122_v53 = vrot.slane %v4121_v31, 2  ;;  %v4115_v16 = vadd.f32 %v4114_v58, %v12417_v7  ;;  %v4803_v36 = vadd.f32 %v4802_v52, %v12400_v38 }
 0x537   : > { %16452 = vst [vmem:[#allocation125_spill] sm:$0xff] %v12523_v45  ;;  %v12529_v21 = vadd.f32 %v5230_v14, %v5229_v15  ;;  %v12531_v35 = vadd.f32 %v4770_v34, %v4769_v11  ;;  %v5251_v47 = vadd.f32 %v5250_v18, %v12451_v54  ;;  %v3655_v51 = vadd.f32 %v3654_v9, %v12247_v37 }
 0x538   : > { %v12535_v60 = vadd.f32 %v5218_v40, %v5217_v46  ;;  %v3662_v27 = vrot.slane %v3661_v4, 2  ;;  %v4110_v42 = vrot.slane %v4109_v10, 2  ;;  %v3668_v55 = vrot.slane %v3667_v43, 2 }
 0x539   : > { %16454 = vst [vmem:[#allocation127_spill] sm:$0xff] %v12529_v21  ;;  %v8463_v25 = vpop.eup %8462  ;;  %v12537_v7 = vadd.f32 %v4776_v12, %v4775_v62  ;;  %v5224_v38 = vrot.slane %v5223_v48, 1  ;;  %v4102_v3 = vrot.slane %v12348_v13, 4  ;;  %v3675_v11 = vadd.f32 %v3674_v22, %v3673_v26 }
 0x53a   : > { %16455 = vst [vmem:[#allocation128_spill] sm:$0xff] %v12531_v35  ;;  %v4123_v14 = vadd.f32 %v4122_v53, %v4121_v31  ;;  %v4116_v58 = vrot.slane %v4115_v16, 2  ;;  %v4804_v54 = vrot.slane %v4803_v36, 2  ;;  %v5252_v46 = vrot.slane %v5251_v47, 2 }
 0x53b   : > { %16456 = vst [vmem:[#allocation129_spill] sm:$0xff] %v12535_v60  ;;  %v8465_v37 = vpop.eup %8464  ;;  %v3656_v34 = vrot.slane %v3655_v51, 2  ;;  %v2798_v40 = vmul.f32 0.5, %v8463_v25  ;;  %v3663_v45 = vadd.f32 %v3662_v27, %v3661_v4  ;;  %v4111_v62 = vadd.f32 %v4110_v42, %v4109_v10 }
 0x53c   : > { %16457 = vst [vmem:[#allocation130_spill] sm:$0xff] %v12537_v7  ;;  %v3669_v12 = vadd.f32 %v3668_v55, %v3667_v43  ;;  %v12542_v21 = vadd.f32 %v5224_v38, %v5223_v48  ;;  %v4103_v7 = vadd.f32 %v4102_v3, %v12348_v13  ;;  %v2799_v31 = vmul.f32 0.5, %v8465_v37 }
 0x53d   : > { %v3676_v22 = vrot.slane %v3675_v11, 1  ;;  %v4117_v53 = vadd.f32 %v4116_v58, %v4115_v16  ;;  %v4124_v60 = vrot.slane %v4123_v14, 1  ;;  %v5253_v35 = vadd.f32 %v5252_v46, %v5251_v47 }
 0x53e   : > { %v3657_v33 = vadd.f32 %v3656_v34, %v3655_v51  ;;  %v3664_v25 = vrot.slane %v3663_v45, 1  ;;  %v4112_v4 = vrot.slane %v4111_v62, 1  ;;  %v3670_v10 = vrot.slane %v3669_v12, 1 }
 0x53f   : > { %v4104_v43 = vrot.slane %v4103_v7, 2  ;;  %v4790_v48 = vrot.slane %v12361_v49, 4  ;;  %v2654_v13 = vadd.f32 %v12510_v39, %v16448_v41  ;;  %v12550_v27 = vadd.f32 0.5, %v2799_v31 }
 0x540   : > { %v12552_v42 = vadd.f32 %v3676_v22, %v3675_v11  ;;  %v4118_v16 = vrot.slane %v4117_v53, 1  ;;  %v9209_v47 = vmov 2   ;;  %v12554_v55 = vadd.f32 %v4124_v60, %v4123_v14 }
 0x541   : > { %16459 = vst [vmem:[#allocation132_spill] sm:$0xff] %v12550_v27  ;;  %8062 = vset.pattern.permute.xlu0 %v9209_v47  ;;  %v5254_v38 = vrot.slane %v5253_v35, 1  ;;  %v3658_v3 = vrot.slane %v3657_v33, 1  ;;  %v2680_v58 = vadd.f32 %v12516_v17, %v16448_v41  ;;  %v12561_v39 = vadd.f32 %v4112_v4, %v4111_v62 }
 0x542   : > { %16460 = vst [vmem:[#allocation133_spill] sm:$0xff] %v12552_v42  ;;  %4623 = vperm.xlu0 %8062, %v12174_v5   ;;  %v12563_v11 = vadd.f32 %v3670_v10, %v3669_v12  ;;  %v4105_v46 = vadd.f32 %v4104_v43, %v4103_v7  ;;  %v4791_v34 = vadd.f32 %v4790_v48, %v12361_v49  ;;  %v5238_v60 = vrot.slane %v12404_v8, 4 }
 0x543   : > { %16461 = vst [vmem:[#allocation134_spill] sm:$0xff] %v12554_v55  ;;  %v2754_v14 = vmul.f32 0.5, %v2654_v13  ;;  %v12575_v62 = vmul.f32 0.5, %v2680_v58  ;;  %v2628_v7 = vadd.f32 %v12215_v61, %v16448_v41 }
 0x544   : > { %16463 = vst [vmem:[#allocation136_spill] sm:$0xff] %v12561_v39  ;;  %v4106_v22 = vrot.slane %v4105_v46, 1 }
 0x545   : > { %v3285_v1 = vpop.f32.mrf.mxu0  ;;  %16464 = vst [vmem:[#allocation137_spill] sm:$0xff] %v12563_v11  ;;  %v12596_v4 = vmul.f32 0.5, %v2628_v7 }
 0x546   : > { %v3286_v15 = vadd.f32 %v3285_v1, %v12527_v20  ;;  %v4805_v1 = vadd.f32 %v4804_v54, %v4803_v36  ;;  %v12559_v54 = vadd.f32 %v3664_v25, %v3663_v45  ;;  %v12571_v45 = vadd.f32 %v5254_v38, %v5253_v35 }
 0x548   : > { %v3476_v18 = vmul.f32 0.5, %v3286_v15  ;;  %v12545_v15 = vadd.f32 0.5, %v2798_v40  ;;  %v4806_v36 = vrot.slane %v4805_v1, 1  ;;  %16462 = vst [vmem:[#allocation135_spill] sm:$0xff] %v12559_v54  ;;  %v12573_v40 = vadd.f32 %v3658_v3, %v3657_v33  ;;  %v12587_v33 = vpop.f32.mrf.mxu2 }
 0x549   : > { %v3311_v52 = vpop.f32.mrf.mxu1  ;;  %16467 = vst [vmem:[#allocation140_spill] sm:$0xff] %v12571_v45 }
 0x54a   : > { %v3312_v9 = vadd.f32 %v3311_v52, %v12527_v20  ;;  %8466 = vtanh.f32 %v3476_v18  ;;  %16458 = vst [vmem:[#allocation131_spill] sm:$0xff] %v12545_v15  ;;  %v12567_v18 = vadd.f32 %v4118_v16, %v4117_v53  ;;  %v4792_v53 = vrot.slane %v4791_v34, 2 }
 0x54b   : > { %16468 = vst [vmem:[#allocation141_spill] sm:$0xff] %v12573_v40 }
 0x54c   : > { %v3477_v26 = vmul.f32 0.5, %v3312_v9  ;;  %16465 = vst [vmem:[#allocation138_spill] sm:$0xff] %v12567_v18  ;;  %v12569_v9 = vadd.f32 %v4806_v36, %v4805_v1  ;;  %v12585_v1 = vadd.f32 %v5238_v60, %v12404_v8  ;;  %v12626_v15 = vadd.f32 %v4792_v53, %v4791_v34 }
 0x54d   : > { %16469 = vst [vmem:[#allocation142_spill] sm:$0xff] %v12587_v33 }
 0x54e   : > { %8468 = vtanh.f32 %v3477_v26  ;;  %16466 = vst [vmem:[#allocation139_spill] sm:$0xff] %v12569_v9 }
 0x54f   : > { %8470 = vtanh.f32 %v2754_v14  ;;  %v12632_v55 = vpop.f32.mrf.mxu0 }
 0x550   : > { %v8467_v51 = vpop.eup %8466  ;;  %16474 = vst [vmem:[#allocation147_spill] sm:$0xff] %v12632_v55  ;;  %8472 = vtanh.f32 %v12596_v4  ;;  %v4808_v4 = vrot.slane %v12424_v56, 4 }
 0x551   : > { %v3524_v52 = vmul.f32 0.5, %v8467_v51 }
 0x553   : > { %v3548_v17 = vadd.f32 0.5, %v3524_v52  ;;  %v3337_v41 = vpop.f32.mrf.mxu2 }
 0x554   : > { %v8469_v37 = vpop.eup %8468 }
 0x555   : > { %v3525_v5 = vmul.f32 0.5, %v8469_v37  ;;  %v12580_v49 = vmul.f32 %v3548_v17, %v12208_v6  ;;  %v12582_v12 = vmul.f32 %v3548_v17, %v3548_v17  ;;  %v4012_v26 = vsub.f32 1.0, %v3548_v17  ;;  %v12616_v37 = vpop.eup %8470 }
 0x556   : > { %16471 = vst [vmem:[#allocation144_spill] sm:$0xff] %v12616_v37  ;;  %v8473_v42 = vpop.eup %8472 }
 0x557   : > { %v3549_v31 = vadd.f32 0.5, %v3525_v5  ;;  %v3580_v35 = vrot.slane %v12580_v49, 4  ;;  %v3692_v25 = vrot.slane %v12582_v12, 4  ;;  %v12592_v61 = vmul.f32 %v4012_v26, %v12257_v44 }
 0x558   : > { %v12594_v6 = vmul.f32 %v4012_v26, %v4012_v26 }
 0x559   : > { %v12599_v10 = vmul.f32 %v3549_v31, %v12210_v57  ;;  %v12601_v43 = vmul.f32 %v3549_v31, %v3549_v31  ;;  %v4013_v8 = vsub.f32 1.0, %v3549_v31  ;;  %v3581_v48 = vadd.f32 %v3580_v35, %v12580_v49 }
 0x55a   : > { %v3693_v13 = vadd.f32 %v3692_v25, %v12582_v12  ;;  %v4028_v16 = vrot.slane %v12592_v61, 4  ;;  %v4140_v36 = vrot.slane %v12594_v6, 4 }
 0x55b   : > { %v3586_v44 = vrot.slane %v12599_v10, 4  ;;  %v3698_v47 = vrot.slane %v12601_v43, 4  ;;  %v12610_v51 = vmul.f32 %v4013_v8, %v12260_v23  ;;  %v12612_v57 = vmul.f32 %v4013_v8, %v4013_v8 }
 0x55c   : > { %v3582_v38 = vrot.slane %v3581_v48, 2  ;;  %v3694_v3 = vrot.slane %v3693_v13, 2  ;;  %v4029_v58 = vadd.f32 %v4028_v16, %v12592_v61  ;;  %v4141_v52 = vadd.f32 %v4140_v36, %v12594_v6 }
 0x55d   : > { %16470 = vst [vmem:[#allocation143_spill] sm:$0xff] %v12612_v57  ;;  %v3587_v60 = vadd.f32 %v3586_v44, %v12599_v10  ;;  %v3699_v14 = vadd.f32 %v3698_v47, %v12601_v43  ;;  %v4034_v17 = vrot.slane %v12610_v51, 4  ;;  %v4146_v5 = vrot.slane %v12612_v57, 4 }
 0x55e   : > { %v3583_v23 = vadd.f32 %v3582_v38, %v3581_v48  ;;  %v3695_v7 = vadd.f32 %v3694_v3, %v3693_v13  ;;  %v4030_v26 = vrot.slane %v4029_v58, 2  ;;  %v4142_v31 = vrot.slane %v4141_v52, 2 }
 0x55f   : > { %v3588_v35 = vrot.slane %v3587_v60, 2  ;;  %v3700_v25 = vrot.slane %v3699_v14, 2  ;;  %v4035_v8 = vadd.f32 %v4034_v17, %v12610_v51  ;;  %v4147_v16 = vadd.f32 %v4146_v5, %v12612_v57 }
 0x560   : > { %v3584_v36 = vrot.slane %v3583_v23, 1  ;;  %v3696_v37 = vrot.slane %v3695_v7, 1  ;;  %v4031_v33 = vadd.f32 %v4030_v26, %v4029_v58  ;;  %v4143_v44 = vadd.f32 %v4142_v31, %v4141_v52 }
 0x561   : > { %v12624_v47 = vadd.f32 %v4106_v22, %v4105_v46  ;;  %v3589_v27 = vadd.f32 %v3588_v35, %v3587_v60  ;;  %v3701_v48 = vadd.f32 %v3700_v25, %v3699_v14  ;;  %v4796_v17 = vrot.slane %v12385_v2, 4 }
 0x562   : > { %v12628_v13 = vadd.f32 %v3584_v36, %v3583_v23  ;;  %v3697_v38 = vadd.f32 %v3696_v37, %v3695_v7  ;;  %v4032_v3 = vrot.slane %v4031_v33, 1  ;;  %v4144_v45 = vrot.slane %v4143_v44, 1 }
 0x563   : > { %16472 = vst [vmem:[#allocation145_spill] sm:$0xff] %v12624_v47  ;;  %v5244_v5 = vrot.slane %v12433_v50, 4  ;;  %v3590_v9 = vrot.slane %v3589_v27, 1  ;;  %v3338_v58 = vadd.f32 %v3337_v41, %v12527_v20  ;;  %v4036_v22 = vrot.slane %v4035_v8, 2 }
 0x564   : > { %16473 = vst [vmem:[#allocation146_spill] sm:$0xff] %v12628_v13  ;;  %v12636_v46 = vadd.f32 %v3697_v38, %v12492_v32  ;;  %v3748_v34 = vmul.f32 -1.0, %v12628_v13  ;;  %v4148_v53 = vrot.slane %v4147_v16, 2  ;;  %v3796_v52 = vmul.f32 -3.0, %v12628_v13 }
 0x565   : > { %v12640_v37 = vadd.f32 %v4032_v3, %v4031_v33  ;;  %v4145_v60 = vadd.f32 %v4144_v45, %v4143_v44  ;;  %v3702_v14 = vrot.slane %v3701_v48, 1  ;;  %v3844_v32 = vmul.f32 -7.0, %v12628_v13 }
 0x566   : > { %v12643_v23 = vadd.f32 %v3748_v34, %v12636_v46  ;;  %v3788_v7 = vmul.f32 2.0, %v12636_v46  ;;  %v3836_v41 = vmul.f32 4.0, %v12636_v46  ;;  %v12652_v35 = vadd.f32 %v3590_v9, %v3589_v27 }
 0x567   : > { %16475 = vst [vmem:[#allocation148_spill] sm:$0xff] %v12640_v37  ;;  %v12649_v26 = vadd.f32 %v4145_v60, %v12499_v24  ;;  %v4196_v31 = vmul.f32 -1.0, %v12640_v37  ;;  %v3478_v33 = vmul.f32 0.5, %v3338_v58  ;;  %v5240_v45 = vrot.slane %v12585_v1, 2 }
 0x568   : > { %16477 = vst [vmem:[#allocation150_spill] sm:$0xff] %v12652_v35  ;;  %v12655_v25 = vadd.f32 %v3796_v52, %v3788_v7  ;;  %v12657_v36 = vadd.f32 %v3844_v32, %v3836_v41  ;;  %v4037_v44 = vadd.f32 %v4036_v22, %v4035_v8  ;;  %v4244_v24 = vmul.f32 -3.0, %v12640_v37 }
 0x569   : > { %16476 = vst [vmem:[#allocation149_spill] sm:$0xff] %v12649_v26  ;;  %v12660_v38 = vadd.f32 %v4196_v31, %v12649_v26  ;;  %v4236_v3 = vmul.f32 2.0, %v12649_v26  ;;  %v4149_v34 = vadd.f32 %v4148_v53, %v4147_v16  ;;  %v4797_v60 = vadd.f32 %v4796_v17, %v12385_v2  ;;  %v12681_v53 = vpop.permute.xlu2 %3256 }
 0x56a   : > { %v5245_v27 = vadd.f32 %v5244_v5, %v12433_v50  ;;  %v3703_v9 = vadd.f32 %v3702_v14, %v3701_v48  ;;  %v4784_v58 = vrot.slane %v12326_v0, 4  ;;  %v3749_v8 = vmul.f32 -1.0, %v12652_v35  ;;  %v12677_v50 = vpop.f32.mrf.mxu1  ;;  %v3291_v14 = vpop.f32.mrf.mxu0 }
 0x56b   : > { %v12668_v52 = vadd.f32 %v4244_v24, %v4236_v3  ;;  %8474 = vtanh.f32 %v3478_v33  ;;  %v5232_v22 = vrot.slane %v12369_v29, 4  ;;  %v3678_v7 = vrot.slane %v12373_v30, 4  ;;  %16478 = vst [vmem:[#allocation151_spill] sm:$0xff] %v12677_v50 }
 0x56c   : > { %v4126_v16 = vrot.slane %v12446_v28, 4  ;;  %v12675_v2 = vadd.f32 %v3703_v9, %v12494_v59  ;;  %v3797_v48 = vmul.f32 -3.0, %v12652_v35  ;;  %v4038_v17 = vrot.slane %v4037_v44, 1 }
 0x56d   : > { %v4150_v5 = vrot.slane %v4149_v34, 1  ;;  %v3845_v59 = vmul.f32 -7.0, %v12652_v35  ;;  %v4798_v33 = vrot.slane %v4797_v60, 2  ;;  %v5256_v3 = vrot.slane %v12456_v63, 4 }
 0x56e   : > { %v12684_v41 = vadd.f32 %v3749_v8, %v12675_v2  ;;  %v3789_v32 = vmul.f32 2.0, %v12675_v2  ;;  %v3837_v31 = vmul.f32 4.0, %v12675_v2  ;;  %v12690_v24 = vadd.f32 %v4038_v17, %v4037_v44 }
 0x56f   : > { %v4151_v9 = vadd.f32 %v4150_v5, %v4149_v34  ;;  %v4785_v50 = vadd.f32 %v4784_v58, %v12326_v0  ;;  %v3292_v8 = vadd.f32 %v3291_v14, %v12681_v53  ;;  %v5246_v39 = vrot.slane %v5245_v27, 2 }
 0x570   : > { %16479 = vst [vmem:[#allocation152_spill] sm:$0xff] %v12690_v24  ;;  %v12693_v55 = vadd.f32 %v3797_v48, %v3789_v32  ;;  %v12695_v18 = vadd.f32 %v3845_v59, %v3837_v31  ;;  %v5233_v54 = vadd.f32 %v5232_v22, %v12369_v29  ;;  %v4197_v44 = vmul.f32 -1.0, %v12690_v24 }
 0x571   : > { %v8475_v11 = vpop.eup %8474  ;;  %v12700_v47 = vadd.f32 %v4151_v9, %v12501_v19  ;;  %v5241_v34 = vadd.f32 %v5240_v45, %v12585_v1  ;;  %v3679_v17 = vadd.f32 %v3678_v7, %v12373_v30  ;;  %v4809_v0 = vadd.f32 %v4808_v4, %v12424_v56 }
 0x572   : > { %v4127_v58 = vadd.f32 %v4126_v16, %v12446_v28  ;;  %v5257_v48 = vadd.f32 %v5256_v3, %v12456_v63  ;;  %v4245_v19 = vmul.f32 -3.0, %v12690_v24  ;;  %v4799_v22 = vadd.f32 %v4798_v33, %v4797_v60  ;;  %v3317_v16 = vpop.f32.mrf.mxu1 }
 0x573   : > { %16480 = vst [vmem:[#allocation153_spill] sm:$0xff] %v12700_v47  ;;  %v12709_v5 = vadd.f32 %v4197_v44, %v12700_v47  ;;  %v4237_v29 = vmul.f32 2.0, %v12700_v47  ;;  %v4786_v14 = vrot.slane %v4785_v50, 2  ;;  %v3526_v32 = vmul.f32 0.5, %v8475_v11  ;;  %v16482_v11 = vld [vmem:[#allocation105_spill] sm:$0xff] }
 0x574   : > { %v3492_v31 = vmul.f32 0.5, %v3292_v8  ;;  %v4794_v1 = vrot.slane %v12626_v15, 1  ;;  %v5247_v30 = vadd.f32 %v5246_v39, %v5245_v27  ;;  %v5234_v45 = vrot.slane %v5233_v54, 2 }
 0x575   : > { %v12714_v56 = vadd.f32 %v4245_v19, %v4237_v29  ;;  %v3680_v28 = vrot.slane %v3679_v17, 2  ;;  %v4128_v7 = vrot.slane %v4127_v58, 2  ;;  %v3550_v63 = vadd.f32 0.5, %v3526_v32 }
 0x576   : > { %8476 = vtanh.f32 %v3492_v31  ;;  %v5242_v4 = vrot.slane %v5241_v34, 1  ;;  %v4810_v59 = vrot.slane %v4809_v0, 2  ;;  %v5258_v3 = vrot.slane %v5257_v48, 2 }
 0x577   : > { %16481 = vst [vmem:[#allocation154_spill] sm:$0xff] %v12714_v56  ;;  %8478 = vtanh.f32 %v12575_v62  ;;  %v4800_v60 = vrot.slane %v4799_v22, 1  ;;  %v4787_v33 = vadd.f32 %v4786_v14, %v4785_v50  ;;  %v12718_v9 = vmul.f32 %v3550_v63, %v16482_v11 }
 0x578   : > { %v12720_v8 = vmul.f32 %v3550_v63, %v3550_v63  ;;  %v12723_v39 = vadd.f32 %v4794_v1, %v12626_v15  ;;  %v5248_v27 = vrot.slane %v5247_v30, 1  ;;  %v5235_v44 = vadd.f32 %v5234_v45, %v5233_v54 }
 0x579   : > { %v3318_v29 = vadd.f32 %v3317_v16, %v12681_v53  ;;  %v3681_v19 = vadd.f32 %v3680_v28, %v3679_v17  ;;  %v4129_v32 = vadd.f32 %v4128_v7, %v4127_v58  ;;  %v3592_v62 = vrot.slane %v12718_v9, 4 }
 0x57a   : > { %16483 = vst [vmem:[#allocation105_spill] sm:$0xff] %v12723_v39  ;;  %v3704_v31 = vrot.slane %v12720_v8, 4  ;;  %v12728_v40 = vadd.f32 %v5242_v4, %v5241_v34  ;;  %v12730_v50 = vmul.f32 0.5, %v8473_v42  ;;  %v4811_v14 = vadd.f32 %v4810_v59, %v4809_v0  ;;  %v12740_v42 = vpop.f32.mrf.mxu3 }
 0x57b   : > { %v5259_v11 = vadd.f32 %v5258_v3, %v5257_v48  ;;  %v12732_v57 = vadd.f32 %v4800_v60, %v4799_v22  ;;  %v4788_v15 = vrot.slane %v4787_v33, 1  ;;  %v3593_v54 = vadd.f32 %v3592_v62, %v12718_v9  ;;  %16489 = vst [vmem:[#allocation160_spill] sm:$0xff] %v12740_v42  ;;  %v8888_v42 = vld [vmem:[#allocation13] sm:$0xff] }
 0x57c   : > { %16484 = vst [vmem:[#allocation155_spill] sm:$0xff] %v12728_v40  ;;  %v8477_v56 = vpop.eup %8476  ;;  %v3705_v1 = vadd.f32 %v3704_v31, %v12720_v8  ;;  %v12738_v58 = vadd.f32 %v5248_v27, %v5247_v30  ;;  %v5236_v45 = vrot.slane %v5235_v44, 1  ;;  %v3493_v34 = vmul.f32 0.5, %v3318_v29  ;;  %v16491_v30 = vld [vmem:[#allocation89_spill] sm:$0xff] }
 0x57d   : > { %16485 = vst [vmem:[#allocation156_spill] sm:$0xff] %v12730_v50  ;;  %v12736_v17 = vpop.eup %8478  ;;  %v3540_v28 = vmul.f32 0.5, %v8477_v56  ;;  %v3682_v7 = vrot.slane %v3681_v19, 1  ;;  %v4130_v0 = vrot.slane %v4129_v32, 1  ;;  %v3594_v48 = vrot.slane %v3593_v54, 2 }
 0x57e   : > { %16486 = vst [vmem:[#allocation157_spill] sm:$0xff] %v12732_v57  ;;  %v3706_v16 = vrot.slane %v3705_v1, 2  ;;  %v4812_v22 = vrot.slane %v4811_v14, 1  ;;  %v5260_v4 = vrot.slane %v5259_v11, 1  ;;  %v12742_v3 = vadd.f32 %v4788_v15, %v4787_v33 }
 0x57f   : > { %16487 = vst [vmem:[#allocation158_spill] sm:$0xff] %v12736_v17  ;;  %v3564_v59 = vadd.f32 0.5, %v3540_v28  ;;  %v3595_v60 = vadd.f32 %v3594_v48, %v3593_v54  ;;  %v4014_v31 = vsub.f32 1.0, %v3550_v63  ;;  %v9210_v17 = vmov 4   ;;  %v16505_v48 = vld [vmem:[#allocation122_spill] sm:$0xff] }
 0x580   : > { %16488 = vst [vmem:[#allocation159_spill] sm:$0xff] %v12738_v58  ;;  %v3707_v62 = vadd.f32 %v3706_v16, %v3705_v1  ;;  %8064 = vset.pattern.permute.xlu0 %v9210_v17  ;;  %8480 = vtanh.f32 %v3493_v34  ;;  %v12749_v50 = vadd.f32 %v5236_v45, %v5235_v44  ;;  %v12751_v58 = vadd.f32 %v3682_v7, %v3681_v19  ;;  %v16500_v45 = vld [vmem:[#allocation102_spill] sm:$0xff] }
 0x581   : > { %16490 = vst [vmem:[#allocation161_spill] sm:$0xff] %v12742_v3  ;;  %v12745_v27 = vmul.f32 %v3564_v59, %v16491_v30  ;;  %v12747_v56 = vmul.f32 %v3564_v59, %v3564_v59  ;;  %v5078_v29 = vsub.f32 1.0, %v3564_v59  ;;  %5697 = vperm.xlu0 %8064, %v8888_v42   ;;  %v3596_v33 = vrot.slane %v3595_v60, 1 }
 0x582   : > { %16492 = vst [vmem:[#allocation89_spill] sm:$0xff] %v12749_v50  ;;  %v3708_v15 = vrot.slane %v3707_v62, 1  ;;  %v12753_v54 = vadd.f32 %v4812_v22, %v4811_v14  ;;  %v12755_v63 = vadd.f32 %v4130_v0, %v4129_v32  ;;  %v12757_v1 = vadd.f32 %v5260_v4, %v5259_v11  ;;  %v16502_v11 = vld [vmem:[#allocation106_spill] sm:$0xff]  ;;  %v3363_v59 = vpop.f32.mrf.mxu3 }
 0x583   : > { %16493 = vst [vmem:[#allocation162_spill] sm:$0xff] %v12751_v58  ;;  %v4654_v17 = vrot.slane %v12745_v27, 4  ;;  %v12761_v28 = vmul.f32 8.0, %v12636_v46  ;;  %v12764_v34 = vmul.f32 -15.0, %v12628_v13  ;;  %v12766_v44 = vadd.f32 %v3596_v33, %v3595_v60 }
 0x584   : > { %16494 = vst [vmem:[#allocation163_spill] sm:$0xff] %v12753_v54  ;;  %v3709_v19 = vadd.f32 %v3708_v15, %v3707_v62  ;;  %v12769_v7 = vmul.f32 %v4014_v31, %v16500_v45  ;;  %v4710_v32 = vrot.slane %v12747_v56, 4  ;;  %v12774_v42 = vmul.f32 %v16502_v11, %v5078_v29 }
 0x585   : > { %16495 = vst [vmem:[#allocation164_spill] sm:$0xff] %v12755_v63  ;;  %v4655_v14 = vadd.f32 %v4654_v17, %v12745_v27  ;;  %v12777_v0 = vmul.f32 16.0, %v12636_v46  ;;  %v3750_v22 = vmul.f32 -1.0, %v12766_v44  ;;  %v12783_v4 = vmul.f32 %v5078_v29, %v5078_v29 }
 0x586   : > { %16496 = vst [vmem:[#allocation165_spill] sm:$0xff] %v12757_v1  ;;  %v12780_v16 = vadd.f32 %v3709_v19, %v16505_v48  ;;  %v8481_v60 = vpop.eup %8480  ;;  %v3764_v62 = vadd.f32 1e-05, %v12643_v23  ;;  %v3798_v30 = vmul.f32 -3.0, %v12766_v44  ;;  %v3846_v33 = vmul.f32 -7.0, %v12766_v44 }
 0x587   : > { %16497 = vst [vmem:[#allocation166_spill] sm:$0xff] %v12761_v28  ;;  %v12788_v15 = vmul.f32 %v4014_v31, %v4014_v31  ;;  %v4656_v45 = vrot.slane %v4655_v14, 2  ;;  %v4040_v29 = vrot.slane %v12769_v7, 4  ;;  %v4711_v11 = vadd.f32 %v4710_v32, %v12747_v56 }
 0x588   : > { %16498 = vst [vmem:[#allocation167_spill] sm:$0xff] %v12764_v34  ;;  %v12791_v46 = vadd.f32 %v3750_v22, %v12780_v16  ;;  %v3790_v17 = vmul.f32 2.0, %v12780_v16  ;;  %v3838_v19 = vmul.f32 4.0, %v12780_v16  ;;  %v5102_v23 = vrot.slane %v12774_v42, 4 }
 0x589   : > { %16499 = vst [vmem:[#allocation168_spill] sm:$0xff] %v12766_v44  ;;  %v3364_v48 = vadd.f32 %v3363_v59, %v12527_v20  ;;  %v5158_v22 = vrot.slane %v12783_v4, 4  ;;  %v3541_v13 = vmul.f32 0.5, %v8481_v60  ;;  %v3812_v34 = vadd.f32 1e-05, %v12655_v25 }
 0x58a   : > { %16501 = vst [vmem:[#allocation102_spill] sm:$0xff] %v12769_v7  ;;  %v12801_v31 = vadd.f32 %v3846_v33, %v3838_v19  ;;  %v12806_v28 = vmul.f32 4.0, %v12649_v26  ;;  %v12809_v1 = vmul.f32 -7.0, %v12640_v37  ;;  %v4152_v32 = vrot.slane %v12788_v15, 4 }
 0x58b   : > { %16503 = vst [vmem:[#allocation106_spill] sm:$0xff] %v12774_v42  ;;  %8482 = vrcp.f32 %v3764_v62  ;;  %v12813_v59 = vadd.f32 1e-05, %v12657_v36  ;;  %v4657_v33 = vadd.f32 %v4656_v45, %v4655_v14  ;;  %v4212_v60 = vadd.f32 1e-05, %v12660_v38  ;;  %v16513_v38 = vld [vmem:[#allocation78_spill] sm:$0xff] }
 0x58c   : > { %16504 = vst [vmem:[#allocation169_spill] sm:$0xff] %v12777_v0  ;;  %v12799_v0 = vadd.f32 %v3798_v30, %v3790_v17  ;;  %v12816_v30 = vmul.f32 8.0, %v12649_v26  ;;  %v4712_v17 = vrot.slane %v4711_v11, 2  ;;  %v5103_v25 = vadd.f32 %v5102_v23, %v12774_v42  ;;  %v3389_v26 = vpop.f32.mrf.mxu0 }
 0x58d   : > { %16506 = vst [vmem:[#allocation122_spill] sm:$0xff] %v12783_v4  ;;  %v3479_v19 = vmul.f32 0.5, %v3364_v48  ;;  %v4658_v37 = vrot.slane %v4657_v33, 1  ;;  %v3565_v54 = vadd.f32 0.5, %v3541_v13  ;;  %8484 = vrcp.f32 %v3812_v34 }
 0x58e   : > { %16507 = vst [vmem:[#allocation170_spill] sm:$0xff] %v12788_v15  ;;  %v4153_v36 = vadd.f32 %v4152_v32, %v12788_v15  ;;  %v4713_v62 = vadd.f32 %v4712_v17, %v4711_v11 }
 0x58f   : > { %16508 = vst [vmem:[#allocation171_spill] sm:$0xff] %v12806_v28  ;;  %v4041_v28 = vadd.f32 %v4040_v29, %v12769_v7  ;;  %v12826_v45 = vmul.f32 %v3565_v54, %v16513_v38  ;;  %v12828_v23 = vmul.f32 %v3565_v54, %v3565_v54  ;;  %v12831_v29 = vmul.f32 -15.0, %v12652_v35 }
 0x590   : > { %16509 = vst [vmem:[#allocation172_spill] sm:$0xff] %v12809_v1  ;;  %v5159_v1 = vadd.f32 %v5158_v22, %v12783_v4  ;;  %v4714_v48 = vrot.slane %v4713_v62, 1  ;;  %v5079_v13 = vsub.f32 1.0, %v3565_v54  ;;  %8486 = vtanh.f32 %v3479_v19 }
 0x591   : > { %16510 = vst [vmem:[#allocation173_spill] sm:$0xff] %v12813_v59  ;;  %v5104_v59 = vrot.slane %v5103_v25, 2  ;;  %v12833_v34 = vpop.eup %8482  ;;  %v4042_v32 = vrot.slane %v4041_v28, 2  ;;  %v4660_v15 = vrot.slane %v12826_v45, 4  ;;  %v4154_v7 = vrot.slane %v4153_v36, 2 }
 0x592   : > { %16511 = vst [vmem:[#allocation174_spill] sm:$0xff] %v12816_v30  ;;  %v12823_v30 = vadd.f32 %v4658_v37, %v4657_v33  ;;  %v5160_v14 = vrot.slane %v5159_v1, 2  ;;  %v3390_v37 = vadd.f32 %v3389_v26, %v12527_v20  ;;  %v4715_v33 = vadd.f32 %v4714_v48, %v4713_v62 }
 0x593   : > { %16514 = vst [vmem:[#allocation78_spill] sm:$0xff] %v12831_v29  ;;  %v5105_v22 = vadd.f32 %v5104_v59, %v5103_v25  ;;  %v4716_v35 = vrot.slane %v12828_v23, 4  ;;  %v16516_v29 = vld [vmem:[#allocation101_spill] sm:$0xff]  ;;  %v12842_v54 = vmul.f32 %v5079_v13, %v5079_v13  ;;  %v12844_v59 = vpop.eup %8484  ;;  %v16518_v25 = vld [vmem:[#allocation128_spill] sm:$0xff]  ;;  %8488 = vrcp.f32 %v4212_v60 }
 0x594   : > { %16512 = vst [vmem:[#allocation175_spill] sm:$0xff] %v12823_v30  ;;  %v4822_v11 = vmul.f32 -1.0, %v12823_v30  ;;  %v5161_v38 = vadd.f32 %v5160_v14, %v5159_v1  ;;  %v12840_v63 = vmul.f32 %v16516_v29, %v5079_v13  ;;  %v4870_v26 = vmul.f32 -3.0, %v12823_v30 }
 0x595   : > { %16515 = vst [vmem:[#allocation176_spill] sm:$0xff] %v12833_v34  ;;  %v5106_v17 = vrot.slane %v5105_v22, 1  ;;  %v12847_v34 = vadd.f32 %v16518_v25, %v4715_v33  ;;  %v4918_v62 = vmul.f32 -7.0, %v12823_v30  ;;  %v4661_v14 = vadd.f32 %v4660_v15, %v12826_v45 }
 0x596   : > { %16517 = vst [vmem:[#allocation101_spill] sm:$0xff] %v12844_v59  ;;  %v5162_v1 = vrot.slane %v5161_v38, 1  ;;  %v4717_v48 = vadd.f32 %v4716_v35, %v12828_v23  ;;  %v5108_v29 = vrot.slane %v12840_v63, 4  ;;  %v5164_v25 = vrot.slane %v12842_v54, 4 }
 0x597   : > { %v12850_v19 = vadd.f32 %v5106_v17, %v5105_v22  ;;  %v12857_v13 = vadd.f32 %v4822_v11, %v12847_v34  ;;  %v4862_v59 = vmul.f32 2.0, %v12847_v34  ;;  %v4910_v33 = vmul.f32 4.0, %v12847_v34  ;;  %v8487_v22 = vpop.eup %8486  ;;  %v16520_v11 = vld [vmem:[#allocation129_spill] sm:$0xff] }
 0x598   : > { %v5163_v17 = vadd.f32 %v5162_v1, %v5161_v38  ;;  %v3480_v57 = vmul.f32 0.5, %v3390_v37  ;;  %v4043_v15 = vadd.f32 %v4042_v32, %v4041_v28  ;;  %v4155_v40 = vadd.f32 %v4154_v7, %v4153_v36 }
 0x599   : > { %16519 = vst [vmem:[#allocation128_spill] sm:$0xff] %v12850_v19  ;;  %v5270_v58 = vmul.f32 -1.0, %v12850_v19  ;;  %v12863_v35 = vadd.f32 %v4870_v26, %v4862_v59  ;;  %v12865_v39 = vadd.f32 %v4918_v62, %v4910_v33  ;;  %v4662_v3 = vrot.slane %v4661_v14, 2  ;;  %v12887_v1 = vpop.eup %8488 }
 0x59a   : > { %v12868_v50 = vadd.f32 %v16520_v11, %v5163_v17  ;;  %v4718_v4 = vrot.slane %v4717_v48, 2  ;;  %v5109_v42 = vadd.f32 %v5108_v29, %v12840_v63  ;;  %v12872_v20 = vadd.f32 1e-05, %v12668_v52  ;;  %16525 = vst [vmem:[#allocation180_spill] sm:$0xff] %v12887_v1 }
 0x59b   : > { %v12875_v60 = vmul.f32 8.0, %v12675_v2  ;;  %v12878_v28 = vmul.f32 16.0, %v12675_v2  ;;  %v5165_v7 = vadd.f32 %v5164_v25, %v12842_v54  ;;  %v3765_v36 = vadd.f32 1e-05, %v12684_v41 }
 0x59c   : > { %16521 = vst [vmem:[#allocation129_spill] sm:$0xff] %v12868_v50  ;;  %v12883_v32 = vadd.f32 %v5270_v58, %v12868_v50  ;;  %v5310_v37 = vmul.f32 2.0, %v12868_v50  ;;  %v5318_v38 = vmul.f32 -3.0, %v12850_v19  ;;  %v4663_v59 = vadd.f32 %v4662_v3, %v4661_v14 }
 0x59d   : > { %16522 = vst [vmem:[#allocation177_spill] sm:$0xff] %v12872_v20  ;;  %v4719_v52 = vadd.f32 %v4718_v4, %v4717_v48  ;;  %v5110_v26 = vrot.slane %v5109_v42, 2  ;;  %8490 = vtanh.f32 %v3480_v57  ;;  %v4044_v62 = vrot.slane %v4043_v15, 1  ;;  %v3415_v20 = vpop.f32.mrf.mxu1 }
 0x59e   : > { %16523 = vst [vmem:[#allocation178_spill] sm:$0xff] %v12875_v60  ;;  %v4156_v2 = vrot.slane %v4155_v40, 1  ;;  %v12889_v29 = vadd.f32 %v5318_v38, %v5310_v37  ;;  %v5166_v33 = vrot.slane %v5165_v7, 2  ;;  %v4664_v25 = vrot.slane %v4663_v59, 1 }
 0x59f   : > { %16524 = vst [vmem:[#allocation179_spill] sm:$0xff] %v12878_v28  ;;  %v4720_v41 = vrot.slane %v4719_v52, 1  ;;  %v5111_v17 = vadd.f32 %v5110_v26, %v5109_v42  ;;  %v3527_v58 = vmul.f32 0.5, %v8487_v22  ;;  %v12892_v11 = vmul.f32 -7.0, %v12690_v24 }
 0x5a0   : > { %v4468_v3 = vadd.f32 %v12599_v10, %v12580_v49  ;;  %v4486_v57 = vadd.f32 %v12601_v43, %v12582_v12  ;;  %v5167_v4 = vadd.f32 %v5166_v33, %v5165_v7  ;;  %8492 = vrcp.f32 %v3765_v36  ;;  %v16530_v49 = vld [vmem:[#allocation130_spill] sm:$0xff] }
 0x5a1   : > { %16526 = vst [vmem:[#allocation181_spill] sm:$0xff] %v12892_v11  ;;  %v12898_v14 = vadd.f32 %v4664_v25, %v4663_v59  ;;  %v4721_v48 = vadd.f32 %v4720_v41, %v4719_v52  ;;  %v5112_v37 = vrot.slane %v5111_v17, 1  ;;  %v3813_v38 = vadd.f32 1e-05, %v12693_v55 }
 0x5a2   : > { %v12901_v1 = vadd.f32 %v4044_v62, %v4043_v15  ;;  %v4157_v42 = vadd.f32 %v4156_v2, %v4155_v40  ;;  %v5168_v22 = vrot.slane %v5167_v4, 1  ;;  %v12904_v28 = vadd.f32 1e-05, %v12695_v18  ;;  %v16532_v62 = vld [vmem:[#allocation123_spill] sm:$0xff] }
 0x5a3   : > { %16527 = vst [vmem:[#allocation182_spill] sm:$0xff] %v12898_v14  ;;  %v8491_v26 = vpop.eup %8490  ;;  %v12907_v10 = vadd.f32 %v16530_v49, %v4721_v48  ;;  %v4823_v12 = vmul.f32 -1.0, %v12898_v14  ;;  %v3551_v43 = vadd.f32 0.5, %v3527_v58  ;;  %v4213_v7 = vadd.f32 1e-05, %v12709_v5 }
 0x5a4   : > { %16528 = vst [vmem:[#allocation183_spill] sm:$0xff] %v12901_v1  ;;  %v4871_v36 = vmul.f32 -3.0, %v12898_v14  ;;  %v12912_v59 = vadd.f32 %v5112_v37, %v5111_v17  ;;  %v5169_v55 = vadd.f32 %v5168_v22, %v5167_v4  ;;  %v4919_v52 = vmul.f32 -7.0, %v12898_v14 }
 0x5a5   : > { %16529 = vst [vmem:[#allocation184_spill] sm:$0xff] %v12904_v28  ;;  %v12915_v40 = vadd.f32 %v4823_v12, %v12907_v10  ;;  %v4863_v15 = vmul.f32 2.0, %v12907_v10  ;;  %v4911_v18 = vmul.f32 4.0, %v12907_v10  ;;  %v12921_v2 = vadd.f32 %v4157_v42, %v16532_v62 }
 0x5a6   : > { %16531 = vst [vmem:[#allocation130_spill] sm:$0xff] %v12912_v59  ;;  %v4198_v33 = vmul.f32 -1.0, %v12901_v1  ;;  %v12925_v5 = vadd.f32 %v12542_v21, %v5169_v55  ;;  %v5271_v25 = vmul.f32 -1.0, %v12912_v59  ;;  %v12928_v41 = vpop.eup %8492  ;;  %v12934_v4 = vmul.f32 %v3551_v43, %v3551_v43  ;;  %v16538_v55 = vld [vmem:[#allocation99_spill] sm:$0xff] }
 0x5a7   : > { %16533 = vst [vmem:[#allocation123_spill] sm:$0xff] %v12921_v2  ;;  %v12930_v17 = vadd.f32 %v4871_v36, %v4863_v15  ;;  %v12932_v58 = vadd.f32 %v4919_v52, %v4911_v18  ;;  %v3528_v48 = vmul.f32 0.5, %v8491_v26  ;;  %v5319_v22 = vmul.f32 -3.0, %v12912_v59  ;;  %v16539_v15 = vld [vmem:[#allocation143_spill] sm:$0xff] }
 0x5a8   : > { %16534 = vst [vmem:[#allocation185_spill] sm:$0xff] %v12925_v5  ;;  %v12937_v37 = vadd.f32 %v5271_v25, %v12925_v5  ;;  %v5311_v42 = vmul.f32 2.0, %v12925_v5  ;;  %v4015_v21 = vsub.f32 1.0, %v3551_v43  ;;  %v12942_v49 = vmul.f32 4.0, %v12700_v47 }
 0x5a9   : > { %16535 = vst [vmem:[#allocation186_spill] sm:$0xff] %v12928_v41  ;;  %v12945_v12 = vmul.f32 8.0, %v12700_v47  ;;  %v12949_v36 = vadd.f32 %v12610_v51, %v12592_v61  ;;  %v12952_v26 = vmul.f32 %v3551_v43, %v16538_v55  ;;  %8494 = vrcp.f32 %v3813_v38  ;;  %v16541_v61 = vld [vmem:[#allocation154_spill] sm:$0xff] }
 0x5aa   : > { %16536 = vst [vmem:[#allocation187_spill] sm:$0xff] %v12942_v49  ;;  %v12956_v18 = vadd.f32 %v16539_v15, %v12594_v6  ;;  %v4206_v52 = vadd.f32 %v4198_v33, %v12921_v2  ;;  %v12959_v62 = vadd.f32 %v5319_v22, %v5311_v42  ;;  %8496 = vrcp.f32 %v4213_v7  ;;  %v12970_v6 = vpop.f32.mrf.mxu2 }
 0x5ab   : > { %16537 = vst [vmem:[#allocation188_spill] sm:$0xff] %v12945_v12  ;;  %v4238_v25 = vmul.f32 2.0, %v12921_v2  ;;  %v3710_v28 = vrot.slane %v12934_v4, 4  ;;  %v3552_v12 = vadd.f32 0.5, %v3528_v48  ;;  %v12964_v51 = vadd.f32 1e-05, %v16541_v61 }
 0x5ac   : > { %16540 = vst [vmem:[#allocation99_spill] sm:$0xff] %v12956_v18  ;;  %v3766_v43 = vadd.f32 1e-05, %v12791_v46  ;;  %v12968_v38 = vadd.f32 %v4468_v3, %v12718_v9  ;;  %v12972_v55 = vmul.f32 %v4015_v21, %v4015_v21  ;;  %v3814_v33 = vadd.f32 1e-05, %v12799_v0  ;;  %v16546_v3 = vld [vmem:[#allocation103_spill] sm:$0xff] }
 0x5ad   : > { %16542 = vst [vmem:[#allocation143_spill] sm:$0xff] %v12964_v51  ;;  %v4246_v7 = vmul.f32 -3.0, %v12901_v1  ;;  %v12977_v42 = vadd.f32 %v4486_v57, %v12720_v8  ;;  %v3598_v48 = vrot.slane %v12952_v26, 4  ;;  %v12981_v22 = vmul.f32 8.0, %v12780_v16 }
 0x5ae   : > { %16543 = vst [vmem:[#allocation154_spill] sm:$0xff] %v12972_v55  ;;  %v12984_v46 = vmul.f32 -15.0, %v12766_v44  ;;  %v4214_v9 = vadd.f32 1e-05, %v4206_v52  ;;  %v12987_v15 = vmul.f32 %v4015_v21, %v16546_v3  ;;  %v12990_v61 = vmul.f32 16.0, %v12780_v16 }
 0x5af   : > { %16544 = vst [vmem:[#allocation189_spill] sm:$0xff] %v12981_v22  ;;  %v4254_v0 = vadd.f32 %v4246_v7, %v4238_v25  ;;  %v3711_v51 = vadd.f32 %v3710_v28, %v12934_v4  ;;  %v4016_v8 = vsub.f32 1.0, %v3552_v12  ;;  %v12993_v57 = vpop.eup %8494  ;;  %8498 = vrcp.f32 %v3766_v43  ;;  %v16554_v7 = vld [vmem:[#allocation108_spill] sm:$0xff] }
 0x5b0   : > { %16545 = vst [vmem:[#allocation190_spill] sm:$0xff] %v12984_v46  ;;  %v12996_v47 = vmul.f32 -7.0, %v12901_v1  ;;  %v4158_v24 = vrot.slane %v12972_v55, 4  ;;  %v12999_v11 = vmul.f32 %v3552_v12, %v3552_v12  ;;  %v13001_v52 = vpop.eup %8496  ;;  %8500 = vrcp.f32 %v3814_v33 }
 0x5b1   : > { %16547 = vst [vmem:[#allocation103_spill] sm:$0xff] %v12990_v61  ;;  %v13004_v16 = vmul.f32 4.0, %v12921_v2  ;;  %v13007_v21 = vmul.f32 8.0, %v12921_v2  ;;  %v3599_v28 = vadd.f32 %v3598_v48, %v12952_v26  ;;  %v13011_v25 = vadd.f32 1e-05, %v12801_v31 }
 0x5b2   : > { %16548 = vst [vmem:[#allocation191_spill] sm:$0xff] %v12993_v57  ;;  %8502 = vrcp.f32 %v4214_v9  ;;  %v4046_v43 = vrot.slane %v12987_v15, 4  ;;  %v13015_v3 = vmul.f32 %v3552_v12, %v16554_v7  ;;  %v13017_v49 = vadd.f32 1e-05, %v4254_v0 }
 0x5b3   : > { %16549 = vst [vmem:[#allocation192_spill] sm:$0xff] %v12996_v47  ;;  %v4838_v33 = vadd.f32 1e-05, %v12857_v13  ;;  %v13020_v60 = vmul.f32 %v4016_v8, %v4016_v8  ;;  %v13023_v57 = vmul.f32 -15.0, %v12823_v30  ;;  %v13027_v31 = vadd.f32 %v12826_v45, %v12745_v27 }
 0x5b4   : > { %16550 = vst [vmem:[#allocation193_spill] sm:$0xff] %v13001_v52  ;;  %v3712_v52 = vrot.slane %v3711_v51, 2  ;;  %v4159_v48 = vadd.f32 %v4158_v24, %v12972_v55  ;;  %v3716_v9 = vrot.slane %v12999_v11, 4  ;;  %v13032_v12 = vmul.f32 8.0, %v12847_v34 }
 0x5b5   : > { %16551 = vst [vmem:[#allocation194_spill] sm:$0xff] %v13004_v16  ;;  %v13035_v0 = vmul.f32 16.0, %v12847_v34  ;;  %v13039_v13 = vadd.f32 %v12828_v23, %v12747_v56  ;;  %v3600_v7 = vrot.slane %v3599_v28, 2  ;;  %v13041_v30 = vpop.eup %8498  ;;  %v13044_v27 = vmul.f32 -7.0, %v12850_v19 }
 0x5b6   : > { %16552 = vst [vmem:[#allocation195_spill] sm:$0xff] %v13007_v21  ;;  %v4047_v24 = vadd.f32 %v4046_v43, %v12987_v15  ;;  %v3604_v45 = vrot.slane %v13015_v3, 4  ;;  %v13051_v34 = vpop.eup %8500  ;;  %8504 = vrcp.f32 %v4838_v33  ;;  %v4886_v56 = vadd.f32 1e-05, %v12863_v35 }
 0x5b7   : > { %16553 = vst [vmem:[#allocation196_spill] sm:$0xff] %v13011_v25  ;;  %v3713_v23 = vadd.f32 %v3712_v52, %v3711_v51  ;;  %v13058_v19 = vadd.f32 1e-05, %v12865_v39  ;;  %v5286_v43 = vadd.f32 1e-05, %v12883_v32  ;;  %v13066_v33 = vmul.f32 8.0, %v12868_v50 }
 0x5b8   : > { %16555 = vst [vmem:[#allocation108_spill] sm:$0xff] %v13017_v49  ;;  %v13055_v21 = vpop.eup %8502  ;;  %v3601_v35 = vadd.f32 %v3600_v7, %v3599_v28  ;;  %v4048_v52 = vrot.slane %v4047_v24, 2  ;;  %8506 = vrcp.f32 %v4886_v56  ;;  %v16571_v28 = vld [vmem:[#allocation106_spill] sm:$0xff] }
 0x5b9   : > { %16556 = vst [vmem:[#allocation197_spill] sm:$0xff] %v13020_v60  ;;  %v3714_v32 = vrot.slane %v3713_v23, 1  ;;  %8508 = vrcp.f32 %v5286_v43  ;;  %v16573_v7 = vld [vmem:[#allocation122_spill] sm:$0xff] }
 0x5ba   : > { %16557 = vst [vmem:[#allocation198_spill] sm:$0xff] %v13023_v57  ;;  %v16562_v57 = vld [vmem:[#allocation112_spill] sm:$0xff]  ;;  %v4049_v56 = vadd.f32 %v4048_v52, %v4047_v24  ;;  %v4887_v52 = vadd.f32 1e-05, %v12930_v17  ;;  %v13113_v17 = vmul.f32 8.0, %v12925_v5 }
 0x5bb   : > { %16558 = vst [vmem:[#allocation199_spill] sm:$0xff] %v13032_v12  ;;  %v13049_v41 = vmul.f32 %v4016_v8, %v16562_v57  ;;  %v3343_v12 = vpop.f32.mrf.mxu2  ;;  %v3717_v8 = vadd.f32 %v3716_v9, %v12999_v11  ;;  %v13063_v57 = vmul.f32 4.0, %v12868_v50 }
 0x5bc   : > { %16559 = vst [vmem:[#allocation200_spill] sm:$0xff] %v13035_v0  ;;  %v4164_v0 = vrot.slane %v13020_v60, 4  ;;  %v3344_v51 = vadd.f32 %v3343_v12, %v12681_v53  ;;  %v13077_v12 = vadd.f32 %v12840_v63, %v16571_v28  ;;  %v13089_v63 = vmul.f32 8.0, %v12907_v10 }
 0x5bd   : > { %16560 = vst [vmem:[#allocation201_spill] sm:$0xff] %v13041_v30  ;;  %v4052_v39 = vrot.slane %v13049_v41, 4  ;;  %v3718_v49 = vrot.slane %v3717_v8, 2 }
 0x5be   : > { %16561 = vst [vmem:[#allocation202_spill] sm:$0xff] %v13044_v27  ;;  %v4160_v27 = vrot.slane %v4159_v48, 2  ;;  %v4165_v9 = vadd.f32 %v4164_v0, %v13020_v60  ;;  %v3494_v1 = vmul.f32 0.5, %v3344_v51 }
 0x5bf   : > { %16563 = vst [vmem:[#allocation112_spill] sm:$0xff] %v13049_v41  ;;  %v4053_v0 = vadd.f32 %v4052_v39, %v13049_v41  ;;  %v13108_v39 = vmul.f32 4.0, %v12925_v5 }
 0x5c0   : > { %16564 = vst [vmem:[#allocation203_spill] sm:$0xff] %v13051_v34  ;;  %8510 = vtanh.f32 %v3494_v1  ;;  %v4166_v43 = vrot.slane %v4165_v9, 2  ;;  %v3719_v1 = vadd.f32 %v3718_v49, %v3717_v8  ;;  %v16596_v34 = vld [vmem:[#allocation124_spill] sm:$0xff] }
 0x5c1   : > { %16565 = vst [vmem:[#allocation204_spill] sm:$0xff] %v13055_v21  ;;  %v3605_v21 = vadd.f32 %v3604_v45, %v13015_v3  ;;  %v13081_v45 = vadd.f32 %v12842_v54, %v16573_v7  ;;  %v13092_v54 = vmul.f32 -15.0, %v12898_v14  ;;  %v4054_v49 = vrot.slane %v4053_v0, 2 }
 0x5c2   : > { %16566 = vst [vmem:[#allocation205_spill] sm:$0xff] %v13058_v19  ;;  %v16569_v19 = vld [vmem:[#allocation126_spill] sm:$0xff] }
 0x5c3   : > { %16567 = vst [vmem:[#allocation206_spill] sm:$0xff] %v13063_v57  ;;  %v3416_v2 = vadd.f32 %v3415_v20, %v16569_v19  ;;  %v4161_v57 = vadd.f32 %v4160_v27, %v4159_v48  ;;  %v3602_v20 = vrot.slane %v3601_v35, 1  ;;  %v3606_v47 = vrot.slane %v3605_v21, 2 }
 0x5c4   : > { %16568 = vst [vmem:[#allocation207_spill] sm:$0xff] %v13066_v33  ;;  %v13073_v33 = vpop.eup %8504  ;;  %v13085_v48 = vadd.f32 1e-05, %v12889_v29  ;;  %v3715_v27 = vadd.f32 %v3714_v32, %v3713_v23  ;;  %v13101_v29 = vmul.f32 -7.0, %v12912_v59  ;;  %v4050_v32 = vrot.slane %v4049_v56, 1  ;;  %v3366_v59 = vpop.f32.mrf.mxu3 }
 0x5c5   : > { %v3481_v50 = vmul.f32 0.5, %v3416_v2  ;;  %16570 = vst [vmem:[#allocation126_spill] sm:$0xff] %v13073_v33  ;;  %v4839_v2 = vadd.f32 1e-05, %v12915_v40  ;;  %v4162_v51 = vrot.slane %v4161_v57, 1  ;;  %v13094_v24 = vpop.eup %8506  ;;  %v13103_v40 = vadd.f32 %v3602_v20, %v3601_v35 }
 0x5c6   : > { %16572 = vst [vmem:[#allocation106_spill] sm:$0xff] %v13077_v12  ;;  %v13105_v23 = vpop.eup %8508  ;;  %v13110_v28 = vadd.f32 %v3606_v47, %v3605_v21  ;;  %v13117_v35 = vadd.f32 1e-05, %v12932_v58  ;;  %v13120_v47 = vadd.f32 1e-05, %v12937_v37  ;;  %v13123_v5 = vadd.f32 %v4050_v32, %v4049_v56  ;;  %v16586_v37 = vld [vmem:[#allocation145_spill] sm:$0xff] }
 0x5c7   : > { %16574 = vst [vmem:[#allocation122_spill] sm:$0xff] %v13081_v45  ;;  %8512 = vtanh.f32 %v3481_v50  ;;  %v13098_v50 = vmul.f32 16.0, %v12907_v10  ;;  %v8511_v8 = vpop.eup %8510  ;;  %v16584_v10 = vld [vmem:[#allocation141_spill] sm:$0xff]  ;;  %v4163_v20 = vadd.f32 %v4162_v51, %v4161_v57  ;;  %v16587_v56 = vld [vmem:[#allocation107_spill] sm:$0xff]  ;;  %v3847_v14 = vmul.f32 -7.0, %v13103_v40 }
 0x5c8   : > { %16575 = vst [vmem:[#allocation208_spill] sm:$0xff] %v13085_v48  ;;  %8514 = vrcp.f32 %v4839_v2  ;;  %v3743_v7 = vadd.f32 %v3715_v27, %v16584_v10  ;;  %v4167_v48 = vadd.f32 %v4166_v43, %v4165_v9  ;;  %v3542_v33 = vmul.f32 0.5, %v8511_v8  ;;  %v13128_v43 = vpop.permute.xlu1 %3252  ;;  %v16598_v12 = vld [vmem:[#allocation135_spill] sm:$0xff] }
 0x5c9   : > { %16576 = vst [vmem:[#allocation209_spill] sm:$0xff] %v13089_v63  ;;  %8516 = vrcp.f32 %v4887_v52  ;;  %v3751_v2 = vmul.f32 -1.0, %v13103_v40  ;;  %v13126_v9 = vadd.f32 %v4054_v49, %v4053_v0  ;;  %v3367_v52 = vadd.f32 %v3366_v59, %v13128_v43  ;;  %v16589_v49 = vld [vmem:[#allocation80_spill] sm:$0xff] }
 0x5ca   : > { %16577 = vst [vmem:[#allocation210_spill] sm:$0xff] %v13092_v54  ;;  %v13130_v58 = vadd.f32 0.5, %v3542_v33  ;;  %v4168_v57 = vrot.slane %v4167_v48, 1  ;;  %v3791_v8 = vmul.f32 2.0, %v3743_v7  ;;  %v13134_v10 = vadd.f32 %v4163_v20, %v16586_v37 }
 0x5cb   : > { %16578 = vst [vmem:[#allocation211_spill] sm:$0xff] %v13094_v24  ;;  %v3759_v27 = vadd.f32 %v3751_v2, %v3743_v7  ;;  %v3799_v20 = vmul.f32 -3.0, %v13103_v40  ;;  %v3895_v16 = vmul.f32 -15.0, %v13103_v40  ;;  %v3935_v61 = vmul.f32 16.0, %v3743_v7 }
 0x5cc   : > { %16579 = vst [vmem:[#allocation212_spill] sm:$0xff] %v13098_v50  ;;  %v13140_v32 = vmul.f32 %v13130_v58, %v16587_v56  ;;  %v13144_v0 = vmul.f32 %v13130_v58, %v13130_v58  ;;  %v3839_v56 = vmul.f32 4.0, %v3743_v7  ;;  %v13159_v50 = vadd.f32 %v4168_v57, %v4167_v48 }
 0x5cd   : > { %16580 = vst [vmem:[#allocation213_spill] sm:$0xff] %v13101_v29  ;;  %v8513_v24 = vpop.eup %8512  ;;  %v4199_v46 = vmul.f32 -1.0, %v13123_v5 }
 0x5ce   : > { %16581 = vst [vmem:[#allocation214_spill] sm:$0xff] %v13105_v23  ;;  %v3720_v23 = vrot.slane %v3719_v1, 1  ;;  %v3529_v21 = vmul.f32 0.5, %v8513_v24  ;;  %v13146_v33 = vpop.eup %8514  ;;  %v4722_v37 = vrot.slane %v13144_v0, 4  ;;  %v3855_v57 = vadd.f32 %v3847_v14, %v3839_v56 }
 0x5cf   : > { %16582 = vst [vmem:[#allocation215_spill] sm:$0xff] %v13108_v39  ;;  %v3807_v39 = vadd.f32 %v3799_v20, %v3791_v8  ;;  %v3943_v20 = vmul.f32 -31.0, %v13103_v40  ;;  %v4247_v14 = vmul.f32 -3.0, %v13123_v5 }
 0x5d0   : > { %16583 = vst [vmem:[#allocation216_spill] sm:$0xff] %v13113_v17  ;;  %v3553_v51 = vadd.f32 0.5, %v3529_v21  ;;  %v13136_v24 = vadd.f32 %v3720_v23, %v3719_v1  ;;  %v4666_v23 = vrot.slane %v13140_v32, 4  ;;  %v13157_v17 = vpop.eup %8516  ;;  %v4723_v2 = vadd.f32 %v4722_v37, %v13144_v0 }
 0x5d1   : > { %16585 = vst [vmem:[#allocation141_spill] sm:$0xff] %v13117_v35  ;;  %v3887_v1 = vmul.f32 8.0, %v3743_v7  ;;  %v3815_v8 = vadd.f32 1e-05, %v3807_v39  ;;  %v3863_v7 = vadd.f32 1e-05, %v3855_v57 }
 0x5d2   : > { %16588 = vst [vmem:[#allocation145_spill] sm:$0xff] %v13146_v33  ;;  %v13149_v21 = vmul.f32 %v3553_v51, %v16589_v49  ;;  %v13151_v59 = vmul.f32 %v3553_v51, %v3553_v51  ;;  %v3487_v49 = vmul.f32 0.5, %v3367_v52  ;;  %v4667_v35 = vadd.f32 %v4666_v23, %v13140_v32 }
 0x5d3   : > { %16591 = vst [vmem:[#allocation80_spill] sm:$0xff] %v13157_v17  ;;  %v4017_v63 = vsub.f32 1.0, %v3553_v51  ;;  %v3767_v33 = vadd.f32 1e-05, %v3759_v27  ;;  %v4724_v48 = vrot.slane %v4723_v2, 2  ;;  %v4239_v23 = vmul.f32 2.0, %v13134_v10 }
 0x5d4   : > { %16590 = vst [vmem:[#allocation107_spill] sm:$0xff] %v13149_v21  ;;  %v3722_v29 = vrot.slane %v13151_v59, 4  ;;  %v3610_v54 = vrot.slane %v13149_v21, 4  ;;  %v4668_v17 = vrot.slane %v4667_v35, 2  ;;  %v3903_v45 = vadd.f32 %v3895_v16, %v3887_v1  ;;  %v16592_v51 = vld [vmem:[#allocation115_spill] sm:$0xff] }
 0x5d5   : > { %v4725_v44 = vadd.f32 %v4724_v48, %v4723_v2  ;;  %v13173_v22 = vmul.f32 %v4017_v63, %v16592_v51  ;;  %v13175_v25 = vmul.f32 %v4017_v63, %v4017_v63  ;;  %8518 = vtanh.f32 %v3487_v49 }
 0x5d6   : > { %v3723_v52 = vadd.f32 %v3722_v29, %v13151_v59  ;;  %v4669_v37 = vadd.f32 %v4668_v17, %v4667_v35  ;;  %v3611_v27 = vadd.f32 %v3610_v54, %v13149_v21  ;;  %8520 = vrcp.f32 %v3767_v33 }
 0x5d7   : > { %16593 = vst [vmem:[#allocation115_spill] sm:$0xff] %v13173_v22  ;;  %v4726_v39 = vrot.slane %v4725_v44, 1  ;;  %v3951_v17 = vadd.f32 %v3943_v20, %v3935_v61  ;;  %v4255_v35 = vadd.f32 %v4247_v14, %v4239_v23  ;;  %8522 = vrcp.f32 %v3815_v8 }
 0x5d8   : > { %16594 = vst [vmem:[#allocation217_spill] sm:$0xff] %v13175_v25  ;;  %v4670_v29 = vrot.slane %v4669_v37, 1  ;;  %v3724_v56 = vrot.slane %v3723_v52, 2  ;;  %v3911_v54 = vadd.f32 1e-05, %v3903_v45  ;;  %v3612_v2 = vrot.slane %v3611_v27, 2 }
 0x5d9   : > { %v4727_v1 = vadd.f32 %v4726_v39, %v4725_v44  ;;  %v4058_v48 = vrot.slane %v13173_v22, 4  ;;  %v4170_v63 = vrot.slane %v13175_v25, 4  ;;  %v4207_v51 = vadd.f32 %v4199_v46, %v13134_v10 }
 0x5da   : > { %v13178_v16 = vadd.f32 %v4670_v29, %v4669_v37  ;;  %8524 = vrcp.f32 %v3863_v7  ;;  %v4287_v61 = vmul.f32 4.0, %v13134_v10  ;;  %v3725_v44 = vadd.f32 %v3724_v56, %v3723_v52 }
 0x5db   : > { %v13184_v30 = vadd.f32 %v16596_v34, %v4727_v1  ;;  %v4263_v57 = vadd.f32 1e-05, %v4255_v35  ;;  %v4295_v45 = vmul.f32 -7.0, %v13123_v5  ;;  %v8519_v8 = vpop.eup %8518  ;;  %v16597_v14 = vrot.slane %v13110_v28, 1 }
 0x5dc   : > { %16595 = vst [vmem:[#allocation218_spill] sm:$0xff] %v13178_v16  ;;  %v4824_v49 = vmul.f32 -1.0, %v13178_v16  ;;  %v4872_v33 = vmul.f32 -3.0, %v13178_v16  ;;  %v4920_v23 = vmul.f32 -7.0, %v13178_v16  ;;  %v8521_v37 = vpop.eup %8520  ;;  %v3613_v52 = vadd.f32 %v3612_v2, %v3611_v27 }
 0x5dd   : > { %v4864_v46 = vmul.f32 2.0, %v13184_v30  ;;  %v4912_v34 = vmul.f32 4.0, %v13184_v30  ;;  %v13199_v29 = vadd.f32 %v16597_v14, %v13110_v28  ;;  %v4059_v39 = vadd.f32 %v4058_v48, %v13173_v22  ;;  %v8523_v56 = vpop.eup %8522  ;;  %v16600_v48 = vld [vmem:[#allocation136_spill] sm:$0xff] }
 0x5de   : > { %v13191_v20 = vadd.f32 %v4824_v49, %v13184_v30  ;;  %v4171_v7 = vadd.f32 %v4170_v63, %v13175_v25  ;;  %v4215_v49 = vadd.f32 1e-05, %v4207_v51  ;;  %v4303_v60 = vadd.f32 %v4295_v45, %v4287_v61 }
 0x5df   : > { %v13203_v35 = vadd.f32 %v4872_v33, %v4864_v46  ;;  %v13205_v1 = vadd.f32 %v4920_v23, %v4912_v34  ;;  %v3744_v55 = vadd.f32 %v13136_v24, %v16598_v12  ;;  %v3726_v18 = vrot.slane %v3725_v44, 1 }
 0x5e0   : > { %8526 = vrcp.f32 %v3911_v54  ;;  %v3959_v41 = vadd.f32 1e-05, %v3951_v17  ;;  %v8525_v28 = vpop.eup %8524  ;;  %v16599_v27 = vrot.slane %v13126_v9, 1  ;;  %v13216_v63 = vadd.f32 %v13159_v50, %v16600_v48 }
 0x5e1   : > { %v13219_v33 = vsub.f32 1.0, %v13130_v58  ;;  %8528 = vrcp.f32 %v4263_v57  ;;  %v3614_v51 = vrot.slane %v3613_v52, 1  ;;  %v4060_v61 = vrot.slane %v4059_v39, 2  ;;  %v16601_v58 = vld [vmem:[#allocation98_spill] sm:$0xff] }
 0x5e2   : > { %v13212_v2 = vadd.f32 %v16599_v27, %v13126_v9  ;;  %v4172_v12 = vrot.slane %v4171_v7, 2  ;;  %v3831_v24 = vadd.f32 %v8523_v56, %v8521_v37  ;;  %v13222_v17 = vadd.f32 1e-05, %v13103_v40 }
 0x5e3   : > { %8530 = vrcp.f32 %v4215_v49  ;;  %v4311_v54 = vadd.f32 1e-05, %v4303_v60  ;;  %v4335_v9 = vmul.f32 8.0, %v13134_v10  ;;  %v3727_v45 = vadd.f32 %v3726_v18, %v3725_v44 }
 0x5e4   : > { %v13225_v46 = vmul.f32 0.5, %v8519_v8  ;;  %v3879_v50 = vadd.f32 %v8525_v28, %v3831_v24  ;;  %8532 = vrcp.f32 %v3959_v41  ;;  %v13229_v34 = vmul.f32 %v16601_v58, %v13219_v33  ;;  %v16602_v28 = vld [vmem:[#allocation137_spill] sm:$0xff] }
 0x5e5   : > { %v4343_v57 = vmul.f32 -15.0, %v13123_v5  ;;  %v4383_v23 = vmul.f32 16.0, %v13134_v10  ;;  %v4391_v40 = vmul.f32 -31.0, %v13123_v5  ;;  %v13234_v14 = vadd.f32 %v3614_v51, %v3613_v52 }
 0x5e6   : > { %v8527_v37 = vpop.eup %8526  ;;  %v13236_v60 = vadd.f32 %v4060_v61, %v4059_v39  ;;  %v13238_v18 = vadd.f32 %v4172_v12, %v4171_v7  ;;  %8534 = vrcp.f32 %v4311_v54  ;;  %v3752_v56 = vmul.f32 -1.0, %v13199_v29 }
 0x5e7   : > { %v8529_v44 = vpop.eup %8528  ;;  %v4351_v41 = vadd.f32 %v4343_v57, %v4335_v9  ;;  %v4399_v8 = vadd.f32 %v4391_v40, %v4383_v23  ;;  %v3792_v49 = vmul.f32 2.0, %v3744_v55  ;;  %v13242_v27 = vadd.f32 %v3727_v45, %v16602_v28 }
 0x5e8   : > { %v3927_v10 = vadd.f32 %v8527_v37, %v3879_v50  ;;  %v3800_v48 = vmul.f32 -3.0, %v13199_v29  ;;  %v3840_v24 = vmul.f32 4.0, %v3744_v55  ;;  %v3760_v61 = vadd.f32 %v3752_v56, %v3744_v55 }
 0x5e9   : > { %v8531_v52 = vpop.eup %8530  ;;  %v4359_v51 = vadd.f32 1e-05, %v4351_v41  ;;  %v4407_v39 = vadd.f32 1e-05, %v4399_v8  ;;  %v3848_v7 = vmul.f32 -7.0, %v13199_v29  ;;  %v3888_v57 = vmul.f32 8.0, %v3744_v55 }
 0x5ea   : > { %v8533_v12 = vpop.eup %8532  ;;  %v4279_v9 = vadd.f32 %v8531_v52, %v8529_v44  ;;  %v3808_v58 = vadd.f32 %v3800_v48, %v3792_v49  ;;  %v3768_v23 = vadd.f32 1e-05, %v3760_v61  ;;  %v3896_v50 = vmul.f32 -15.0, %v13199_v29 }
 0x5eb   : > { %8536 = vrcp.f32 %v4359_v51  ;;  %v3856_v45 = vadd.f32 %v3848_v7, %v3840_v24  ;;  %v4174_v37 = vrot.slane %v13238_v18, 1  ;;  %v3975_v28 = vadd.f32 %v8533_v12, %v3927_v10  ;;  %v3392_v51 = vpop.f32.mrf.mxu0 }
 0x5ec   : > { %v8535_v40 = vpop.eup %8534  ;;  %8538 = vrcp.f32 %v4407_v39  ;;  %v3816_v41 = vadd.f32 1e-05, %v3808_v58  ;;  %v3904_v56 = vadd.f32 %v3896_v50, %v3888_v57  ;;  %v3936_v25 = vmul.f32 16.0, %v3744_v55 }
 0x5ed   : > { %8540 = vrcp.f32 %v3768_v23  ;;  %v3864_v8 = vadd.f32 1e-05, %v3856_v45  ;;  %v4327_v22 = vadd.f32 %v8535_v40, %v4279_v9  ;;  %v3944_v44 = vmul.f32 -31.0, %v13199_v29 }
 0x5ee   : > { %8542 = vrcp.f32 %v3816_v41  ;;  %v4200_v49 = vmul.f32 -1.0, %v13212_v2  ;;  %v3912_v48 = vadd.f32 1e-05, %v3904_v56  ;;  %v4240_v24 = vmul.f32 2.0, %v13216_v63 }
 0x5ef   : > { %8544 = vrcp.f32 %v3864_v8  ;;  %v4248_v52 = vmul.f32 -3.0, %v13212_v2  ;;  %v3952_v10 = vadd.f32 %v3944_v44, %v3936_v25  ;;  %v4288_v61 = vmul.f32 4.0, %v13216_v63 }
 0x5f0   : > { %v4208_v39 = vadd.f32 %v4200_v49, %v13216_v63  ;;  %v4296_v55 = vmul.f32 -7.0, %v13212_v2  ;;  %v3991_v12 = vmul.f32 %v13222_v17, %v3975_v28  ;;  %v3393_v9 = vadd.f32 %v3392_v51, %v13128_v43  ;;  %v3441_v49 = vpop.f32.mrf.mxu2 }
 0x5f1   : > { %v8537_v7 = vpop.eup %8536  ;;  %v4256_v58 = vadd.f32 %v4248_v52, %v4240_v24  ;;  %v4336_v57 = vmul.f32 8.0, %v13216_v63  ;;  %8546 = vrcp.f32 %v3912_v48  ;;  %v3960_v41 = vadd.f32 1e-05, %v3952_v10 }
 0x5f2   : > { %v8539_v23 = vpop.eup %8538  ;;  %v4375_v45 = vadd.f32 %v8537_v7, %v4327_v22  ;;  %v4216_v50 = vadd.f32 1e-05, %v4208_v39  ;;  %v4304_v40 = vadd.f32 %v4296_v55, %v4288_v61  ;;  %v4344_v56 = vmul.f32 -15.0, %v13212_v2 }
 0x5f3   : > { %v8541_v25 = vpop.eup %8540  ;;  %v4264_v8 = vadd.f32 1e-05, %v4256_v58  ;;  %v4384_v44 = vmul.f32 16.0, %v13216_v63  ;;  %v4431_v28 = vadd.f32 1e-05, %v13123_v5  ;;  %v4392_v52 = vmul.f32 -31.0, %v13212_v2 }
 0x5f4   : > { %v8543_v54 = vpop.eup %8542  ;;  %v4423_v17 = vadd.f32 %v8539_v23, %v4375_v45  ;;  %v4312_v24 = vadd.f32 1e-05, %v4304_v40  ;;  %v3488_v22 = vmul.f32 0.5, %v3393_v9  ;;  %8548 = vrcp.f32 %v4216_v50 }
 0x5f5   : > { %v8545_v51 = vpop.eup %8544  ;;  %v3832_v48 = vadd.f32 %v8543_v54, %v8541_v25  ;;  %v4352_v39 = vadd.f32 %v4344_v56, %v4336_v57  ;;  %8550 = vrcp.f32 %v4264_v8  ;;  %v4400_v10 = vadd.f32 %v4392_v52, %v4384_v44  ;;  %v16606_v52 = vld [vmem:[#allocation138_spill] sm:$0xff] }
 0x5f6   : > { %v4439_v61 = vmul.f32 %v4431_v28, %v4423_v17  ;;  %v3442_v55 = vadd.f32 %v3441_v49, %v16569_v19  ;;  %v3999_v7 = vmul.f32 0.2, %v3991_v12  ;;  %8552 = vrcp.f32 %v3960_v41 }
 0x5f7   : > { %v3880_v63 = vadd.f32 %v8545_v51, %v3832_v48  ;;  %v4360_v58 = vadd.f32 1e-05, %v4352_v39  ;;  %v8547_v23 = vpop.eup %8546  ;;  %8554 = vrcp.f32 %v4312_v24  ;;  %v4408_v5 = vadd.f32 1e-05, %v4400_v10 }
 0x5f8   : > { %v4447_v45 = vmul.f32 0.2, %v4439_v61  ;;  %v3482_v40 = vmul.f32 0.5, %v3442_v55  ;;  %v4175_v21 = vadd.f32 %v4174_v37, %v13238_v18  ;;  %8556 = vtanh.f32 %v3488_v22 }
 0x5f9   : > { %v3753_v54 = vmul.f32 -1.0, %v13234_v14  ;;  %v3793_v9 = vmul.f32 2.0, %v13242_v27  ;;  %v3928_v50 = vadd.f32 %v8547_v23, %v3880_v63  ;;  %8558 = vrcp.f32 %v4360_v58 }
 0x5fa   : > { %v4455_v57 = vadd.f32 %v4447_v45, %v3999_v7  ;;  %v3801_v12 = vmul.f32 -3.0, %v13234_v14  ;;  %v8549_v25 = vpop.eup %8548  ;;  %v5114_v41 = vrot.slane %v13229_v34, 4  ;;  %v13271_v8 = vmul.f32 %v13219_v33, %v13219_v33 }
 0x5fb   : > { %v13274_v56 = vadd.f32 0.5, %v13225_v46  ;;  %8560 = vtanh.f32 %v3482_v40  ;;  %v8551_v18 = vpop.eup %8550  ;;  %v3841_v49 = vmul.f32 4.0, %v13242_v27  ;;  %v16605_v28 = vrot.slane %v13236_v60, 1 }
 0x5fc   : > { %16603 = vst [vmem:[#allocation124_spill] sm:$0xff] %v13271_v8  ;;  %v4463_v37 = vmul.f32 0.5, %v4455_v57  ;;  %8562 = vrcp.f32 %v4408_v5  ;;  %v3809_v44 = vadd.f32 %v3801_v12, %v3793_v9  ;;  %v8553_v17 = vpop.eup %8552  ;;  %v13283_v51 = vadd.f32 %v4175_v21, %v16606_v52 }
 0x5fd   : > { %16604 = vst [vmem:[#allocation135_spill] sm:$0xff] %v13274_v56  ;;  %v13280_v24 = vadd.f32 %v16605_v28, %v13236_v60  ;;  %v4280_v33 = vadd.f32 %v8551_v18, %v8549_v25  ;;  %v3761_v46 = vadd.f32 %v3753_v54, %v13242_v27  ;;  %v8555_v22 = vpop.eup %8554  ;;  %8564 = vrcp.f32 %v13120_v47 }
 0x5fe   : > { %v13288_v48 = vmul.f32 %v4463_v37, %v13274_v56  ;;  %v3976_v39 = vadd.f32 %v8553_v17, %v3928_v50  ;;  %v3849_v61 = vmul.f32 -7.0, %v13234_v14  ;;  %v8557_v10 = vpop.eup %8556  ;;  %v13292_v55 = vadd.f32 1e-05, %v12959_v62 }
 0x5ff   : > { %v5170_v60 = vrot.slane %v13271_v8, 4  ;;  %v4328_v21 = vadd.f32 %v8555_v22, %v4280_v33  ;;  %v3817_v7 = vadd.f32 1e-05, %v3809_v44  ;;  %v8559_v63 = vpop.eup %8558  ;;  %v5115_v58 = vadd.f32 %v5114_v41, %v13229_v34 }
 0x600   : > { %16607 = vst [vmem:[#allocation136_spill] sm:$0xff] %v13288_v48  ;;  %v3984_v23 = vadd.f32 1e-05, %v13199_v29  ;;  %v3857_v47 = vadd.f32 %v3849_v61, %v3841_v49  ;;  %v3889_v45 = vmul.f32 8.0, %v13242_v27  ;;  %v3769_v54 = vadd.f32 1e-05, %v3761_v46 }
 0x601   : > { %16608 = vst [vmem:[#allocation98_spill] sm:$0xff] %v13292_v55  ;;  %v8561_v5 = vpop.eup %8560  ;;  %v4376_v40 = vadd.f32 %v8559_v63, %v4328_v21  ;;  %v4201_v9 = vmul.f32 -1.0, %v13280_v24  ;;  %v4241_v62 = vmul.f32 2.0, %v13283_v51  ;;  %v3897_v25 = vmul.f32 -15.0, %v13234_v14 }
 0x602   : > { %v8563_v57 = vpop.eup %8562  ;;  %v3992_v50 = vmul.f32 %v3984_v23, %v3976_v39  ;;  %v3530_v12 = vmul.f32 0.5, %v8561_v5  ;;  %v4249_v18 = vmul.f32 -3.0, %v13280_v24  ;;  %v4432_v29 = vadd.f32 1e-05, %v13212_v2 }
 0x603   : > { %v4424_v41 = vadd.f32 %v8563_v57, %v4376_v40  ;;  %8566 = vrcp.f32 %v3817_v7  ;;  %v4209_v37 = vadd.f32 %v4201_v9, %v13283_v51  ;;  %v13304_v44 = vpop.eup %8564  ;;  %v3536_v49 = vmul.f32 0.5, %v8557_v10 }
 0x604   : > { %16609 = vst [vmem:[#allocation137_spill] sm:$0xff] %v13304_v44  ;;  %v3865_v17 = vadd.f32 1e-05, %v3857_v47  ;;  %v3905_v28 = vadd.f32 %v3897_v25, %v3889_v45  ;;  %v4257_v52 = vadd.f32 %v4249_v18, %v4241_v62  ;;  %8568 = vrcp.f32 %v3769_v54 }
 0x605   : > { %v4440_v33 = vmul.f32 %v4432_v29, %v4424_v41  ;;  %v3937_v46 = vmul.f32 16.0, %v13242_v27  ;;  %v4289_v22 = vmul.f32 4.0, %v13283_v51  ;;  %v5171_v39 = vadd.f32 %v5170_v60, %v13271_v8  ;;  %v16611_v60 = vld [vmem:[#allocation147_spill] sm:$0xff]  ;;  %v3418_v41 = vpop.f32.mrf.mxu1 }
 0x606   : > { %v4000_v61 = vmul.f32 0.2, %v3992_v50  ;;  %v3554_v21 = vadd.f32 0.5, %v3530_v12  ;;  %v4217_v2 = vadd.f32 1e-05, %v4209_v37  ;;  %v3945_v63 = vmul.f32 -31.0, %v13234_v14 }
 0x607   : > { %v4448_v7 = vmul.f32 0.2, %v4440_v33  ;;  %v4265_v23 = vadd.f32 1e-05, %v4257_v52  ;;  %v4297_v10 = vmul.f32 -7.0, %v13280_v24  ;;  %v5116_v47 = vrot.slane %v5115_v58, 2 }
 0x608   : > { %v13311_v45 = vadd.f32 0.5, %v3536_v49  ;;  %8570 = vrcp.f32 %v3865_v17  ;;  %v3913_v5 = vadd.f32 1e-05, %v3905_v28  ;;  %v3953_v54 = vadd.f32 %v3945_v63, %v3937_v46  ;;  %v16613_v33 = vld [vmem:[#allocation104_spill] sm:$0xff] }
 0x609   : > { %v8567_v40 = vpop.eup %8566  ;;  %v4456_v27 = vadd.f32 %v4448_v7, %v4000_v61  ;;  %8572 = vrcp.f32 %v4265_v23  ;;  %v4305_v9 = vadd.f32 %v4297_v10, %v4289_v22  ;;  %v3289_v62 = vadd.f32 %v16611_v60, %v13128_v43 }
 0x60a   : > { %16610 = vst [vmem:[#allocation138_spill] sm:$0xff] %v13311_v45  ;;  %v5172_v57 = vrot.slane %v5171_v39, 2  ;;  %v13315_v50 = vmul.f32 %v3554_v21, %v3554_v21  ;;  %v4018_v12 = vsub.f32 1.0, %v3554_v21  ;;  %v8569_v25 = vpop.eup %8568  ;;  %8574 = vrcp.f32 %v4217_v2  ;;  %v16614_v2 = vld [vmem:[#allocation151_spill] sm:$0xff] }
 0x60b   : > { %v4464_v18 = vmul.f32 0.5, %v4456_v27  ;;  %v4313_v29 = vadd.f32 1e-05, %v4305_v9  ;;  %v4337_v37 = vmul.f32 8.0, %v13283_v51  ;;  %v5117_v49 = vadd.f32 %v5116_v47, %v5115_v58 }
 0x60c   : > { %v3419_v17 = vadd.f32 %v3418_v41, %v13128_v43  ;;  %v3833_v28 = vadd.f32 %v8569_v25, %v8567_v40  ;;  %8576 = vrcp.f32 %v3913_v5  ;;  %v13323_v46 = vmul.f32 %v3554_v21, %v16613_v33  ;;  %v3369_v25 = vpop.f32.mrf.mxu3 }
 0x60d   : > { %v13320_v52 = vmul.f32 %v4464_v18, %v13311_v45  ;;  %v3961_v22 = vadd.f32 1e-05, %v3953_v54  ;;  %v4345_v61 = vmul.f32 -15.0, %v13280_v24  ;;  %v3315_v63 = vadd.f32 %v16614_v2, %v13128_v43 }
 0x60e   : > { %v8571_v7 = vpop.eup %8570  ;;  %v5173_v23 = vadd.f32 %v5172_v57, %v5171_v39  ;;  %v3728_v58 = vrot.slane %v13315_v50, 4  ;;  %v13329_v10 = vmul.f32 %v4018_v12, %v4018_v12  ;;  %8578 = vrcp.f32 %v4313_v29 }
 0x60f   : > { %16612 = vst [vmem:[#allocation147_spill] sm:$0xff] %v13320_v52  ;;  %v8573_v47 = vpop.eup %8572  ;;  %v4353_v5 = vadd.f32 %v4345_v61, %v4337_v37  ;;  %v4385_v40 = vmul.f32 16.0, %v13283_v51  ;;  %v4393_v21 = vmul.f32 -31.0, %v13280_v24  ;;  %v3341_v27 = vadd.f32 %v12970_v6, %v13128_v43  ;;  %v16616_v51 = vld [vmem:[#allocation118_spill] sm:$0xff]  ;;  %v3395_v52 = vpop.f32.mrf.mxu0 }
 0x610   : > { %16615 = vst [vmem:[#allocation104_spill] sm:$0xff] %v13329_v10  ;;  %v5118_v54 = vrot.slane %v5117_v49, 1  ;;  %v3489_v9 = vmul.f32 0.5, %v3419_v17  ;;  %v3881_v60 = vadd.f32 %v8571_v7, %v3833_v28  ;;  %v8575_v18 = vpop.eup %8574  ;;  %v3616_v39 = vrot.slane %v13323_v46, 4 }
 0x611   : > { %8580 = vrcp.f32 %v3961_v22  ;;  %v4361_v57 = vadd.f32 1e-05, %v4353_v5  ;;  %v4401_v41 = vadd.f32 %v4393_v21, %v4385_v40  ;;  %v5174_v29 = vrot.slane %v5173_v23, 1 }
 0x612   : > { %v8577_v33 = vpop.eup %8576  ;;  %v3729_v37 = vadd.f32 %v3728_v58, %v13315_v50  ;;  %v13338_v61 = vmul.f32 %v4018_v12, %v16616_v51  ;;  %v4281_v2 = vadd.f32 %v8575_v18, %v8573_v47  ;;  %v4176_v6 = vrot.slane %v13329_v10, 4  ;;  %v16624_v51 = vld [vmem:[#allocation127_spill] sm:$0xff] }
 0x613   : > { %8582 = vrcp.f32 %v4361_v57  ;;  %v4409_v17 = vadd.f32 1e-05, %v4401_v41  ;;  %v3370_v28 = vadd.f32 %v3369_v25, %v12681_v53  ;;  %v13342_v7 = vmul.f32 0.5, %v3289_v62 }
 0x614   : > { %v13344_v22 = vmul.f32 0.5, %v3315_v63  ;;  %8584 = vtanh.f32 %v3489_v9  ;;  %v3929_v5 = vadd.f32 %v8577_v33, %v3881_v60  ;;  %v8579_v40 = vpop.eup %8578  ;;  %v3617_v58 = vadd.f32 %v3616_v39, %v13323_v46 }
 0x615   : > { %16617 = vst [vmem:[#allocation151_spill] sm:$0xff] %v13342_v7  ;;  %8586 = vrcp.f32 %v4409_v17  ;;  %v3495_v12 = vmul.f32 0.5, %v3370_v28  ;;  %v3396_v47 = vadd.f32 %v3395_v52, %v12681_v53  ;;  %v13348_v21 = vadd.f32 %v5118_v54, %v5117_v49 }
 0x616   : > { %16618 = vst [vmem:[#allocation118_spill] sm:$0xff] %v13344_v22  ;;  %v5175_v18 = vadd.f32 %v5174_v29, %v5173_v23  ;;  %v4064_v57 = vrot.slane %v13338_v61, 4  ;;  %v4329_v41 = vadd.f32 %v8579_v40, %v4281_v2  ;;  %v3730_v62 = vrot.slane %v3729_v37, 2 }
 0x617   : > { %16619 = vst [vmem:[#allocation219_spill] sm:$0xff] %v13348_v21  ;;  %v8581_v25 = vpop.eup %8580  ;;  %v4177_v63 = vadd.f32 %v4176_v6, %v13329_v10  ;;  %8588 = vtanh.f32 %v3495_v12  ;;  %v3496_v9 = vmul.f32 0.5, %v3396_v47  ;;  %v13352_v60 = vmul.f32 0.5, %v3341_v27 }
 0x618   : > { %v13356_v39 = vadd.f32 %v13027_v31, %v13140_v32  ;;  %v13360_v49 = vadd.f32 %v13039_v13, %v13144_v0  ;;  %v3977_v52 = vadd.f32 %v8581_v25, %v3929_v5  ;;  %v13363_v54 = vmul.f32 8.0, %v13184_v30 }
 0x619   : > { %16620 = vst [vmem:[#allocation220_spill] sm:$0xff] %v13352_v60  ;;  %v8583_v23 = vpop.eup %8582  ;;  %v13366_v33 = vmul.f32 -15.0, %v13178_v16  ;;  %v3618_v29 = vrot.slane %v3617_v58, 2  ;;  %8590 = vtanh.f32 %v3496_v9  ;;  %v13369_v2 = vadd.f32 %v16624_v51, %v5175_v18 }
 0x61a   : > { %16621 = vst [vmem:[#allocation221_spill] sm:$0xff] %v13360_v49  ;;  %v8585_v27 = vpop.eup %8584  ;;  %v5272_v31 = vmul.f32 -1.0, %v13348_v21  ;;  %v3985_v32 = vadd.f32 1e-05, %v13234_v14  ;;  %v4377_v13 = vadd.f32 %v8583_v23, %v4329_v41  ;;  %v13374_v6 = vmul.f32 16.0, %v13184_v30 }
 0x61b   : > { %16622 = vst [vmem:[#allocation222_spill] sm:$0xff] %v13363_v54  ;;  %v8587_v0 = vpop.eup %8586  ;;  %v3731_v17 = vadd.f32 %v3730_v62, %v3729_v37  ;;  %v4065_v28 = vadd.f32 %v4064_v57, %v13338_v61  ;;  %v4178_v5 = vrot.slane %v4177_v63, 2  ;;  %v5320_v40 = vmul.f32 -3.0, %v13348_v21 }
 0x61c   : > { %16623 = vst [vmem:[#allocation223_spill] sm:$0xff] %v13366_v33  ;;  %v3993_v12 = vmul.f32 %v3985_v32, %v3977_v52  ;;  %v4425_v47 = vadd.f32 %v8587_v0, %v4377_v13  ;;  %v4433_v18 = vadd.f32 1e-05, %v13280_v24  ;;  %v4840_v9 = vadd.f32 1e-05, %v13191_v20 }
 0x61d   : > { %16625 = vst [vmem:[#allocation127_spill] sm:$0xff] %v13369_v2  ;;  %v8589_v25 = vpop.eup %8588  ;;  %v13381_v14 = vmul.f32 -7.0, %v13348_v21  ;;  %v3619_v41 = vadd.f32 %v3618_v29, %v3617_v58  ;;  %v3537_v23 = vmul.f32 0.5, %v8585_v27  ;;  %v5280_v30 = vadd.f32 %v5272_v31, %v13369_v2 }
 0x61e   : > { %16626 = vst [vmem:[#allocation224_spill] sm:$0xff] %v13374_v6  ;;  %v5312_v37 = vmul.f32 2.0, %v13369_v2  ;;  %v4441_v57 = vmul.f32 %v4433_v18, %v4425_v47  ;;  %v3543_v62 = vmul.f32 0.5, %v8589_v25  ;;  %v13386_v52 = vmul.f32 4.0, %v13369_v2  ;;  %v16630_v47 = vld [vmem:[#allocation96_spill] sm:$0xff] }
 0x61f   : > { %16627 = vst [vmem:[#allocation225_spill] sm:$0xff] %v13381_v14  ;;  %v8591_v51 = vpop.eup %8590  ;;  %v3732_v32 = vrot.slane %v3731_v17, 1  ;;  %v4066_v24 = vrot.slane %v4065_v28, 2  ;;  %v4179_v13 = vadd.f32 %v4178_v5, %v4177_v63  ;;  %v4001_v0 = vmul.f32 0.2, %v3993_v12 }
 0x620   : > { %16628 = vst [vmem:[#allocation226_spill] sm:$0xff] %v13386_v52  ;;  %v4449_v20 = vmul.f32 0.2, %v4441_v57  ;;  %v3567_v45 = vadd.f32 0.5, %v3543_v62  ;;  %v3544_v48 = vmul.f32 0.5, %v8591_v51  ;;  %8592 = vrcp.f32 %v4840_v9 }
 0x621   : > { %v4888_v58 = vadd.f32 1e-05, %v13203_v35  ;;  %v3620_v29 = vrot.slane %v3619_v41, 1  ;;  %v13389_v27 = vadd.f32 0.5, %v3537_v23  ;;  %v3733_v22 = vadd.f32 %v3732_v32, %v3731_v17  ;;  %v16632_v35 = vld [vmem:[#allocation85_spill] sm:$0xff] }
 0x622   : > { %v4457_v31 = vadd.f32 %v4449_v20, %v4001_v0  ;;  %v13392_v18 = vmul.f32 %v3567_v45, %v16630_v47  ;;  %v13394_v25 = vmul.f32 %v3567_v45, %v3567_v45  ;;  %v5081_v56 = vsub.f32 1.0, %v3567_v45  ;;  %v16635_v17 = vld [vmem:[#allocation109_spill] sm:$0xff] }
 0x623   : > { %16629 = vst [vmem:[#allocation227_spill] sm:$0xff] %v13389_v27  ;;  %v4067_v44 = vadd.f32 %v4066_v24, %v4065_v28  ;;  %v4180_v63 = vrot.slane %v4179_v13, 1  ;;  %v3568_v5 = vadd.f32 0.5, %v3544_v48  ;;  %v5288_v23 = vadd.f32 1e-05, %v5280_v30  ;;  %v16637_v24 = vld [vmem:[#allocation133_spill] sm:$0xff] }
 0x624   : > { %16631 = vst [vmem:[#allocation96_spill] sm:$0xff] %v13394_v25  ;;  %v4465_v12 = vmul.f32 0.5, %v4457_v31  ;;  %v4672_v57 = vrot.slane %v13392_v18, 4  ;;  %v4728_v9 = vrot.slane %v13394_v25, 4  ;;  %v13399_v62 = vmul.f32 %v16632_v35, %v5081_v56 }
 0x625   : > { %v5328_v51 = vadd.f32 %v5320_v40, %v5312_v37  ;;  %v3621_v0 = vadd.f32 %v3620_v29, %v3619_v41  ;;  %v13401_v20 = vmul.f32 %v5081_v56, %v5081_v56  ;;  %v13409_v28 = vmul.f32 %v3568_v5, %v16635_v17 }
 0x626   : > { %v13404_v47 = vmul.f32 %v4465_v12, %v13389_v27  ;;  %v4673_v45 = vadd.f32 %v4672_v57, %v13392_v18  ;;  %v4729_v48 = vadd.f32 %v4728_v9, %v13394_v25  ;;  %v13411_v32 = vpop.eup %8592  ;;  %v3746_v31 = vadd.f32 %v3733_v22, %v16637_v24  ;;  %v3421_v22 = vpop.f32.mrf.mxu1 }
 0x627   : > { %16633 = vst [vmem:[#allocation85_spill] sm:$0xff] %v13401_v20  ;;  %v4068_v35 = vrot.slane %v4067_v44, 1  ;;  %v5120_v40 = vrot.slane %v13399_v62, 4  ;;  %v5176_v56 = vrot.slane %v13401_v20, 4  ;;  %8594 = vrcp.f32 %v4888_v58 }
 0x628   : > { %16634 = vst [vmem:[#allocation228_spill] sm:$0xff] %v13404_v47  ;;  %v13417_v41 = vadd.f32 1e-05, %v13205_v1  ;;  %v13420_v30 = vmul.f32 8.0, %v13369_v2  ;;  %v4181_v37 = vadd.f32 %v4180_v63, %v4179_v13  ;;  %8596 = vrcp.f32 %v5288_v23  ;;  %v16642_v13 = vld [vmem:[#allocation134_spill] sm:$0xff] }
 0x629   : > { %16636 = vst [vmem:[#allocation109_spill] sm:$0xff] %v13411_v32  ;;  %v13422_v29 = vadd.f32 1e-05, %v5328_v51  ;;  %v13424_v12 = vmul.f32 %v3568_v5, %v3568_v5  ;;  %v5082_v57 = vsub.f32 1.0, %v3568_v5  ;;  %v4674_v9 = vrot.slane %v4673_v45, 2  ;;  %v16643_v2 = vld [vmem:[#allocation114_spill] sm:$0xff] }
 0x62a   : > { %16638 = vst [vmem:[#allocation133_spill] sm:$0xff] %v13417_v41  ;;  %v4730_v17 = vrot.slane %v4729_v48, 2  ;;  %v4678_v24 = vrot.slane %v13409_v28, 4  ;;  %v3754_v47 = vmul.f32 -1.0, %v3621_v0  ;;  %v13427_v58 = vadd.f32 %v4068_v35, %v4067_v44 }
 0x62b   : > { %16639 = vst [vmem:[#allocation229_spill] sm:$0xff] %v13420_v30  ;;  %v5121_v1 = vadd.f32 %v5120_v40, %v13399_v62  ;;  %v5177_v27 = vadd.f32 %v5176_v56, %v13401_v20  ;;  %v3794_v55 = vmul.f32 2.0, %v3746_v31  ;;  %v13432_v63 = vadd.f32 %v4181_v37, %v16642_v13 }
 0x62c   : > { %16640 = vst [vmem:[#allocation230_spill] sm:$0xff] %v13422_v29  ;;  %v3802_v23 = vmul.f32 -3.0, %v3621_v0  ;;  %v3850_v51 = vmul.f32 -7.0, %v3621_v0  ;;  %v3422_v5 = vadd.f32 %v3421_v22, %v12681_v53  ;;  %v4734_v30 = vrot.slane %v13424_v12, 4 }
 0x62d   : > { %16641 = vst [vmem:[#allocation231_spill] sm:$0xff] %v13424_v12  ;;  %v13437_v21 = vmul.f32 %v16643_v2, %v5082_v57  ;;  %v3842_v14 = vmul.f32 4.0, %v3746_v31  ;;  %v3898_v44 = vmul.f32 -15.0, %v3621_v0  ;;  %v13439_v35 = vpop.eup %8594  ;;  %v4675_v40 = vadd.f32 %v4674_v9, %v4673_v45 }
 0x62e   : > { %16644 = vst [vmem:[#allocation134_spill] sm:$0xff] %v13439_v35  ;;  %v4731_v52 = vadd.f32 %v4730_v17, %v4729_v48  ;;  %v4679_v56 = vadd.f32 %v4678_v24, %v13409_v28  ;;  %v3762_v29 = vadd.f32 %v3754_v47, %v3746_v31  ;;  %v13442_v37 = vpop.eup %8596  ;;  %v5122_v13 = vrot.slane %v5121_v1, 2 }
 0x62f   : > { %16645 = vst [vmem:[#allocation114_spill] sm:$0xff] %v13442_v37  ;;  %v5178_v6 = vrot.slane %v5177_v27, 2  ;;  %v3810_v41 = vadd.f32 %v3802_v23, %v3794_v55  ;;  %v3890_v22 = vmul.f32 8.0, %v3746_v31  ;;  %v3938_v16 = vmul.f32 16.0, %v3746_v31 }
 0x630   : > { %v3946_v32 = vmul.f32 -31.0, %v3621_v0  ;;  %v13444_v33 = vadd.f32 1e-05, %v3621_v0  ;;  %v4202_v2 = vmul.f32 -1.0, %v13427_v58  ;;  %v4735_v54 = vadd.f32 %v4734_v30, %v13424_v12 }
 0x631   : > { %v5126_v45 = vrot.slane %v13437_v21, 4  ;;  %v13449_v48 = vmul.f32 %v5082_v57, %v5082_v57  ;;  %v3858_v9 = vadd.f32 %v3850_v51, %v3842_v14  ;;  %v4676_v47 = vrot.slane %v4675_v40, 1 }
 0x632   : > { %v4732_v17 = vrot.slane %v4731_v52, 1  ;;  %v4680_v24 = vrot.slane %v4679_v56, 2  ;;  %v3770_v37 = vadd.f32 1e-05, %v3762_v29  ;;  %v5123_v35 = vadd.f32 %v5122_v13, %v5121_v1 }
 0x633   : > { %16646 = vst [vmem:[#allocation232_spill] sm:$0xff] %v13449_v48  ;;  %v5179_v55 = vadd.f32 %v5178_v6, %v5177_v27  ;;  %v3818_v23 = vadd.f32 1e-05, %v3810_v41  ;;  %v3906_v31 = vadd.f32 %v3898_v44, %v3890_v22  ;;  %v3954_v7 = vadd.f32 %v3946_v32, %v3938_v16 }
 0x634   : > { %v4210_v0 = vadd.f32 %v4202_v2, %v13432_v63  ;;  %v4242_v60 = vmul.f32 2.0, %v13432_v63  ;;  %v13453_v20 = vmul.f32 0.5, %v3422_v5  ;;  %v4736_v30 = vrot.slane %v4735_v54, 2 }
 0x635   : > { %v5127_v57 = vadd.f32 %v5126_v45, %v13437_v21  ;;  %v5182_v14 = vrot.slane %v13449_v48, 4  ;;  %v3866_v51 = vadd.f32 1e-05, %v3858_v9  ;;  %v13457_v12 = vadd.f32 %v4676_v47, %v4675_v40  ;;  %v16648_v45 = vld [vmem:[#allocation161_spill] sm:$0xff] }
 0x636   : > { %v4733_v29 = vadd.f32 %v4732_v17, %v4731_v52  ;;  %v4681_v1 = vadd.f32 %v4680_v24, %v4679_v56  ;;  %v4250_v6 = vmul.f32 -3.0, %v13427_v58  ;;  %v5124_v27 = vrot.slane %v5123_v35, 1 }
 0x637   : > { %16647 = vst [vmem:[#allocation233_spill] sm:$0xff] %v13457_v12  ;;  %v5180_v16 = vrot.slane %v5179_v55, 1  ;;  %8598 = vrcp.f32 %v3818_v23  ;;  %v3914_v32 = vadd.f32 1e-05, %v3906_v31  ;;  %v3962_v41 = vadd.f32 1e-05, %v3954_v7 }
 0x638   : > { %8600 = vrcp.f32 %v3770_v37  ;;  %v4218_v5 = vadd.f32 1e-05, %v4210_v0  ;;  %v4258_v44 = vadd.f32 %v4250_v6, %v4242_v60  ;;  %v4737_v13 = vadd.f32 %v4736_v30, %v4735_v54  ;;  %v3444_v37 = vpop.f32.mrf.mxu2 }
 0x639   : > { %v5128_v22 = vrot.slane %v5127_v57, 2  ;;  %v13461_v2 = vadd.f32 %v5182_v14, %v13449_v48  ;;  %v4290_v40 = vmul.f32 4.0, %v13432_v63  ;;  %v4817_v52 = vadd.f32 %v16648_v45, %v4733_v29 }
 0x63a   : > { %v4825_v56 = vmul.f32 -1.0, %v13457_v12  ;;  %v4682_v9 = vrot.slane %v4681_v1, 1  ;;  %8602 = vrcp.f32 %v3866_v51  ;;  %v13466_v47 = vadd.f32 %v5124_v27, %v5123_v35 }
 0x63b   : > { %v5181_v17 = vadd.f32 %v5180_v16, %v5179_v55  ;;  %8604 = vrcp.f32 %v3914_v32  ;;  %v4298_v7 = vmul.f32 -7.0, %v13427_v58  ;;  %v3445_v60 = vadd.f32 %v3444_v37, %v13128_v43  ;;  %v16652_v16 = vld [vmem:[#allocation89_spill] sm:$0xff] }
 0x63c   : > { %16649 = vst [vmem:[#allocation161_spill] sm:$0xff] %v13466_v47  ;;  %8606 = vrcp.f32 %v3962_v41  ;;  %v4266_v54 = vadd.f32 1e-05, %v4258_v44  ;;  %v4338_v24 = vmul.f32 8.0, %v13432_v63  ;;  %v4873_v31 = vmul.f32 -3.0, %v13457_v12 }
 0x63d   : > { %v8599_v23 = vpop.eup %8598  ;;  %v4738_v0 = vrot.slane %v4737_v13, 1  ;;  %v13472_v30 = vadd.f32 %v5128_v22, %v5127_v57  ;;  %v5184_v35 = vrot.slane %v13461_v2, 2  ;;  %v4833_v55 = vadd.f32 %v4825_v56, %v4817_v52 }
 0x63e   : > { %v8601_v14 = vpop.eup %8600  ;;  %v4921_v51 = vmul.f32 -7.0, %v13457_v12  ;;  %v13477_v29 = vmul.f32 -15.0, %v13457_v12  ;;  %v13479_v6 = vadd.f32 %v4682_v9, %v4681_v1  ;;  %v4865_v27 = vmul.f32 2.0, %v4817_v52 }
 0x63f   : > { %v13482_v32 = vadd.f32 %v16652_v16, %v5181_v17  ;;  %v5273_v41 = vmul.f32 -1.0, %v13466_v47  ;;  %v4306_v44 = vadd.f32 %v4298_v7, %v4290_v40  ;;  %v3490_v22 = vmul.f32 0.5, %v3445_v60  ;;  %v3467_v60 = vpop.f32.mrf.mxu3 }
 0x640   : > { %16650 = vst [vmem:[#allocation234_spill] sm:$0xff] %v13477_v29  ;;  %v8603_v57 = vpop.eup %8602  ;;  %v3834_v45 = vadd.f32 %v8601_v14, %v8599_v23  ;;  %v4346_v37 = vmul.f32 -15.0, %v13427_v58  ;;  %v4386_v56 = vmul.f32 16.0, %v13432_v63  ;;  %v4913_v10 = vmul.f32 4.0, %v4817_v52 }
 0x641   : > { %16651 = vst [vmem:[#allocation235_spill] sm:$0xff] %v13479_v6  ;;  %v8605_v48 = vpop.eup %8604  ;;  %v13487_v12 = vmul.f32 8.0, %v4817_v52  ;;  %v13489_v1 = vmul.f32 16.0, %v4817_v52  ;;  %v4394_v9 = vmul.f32 -31.0, %v13427_v58  ;;  %v5321_v16 = vmul.f32 -3.0, %v13466_v47 }
 0x642   : > { %16653 = vst [vmem:[#allocation89_spill] sm:$0xff] %v13482_v32  ;;  %v8607_v17 = vpop.eup %8606  ;;  %8608 = vrcp.f32 %v4218_v5  ;;  %v4314_v40 = vadd.f32 1e-05, %v4306_v44  ;;  %v4354_v7 = vadd.f32 %v4346_v37, %v4338_v24  ;;  %v4841_v23 = vadd.f32 1e-05, %v4833_v55 }
 0x643   : > { %16654 = vst [vmem:[#allocation236_spill] sm:$0xff] %v13487_v12  ;;  %v4881_v14 = vadd.f32 %v4873_v31, %v4865_v27  ;;  %8610 = vrcp.f32 %v4266_v54  ;;  %v4402_v29 = vadd.f32 %v4394_v9, %v4386_v56  ;;  %v5281_v63 = vadd.f32 %v5273_v41, %v13482_v32  ;;  %v3447_v31 = vpop.f32.mrf.mxu2 }
 0x644   : > { %16655 = vst [vmem:[#allocation237_spill] sm:$0xff] %v13489_v1  ;;  %8612 = vtanh.f32 %v3490_v22  ;;  %v3882_v8 = vadd.f32 %v8603_v57, %v3834_v45  ;;  %v4362_v12 = vadd.f32 1e-05, %v4354_v7  ;;  %v4739_v52 = vadd.f32 %v4738_v0, %v4737_v13 }
 0x645   : > { %8614 = vrcp.f32 %v4314_v40  ;;  %v4410_v1 = vadd.f32 1e-05, %v4402_v29  ;;  %v3468_v49 = vadd.f32 %v3467_v60, %v16569_v19  ;;  %v4929_v25 = vadd.f32 %v4921_v51, %v4913_v10  ;;  %v16659_v51 = vld [vmem:[#allocation105_spill] sm:$0xff] }
 0x646   : > { %v5313_v5 = vmul.f32 2.0, %v13482_v32  ;;  %v13497_v24 = vmul.f32 -7.0, %v13466_v47  ;;  %8616 = vrcp.f32 %v4362_v12  ;;  %v4889_v54 = vadd.f32 1e-05, %v4881_v14 }
 0x647   : > { %v13500_v55 = vmul.f32 4.0, %v13482_v32  ;;  %8618 = vrcp.f32 %v4410_v1  ;;  %v3483_v27 = vmul.f32 0.5, %v3468_v49  ;;  %v5289_v13 = vadd.f32 1e-05, %v5281_v63 }
 0x648   : > { %16656 = vst [vmem:[#allocation238_spill] sm:$0xff] %v13497_v24  ;;  %v8609_v41 = vpop.eup %8608  ;;  %v13503_v0 = vmul.f32 8.0, %v13482_v32  ;;  %v3930_v19 = vadd.f32 %v8605_v48, %v3882_v8  ;;  %8620 = vtanh.f32 %v13453_v20  ;;  %v4818_v29 = vadd.f32 %v16659_v51, %v4739_v52 }
 0x649   : > { %16657 = vst [vmem:[#allocation239_spill] sm:$0xff] %v13500_v55  ;;  %v8611_v10 = vpop.eup %8610  ;;  %v4826_v12 = vmul.f32 -1.0, %v13479_v6  ;;  %8622 = vtanh.f32 %v3483_v27  ;;  %v3448_v44 = vadd.f32 %v3447_v31, %v12681_v53  ;;  %v5329_v22 = vadd.f32 %v5321_v16, %v5313_v5 }
 0x64a   : > { %16658 = vst [vmem:[#allocation240_spill] sm:$0xff] %v13503_v0  ;;  %v8613_v57 = vpop.eup %8612  ;;  %8624 = vrcp.f32 %v4841_v23  ;;  %v5185_v49 = vadd.f32 %v5184_v35, %v13461_v2  ;;  %v4282_v45 = vadd.f32 %v8611_v10, %v8609_v41  ;;  %v13510_v56 = vadd.f32 1e-05, %v4929_v25 }
 0x64b   : > { %v8615_v37 = vpop.eup %8614  ;;  %8626 = vrcp.f32 %v4889_v54  ;;  %v4874_v8 = vmul.f32 -3.0, %v13479_v6  ;;  %v5130_v20 = vrot.slane %v13472_v30, 1  ;;  %v13515_v1 = vmul.f32 -7.0, %v13479_v6 }
 0x64c   : > { %16660 = vst [vmem:[#allocation105_spill] sm:$0xff] %v13510_v56  ;;  %v8617_v48 = vpop.eup %8616  ;;  %v13518_v9 = vmul.f32 -15.0, %v13479_v6  ;;  %v3978_v40 = vadd.f32 %v8607_v17, %v3930_v19  ;;  %v4330_v16 = vadd.f32 %v8615_v37, %v4282_v45  ;;  %8628 = vrcp.f32 %v5289_v13 }
 0x64d   : > { %v8619_v7 = vpop.eup %8618  ;;  %v4834_v2 = vadd.f32 %v4826_v12, %v4818_v29  ;;  %v4866_v35 = vmul.f32 2.0, %v4818_v29  ;;  %v3498_v60 = vmul.f32 0.5, %v3448_v44  ;;  %v13520_v23 = vadd.f32 1e-05, %v5329_v22 }
 0x64e   : > { %16661 = vst [vmem:[#allocation241_spill] sm:$0xff] %v13518_v9  ;;  %v8621_v25 = vpop.eup %8620  ;;  %v13522_v14 = vmul.f32 4.0, %v4818_v29  ;;  %v5186_v63 = vrot.slane %v5185_v49, 1  ;;  %v4378_v52 = vadd.f32 %v8617_v48, %v4330_v16  ;;  %v13524_v31 = vmul.f32 8.0, %v4818_v29 }
 0x64f   : > { %16662 = vst [vmem:[#allocation242_spill] sm:$0xff] %v13520_v23  ;;  %v8623_v5 = vpop.eup %8622  ;;  %v13526_v54 = vmul.f32 16.0, %v4818_v29  ;;  %v13529_v17 = vadd.f32 %v5130_v20, %v13472_v30  ;;  %v3545_v27 = vmul.f32 0.5, %v8621_v25  ;;  %v3994_v13 = vmul.f32 %v13444_v33, %v3978_v40  ;;  %v16669_v33 = vld [vmem:[#allocation110_spill] sm:$0xff]  ;;  %v16679_v23 = vld [vmem:[#allocation119_spill] sm:$0xff] }
 0x650   : > { %16663 = vst [vmem:[#allocation243_spill] sm:$0xff] %v13524_v31  ;;  %v13531_v41 = vpop.eup %8624  ;;  %v4426_v19 = vadd.f32 %v8619_v7, %v4378_v52  ;;  %v4434_v10 = vadd.f32 1e-05, %v13427_v58  ;;  %v3531_v51 = vmul.f32 0.5, %v8623_v5  ;;  %v13537_v44 = vadd.f32 1e-05, %v4834_v2 }
 0x651   : > { %16664 = vst [vmem:[#allocation244_spill] sm:$0xff] %v13526_v54  ;;  %v13535_v12 = vpop.eup %8626  ;;  %v4882_v22 = vadd.f32 %v4874_v8, %v4866_v35  ;;  %v3569_v45 = vadd.f32 0.5, %v3545_v27  ;;  %8630 = vtanh.f32 %v3498_v60  ;;  %v5187_v29 = vadd.f32 %v5186_v63, %v5185_v49  ;;  %v16671_v52 = vld [vmem:[#allocation111_spill] sm:$0xff]  ;;  %v16672_v60 = vld [vmem:[#allocation116_spill] sm:$0xff] }
 0x652   : > { %16665 = vst [vmem:[#allocation245_spill] sm:$0xff] %v13529_v17  ;;  %v3538_v37 = vmul.f32 0.5, %v8613_v57  ;;  %v4442_v30 = vmul.f32 %v4434_v10, %v4426_v19  ;;  %v3555_v20 = vadd.f32 0.5, %v3531_v51  ;;  %v13539_v48 = vpop.eup %8628  ;;  %v5274_v16 = vmul.f32 -1.0, %v13529_v17 }
 0x653   : > { %16666 = vst [vmem:[#allocation246_spill] sm:$0xff] %v13531_v41  ;;  %v13543_v40 = vmul.f32 %v3569_v45, %v16669_v33  ;;  %v13545_v58 = vmul.f32 %v3569_v45, %v3569_v45  ;;  %v5083_v7 = vsub.f32 1.0, %v3569_v45  ;;  %v4002_v25 = vmul.f32 0.2, %v3994_v13  ;;  %v16676_v41 = vld [vmem:[#allocation155_spill] sm:$0xff] }
 0x654   : > { %16667 = vst [vmem:[#allocation247_spill] sm:$0xff] %v13535_v12  ;;  %v4450_v2 = vmul.f32 0.2, %v4442_v30  ;;  %v13548_v8 = vmul.f32 %v3555_v20, %v16671_v52  ;;  %v13550_v35 = vmul.f32 %v3555_v20, %v3555_v20  ;;  %v13559_v27 = vadd.f32 0.5, %v3538_v37 }
 0x655   : > { %16668 = vst [vmem:[#allocation248_spill] sm:$0xff] %v13539_v48  ;;  %v4684_v57 = vrot.slane %v13543_v40, 4  ;;  %v4740_v49 = vrot.slane %v13545_v58, 4  ;;  %v13555_v63 = vmul.f32 %v16672_v60, %v5083_v7  ;;  %v13557_v5 = vmul.f32 %v5083_v7, %v5083_v7 }
 0x656   : > { %16670 = vst [vmem:[#allocation110_spill] sm:$0xff] %v13545_v58  ;;  %v4458_v19 = vadd.f32 %v4450_v2, %v4002_v25  ;;  %v3622_v13 = vrot.slane %v13548_v8, 4  ;;  %v3734_v10 = vrot.slane %v13550_v35, 4  ;;  %v4019_v48 = vsub.f32 1.0, %v3555_v20 }
 0x657   : > { %16673 = vst [vmem:[#allocation111_spill] sm:$0xff] %v13555_v63  ;;  %v8631_v51 = vpop.eup %8630  ;;  %v4685_v45 = vadd.f32 %v4684_v57, %v13543_v40  ;;  %v4741_v30 = vadd.f32 %v4740_v49, %v13545_v58  ;;  %v5132_v33 = vrot.slane %v13555_v63, 4  ;;  %v5188_v52 = vrot.slane %v13557_v5, 4 }
 0x658   : > { %16674 = vst [vmem:[#allocation116_spill] sm:$0xff] %v13557_v5  ;;  %v4466_v60 = vmul.f32 0.5, %v4458_v19  ;;  %v3623_v7 = vadd.f32 %v3622_v13, %v13548_v8  ;;  %v3735_v37 = vadd.f32 %v3734_v10, %v13550_v35  ;;  %v13572_v57 = vadd.f32 %v16676_v41, %v5187_v29 }
 0x659   : > { %16675 = vst [vmem:[#allocation249_spill] sm:$0xff] %v13559_v27  ;;  %v4686_v25 = vrot.slane %v4685_v45, 2  ;;  %v4742_v2 = vrot.slane %v4741_v30, 2  ;;  %v5133_v0 = vadd.f32 %v5132_v33, %v13555_v63  ;;  %v5189_v12 = vadd.f32 %v5188_v52, %v13557_v5 }
 0x65a   : > { %16677 = vst [vmem:[#allocation155_spill] sm:$0xff] %v13572_v57  ;;  %v13575_v49 = vmul.f32 %v4466_v60, %v13559_v27  ;;  %v3736_v32 = vrot.slane %v3735_v37, 2  ;;  %v3546_v47 = vmul.f32 0.5, %v8631_v51  ;;  %v3624_v10 = vrot.slane %v3623_v7, 2 }
 0x65b   : > { %v4687_v19 = vadd.f32 %v4686_v25, %v4685_v45  ;;  %v4743_v24 = vadd.f32 %v4742_v2, %v4741_v30  ;;  %v5134_v13 = vrot.slane %v5133_v0, 2  ;;  %v5190_v55 = vrot.slane %v5189_v12, 2 }
 0x65c   : > { %16678 = vst [vmem:[#allocation250_spill] sm:$0xff] %v13575_v49  ;;  %v3737_v20 = vadd.f32 %v3736_v32, %v3735_v37  ;;  %v13578_v56 = vmul.f32 %v4019_v48, %v16679_v23  ;;  %v13580_v33 = vmul.f32 %v4019_v48, %v4019_v48  ;;  %v4890_v6 = vadd.f32 1e-05, %v4882_v22 }
 0x65d   : > { %v4688_v52 = vrot.slane %v4687_v19, 1  ;;  %v4744_v54 = vrot.slane %v4743_v24, 1  ;;  %v5135_v41 = vadd.f32 %v5134_v13, %v5133_v0  ;;  %v5191_v29 = vadd.f32 %v5190_v55, %v5189_v12  ;;  %v16681_v0 = vld [vmem:[#allocation157_spill] sm:$0xff] }
 0x65e   : > { %16680 = vst [vmem:[#allocation119_spill] sm:$0xff] %v13580_v33  ;;  %v4930_v60 = vadd.f32 %v13515_v1, %v13522_v14  ;;  %v5322_v51 = vmul.f32 -3.0, %v13529_v17  ;;  %v3738_v45 = vrot.slane %v3737_v20, 1  ;;  %v5282_v23 = vadd.f32 %v5274_v16, %v13572_v57 }
 0x65f   : > { %v13585_v30 = vadd.f32 %v4688_v52, %v4687_v19  ;;  %v4745_v25 = vadd.f32 %v4744_v54, %v4743_v24  ;;  %v5136_v32 = vrot.slane %v5135_v41, 1  ;;  %v5192_v37 = vrot.slane %v5191_v29, 1  ;;  %v16683_v54 = vld [vmem:[#allocation162_spill] sm:$0xff]  ;;  %v16684_v52 = vld [vmem:[#allocation159_spill] sm:$0xff] }
 0x660   : > { %v3625_v48 = vadd.f32 %v3624_v10, %v3623_v7  ;;  %v3739_v2 = vadd.f32 %v3738_v45, %v3737_v20  ;;  %v4182_v49 = vrot.slane %v13580_v33, 4  ;;  %v4070_v1 = vrot.slane %v13578_v56, 4 }
 0x661   : > { %v13590_v55 = vadd.f32 %v16681_v0, %v4745_v25  ;;  %v4827_v12 = vmul.f32 -1.0, %v13585_v30  ;;  %v3570_v14 = vadd.f32 0.5, %v3546_v47  ;;  %v4875_v22 = vmul.f32 -3.0, %v13585_v30 }
 0x662   : > { %v13595_v19 = vadd.f32 %v5136_v32, %v5135_v41  ;;  %v5193_v24 = vadd.f32 %v5192_v37, %v5191_v29  ;;  %v13598_v13 = vadd.f32 %v3739_v2, %v16683_v54  ;;  %v4923_v20 = vmul.f32 -7.0, %v13585_v30 }
 0x663   : > { %v13601_v16 = vadd.f32 %v4827_v12, %v13590_v55  ;;  %v4867_v7 = vmul.f32 2.0, %v13590_v55  ;;  %v4915_v10 = vmul.f32 4.0, %v13590_v55  ;;  %v3626_v41 = vrot.slane %v3625_v48, 1 }
 0x664   : > { %16682 = vst [vmem:[#allocation157_spill] sm:$0xff] %v13595_v19  ;;  %v13607_v45 = vadd.f32 %v16684_v52, %v5193_v24  ;;  %v5275_v47 = vmul.f32 -1.0, %v13595_v19  ;;  %v4183_v29 = vadd.f32 %v4182_v49, %v13580_v33  ;;  %8632 = vrcp.f32 %v13537_v44 }
 0x665   : > { %v5314_v25 = vmul.f32 2.0, %v13572_v57  ;;  %v13613_v32 = vadd.f32 %v4875_v22, %v4867_v7  ;;  %v13615_v37 = vadd.f32 %v4923_v20, %v4915_v10  ;;  %v5290_v2 = vadd.f32 1e-05, %v5282_v23  ;;  %v16688_v10 = vld [vmem:[#allocation113_spill] sm:$0xff] }
 0x666   : > { %16685 = vst [vmem:[#allocation162_spill] sm:$0xff] %v13607_v45  ;;  %v13618_v0 = vadd.f32 %v5275_v47, %v13607_v45  ;;  %v5315_v12 = vmul.f32 2.0, %v13607_v45  ;;  %v5323_v24 = vmul.f32 -3.0, %v13595_v19  ;;  %8634 = vrcp.f32 %v4890_v6 }
 0x667   : > { %v13622_v54 = vadd.f32 1e-05, %v4930_v60  ;;  %v13625_v49 = vmul.f32 -7.0, %v13529_v17  ;;  %v4071_v44 = vadd.f32 %v4070_v1, %v13578_v56  ;;  %v13630_v7 = vadd.f32 %v3626_v41, %v3625_v48 }
 0x668   : > { %v13628_v22 = vadd.f32 %v5323_v24, %v5315_v12  ;;  %v4184_v23 = vrot.slane %v4183_v29, 2  ;;  %v13633_v20 = vmul.f32 %v3570_v14, %v16688_v10  ;;  %v5330_v52 = vadd.f32 %v5322_v51, %v5314_v25  ;;  %v16694_v10 = vld [vmem:[#allocation120_spill] sm:$0xff] }
 0x669   : > { %16686 = vst [vmem:[#allocation159_spill] sm:$0xff] %v13622_v54  ;;  %v13636_v47 = vmul.f32 4.0, %v13572_v57  ;;  %v13638_v6 = vmul.f32 %v3570_v14, %v3570_v14  ;;  %v5084_v60 = vsub.f32 1.0, %v3570_v14  ;;  %8636 = vrcp.f32 %v5290_v2 }
 0x66a   : > { %16687 = vst [vmem:[#allocation251_spill] sm:$0xff] %v13625_v49  ;;  %v13641_v27 = vmul.f32 8.0, %v13572_v57  ;;  %v4185_v1 = vadd.f32 %v4184_v23, %v4183_v29  ;;  %v4690_v12 = vrot.slane %v13633_v20, 4  ;;  %v13644_v48 = vpop.eup %8632  ;;  %v4072_v41 = vrot.slane %v4071_v44, 2 }
 0x66b   : > { %16689 = vst [vmem:[#allocation113_spill] sm:$0xff] %v13633_v20  ;;  %v4746_v24 = vrot.slane %v13638_v6, 4  ;;  %v13648_v51 = vmul.f32 %v16694_v10, %v5084_v60  ;;  %v13650_v25 = vmul.f32 %v5084_v60, %v5084_v60  ;;  %v3755_v2 = vmul.f32 -1.0, %v13630_v7 }
 0x66c   : > { %16690 = vst [vmem:[#allocation252_spill] sm:$0xff] %v13636_v47  ;;  %v4186_v17 = vrot.slane %v4185_v1, 1  ;;  %v4691_v14 = vadd.f32 %v4690_v12, %v13633_v20  ;;  %v3795_v57 = vmul.f32 2.0, %v13598_v13  ;;  %v13655_v29 = vpop.eup %8634  ;;  %v13657_v23 = vadd.f32 1e-05, %v5330_v52 }
 0x66d   : > { %16691 = vst [vmem:[#allocation253_spill] sm:$0xff] %v13638_v6  ;;  %v5138_v49 = vrot.slane %v13648_v51, 4  ;;  %v5194_v10 = vrot.slane %v13650_v25, 4  ;;  %v3763_v9 = vadd.f32 %v3755_v2, %v13598_v13  ;;  %v3803_v12 = vmul.f32 -3.0, %v13630_v7 }
 0x66e   : > { %16692 = vst [vmem:[#allocation254_spill] sm:$0xff] %v13641_v27  ;;  %v4747_v27 = vadd.f32 %v4746_v24, %v13638_v6  ;;  %v4187_v47 = vadd.f32 %v4186_v17, %v4185_v1  ;;  %v4692_v60 = vrot.slane %v4691_v14, 2  ;;  %v3843_v52 = vmul.f32 4.0, %v13598_v13 }
 0x66f   : > { %16693 = vst [vmem:[#allocation255_spill] sm:$0xff] %v13644_v48  ;;  %v5139_v54 = vadd.f32 %v5138_v49, %v13648_v51  ;;  %v5195_v48 = vadd.f32 %v5194_v10, %v13650_v25  ;;  %v4073_v24 = vadd.f32 %v4072_v41, %v4071_v44  ;;  %v3811_v17 = vadd.f32 %v3803_v12, %v3795_v57 }
 0x670   : > { %16695 = vst [vmem:[#allocation120_spill] sm:$0xff] %v13650_v25  ;;  %v4748_v31 = vrot.slane %v4747_v27, 2  ;;  %v4693_v6 = vadd.f32 %v4692_v60, %v4691_v14  ;;  %v3851_v20 = vmul.f32 -7.0, %v13630_v7  ;;  %v3771_v63 = vadd.f32 1e-05, %v3763_v9 }
 0x671   : > { %16696 = vst [vmem:[#allocation256_spill] sm:$0xff] %v13655_v29  ;;  %v16699_v29 = vld [vmem:[#allocation164_spill] sm:$0xff]  ;;  %v5140_v58 = vrot.slane %v5139_v54, 2  ;;  %v5196_v2 = vrot.slane %v5195_v48, 2  ;;  %v3819_v49 = vadd.f32 1e-05, %v3811_v17  ;;  %v13675_v10 = vadd.f32 %v12977_v42, %v12934_v4  ;;  %v3470_v42 = vpop.f32.mrf.mxu3 }
 0x672   : > { %16697 = vst [vmem:[#allocation257_spill] sm:$0xff] %v13657_v23  ;;  %v13667_v23 = vpop.eup %8636  ;;  %v13670_v5 = vadd.f32 %v4187_v47, %v16699_v29  ;;  %v4749_v1 = vadd.f32 %v4748_v31, %v4747_v27  ;;  %v4694_v33 = vrot.slane %v4693_v6, 1  ;;  %v3859_v41 = vadd.f32 %v3851_v20, %v3843_v52 }
 0x673   : > { %16698 = vst [vmem:[#allocation258_spill] sm:$0xff] %v13667_v23  ;;  %v5141_v23 = vadd.f32 %v5140_v58, %v5139_v54  ;;  %v5197_v44 = vadd.f32 %v5196_v2, %v5195_v48  ;;  %v4074_v47 = vrot.slane %v4073_v24, 1  ;;  %8638 = vrcp.f32 %v3819_v49  ;;  %v16700_v54 = vld [vmem:[#allocation139_spill] sm:$0xff] }
 0x674   : > { %v4750_v25 = vrot.slane %v4749_v1, 1  ;;  %v13677_v29 = vadd.f32 %v4694_v33, %v4693_v6  ;;  %v3891_v31 = vmul.f32 8.0, %v13598_v13  ;;  %v3867_v60 = vadd.f32 1e-05, %v3859_v41 }
 0x675   : > { %v5142_v57 = vrot.slane %v5141_v23, 1  ;;  %v5198_v14 = vrot.slane %v5197_v44, 1  ;;  %v13681_v9 = vmul.f32 -15.0, %v13585_v30  ;;  %8640 = vrcp.f32 %v3771_v63 }
 0x676   : > { %v4751_v27 = vadd.f32 %v4750_v25, %v4749_v1  ;;  %v4828_v4 = vmul.f32 -1.0, %v13677_v29  ;;  %v3899_v58 = vmul.f32 -15.0, %v13630_v7  ;;  %v3471_v48 = vadd.f32 %v3470_v42, %v13128_v43  ;;  %v16701_v43 = vld [vmem:[#allocation140_spill] sm:$0xff] }
 0x677   : > { %v13688_v33 = vadd.f32 %v5142_v57, %v5141_v23  ;;  %v5199_v6 = vadd.f32 %v5198_v14, %v5197_v44  ;;  %v13692_v25 = vmul.f32 8.0, %v13590_v55  ;;  %v4876_v12 = vmul.f32 -3.0, %v13677_v29 }
 0x678   : > { %v13686_v20 = vadd.f32 %v16700_v54, %v4751_v27  ;;  %8642 = vrcp.f32 %v3867_v60  ;;  %v3907_v52 = vadd.f32 %v3899_v58, %v3891_v31  ;;  %v4924_v23 = vmul.f32 -7.0, %v13677_v29 }
 0x679   : > { %v8639_v2 = vpop.eup %8638  ;;  %v4843_v49 = vadd.f32 1e-05, %v13601_v16  ;;  %v13703_v44 = vadd.f32 %v16701_v43, %v5199_v6  ;;  %v5276_v41 = vmul.f32 -1.0, %v13688_v33  ;;  %v3939_v27 = vmul.f32 16.0, %v13598_v13 }
 0x67a   : > { %v13696_v17 = vadd.f32 %v4828_v4, %v13686_v20  ;;  %v4868_v63 = vmul.f32 2.0, %v13686_v20  ;;  %v4916_v1 = vmul.f32 4.0, %v13686_v20  ;;  %v13707_v31 = vadd.f32 %v4074_v47, %v4073_v24 }
 0x67b   : > { %16702 = vst [vmem:[#allocation164_spill] sm:$0xff] %v13703_v44  ;;  %v3491_v60 = vmul.f32 0.5, %v3471_v48  ;;  %v8641_v4 = vpop.eup %8640  ;;  %v13714_v42 = vadd.f32 %v5276_v41, %v13703_v44  ;;  %v5316_v16 = vmul.f32 2.0, %v13703_v44  ;;  %v5324_v58 = vmul.f32 -3.0, %v13688_v33 }
 0x67c   : > { %v13709_v57 = vadd.f32 %v4876_v12, %v4868_v63  ;;  %v13711_v14 = vadd.f32 %v4924_v23, %v4916_v1  ;;  %v3947_v54 = vmul.f32 -31.0, %v13630_v7  ;;  %v13720_v6 = vmul.f32 16.0, %v13590_v55 }
 0x67d   : > { %v13723_v13 = vmul.f32 4.0, %v13607_v45  ;;  %v13726_v24 = vmul.f32 -7.0, %v13595_v19  ;;  %v3835_v47 = vadd.f32 %v8641_v4, %v8639_v2  ;;  %v13729_v12 = vmul.f32 8.0, %v13607_v45 }
 0x67e   : > { %16703 = vst [vmem:[#allocation139_spill] sm:$0xff] %v13720_v6  ;;  %v8643_v48 = vpop.eup %8642  ;;  %v13731_v63 = vadd.f32 %v5324_v58, %v5316_v16  ;;  %v3915_v1 = vadd.f32 1e-05, %v3907_v52  ;;  %v3955_v23 = vadd.f32 %v3947_v54, %v3939_v27  ;;  %v4891_v43 = vadd.f32 1e-05, %v13613_v32  ;;  %v3473_v27 = vpop.f32.mrf.mxu3 }
 0x67f   : > { %16704 = vst [vmem:[#allocation140_spill] sm:$0xff] %v13723_v13  ;;  %8644 = vtanh.f32 %v3491_v60  ;;  %v3883_v55 = vadd.f32 %v8643_v48, %v3835_v47  ;;  %v4203_v41 = vmul.f32 -1.0, %v13707_v31  ;;  %v13736_v13 = vadd.f32 1e-05, %v13615_v37 }
 0x680   : > { %16705 = vst [vmem:[#allocation259_spill] sm:$0xff] %v13726_v24  ;;  %8646 = vrcp.f32 %v4843_v49  ;;  %v3963_v19 = vadd.f32 1e-05, %v3955_v23  ;;  %v4243_v2 = vmul.f32 2.0, %v13670_v5  ;;  %v4251_v16 = vmul.f32 -3.0, %v13707_v31 }
 0x681   : > { %16706 = vst [vmem:[#allocation260_spill] sm:$0xff] %v13729_v12  ;;  %8648 = vrcp.f32 %v3915_v1  ;;  %v4211_v4 = vadd.f32 %v4203_v41, %v13670_v5  ;;  %v4291_v52 = vmul.f32 4.0, %v13670_v5  ;;  %v4299_v32 = vmul.f32 -7.0, %v13707_v31 }
 0x682   : > { %8650 = vrcp.f32 %v3963_v19  ;;  %v4339_v60 = vmul.f32 8.0, %v13670_v5  ;;  %v4347_v49 = vmul.f32 -15.0, %v13707_v31  ;;  %v4259_v58 = vadd.f32 %v4251_v16, %v4243_v2 }
 0x683   : > { %v4219_v37 = vadd.f32 1e-05, %v4211_v4  ;;  %v4387_v54 = vmul.f32 16.0, %v13670_v5  ;;  %v4395_v47 = vmul.f32 -31.0, %v13707_v31  ;;  %v5291_v48 = vadd.f32 1e-05, %v13618_v0 }
 0x684   : > { %v4307_v1 = vadd.f32 %v4299_v32, %v4291_v52  ;;  %v4355_v23 = vadd.f32 %v4347_v49, %v4339_v60  ;;  %v3474_v41 = vadd.f32 %v3473_v27, %v12681_v53  ;;  %8652 = vrcp.f32 %v4891_v43  ;;  %v16707_v52 = vld [vmem:[#allocation102_spill] sm:$0xff] }
 0x685   : > { %v8645_v12 = vpop.eup %8644  ;;  %v4267_v19 = vadd.f32 1e-05, %v4259_v58  ;;  %v4403_v45 = vadd.f32 %v4395_v47, %v4387_v54  ;;  %v4489_v24 = vadd.f32 %v13675_v10, %v12999_v11  ;;  %8654 = vrcp.f32 %v4219_v37  ;;  %v16711_v54 = vld [vmem:[#allocation99_spill] sm:$0xff] }
 0x686   : > { %v13751_v6 = vpop.eup %8646  ;;  %v4315_v2 = vadd.f32 1e-05, %v4307_v1  ;;  %v4363_v5 = vadd.f32 1e-05, %v4355_v23  ;;  %v4470_v4 = vadd.f32 %v12968_v38, %v12952_v26  ;;  %v3499_v16 = vmul.f32 0.5, %v3474_v41  ;;  %v16712_v23 = vld [vmem:[#allocation115_spill] sm:$0xff] }
 0x687   : > { %v8649_v0 = vpop.eup %8648  ;;  %8656 = vrcp.f32 %v4267_v19  ;;  %v4490_v53 = vadd.f32 %v4489_v24, %v13151_v59  ;;  %v4529_v43 = vadd.f32 %v12949_v36, %v16707_v52  ;;  %v3539_v32 = vmul.f32 0.5, %v8645_v12  ;;  %v16708_v59 = vld [vmem:[#allocation107_spill] sm:$0xff]  ;;  %v16709_v12 = vld [vmem:[#allocation112_spill] sm:$0xff] }
 0x688   : > { %v8651_v27 = vpop.eup %8650  ;;  %8658 = vrcp.f32 %v5291_v48  ;;  %v3931_v11 = vadd.f32 %v8649_v0, %v3883_v55  ;;  %v4471_v10 = vadd.f32 %v4470_v4, %v13015_v3  ;;  %v4411_v60 = vadd.f32 1e-05, %v4403_v45  ;;  %v16710_v3 = vld [vmem:[#allocation170_spill] sm:$0xff] }
 0x689   : > { %8660 = vrcp.f32 %v4315_v2  ;;  %v4491_v49 = vadd.f32 %v4490_v53, %v13315_v50  ;;  %v4530_v26 = vadd.f32 %v4529_v43, %v12987_v15  ;;  %v3987_v37 = vadd.f32 1e-05, %v13630_v7  ;;  %v16714_v2 = vld [vmem:[#allocation106_spill] sm:$0xff] }
 0x68a   : > { %v3979_v38 = vadd.f32 %v8651_v27, %v3931_v11  ;;  %8662 = vrcp.f32 %v4363_v5  ;;  %v4472_v24 = vadd.f32 %v4471_v10, %v16708_v59  ;;  %v13763_v58 = vpop.eup %8652  ;;  %v4547_v45 = vadd.f32 %v16711_v54, %v16710_v3 }
 0x68b   : > { %8664 = vtanh.f32 %v3499_v16  ;;  %v4492_v36 = vadd.f32 %v4491_v49, %v13550_v35  ;;  %v4531_v55 = vadd.f32 %v4530_v26, %v16709_v12  ;;  %v8655_v47 = vpop.eup %8654  ;;  %v4844_v50 = vadd.f32 1e-05, %v13696_v17  ;;  %v16713_v35 = vld [vmem:[#allocation154_spill] sm:$0xff]  ;;  %v16718_v26 = vld [vmem:[#allocation203_spill] sm:$0xff]  ;;  %v16720_v12 = vld [vmem:[#allocation189_spill] sm:$0xff] }
 0x68c   : > { %v3995_v15 = vmul.f32 %v3987_v37, %v3979_v38  ;;  %v4473_v48 = vadd.f32 %v4472_v24, %v13323_v46  ;;  %v5544_v7 = vadd.f32 %v13356_v39, %v13392_v18  ;;  %8666 = vrcp.f32 %v4411_v60  ;;  %v16716_v60 = vld [vmem:[#allocation197_spill] sm:$0xff] }
 0x68d   : > { %v8657_v1 = vpop.eup %8656  ;;  %4493 = vadd.xlane.f32.xlu0 %v4492_v36  ;;  %v4532_v41 = vadd.f32 %v4531_v55, %v16712_v23  ;;  %v4548_v19 = vadd.f32 %v4547_v45, %v16713_v35  ;;  %v5603_v5 = vadd.f32 %v16714_v2, %v13229_v34  ;;  %v13780_v17 = vadd.f32 1e-05, %v13628_v22  ;;  %v16721_v55 = vld [vmem:[#allocation190_spill] sm:$0xff]  ;;  %v16727_v35 = vld [vmem:[#allocation168_spill] sm:$0xff]  ;;  %v16728_v2 = vld [vmem:[#allocation117_spill] sm:$0xff] }
 0x68e   : > { %v13777_v4 = vpop.eup %8658  ;;  %v13783_v46 = vmul.f32 -15.0, %v13677_v29  ;;  %v4283_v0 = vadd.f32 %v8657_v1, %v8655_v47  ;;  %v4474_v39 = vadd.f32 %v4473_v48, %v13548_v8  ;;  %v13787_v16 = vmul.f32 8.0, %v13686_v20  ;;  %v16722_v47 = vld [vmem:[#allocation96_spill] sm:$0xff]  ;;  %v16724_v48 = vld [vmem:[#allocation217_spill] sm:$0xff]  ;;  %v16726_v23 = vld [vmem:[#allocation122_spill] sm:$0xff] }
 0x68f   : > { %v8661_v18 = vpop.eup %8660  ;;  %v13789_v53 = vadd.f32 0.5, %v3539_v32  ;;  %v4533_v52 = vadd.f32 %v4532_v41, %v13338_v61  ;;  %v5604_v34 = vadd.f32 %v5603_v5, %v13399_v62  ;;  %v13794_v22 = vmul.f32 16.0, %v13686_v20  ;;  %v16717_v61 = vld [vmem:[#allocation201_spill] sm:$0xff]  ;;  %v16725_v1 = vld [vmem:[#allocation124_spill] sm:$0xff] }
 0x690   : > { %v8663_v43 = vpop.eup %8662  ;;  %v13797_v27 = vmul.f32 -7.0, %v13688_v33  ;;  %v4331_v11 = vadd.f32 %v8661_v18, %v4283_v0  ;;  %4475 = vadd.xlane.f32.xlu1 %v4474_v39  ;;  %v5545_v8 = vadd.f32 %v5544_v7, %v13409_v28  ;;  %8668 = vrcp.f32 %v4844_v50 }
 0x691   : > { %16715 = vst [vmem:[#allocation102_spill] sm:$0xff] %v13789_v53  ;;  %v8665_v10 = vpop.eup %8664  ;;  %v4534_v32 = vadd.f32 %v4533_v52, %v13578_v56  ;;  %v4549_v49 = vadd.f32 %v4548_v19, %v16716_v60  ;;  %v3830_v62 = vadd.f32 %v16718_v26, %v16717_v61  ;;  %v13805_v38 = vadd.f32 1e-05, %v13709_v57  ;;  %v16719_v56 = vld [vmem:[#allocation196_spill] sm:$0xff]  ;;  %v16732_v26 = vld [vmem:[#allocation119_spill] sm:$0xff] }
 0x692   : > { %v13808_v20 = vadd.f32 1e-05, %v13714_v42  ;;  %v4379_v37 = vadd.f32 %v8663_v43, %v4331_v11  ;;  %v3547_v59 = vmul.f32 0.5, %v8665_v10  ;;  %v8667_v24 = vpop.eup %8666  ;;  %v4435_v28 = vadd.f32 1e-05, %v13707_v31  ;;  %v16723_v42 = vld [vmem:[#allocation221_spill] sm:$0xff] }
 0x693   : > { %4535 = vadd.xlane.f32.xlu2 %v4534_v32  ;;  %v5605_v36 = vadd.f32 %v5604_v34, %v13437_v21  ;;  %8670 = vrcp.f32 %v16719_v56  ;;  %v3902_v3 = vadd.f32 %v16721_v55, %v16720_v12  ;;  %v5546_v57 = vadd.f32 %v5545_v8, %v13543_v40  ;;  %v16729_v40 = vld [vmem:[#allocation104_spill] sm:$0xff]  ;;  %v16730_v34 = vld [vmem:[#allocation111_spill] sm:$0xff] }
 0x694   : > { %v4427_v54 = vadd.f32 %v8667_v24, %v4379_v37  ;;  %v3571_v45 = vadd.f32 0.5, %v3547_v59  ;;  %v5553_v50 = vadd.f32 %v16723_v42, %v16722_v47  ;;  %v4550_v7 = vadd.f32 %v4549_v49, %v16724_v48  ;;  %v16731_v11 = vld [vmem:[#allocation103_spill] sm:$0xff]  ;;  %v16733_v59 = vld [vmem:[#allocation121_spill] sm:$0xff] }
 0x695   : > { %v5612_v31 = vadd.f32 %v16726_v23, %v16725_v1  ;;  %v3910_v41 = vadd.f32 1e-05, %v3902_v3  ;;  %v3942_v21 = vmul.f32 -31.0, %v16727_v35  ;;  %v5606_v43 = vadd.f32 %v5605_v36, %v16730_v34  ;;  %v16735_v23 = vld [vmem:[#allocation85_spill] sm:$0xff] }
 0x696   : > { %v4443_v19 = vmul.f32 %v4435_v28, %v4427_v54  ;;  %v4653_v5 = vmul.f32 %v3571_v45, %v16728_v2  ;;  %v13823_v0 = vmul.f32 %v3571_v45, %v3571_v45  ;;  %v5085_v39 = vsub.f32 1.0, %v3571_v45  ;;  %v13825_v18 = vpop.eup %8668  ;;  %v16734_v45 = vld [vmem:[#allocation231_spill] sm:$0xff] }
 0x697   : > { %v4551_v52 = vadd.f32 %v4550_v7, %v16729_v40  ;;  %8672 = vrcp.f32 %v3910_v41  ;;  %v3950_v8 = vadd.f32 %v3942_v21, %v16731_v11  ;;  %v4003_v10 = vmul.f32 0.2, %v3995_v15  ;;  %v16736_v21 = vld [vmem:[#allocation113_spill] sm:$0xff]  ;;  %v16739_v11 = vld [vmem:[#allocation110_spill] sm:$0xff] }
 0x698   : > { %v4451_v32 = vmul.f32 0.2, %v4443_v19  ;;  %v4696_v60 = vrot.slane %v4653_v5, 4  ;;  %v4752_v49 = vrot.slane %v13823_v0, 4  ;;  %v5101_v24 = vmul.f32 %v16733_v59, %v5085_v39 }
 0x699   : > { %v8671_v61 = vpop.eup %8670  ;;  %v4552_v37 = vadd.f32 %v4551_v52, %v16732_v26  ;;  %v5607_v28 = vadd.f32 %v5606_v43, %v13648_v51  ;;  %v13834_v56 = vmul.f32 %v5085_v39, %v5085_v39  ;;  %v5554_v47 = vadd.f32 %v5553_v50, %v16734_v45  ;;  %v16742_v26 = vld [vmem:[#allocation232_spill] sm:$0xff]  ;;  %v16745_v45 = vld [vmem:[#allocation183_spill] sm:$0xff] }
 0x69a   : > { %v4459_v12 = vadd.f32 %v4451_v32, %v4003_v10  ;;  %v4697_v55 = vadd.f32 %v4696_v60, %v4653_v5  ;;  %v4753_v36 = vadd.f32 %v4752_v49, %v13823_v0  ;;  %v3878_v3 = vadd.f32 %v8671_v61, %v3830_v62  ;;  %v16737_v62 = vld [vmem:[#allocation220_spill] sm:$0xff] }
 0x69b   : > { %4553 = vadd.xlane.f32.xlu2 %v4552_v37  ;;  %v5144_v15 = vrot.slane %v5101_v24, 4  ;;  %v5608_v54 = vadd.f32 %v5607_v28, %v5101_v24  ;;  %v5200_v42 = vrot.slane %v13834_v56, 4  ;;  %v5613_v41 = vadd.f32 %v5612_v31, %v16735_v23  ;;  %v16740_v31 = vld [vmem:[#allocation194_spill] sm:$0xff]  ;;  %v16741_v60 = vld [vmem:[#allocation192_spill] sm:$0xff]  ;;  %v16746_v23 = vld [vmem:[#allocation123_spill] sm:$0xff] }
 0x69c   : > { %v4467_v48 = vmul.f32 0.5, %v4459_v12  ;;  %v4698_v7 = vrot.slane %v4697_v55, 2  ;;  %v4754_v1 = vrot.slane %v4753_v36, 2  ;;  %v5547_v19 = vadd.f32 %v5546_v57, %v16736_v21  ;;  %v16743_v12 = vld [vmem:[#allocation253_spill] sm:$0xff]  ;;  %v16748_v21 = vld [vmem:[#allocation195_spill] sm:$0xff] }
 0x69d   : > { %v8673_v51 = vpop.eup %8672  ;;  %v5145_v2 = vadd.f32 %v5144_v15, %v5101_v24  ;;  %5609 = vadd.xlane.f32.xlu1 %v5608_v54  ;;  %v5201_v39 = vadd.f32 %v5200_v42, %v13834_v56  ;;  %8674 = vtanh.f32 %v16737_v62  ;;  %v5555_v10 = vadd.f32 %v5554_v47, %v16739_v11 }
 0x69e   : > { %v13844_v40 = vmul.f32 %v4467_v48, %v13789_v53  ;;  %v4699_v50 = vadd.f32 %v4698_v7, %v4697_v55  ;;  %v4755_v52 = vadd.f32 %v4754_v1, %v4753_v36  ;;  %v3926_v34 = vadd.f32 %v8673_v51, %v3878_v3  ;;  %v16744_v3 = vld [vmem:[#allocation108_spill] sm:$0xff] }
 0x69f   : > { %v5146_v43 = vrot.slane %v5145_v2, 2  ;;  %v5202_v32 = vrot.slane %v5201_v39, 2  ;;  %v4302_v49 = vadd.f32 %v16741_v60, %v16740_v31  ;;  %v5614_v37 = vadd.f32 %v5613_v41, %v16742_v26  ;;  %v16749_v31 = vld [vmem:[#allocation165_spill] sm:$0xff]  ;;  %v16779_v53 = vld [vmem:[#allocation188_spill] sm:$0xff] }
 0x6a0   : > { %16738 = vst [vmem:[#allocation107_spill] sm:$0xff] %v13844_v40  ;;  %v4700_v57 = vrot.slane %v4699_v50, 1  ;;  %v4756_v61 = vrot.slane %v4755_v52, 1  ;;  %v3958_v59 = vadd.f32 1e-05, %v3950_v8  ;;  %v5548_v24 = vadd.f32 %v5547_v19, %v4653_v5  ;;  %v16747_v8 = vld [vmem:[#allocation163_spill] sm:$0xff] }
 0x6a1   : > { %v5147_v28 = vadd.f32 %v5146_v43, %v5145_v2  ;;  %v5556_v15 = vadd.f32 %v5555_v10, %v16743_v12  ;;  %v5203_v54 = vadd.f32 %v5202_v32, %v5201_v39  ;;  %8676 = vrcp.f32 %v16744_v3  ;;  %v16750_v3 = vld [vmem:[#allocation116_spill] sm:$0xff] }
 0x6a2   : > { %v13851_v55 = vadd.f32 %v4700_v57, %v4699_v50  ;;  %v4757_v36 = vadd.f32 %v4756_v61, %v4755_v52  ;;  %v4342_v47 = vmul.f32 -15.0, %v16745_v45  ;;  %v4310_v1 = vadd.f32 1e-05, %v4302_v49 }
 0x6a3   : > { %v8675_v42 = vpop.eup %8674  ;;  %5549 = vadd.xlane.f32.xlu2 %v5548_v24  ;;  %v5148_v48 = vrot.slane %v5147_v28, 1  ;;  %v5204_v7 = vrot.slane %v5203_v54, 1  ;;  %v4382_v41 = vmul.f32 16.0, %v16746_v23  ;;  %8678 = vrcp.f32 %v3958_v59 }
 0x6a4   : > { %v13857_v5 = vadd.f32 %v16747_v8, %v4757_v36  ;;  %v4829_v51 = vmul.f32 -1.0, %v13851_v55  ;;  %v4350_v19 = vadd.f32 %v4342_v47, %v16748_v21  ;;  %v4877_v2 = vmul.f32 -3.0, %v13851_v55 }
 0x6a5   : > { %v13862_v39 = vadd.f32 %v5148_v48, %v5147_v28  ;;  %v5205_v62 = vadd.f32 %v5204_v7, %v5203_v54  ;;  %v4390_v50 = vmul.f32 -31.0, %v16745_v45  ;;  %v4925_v10 = vmul.f32 -7.0, %v13851_v55 }
 0x6a6   : > { %v13866_v52 = vadd.f32 %v4829_v51, %v13857_v5  ;;  %v4869_v43 = vmul.f32 2.0, %v13857_v5  ;;  %v4917_v11 = vmul.f32 4.0, %v13857_v5  ;;  %v5557_v32 = vadd.f32 %v5556_v15, %v13823_v0 }
 0x6a7   : > { %v13873_v60 = vadd.f32 %v16749_v31, %v5205_v62  ;;  %8680 = vrcp.f32 %v4310_v1  ;;  %v4398_v49 = vadd.f32 %v4390_v50, %v4382_v41  ;;  %v8677_v57 = vpop.eup %8676  ;;  %v5277_v59 = vmul.f32 -1.0, %v13862_v39  ;;  %v16751_v41 = vld [vmem:[#allocation204_spill] sm:$0xff] }
 0x6a8   : > { %v13875_v61 = vadd.f32 %v4877_v2, %v4869_v43  ;;  %v13877_v26 = vadd.f32 %v4925_v10, %v4917_v11  ;;  %v4358_v24 = vadd.f32 1e-05, %v4350_v19  ;;  %v5325_v28 = vmul.f32 -3.0, %v13862_v39  ;;  %v16753_v19 = vld [vmem:[#allocation120_spill] sm:$0xff]  ;;  %v16755_v43 = vld [vmem:[#allocation101_spill] sm:$0xff]  ;;  %v16756_v10 = vld [vmem:[#allocation166_spill] sm:$0xff] }
 0x6a9   : > { %v5373_v12 = vmul.f32 -7.0, %v13862_v39  ;;  %v5317_v54 = vmul.f32 2.0, %v13873_v60  ;;  %v5365_v0 = vmul.f32 4.0, %v13873_v60  ;;  %v8679_v15 = vpop.eup %8678  ;;  %8682 = vrcp.f32 %v13805_v38 }
 0x6aa   : > { %v13886_v36 = vadd.f32 %v5277_v59, %v13873_v60  ;;  %v5615_v47 = vadd.f32 %v5614_v37, %v16750_v3  ;;  %v3982_v48 = vadd.f32 1e-05, %v16727_v35  ;;  %v3974_v23 = vadd.f32 %v8679_v15, %v3926_v34  ;;  %v16758_v59 = vld [vmem:[#allocation151_spill] sm:$0xff]  ;;  %v16763_v3 = vld [vmem:[#allocation173_spill] sm:$0xff] }
 0x6ab   : > { %5558 = vadd.xlane.f32.xlu2 %v5557_v32  ;;  %v13890_v7 = vadd.f32 %v5325_v28, %v5317_v54  ;;  %v13892_v1 = vadd.f32 %v5373_v12, %v5365_v0  ;;  %v4278_v8 = vadd.f32 %v8677_v57, %v16751_v41  ;;  %8684 = vrcp.f32 %v13808_v20  ;;  %v16754_v20 = vld [vmem:[#allocation176_spill] sm:$0xff]  ;;  %v16757_v32 = vld [vmem:[#allocation167_spill] sm:$0xff] }
 0x6ac   : > { %v13897_v51 = vmul.f32 4.0, %v13703_v44  ;;  %v13900_v38 = vmul.f32 8.0, %v13703_v44  ;;  %v4406_v21 = vadd.f32 1e-05, %v4398_v49  ;;  %v13903_v35 = vadd.f32 1e-05, %v13711_v14 }
 0x6ad   : > { %v8681_v37 = vpop.eup %8680  ;;  %v5616_v2 = vadd.f32 %v5615_v47, %v16753_v19  ;;  %v3990_v62 = vmul.f32 %v3982_v48, %v3974_v23  ;;  %8686 = vrcp.f32 %v4358_v24  ;;  %v13907_v34 = vadd.f32 1e-05, %v13731_v63  ;;  %v16759_v14 = vld [vmem:[#allocation146_spill] sm:$0xff]  ;;  %v16760_v63 = vld [vmem:[#allocation171_spill] sm:$0xff]  ;;  %v16761_v54 = vld [vmem:[#allocation172_spill] sm:$0xff] }
 0x6ae   : > { %16752 = vst [vmem:[#allocation112_spill] sm:$0xff] %v13900_v38  ;;  %v3534_v50 = vmul.f32 0.5, %v8675_v42  ;;  %v3828_v11 = vadd.f32 %v16755_v43, %v16754_v20  ;;  %v3900_v31 = vadd.f32 %v16757_v32, %v16756_v10  ;;  %v4326_v57 = vadd.f32 %v8681_v37, %v4278_v8  ;;  %v16762_v0 = vld [vmem:[#allocation148_spill] sm:$0xff]  ;;  %v16764_v47 = vld [vmem:[#allocation169_spill] sm:$0xff]  ;;  %v16767_v19 = vld [vmem:[#allocation174_spill] sm:$0xff] }
 0x6af   : > { %v5617_v49 = vadd.f32 %v5616_v2, %v13834_v56  ;;  %8688 = vtanh.f32 %v16758_v59  ;;  %v3940_v28 = vmul.f32 -31.0, %v16759_v14  ;;  %v13916_v12 = vpop.eup %8682  ;;  %v4300_v42 = vadd.f32 %v16761_v54, %v16760_v63  ;;  %v16765_v23 = vld [vmem:[#allocation149_spill] sm:$0xff]  ;;  %v16770_v59 = vld [vmem:[#allocation191_spill] sm:$0xff]  ;;  %v16780_v38 = vld [vmem:[#allocation184_spill] sm:$0xff] }
 0x6b0   : > { %8690 = vrcp.f32 %v4406_v21  ;;  %v3908_v24 = vadd.f32 1e-05, %v3900_v31  ;;  %v4340_v15 = vmul.f32 -15.0, %v16762_v0  ;;  %v4380_v56 = vmul.f32 16.0, %v16765_v23  ;;  %v16768_v10 = vld [vmem:[#allocation177_spill] sm:$0xff]  ;;  %v16769_v31 = vld [vmem:[#allocation186_spill] sm:$0xff] }
 0x6b1   : > { %8692 = vrcp.f32 %v16763_v3  ;;  %v3948_v48 = vadd.f32 %v3940_v28, %v16764_v47  ;;  %v4388_v41 = vmul.f32 -31.0, %v16762_v0  ;;  %v13925_v8 = vpop.eup %8684  ;;  %v13927_v37 = vadd.f32 0.5, %v3534_v50  ;;  %v16771_v3 = vld [vmem:[#allocation178_spill] sm:$0xff] }
 0x6b2   : > { %16766 = vst [vmem:[#allocation170_spill] sm:$0xff] %v13925_v8  ;;  %8694 = vrcp.f32 %v3908_v24  ;;  %v4308_v21 = vadd.f32 1e-05, %v4300_v42  ;;  %v4348_v2 = vadd.f32 %v4340_v15, %v16767_v19  ;;  %v3829_v28 = vadd.f32 %v16770_v59, %v16769_v31  ;;  %v16772_v47 = vld [vmem:[#allocation78_spill] sm:$0xff]  ;;  %v16777_v59 = vld [vmem:[#allocation179_spill] sm:$0xff] }
 0x6b3   : > { %v8687_v20 = vpop.eup %8686  ;;  %5618 = vadd.xlane.f32.xlu2 %v5617_v49  ;;  %v3956_v43 = vadd.f32 1e-05, %v3948_v48  ;;  %8696 = vrcp.f32 %v16768_v10  ;;  %v4396_v32 = vadd.f32 %v4388_v41, %v4380_v56  ;;  %v3901_v50 = vadd.f32 %v16772_v47, %v16771_v3  ;;  %v16773_v49 = vld [vmem:[#allocation150_spill] sm:$0xff]  ;;  %v16774_v41 = vld [vmem:[#allocation187_spill] sm:$0xff]  ;;  %v16775_v10 = vld [vmem:[#allocation181_spill] sm:$0xff] }
 0x6b4   : > { %v4374_v63 = vadd.f32 %v8687_v20, %v4326_v57  ;;  %8698 = vrcp.f32 %v4308_v21  ;;  %v4356_v54 = vadd.f32 1e-05, %v4348_v2  ;;  %v4430_v24 = vadd.f32 1e-05, %v16745_v45  ;;  %v16776_v57 = vld [vmem:[#allocation152_spill] sm:$0xff]  ;;  %v16778_v47 = vld [vmem:[#allocation153_spill] sm:$0xff] }
 0x6b5   : > { %v13935_v23 = vpop.eup %8688  ;;  %8700 = vrcp.f32 %v3956_v43  ;;  %v4404_v42 = vadd.f32 1e-05, %v4396_v32  ;;  %v3941_v15 = vmul.f32 -31.0, %v16773_v49  ;;  %v3998_v19 = vmul.f32 0.2, %v3990_v62 }
 0x6b6   : > { %v8691_v48 = vpop.eup %8690  ;;  %v3909_v56 = vadd.f32 1e-05, %v3901_v50  ;;  %v4301_v31 = vadd.f32 %v16775_v10, %v16774_v41  ;;  %v4341_v21 = vmul.f32 -15.0, %v16776_v57  ;;  %8702 = vrcp.f32 %v4356_v54  ;;  %v16781_v54 = vld [vmem:[#allocation180_spill] sm:$0xff] }
 0x6b7   : > { %v8693_v2 = vpop.eup %8692  ;;  %v4422_v20 = vadd.f32 %v8691_v48, %v4374_v63  ;;  %v3949_v3 = vadd.f32 %v3941_v15, %v16777_v59  ;;  %v4381_v40 = vmul.f32 16.0, %v16778_v47  ;;  %8704 = vrcp.f32 %v4404_v42 }
 0x6b8   : > { %v8695_v45 = vpop.eup %8694  ;;  %v3876_v43 = vadd.f32 %v8693_v2, %v3828_v11  ;;  %v4309_v32 = vadd.f32 1e-05, %v4301_v31  ;;  %v4349_v44 = vadd.f32 %v4341_v21, %v16779_v53  ;;  %8706 = vrcp.f32 %v16780_v38  ;;  %v16783_v38 = vld [vmem:[#allocation222_spill] sm:$0xff]  ;;  %v16784_v21 = vld [vmem:[#allocation223_spill] sm:$0xff] }
 0x6b9   : > { %v8697_v62 = vpop.eup %8696  ;;  %v4438_v50 = vmul.f32 %v4430_v24, %v4422_v20  ;;  %v3957_v41 = vadd.f32 1e-05, %v3949_v3  ;;  %v4389_v10 = vmul.f32 -31.0, %v16776_v57  ;;  %8708 = vrcp.f32 %v3909_v56  ;;  %v16782_v24 = vld [vmem:[#allocation143_spill] sm:$0xff] }
 0x6ba   : > { %v8699_v8 = vpop.eup %8698  ;;  %v3924_v63 = vadd.f32 %v8695_v45, %v3876_v43  ;;  %v4276_v48 = vadd.f32 %v8697_v62, %v16781_v54  ;;  %v4357_v15 = vadd.f32 1e-05, %v4349_v44  ;;  %v3980_v11 = vadd.f32 1e-05, %v16759_v14  ;;  %v16785_v14 = vld [vmem:[#allocation109_spill] sm:$0xff] }
 0x6bb   : > { %v8701_v59 = vpop.eup %8700  ;;  %v4446_v47 = vmul.f32 0.2, %v4438_v50  ;;  %8710 = vrcp.f32 %v3957_v41  ;;  %v4397_v42 = vadd.f32 %v4389_v10, %v4381_v40  ;;  %v4976_v2 = vadd.f32 %v16784_v21, %v16783_v38  ;;  %v16786_v50 = vld [vmem:[#allocation134_spill] sm:$0xff] }
 0x6bc   : > { %v3972_v53 = vadd.f32 %v8701_v59, %v3924_v63  ;;  %v4324_v31 = vadd.f32 %v8699_v8, %v4276_v48  ;;  %8712 = vrcp.f32 %v16782_v24  ;;  %v8703_v20 = vpop.eup %8702  ;;  %v4845_v3 = vadd.f32 1e-05, %v13866_v52  ;;  %v16787_v63 = vld [vmem:[#allocation218_spill] sm:$0xff] }
 0x6bd   : > { %v4454_v45 = vadd.f32 %v4446_v47, %v3998_v19  ;;  %8714 = vrcp.f32 %v4309_v32  ;;  %v4405_v56 = vadd.f32 1e-05, %v4397_v42  ;;  %v8705_v44 = vpop.eup %8704  ;;  %v4904_v40 = vadd.f32 %v16786_v50, %v16785_v14  ;;  %v16788_v32 = vld [vmem:[#allocation133_spill] sm:$0xff]  ;;  %v16789_v42 = vld [vmem:[#allocation224_spill] sm:$0xff]  ;;  %v16794_v14 = vld [vmem:[#allocation219_spill] sm:$0xff] }
 0x6be   : > { %v3988_v43 = vmul.f32 %v3980_v11, %v3972_v53  ;;  %v4372_v62 = vadd.f32 %v8703_v20, %v4324_v31  ;;  %8716 = vrcp.f32 %v4357_v15  ;;  %v8707_v41 = vpop.eup %8706  ;;  %v4984_v10 = vadd.f32 1e-05, %v4976_v2  ;;  %v16790_v2 = vld [vmem:[#allocation230_spill] sm:$0xff] }
 0x6bf   : > { %v4462_v8 = vmul.f32 0.5, %v4454_v45  ;;  %8718 = vrcp.f32 %v4405_v56  ;;  %v5016_v54 = vmul.f32 -31.0, %v16787_v63  ;;  %v8709_v48 = vpop.eup %8708  ;;  %v4428_v52 = vadd.f32 1e-05, %v16762_v0  ;;  %v16791_v0 = vld [vmem:[#allocation193_spill] sm:$0xff]  ;;  %v16792_v56 = vld [vmem:[#allocation226_spill] sm:$0xff] }
 0x6c0   : > { %v4420_v59 = vadd.f32 %v8705_v44, %v4372_v62  ;;  %v3877_v19 = vadd.f32 %v8707_v41, %v3829_v28  ;;  %8720 = vrcp.f32 %v16788_v32  ;;  %v3981_v15 = vadd.f32 1e-05, %v16773_v49  ;;  %v16793_v44 = vld [vmem:[#allocation225_spill] sm:$0xff] }
 0x6c1   : > { %v8711_v47 = vpop.eup %8710  ;;  %v13959_v11 = vmul.f32 %v4462_v8, %v13927_v37  ;;  %8722 = vrcp.f32 %v4984_v10  ;;  %v5024_v53 = vadd.f32 %v5016_v54, %v16789_v42  ;;  %v3996_v24 = vmul.f32 0.2, %v3988_v43  ;;  %v16795_v10 = vld [vmem:[#allocation127_spill] sm:$0xff] }
 0x6c2   : > { %v8713_v31 = vpop.eup %8712  ;;  %v4436_v38 = vmul.f32 %v4428_v52, %v4420_v59  ;;  %v3925_v21 = vadd.f32 %v8709_v48, %v3877_v19  ;;  %8724 = vrcp.f32 %v16790_v2  ;;  %v5376_v62 = vadd.f32 %v16793_v44, %v16792_v56  ;;  %v16796_v19 = vld [vmem:[#allocation229_spill] sm:$0xff] }
 0x6c3   : > { %v8715_v20 = vpop.eup %8714  ;;  %v4277_v28 = vadd.f32 %v8713_v31, %v16791_v0  ;;  %v5032_v45 = vadd.f32 1e-05, %v5024_v53  ;;  %v5416_v50 = vmul.f32 -15.0, %v16794_v14  ;;  %v5456_v54 = vmul.f32 16.0, %v16795_v10 }
 0x6c4   : > { %v8717_v41 = vpop.eup %8716  ;;  %v4444_v49 = vmul.f32 0.2, %v4436_v38  ;;  %v3973_v8 = vadd.f32 %v8711_v47, %v3925_v21  ;;  %v5464_v43 = vmul.f32 -31.0, %v16794_v14  ;;  %v5384_v52 = vadd.f32 1e-05, %v5376_v62  ;;  %v16798_v62 = vld [vmem:[#allocation80_spill] sm:$0xff] }
 0x6c5   : > { %v8719_v59 = vpop.eup %8718  ;;  %v4325_v48 = vadd.f32 %v8715_v20, %v4277_v28  ;;  %8726 = vrcp.f32 %v5032_v45  ;;  %v5424_v32 = vadd.f32 %v5416_v50, %v16796_v19  ;;  %v13972_v53 = vmul.f32 -15.0, %v13851_v55  ;;  %v16797_v45 = vld [vmem:[#allocation145_spill] sm:$0xff] }
 0x6c6   : > { %v8721_v42 = vpop.eup %8720  ;;  %v13974_v31 = vadd.f32 %v4444_v49, %v3996_v24  ;;  %v3989_v2 = vmul.f32 %v3981_v15, %v3973_v8  ;;  %v5472_v0 = vadd.f32 %v5464_v43, %v5456_v54  ;;  %8728 = vrcp.f32 %v5384_v52  ;;  %v16799_v15 = vld [vmem:[#allocation114_spill] sm:$0xff]  ;;  %v16803_v52 = vld [vmem:[#allocation141_spill] sm:$0xff] }
 0x6c7   : > { %v8723_v38 = vpop.eup %8722  ;;  %v4373_v47 = vadd.f32 %v8717_v41, %v4325_v48  ;;  %v4952_v21 = vadd.f32 %v8721_v42, %v4904_v40  ;;  %v5432_v56 = vadd.f32 1e-05, %v5424_v32  ;;  %8730 = vrcp.f32 %v4845_v3  ;;  %v16800_v41 = vld [vmem:[#allocation209_spill] sm:$0xff]  ;;  %v16801_v40 = vld [vmem:[#allocation210_spill] sm:$0xff]  ;;  %v16804_v32 = vld [vmem:[#allocation215_spill] sm:$0xff] }
 0x6c8   : > { %v8725_v44 = vpop.eup %8724  ;;  %v4429_v20 = vadd.f32 1e-05, %v16776_v57  ;;  %v5480_v28 = vadd.f32 1e-05, %v5472_v0  ;;  %v4903_v50 = vadd.f32 %v16798_v62, %v16797_v45  ;;  %v5056_v24 = vadd.f32 1e-05, %v16787_v63 }
 0x6c9   : > { %v4421_v10 = vadd.f32 %v8719_v59, %v4373_v47  ;;  %v5000_v19 = vadd.f32 %v8723_v38, %v4952_v21  ;;  %8732 = vrcp.f32 %v5432_v56  ;;  %v5352_v49 = vadd.f32 %v8725_v44, %v16799_v15  ;;  %v16802_v54 = vld [vmem:[#allocation182_spill] sm:$0xff]  ;;  %v16805_v42 = vld [vmem:[#allocation213_spill] sm:$0xff]  ;;  %v16806_v63 = vld [vmem:[#allocation212_spill] sm:$0xff] }
 0x6ca   : > { %8734 = vrcp.f32 %v5480_v28  ;;  %v4975_v8 = vadd.f32 %v16801_v40, %v16800_v41  ;;  %v5015_v43 = vmul.f32 -31.0, %v16802_v54  ;;  %v3997_v48 = vmul.f32 0.2, %v3989_v2  ;;  %v16807_v21 = vld [vmem:[#allocation98_spill] sm:$0xff]  ;;  %v16809_v15 = vld [vmem:[#allocation185_spill] sm:$0xff] }
 0x6cb   : > { %v8727_v3 = vpop.eup %8726  ;;  %v4437_v57 = vmul.f32 %v4429_v20, %v4421_v10  ;;  %8736 = vrcp.f32 %v16803_v52  ;;  %v5375_v59 = vadd.f32 %v16805_v42, %v16804_v32  ;;  %v16808_v45 = vld [vmem:[#allocation130_spill] sm:$0xff]  ;;  %v5455_v41 = vmul.f32 16.0, %v16809_v15 }
 0x6cc   : > { %v5048_v0 = vadd.f32 %v8727_v3, %v5000_v19  ;;  %v4983_v38 = vadd.f32 1e-05, %v4975_v8  ;;  %v5023_v47 = vadd.f32 %v5015_v43, %v16806_v63  ;;  %8738 = vrcp.f32 %v16807_v21  ;;  %v8729_v56 = vpop.eup %8728  ;;  %v16810_v8 = vld [vmem:[#allocation216_spill] sm:$0xff] }
 0x6cd   : > { %v4445_v44 = vmul.f32 0.2, %v4437_v57  ;;  %v5383_v28 = vadd.f32 1e-05, %v5375_v59  ;;  %v5415_v62 = vmul.f32 -15.0, %v16808_v45  ;;  %v13991_v2 = vpop.eup %8730  ;;  %v5400_v10 = vadd.f32 %v8729_v56, %v5352_v49 }
 0x6ce   : > { %v5064_v20 = vmul.f32 %v5056_v24, %v5048_v0  ;;  %8740 = vrcp.f32 %v4983_v38  ;;  %v5031_v40 = vadd.f32 1e-05, %v5023_v47  ;;  %v5463_v3 = vmul.f32 -31.0, %v16808_v45 }
 0x6cf   : > { %v8733_v52 = vpop.eup %8732  ;;  %v13993_v19 = vadd.f32 %v4445_v44, %v3997_v48  ;;  %8742 = vrcp.f32 %v5383_v28  ;;  %v5423_v43 = vadd.f32 %v5415_v62, %v16810_v8  ;;  %v13998_v32 = vmul.f32 8.0, %v13857_v5  ;;  %v16811_v44 = vld [vmem:[#allocation137_spill] sm:$0xff] }
 0x6d0   : > { %v8735_v57 = vpop.eup %8734  ;;  %v14001_v42 = vmul.f32 16.0, %v13857_v5  ;;  %v5448_v59 = vadd.f32 %v8733_v52, %v5400_v10  ;;  %8744 = vrcp.f32 %v5031_v40  ;;  %v5504_v49 = vadd.f32 1e-05, %v16794_v14  ;;  %v16812_v40 = vld [vmem:[#allocation139_spill] sm:$0xff] }
 0x6d1   : > { %v8737_v24 = vpop.eup %8736  ;;  %v5431_v0 = vadd.f32 1e-05, %v5423_v43  ;;  %v5471_v48 = vadd.f32 %v5463_v3, %v5455_v41  ;;  %8746 = vrcp.f32 %v13736_v13  ;;  %v4979_v21 = vadd.f32 %v13681_v9, %v13692_v25  ;;  %v16813_v25 = vld [vmem:[#allocation140_spill] sm:$0xff] }
 0x6d2   : > { %v8739_v38 = vpop.eup %8738  ;;  %v5496_v63 = vadd.f32 %v8735_v57, %v5448_v59  ;;  %v4951_v47 = vadd.f32 %v8737_v24, %v4903_v50  ;;  %v5019_v56 = vmul.f32 -31.0, %v13585_v30  ;;  %v5055_v5 = vadd.f32 1e-05, %v16802_v54  ;;  %v16814_v50 = vld [vmem:[#allocation259_spill] sm:$0xff] }
 0x6d3   : > { %v5351_v28 = vadd.f32 %v8739_v38, %v16811_v44  ;;  %8748 = vrcp.f32 %v5431_v0  ;;  %v5479_v62 = vadd.f32 1e-05, %v5471_v48  ;;  %v5072_v14 = vmul.f32 0.2, %v5064_v20  ;;  %v16815_v0 = vld [vmem:[#allocation157_spill] sm:$0xff] }
 0x6d4   : > { %v8741_v15 = vpop.eup %8740  ;;  %v5512_v10 = vmul.f32 %v5504_v49, %v5496_v63  ;;  %v4987_v41 = vadd.f32 1e-05, %v4979_v21  ;;  %v5027_v13 = vadd.f32 %v5019_v56, %v16812_v40  ;;  %v4907_v9 = vadd.f32 %v13763_v58, %v13751_v6  ;;  %v16817_v56 = vld [vmem:[#allocation260_spill] sm:$0xff] }
 0x6d5   : > { %v8743_v52 = vpop.eup %8742  ;;  %v4999_v8 = vadd.f32 %v8741_v15, %v4951_v47  ;;  %8750 = vrcp.f32 %v5479_v62  ;;  %v5379_v43 = vadd.f32 %v16814_v50, %v16813_v25  ;;  %v5419_v48 = vmul.f32 -15.0, %v16815_v0  ;;  %v16816_v47 = vld [vmem:[#allocation162_spill] sm:$0xff]  ;;  %v16821_v25 = vld [vmem:[#allocation125_spill] sm:$0xff] }
 0x6d6   : > { %v8745_v54 = vpop.eup %8744  ;;  %v5520_v3 = vmul.f32 0.2, %v5512_v10  ;;  %v5399_v57 = vadd.f32 %v8743_v52, %v5351_v28  ;;  %8752 = vrcp.f32 %v4987_v41  ;;  %v5035_v59 = vadd.f32 1e-05, %v5027_v13  ;;  %v16818_v13 = vld [vmem:[#allocation255_spill] sm:$0xff]  ;;  %v16819_v52 = vld [vmem:[#allocation256_spill] sm:$0xff] }
 0x6d7   : > { %v8747_v24 = vpop.eup %8746  ;;  %v5047_v20 = vadd.f32 %v8745_v54, %v4999_v8  ;;  %8754 = vrcp.f32 %v13780_v17  ;;  %v5387_v49 = vadd.f32 1e-05, %v5379_v43  ;;  %v5459_v6 = vmul.f32 16.0, %v16816_v47  ;;  %v16823_v54 = vld [vmem:[#allocation243_spill] sm:$0xff] }
 0x6d8   : > { %v5528_v38 = vadd.f32 %v5520_v3, %v5072_v14  ;;  %v4955_v63 = vadd.f32 %v8747_v24, %v4907_v9  ;;  %8756 = vrcp.f32 %v5035_v59  ;;  %v5427_v44 = vadd.f32 %v5419_v48, %v16817_v56  ;;  %v16820_v9 = vld [vmem:[#allocation159_spill] sm:$0xff]  ;;  %v16824_v3 = vld [vmem:[#allocation241_spill] sm:$0xff] }
 0x6d9   : > { %v8749_v58 = vpop.eup %8748  ;;  %v5063_v21 = vmul.f32 %v5055_v5, %v5047_v20  ;;  %8758 = vrcp.f32 %v5387_v49  ;;  %v5467_v28 = vmul.f32 -31.0, %v16815_v0  ;;  %v5503_v10 = vadd.f32 1e-05, %v16808_v45  ;;  %v16825_v59 = vld [vmem:[#allocation235_spill] sm:$0xff] }
 0x6da   : > { %v5536_v62 = vmul.f32 0.5, %v5528_v38  ;;  %v5447_v15 = vadd.f32 %v8749_v58, %v5399_v57  ;;  %v5059_v17 = vadd.f32 1e-05, %v13585_v30  ;;  %v5435_v40 = vadd.f32 1e-05, %v5427_v44  ;;  %v16826_v58 = vld [vmem:[#allocation244_spill] sm:$0xff] }
 0x6db   : > { %v8751_v41 = vpop.eup %8750  ;;  %v5475_v14 = vadd.f32 %v5467_v28, %v5459_v6  ;;  %v4906_v8 = vadd.f32 %v16819_v52, %v16818_v13  ;;  %8760 = vrcp.f32 %v16820_v9  ;;  %v4978_v57 = vadd.f32 %v16824_v3, %v16823_v54  ;;  %v16829_v13 = vld [vmem:[#allocation245_spill] sm:$0xff]  ;;  %v14036_v9 = vpop.permute.xlu2 %5709 }
 0x6dc   : > { %v8753_v5 = vpop.eup %8752  ;;  %v14026_v50 = vmul.f32 %v5536_v62, %v16821_v25  ;;  %v5495_v43 = vadd.f32 %v8751_v41, %v5447_v15  ;;  %v5018_v45 = vmul.f32 -31.0, %v16825_v59  ;;  %v5071_v30 = vmul.f32 0.2, %v5063_v21  ;;  %v16827_v62 = vld [vmem:[#allocation252_spill] sm:$0xff]  ;;  %v16828_v15 = vld [vmem:[#allocation251_spill] sm:$0xff]  ;;  %16830 = vst [vmem:[#allocation115_spill] sm:$0xff] %v14036_v9 }
 0x6dd   : > { %v8755_v24 = vpop.eup %8754  ;;  %v5003_v20 = vadd.f32 %v8753_v5, %v4955_v63  ;;  %8762 = vrcp.f32 %v5435_v40  ;;  %v5483_v49 = vadd.f32 1e-05, %v5475_v14  ;;  %v4986_v6 = vadd.f32 1e-05, %v4978_v57 }
 0x6de   : > { %16822 = vst [vmem:[#allocation99_spill] sm:$0xff] %v14026_v50  ;;  %v8757_v48 = vpop.eup %8756  ;;  %v5511_v38 = vmul.f32 %v5503_v10, %v5495_v43  ;;  %v5355_v47 = vadd.f32 %v8755_v24, %v13777_v4  ;;  %v5026_v56 = vadd.f32 %v5018_v45, %v16826_v58  ;;  %v5378_v41 = vadd.f32 %v16828_v15, %v16827_v62  ;;  %v16831_v4 = vld [vmem:[#allocation257_spill] sm:$0xff]  ;;  %v16832_v43 = vld [vmem:[#allocation254_spill] sm:$0xff]  ;;  %v16833_v45 = vld [vmem:[#allocation155_spill] sm:$0xff] }
 0x6df   : > { %v8759_v44 = vpop.eup %8758  ;;  %v5051_v28 = vadd.f32 %v8757_v48, %v5003_v20  ;;  %8764 = vrcp.f32 %v5483_v49  ;;  %v5418_v52 = vmul.f32 -15.0, %v16829_v13  ;;  %v5507_v57 = vadd.f32 1e-05, %v16815_v0  ;;  %v16834_v58 = vld [vmem:[#allocation126_spill] sm:$0xff]  ;;  %v16836_v0 = vld [vmem:[#allocation199_spill] sm:$0xff] }
 0x6e0   : > { %v5519_v63 = vmul.f32 0.2, %v5511_v38  ;;  %v5403_v21 = vadd.f32 %v8759_v44, %v5355_v47  ;;  %8766 = vrcp.f32 %v4986_v6  ;;  %v5034_v40 = vadd.f32 1e-05, %v5026_v56  ;;  %v16835_v56 = vld [vmem:[#allocation211_spill] sm:$0xff]  ;;  %v16837_v62 = vld [vmem:[#allocation198_spill] sm:$0xff] }
 0x6e1   : > { %v8761_v10 = vpop.eup %8760  ;;  %v5067_v14 = vmul.f32 %v5059_v17, %v5051_v28  ;;  %8768 = vrcp.f32 %v16831_v4  ;;  %v5386_v5 = vadd.f32 1e-05, %v5378_v41  ;;  %v5426_v54 = vadd.f32 %v5418_v52, %v16832_v43  ;;  %v16838_v41 = vld [vmem:[#allocation175_spill] sm:$0xff]  ;;  %v16862_v50 = vld [vmem:[#allocation246_spill] sm:$0xff] }
 0x6e2   : > { %v5527_v3 = vadd.f32 %v5519_v63, %v5071_v30  ;;  %8770 = vrcp.f32 %v5034_v40  ;;  %v5458_v24 = vmul.f32 16.0, %v16833_v45  ;;  %v4954_v49 = vadd.f32 %v8761_v10, %v4906_v8  ;;  %v16839_v63 = vld [vmem:[#allocation132_spill] sm:$0xff] }
 0x6e3   : > { %v8763_v20 = vpop.eup %8762  ;;  %8772 = vrcp.f32 %v5386_v5  ;;  %v5434_v48 = vadd.f32 1e-05, %v5426_v54  ;;  %v5466_v38 = vmul.f32 -31.0, %v16829_v13  ;;  %v5058_v17 = vadd.f32 1e-05, %v16825_v59 }
 0x6e4   : > { %v5535_v47 = vmul.f32 0.5, %v5527_v3  ;;  %v5451_v6 = vadd.f32 %v8763_v20, %v5403_v21  ;;  %v4902_v44 = vadd.f32 %v16835_v56, %v16834_v58  ;;  %v4974_v15 = vadd.f32 %v16837_v62, %v16836_v0  ;;  %v16841_v21 = vld [vmem:[#allocation205_spill] sm:$0xff]  ;;  %v16842_v3 = vld [vmem:[#allocation200_spill] sm:$0xff]  ;;  %v16845_v56 = vld [vmem:[#allocation206_spill] sm:$0xff] }
 0x6e5   : > { %v8765_v28 = vpop.eup %8764  ;;  %8774 = vrcp.f32 %v5434_v48  ;;  %v5474_v30 = vadd.f32 %v5466_v38, %v5458_v24  ;;  %v5014_v52 = vmul.f32 -31.0, %v16838_v41  ;;  %v5075_v10 = vmul.f32 0.2, %v5067_v14  ;;  %v16843_v48 = vld [vmem:[#allocation258_spill] sm:$0xff]  ;;  %v16844_v58 = vld [vmem:[#allocation208_spill] sm:$0xff] }
 0x6e6   : > { %v8767_v8 = vpop.eup %8766  ;;  %v14050_v40 = vmul.f32 %v5535_v47, %v16839_v63  ;;  %v5499_v4 = vadd.f32 %v8765_v28, %v5451_v6  ;;  %8776 = vrcp.f32 %v16841_v21  ;;  %v4982_v54 = vadd.f32 1e-05, %v4974_v15  ;;  %v16846_v0 = vld [vmem:[#allocation202_spill] sm:$0xff]  ;;  %v16847_v28 = vld [vmem:[#allocation128_spill] sm:$0xff]  ;;  %v16863_v63 = vld [vmem:[#allocation247_spill] sm:$0xff] }
 0x6e7   : > { %v8769_v59 = vpop.eup %8768  ;;  %v5002_v5 = vadd.f32 %v8767_v8, %v4954_v49  ;;  %v5482_v43 = vadd.f32 1e-05, %v5474_v30  ;;  %v5022_v45 = vadd.f32 %v5014_v52, %v16842_v3  ;;  %8778 = vrcp.f32 %v16844_v58  ;;  %v14059_v49 = vpop.xlane.xlu2 %4484  ;;  %v16849_v3 = vld [vmem:[#allocation129_spill] sm:$0xff] }
 0x6e8   : > { %16840 = vst [vmem:[#allocation154_spill] sm:$0xff] %v14050_v40  ;;  %v8771_v24 = vpop.eup %8770  ;;  %v5515_v20 = vmul.f32 %v5507_v57, %v5499_v4  ;;  %v5354_v38 = vadd.f32 %v8769_v59, %v16843_v48  ;;  %v5374_v47 = vadd.f32 %v16846_v0, %v16845_v56  ;;  %v5414_v21 = vmul.f32 -15.0, %v16847_v28  ;;  %v16848_v4 = vld [vmem:[#allocation207_spill] sm:$0xff] }
 0x6e9   : > { %v8773_v62 = vpop.eup %8772  ;;  %v5050_v14 = vadd.f32 %v8771_v24, %v5002_v5  ;;  %8780 = vrcp.f32 %v5482_v43  ;;  %v5030_v6 = vadd.f32 1e-05, %v5022_v45  ;;  %v5454_v48 = vmul.f32 16.0, %v16849_v3  ;;  %v16850_v24 = vld [vmem:[#allocation118_spill] sm:$0xff] }
 0x6ea   : > { %v5523_v30 = vmul.f32 0.2, %v5515_v20  ;;  %v5402_v15 = vadd.f32 %v8773_v62, %v5354_v38  ;;  %8782 = vrcp.f32 %v4982_v54  ;;  %v5382_v52 = vadd.f32 1e-05, %v5374_v47  ;;  %v16851_v62 = vld [vmem:[#allocation105_spill] sm:$0xff] }
 0x6eb   : > { %v8775_v57 = vpop.eup %8774  ;;  %v5066_v8 = vmul.f32 %v5058_v17, %v5050_v14  ;;  %8784 = vrcp.f32 %v5030_v6  ;;  %v5422_v59 = vadd.f32 %v5414_v21, %v16848_v4  ;;  %v5462_v43 = vmul.f32 -31.0, %v16847_v28  ;;  %v14068_v17 = vpop.permute.xlu0 %4623  ;;  %v16853_v14 = vld [vmem:[#allocation234_spill] sm:$0xff] }
 0x6ec   : > { %v8777_v58 = vpop.eup %8776  ;;  %v14063_v56 = vadd.f32 %v5523_v30, %v5075_v10  ;;  %v5450_v5 = vadd.f32 %v8775_v57, %v5402_v15  ;;  %8786 = vrcp.f32 %v5382_v52  ;;  %v4893_v45 = vadd.f32 1e-05, %v13875_v61  ;;  %v16852_v10 = vld [vmem:[#allocation236_spill] sm:$0xff]  ;;  %v16854_v15 = vld [vmem:[#allocation214_spill] sm:$0xff]  ;;  %v16855_v52 = vld [vmem:[#allocation233_spill] sm:$0xff] }
 0x6ed   : > { %8788 = vtanh.f32 %v16850_v24  ;;  %v4950_v54 = vadd.f32 %v8777_v58, %v4902_v44  ;;  %v5430_v20 = vadd.f32 1e-05, %v5422_v59  ;;  %v8779_v38 = vpop.eup %8778  ;;  %v5506_v0 = vadd.f32 1e-05, %v16829_v13  ;;  %v16856_v24 = vld [vmem:[#allocation237_spill] sm:$0xff] }
 0x6ee   : > { %v5470_v47 = vadd.f32 %v5462_v43, %v5454_v48  ;;  %8790 = vrcp.f32 %v16851_v62  ;;  %v4977_v6 = vadd.f32 %v16853_v14, %v16852_v10  ;;  %v5054_v30 = vadd.f32 1e-05, %v16838_v41  ;;  %v14077_v48 = vpop.permute.xlu1 %4635  ;;  %v16857_v10 = vld [vmem:[#allocation242_spill] sm:$0xff]  ;;  %v16858_v14 = vld [vmem:[#allocation239_spill] sm:$0xff] }
 0x6ef   : > { %v8781_v21 = vpop.eup %8780  ;;  %v5350_v61 = vadd.f32 %v8779_v38, %v16854_v15  ;;  %8792 = vrcp.f32 %v5430_v20  ;;  %v5017_v44 = vmul.f32 -31.0, %v16855_v52  ;;  %v5074_v4 = vmul.f32 0.2, %v5066_v8  ;;  %v16859_v41 = vld [vmem:[#allocation238_spill] sm:$0xff]  ;;  %v16860_v15 = vld [vmem:[#allocation161_spill] sm:$0xff] }
 0x6f0   : > { %v8783_v57 = vpop.eup %8782  ;;  %v5498_v59 = vadd.f32 %v8781_v21, %v5450_v5  ;;  %v5478_v3 = vadd.f32 1e-05, %v5470_v47  ;;  %v4985_v58 = vadd.f32 1e-05, %v4977_v6  ;;  %8794 = vrcp.f32 %v16857_v10  ;;  %v16861_v8 = vld [vmem:[#allocation89_spill] sm:$0xff] }
 0x6f1   : > { %v8785_v13 = vpop.eup %8784  ;;  %v4998_v43 = vadd.f32 %v8783_v57, %v4950_v54  ;;  %v5025_v62 = vadd.f32 %v5017_v44, %v16856_v24  ;;  %v5377_v9 = vadd.f32 %v16859_v41, %v16858_v14  ;;  %v5417_v40 = vmul.f32 -15.0, %v16860_v15  ;;  %v14087_v57 = vpop.xlane.xlu2 %5567  ;;  %v16864_v41 = vld [vmem:[#allocation240_spill] sm:$0xff] }
 0x6f2   : > { %v8787_v38 = vpop.eup %8786  ;;  %v5514_v20 = vmul.f32 %v5506_v0, %v5498_v59  ;;  %8796 = vrcp.f32 %v5478_v3  ;;  %v5457_v5 = vmul.f32 16.0, %v16861_v8  ;;  %v4905_v54 = vadd.f32 %v16863_v63, %v16862_v50 }
 0x6f3   : > { %v8789_v47 = vpop.eup %8788  ;;  %v5046_v6 = vadd.f32 %v8785_v13, %v4998_v43  ;;  %v5398_v21 = vadd.f32 %v8787_v38, %v5350_v61  ;;  %8798 = vrcp.f32 %v4985_v58  ;;  %v5033_v10 = vadd.f32 1e-05, %v5025_v62 }
 0x6f4   : > { %v8791_v44 = vpop.eup %8790  ;;  %v5522_v24 = vmul.f32 0.2, %v5514_v20  ;;  %v5385_v14 = vadd.f32 1e-05, %v5377_v9  ;;  %v5425_v0 = vadd.f32 %v5417_v40, %v16864_v41  ;;  %8800 = vrcp.f32 %v4893_v45  ;;  %v14101_v45 = vpop.permute.xlu0 %5697 }
 0x6f5   : > { %v8793_v59 = vpop.eup %8792  ;;  %v5293_v3 = vadd.f32 1e-05, %v13886_v36  ;;  %v14092_v8 = vmul.f32 8.0, %v13873_v60  ;;  %v5062_v61 = vmul.f32 %v5054_v30, %v5046_v6  ;;  %v4953_v63 = vadd.f32 %v8791_v44, %v4905_v54  ;;  %16865 = vst [vmem:[#allocation106_spill] sm:$0xff] %v14101_v45 }
 0x6f6   : > { %v14094_v13 = vadd.f32 %v5522_v24, %v5074_v4  ;;  %v5446_v50 = vadd.f32 %v8793_v59, %v5398_v21  ;;  %v5465_v58 = vmul.f32 -31.0, %v16860_v15  ;;  %v8795_v43 = vpop.eup %8794  ;;  %v5341_v62 = vadd.f32 1e-05, %v13890_v7  ;;  %v16866_v24 = vld [vmem:[#allocation248_spill] sm:$0xff] }
 0x6f7   : > { %v5461_v9 = vmul.f32 16.0, %v13873_v60  ;;  %8802 = vrcp.f32 %v5033_v10  ;;  %v4980_v40 = vadd.f32 %v13783_v46, %v13787_v16  ;;  %v5433_v30 = vadd.f32 1e-05, %v5425_v0 }
 0x6f8   : > { %v8797_v36 = vpop.eup %8796  ;;  %8804 = vrcp.f32 %v5385_v14  ;;  %v5473_v4 = vadd.f32 %v5465_v58, %v5457_v5  ;;  %v5020_v38 = vmul.f32 -31.0, %v13677_v29  ;;  %v4941_v6 = vadd.f32 1e-05, %v13877_v26  ;;  %v14113_v5 = vpop.xlane.xlu1 %4544 }
 0x6f9   : > { %v8799_v20 = vpop.eup %8798  ;;  %v5494_v21 = vadd.f32 %v8797_v36, %v5446_v50  ;;  %v5502_v7 = vadd.f32 1e-05, %v16847_v28  ;;  %8806 = vrcp.f32 %v13903_v35  ;;  %v14108_v60 = vmul.f32 0.5, %v13935_v23 }
 0x6fa   : > { %8808 = vrcp.f32 %v5293_v3  ;;  %v5001_v46 = vadd.f32 %v8799_v20, %v4953_v63  ;;  %v5028_v16 = vadd.f32 %v5020_v38, %v13794_v22  ;;  %v14111_v54 = vpop.eup %8800  ;;  %v14116_v44 = vadd.f32 1e-05, %v13892_v1  ;;  %v14126_v1 = vpop.xlane.xlu2 %5627 }
 0x6fb   : > { %8810 = vrcp.f32 %v5341_v62  ;;  %v5510_v26 = vmul.f32 %v5502_v7, %v5494_v21  ;;  %v5353_v28 = vadd.f32 %v8795_v43, %v16866_v24  ;;  %v5070_v10 = vmul.f32 0.2, %v5062_v61 }
 0x6fc   : > { %8812 = vrcp.f32 %v5433_v30  ;;  %v5481_v35 = vadd.f32 1e-05, %v5473_v4  ;;  %v14121_v23 = vadd.f32 %v13797_v27, %v13897_v51  ;;  %v14123_v22 = vmul.f32 0.5, %v8789_v47 }
 0x6fd   : > { %v8803_v14 = vpop.eup %8802  ;;  %v5518_v41 = vmul.f32 0.2, %v5510_v26  ;;  %v5021_v0 = vmul.f32 -31.0, %v13851_v55  ;;  %v4988_v59 = vadd.f32 1e-05, %v4980_v40  ;;  %v14129_v50 = vmul.f32 0.5, %v13974_v31 }
 0x6fe   : > { %v8805_v3 = vpop.eup %8804  ;;  %v5049_v61 = vadd.f32 %v8803_v14, %v5001_v46  ;;  %v5057_v63 = vadd.f32 1e-05, %v16855_v52  ;;  %v4908_v27 = vadd.f32 %v13916_v12, %v13825_v18  ;;  %v4981_v47 = vadd.f32 %v13972_v53, %v13998_v32 }
 0x6ff   : > { %v8807_v51 = vpop.eup %8806  ;;  %v5526_v58 = vadd.f32 %v5518_v41, %v5070_v10  ;;  %v5029_v43 = vadd.f32 %v5021_v0, %v14001_v42  ;;  %v5401_v62 = vadd.f32 %v8805_v3, %v5353_v28  ;;  %v5421_v30 = vmul.f32 -15.0, %v13862_v39 }
 0x700   : > { %v8809_v40 = vpop.eup %8808  ;;  %v4494_v36 = vpop.xlane.xlu0 %4493  ;;  %v5469_v31 = vmul.f32 -31.0, %v13862_v39  ;;  %8814 = vrcp.f32 %v5481_v35  ;;  %v4956_v4 = vadd.f32 %v8807_v51, %v4908_v27  ;;  %v5036_v12 = vadd.f32 1e-05, %v5028_v16  ;;  %v16867_v35 = vld [vmem:[#allocation131_spill] sm:$0xff] }
 0x701   : > { %v8811_v52 = vpop.eup %8810  ;;  %v4495_v38 = vadd.f32 %v4494_v36, %v14059_v49  ;;  %v5534_v18 = vmul.f32 0.5, %v5526_v58  ;;  %8816 = vrcp.f32 %v4988_v59  ;;  %v14141_v53 = vadd.f32 %v5421_v30, %v14092_v8 }
 0x702   : > { %v8813_v20 = vpop.eup %8812  ;;  %v14143_v32 = vadd.f32 %v5469_v31, %v5461_v9  ;;  %v5065_v42 = vmul.f32 %v5057_v63, %v5049_v61  ;;  %8818 = vrcp.f32 %v13907_v34  ;;  %v4989_v10 = vadd.f32 1e-05, %v4981_v47 }
 0x703   : > { %v4501_v21 = vmul.f32 2.0, %v4495_v38  ;;  %v4507_v7 = vmul.f32 4.0, %v4495_v38  ;;  %v4513_v46 = vmul.f32 8.0, %v4495_v38  ;;  %v14146_v26 = vpop.xlane.xlu1 %4475  ;;  %v5449_v24 = vadd.f32 %v8813_v20, %v5401_v62 }
 0x704   : > { %v4496_v49 = vmul.f32 -1.0, %v14146_v26  ;;  %v4502_v28 = vmul.f32 -3.0, %v14146_v26  ;;  %v4508_v16 = vmul.f32 -7.0, %v14146_v26  ;;  %v4519_v8 = vmul.f32 16.0, %v4495_v38 }
 0x705   : > { %v4514_v9 = vmul.f32 -15.0, %v14146_v26  ;;  %v14153_v14 = vmul.f32 %v5534_v18, %v16867_v35  ;;  %8820 = vrcp.f32 %v4941_v6  ;;  %v4520_v27 = vmul.f32 -31.0, %v14146_v26 }
 0x706   : > { %v8815_v34 = vpop.eup %8814  ;;  %v4497_v41 = vadd.f32 %v4496_v49, %v4495_v38  ;;  %v4503_v0 = vadd.f32 %v4502_v28, %v4501_v21  ;;  %v4509_v59 = vadd.f32 %v4508_v16, %v4507_v7  ;;  %v14155_v3 = vpop.xlane.xlu2 %4535  ;;  %8822 = vrcp.f32 %v5036_v12 }
 0x707   : > { %v8817_v61 = vpop.eup %8816  ;;  %v4515_v63 = vadd.f32 %v4514_v9, %v4513_v46  ;;  %v5497_v51 = vadd.f32 %v8815_v34, %v5449_v24  ;;  %v5505_v58 = vadd.f32 1e-05, %v16860_v15  ;;  %8824 = vrcp.f32 %v4989_v10  ;;  %v16869_v34 = vld [vmem:[#allocation112_spill] sm:$0xff] }
 0x708   : > { %v8819_v47 = vpop.eup %8818  ;;  %v4498_v62 = vadd.f32 1e-05, %v4497_v41  ;;  %v4504_v36 = vadd.f32 1e-05, %v4503_v0  ;;  %v5060_v6 = vadd.f32 1e-05, %v13677_v29  ;;  %v4521_v30 = vadd.f32 %v4520_v27, %v4519_v8 }
 0x709   : > { %v5037_v31 = vadd.f32 1e-05, %v5029_v43  ;;  %v5073_v38 = vmul.f32 0.2, %v5065_v42  ;;  %v5420_v18 = vmul.f32 -15.0, %v13688_v33  ;;  %v4556_v20 = vmul.f32 -1.0, %v14155_v3 }
 0x70a   : > { %8826 = vrcp.f32 %v4498_v62  ;;  %v4510_v12 = vadd.f32 1e-05, %v4509_v59  ;;  %v4909_v21 = vadd.f32 %v14111_v54, %v13991_v2  ;;  %v4516_v15 = vadd.f32 1e-05, %v4515_v63  ;;  %v16868_v42 = vld [vmem:[#allocation170_spill] sm:$0xff] }
 0x70b   : > { %v8821_v7 = vpop.eup %8820  ;;  %8828 = vrcp.f32 %v4504_v36  ;;  %v5513_v46 = vmul.f32 %v5505_v58, %v5497_v51  ;;  %v5004_v24 = vadd.f32 %v8817_v61, %v4956_v4  ;;  %v4562_v29 = vmul.f32 -3.0, %v14155_v3  ;;  %v16870_v4 = vld [vmem:[#allocation164_spill] sm:$0xff] }
 0x70c   : > { %v8823_v49 = vpop.eup %8822  ;;  %v4957_v28 = vadd.f32 %v8821_v7, %v4909_v21  ;;  %v5357_v43 = vadd.f32 %v8811_v52, %v8809_v40  ;;  %v14166_v16 = vadd.f32 %v8819_v47, %v16868_v42  ;;  %v4568_v10 = vmul.f32 -7.0, %v14155_v3  ;;  %v16873_v42 = vld [vmem:[#allocation160_spill] sm:$0xff] }
 0x70d   : > { %v5521_v8 = vmul.f32 0.2, %v5513_v46  ;;  %v5052_v9 = vadd.f32 %v8823_v49, %v5004_v24  ;;  %v14170_v41 = vadd.f32 %v5420_v18, %v16869_v34  ;;  %v8825_v2 = vpop.eup %8824  ;;  %8830 = vrcp.f32 %v4510_v12 }
 0x70e   : > { %v4522_v54 = vadd.f32 1e-05, %v4521_v30  ;;  %v4554_v0 = vpop.xlane.xlu2 %4553  ;;  %v5460_v59 = vmul.f32 16.0, %v16870_v4  ;;  %v5468_v61 = vmul.f32 -31.0, %v13688_v33  ;;  %8832 = vrcp.f32 %v4516_v15 }
 0x70f   : > { %v4555_v40 = vadd.f32 %v4554_v0, %v14113_v5  ;;  %v5005_v52 = vadd.f32 %v8825_v2, %v4957_v28  ;;  %v5529_v63 = vadd.f32 %v5521_v8, %v5073_v38  ;;  %v4574_v51 = vmul.f32 -15.0, %v14155_v3  ;;  %v16872_v28 = vld [vmem:[#allocation32_spill] sm:$0xff] }
 0x710   : > { %v8827_v27 = vpop.eup %8826  ;;  %8834 = vrcp.f32 %v5037_v31  ;;  %v14176_v58 = vmul.f32 %v5060_v6, %v5052_v9  ;;  %v5476_v47 = vadd.f32 %v5468_v61, %v5460_v59  ;;  %v4580_v7 = vmul.f32 -31.0, %v14155_v3  ;;  %v16871_v31 = vld [vmem:[#allocation156_spill] sm:$0xff] }
 0x711   : > { %v8829_v62 = vpop.eup %8828  ;;  %v4557_v36 = vadd.f32 %v4556_v20, %v4555_v40  ;;  %v4561_v30 = vmul.f32 2.0, %v4555_v40  ;;  %v4567_v18 = vmul.f32 4.0, %v4555_v40  ;;  %v4573_v12 = vmul.f32 8.0, %v4555_v40 }
 0x712   : > { %v4506_v21 = vadd.f32 %v8829_v62, %v8827_v27  ;;  %v4579_v15 = vmul.f32 16.0, %v4555_v40  ;;  %8836 = vrcp.f32 %v14116_v44  ;;  %v14181_v6 = vadd.f32 0.5, %v16871_v31 }
 0x713   : > { %v4558_v5 = vadd.f32 1e-05, %v4557_v36  ;;  %v4563_v38 = vadd.f32 %v4562_v29, %v4561_v30  ;;  %v4569_v46 = vadd.f32 %v4568_v10, %v4567_v18  ;;  %v4575_v24 = vadd.f32 %v4574_v51, %v4573_v12  ;;  %v8831_v49 = vpop.eup %8830  ;;  %v14210_v12 = vpop.xlane.xlu1 %5609 }
 0x714   : > { %v14185_v20 = vadd.f32 %v16873_v42, %v16872_v28  ;;  %v4581_v8 = vadd.f32 %v4580_v7, %v4579_v15  ;;  %v14188_v9 = vadd.f32 0.5, %v14108_v60  ;;  %v8833_v34 = vpop.eup %8832  ;;  %8838 = vrcp.f32 %v4522_v54 }
 0x715   : > { %v4564_v2 = vadd.f32 1e-05, %v4563_v38  ;;  %v4570_v44 = vadd.f32 1e-05, %v4569_v46  ;;  %v4576_v0 = vadd.f32 1e-05, %v4575_v24  ;;  %v4512_v10 = vadd.f32 %v8831_v49, %v4506_v21 }
 0x716   : > { %v8835_v29 = vpop.eup %8834  ;;  %8840 = vrcp.f32 %v4558_v5  ;;  %v4582_v4 = vadd.f32 1e-05, %v4581_v8  ;;  %v14190_v59 = vpop.xlane.xlu2 %5549  ;;  %v14193_v61 = vadd.f32 0.5, %v14123_v22  ;;  %v14197_v40 = vmul.f32 %v14129_v50, %v14188_v9 }
 0x717   : > { %8842 = vrcp.f32 %v4564_v2  ;;  %v14200_v60 = vmul.f32 0.5, %v13993_v19  ;;  %v5437_v54 = vadd.f32 1e-05, %v14141_v53  ;;  %v5061_v51 = vadd.f32 1e-05, %v13851_v55 }
 0x718   : > { %v8837_v27 = vpop.eup %8836  ;;  %8844 = vrcp.f32 %v4570_v44  ;;  %v5485_v62 = vadd.f32 1e-05, %v14143_v32  ;;  %v14206_v36 = vadd.f32 1e-05, %v13862_v39  ;;  %v5053_v22 = vadd.f32 %v8835_v29, %v5005_v52 }
 0x719   : > { %8846 = vrcp.f32 %v4576_v0  ;;  %v5405_v30 = vadd.f32 %v8837_v27, %v5357_v43  ;;  %v5388_v50 = vadd.f32 1e-05, %v14121_v23  ;;  %v4518_v18 = vadd.f32 %v8833_v34, %v4512_v10 }
 0x71a   : > { %v4525_v19 = vadd.f32 1e-05, %v14146_v26  ;;  %8848 = vrcp.f32 %v4582_v4  ;;  %v5537_v53 = vmul.f32 0.5, %v5529_v63  ;;  %v8839_v21 = vpop.eup %8838  ;;  %v4585_v55 = vadd.f32 1e-05, %v14155_v3 }
 0x71b   : > { %v5069_v7 = vmul.f32 %v5061_v51, %v5053_v22  ;;  %8850 = vrcp.f32 %v5437_v54  ;;  %v5436_v39 = vadd.f32 1e-05, %v14170_v41  ;;  %v5484_v23 = vadd.f32 1e-05, %v5476_v47 }
 0x71c   : > { %v8841_v32 = vpop.eup %8840  ;;  %8852 = vrcp.f32 %v5485_v62  ;;  %v14215_v43 = vmul.f32 %v5537_v53, %v14181_v6  ;;  %v14218_v52 = vadd.f32 1e-05, %v13688_v33  ;;  %v5630_v15 = vmul.f32 -1.0, %v14210_v12 }
 0x71d   : > { %v8843_v26 = vpop.eup %8842  ;;  %v14222_v63 = vmul.f32 -3.0, %v14210_v12  ;;  %v14225_v3 = vmul.f32 -7.0, %v14210_v12  ;;  %8854 = vrcp.f32 %v5388_v50  ;;  %v4524_v5 = vadd.f32 %v8839_v21, %v4518_v18 }
 0x71e   : > { %v8845_v41 = vpop.eup %8844  ;;  %v4566_v38 = vadd.f32 %v8843_v26, %v8841_v32  ;;  %v5570_v46 = vmul.f32 -1.0, %v14190_v59  ;;  %v14229_v47 = vmul.f32 -15.0, %v14210_v12  ;;  %v5559_v33 = vpop.xlane.xlu2 %5558  ;;  %v5576_v49 = vmul.f32 -3.0, %v14190_v59 }
 0x71f   : > { %v8847_v24 = vpop.eup %8846  ;;  %v5582_v31 = vmul.f32 -7.0, %v14190_v59  ;;  %v5569_v42 = vadd.f32 %v14087_v57, %v5559_v33  ;;  %8856 = vrcp.f32 %v5436_v39  ;;  %v5588_v2 = vmul.f32 -15.0, %v14190_v59 }
 0x720   : > { %v8849_v8 = vpop.eup %8848  ;;  %v4572_v34 = vadd.f32 %v8845_v41, %v4566_v38  ;;  %v5594_v44 = vmul.f32 -31.0, %v14190_v59  ;;  %8858 = vrcp.f32 %v5484_v23  ;;  %v4526_v51 = vmul.f32 %v4525_v19, %v4524_v5 }
 0x721   : > { %v8851_v0 = vpop.eup %8850  ;;  %v5571_v29 = vadd.f32 %v5570_v46, %v5569_v42  ;;  %v5575_v10 = vmul.f32 2.0, %v5569_v42  ;;  %v5581_v4 = vmul.f32 4.0, %v5569_v42  ;;  %v5587_v54 = vmul.f32 8.0, %v5569_v42 }
 0x722   : > { %v8853_v27 = vpop.eup %8852  ;;  %v4578_v62 = vadd.f32 %v8847_v24, %v4572_v34  ;;  %v5593_v22 = vmul.f32 16.0, %v5569_v42  ;;  %v5453_v50 = vadd.f32 %v8851_v0, %v5405_v30  ;;  %v5654_v46 = vmul.f32 -31.0, %v14210_v12 }
 0x723   : > { %v8855_v18 = vpop.eup %8854  ;;  %v5572_v57 = vadd.f32 1e-05, %v5571_v29  ;;  %v5577_v53 = vadd.f32 %v5576_v49, %v5575_v10  ;;  %v5583_v21 = vadd.f32 %v5582_v31, %v5581_v4  ;;  %v5589_v39 = vadd.f32 %v5588_v2, %v5587_v54 }
 0x724   : > { %v4584_v32 = vadd.f32 %v8849_v8, %v4578_v62  ;;  %v5595_v26 = vadd.f32 %v5594_v44, %v5593_v22  ;;  %v5501_v41 = vadd.f32 %v8853_v27, %v5453_v50  ;;  %v5404_v23 = vadd.f32 %v8855_v18, %v14166_v16 }
 0x725   : > { %v8857_v38 = vpop.eup %8856  ;;  %8860 = vrcp.f32 %v5572_v57  ;;  %v5578_v33 = vadd.f32 1e-05, %v5577_v53  ;;  %v5584_v45 = vadd.f32 1e-05, %v5583_v21  ;;  %v5590_v24 = vadd.f32 1e-05, %v5589_v39 }
 0x726   : > { %v8859_v19 = vpop.eup %8858  ;;  %v4586_v5 = vmul.f32 %v4585_v55, %v4584_v32  ;;  %v5619_v30 = vpop.xlane.xlu2 %5618  ;;  %v5517_v42 = vmul.f32 %v14206_v36, %v5501_v41  ;;  %v5452_v49 = vadd.f32 %v8857_v38, %v5404_v23  ;;  %v4527_v31 = vmul.f32 0.2, %v4526_v51  ;;  %v16874_v39 = vld [vmem:[#allocation135_spill] sm:$0xff] }
 0x727   : > { %8862 = vrcp.f32 %v5578_v33  ;;  %v5629_v8 = vadd.f32 %v14126_v1, %v5619_v30  ;;  %v5077_v34 = vmul.f32 0.2, %v5069_v7  ;;  %v5596_v16 = vadd.f32 1e-05, %v5595_v26  ;;  %v16875_v41 = vld [vmem:[#allocation227_spill] sm:$0xff] }
 0x728   : > { %v4587_v2 = vmul.f32 0.2, %v4586_v5  ;;  %v5525_v44 = vmul.f32 0.2, %v5517_v42  ;;  %v5500_v0 = vadd.f32 %v8859_v19, %v5452_v49  ;;  %8864 = vrcp.f32 %v5584_v45 }
 0x729   : > { %v5631_v29 = vadd.f32 %v5630_v15, %v5629_v8  ;;  %v5635_v10 = vmul.f32 2.0, %v5629_v8  ;;  %v5641_v4 = vmul.f32 4.0, %v5629_v8  ;;  %8866 = vrcp.f32 %v5590_v24 }
 0x72a   : > { %v4588_v54 = vadd.f32 %v4587_v2, %v4527_v31  ;;  %v5647_v55 = vmul.f32 8.0, %v5629_v8  ;;  %v5653_v27 = vmul.f32 16.0, %v5629_v8  ;;  %v14242_v1 = vadd.f32 %v5525_v44, %v5077_v34  ;;  %v16877_v2 = vld [vmem:[#allocation228_spill] sm:$0xff]  ;;  %v16878_v44 = vld [vmem:[#allocation102_spill] sm:$0xff] }
 0x72b   : > { %v8861_v62 = vpop.eup %8860  ;;  %v5632_v36 = vadd.f32 1e-05, %v5631_v29  ;;  %v5637_v51 = vadd.f32 %v14222_v63, %v5635_v10  ;;  %v5643_v22 = vadd.f32 %v14225_v3, %v5641_v4  ;;  %v14248_v15 = vmul.f32 %v14218_v52, %v5500_v0 }
 0x72c   : > { %v14244_v7 = vmul.f32 0.5, %v4588_v54  ;;  %v5649_v50 = vadd.f32 %v14229_v47, %v5647_v55  ;;  %v5655_v45 = vadd.f32 %v5654_v46, %v5653_v27  ;;  %8868 = vrcp.f32 %v5596_v16 }
 0x72d   : > { %v8863_v18 = vpop.eup %8862  ;;  %v5638_v57 = vadd.f32 1e-05, %v5637_v51  ;;  %v5644_v53 = vadd.f32 1e-05, %v5643_v22  ;;  %v4607_v21 = vmul.f32 %v14200_v60, %v14193_v61  ;;  %8870 = vrcp.f32 %v5632_v36  ;;  %v16879_v22 = vld [vmem:[#allocation138_spill] sm:$0xff] }
 0x72e   : > { %v5580_v63 = vadd.f32 %v8863_v18, %v8861_v62  ;;  %v5650_v3 = vadd.f32 1e-05, %v5649_v50  ;;  %v4593_v32 = vmul.f32 %v14244_v7, %v16874_v39  ;;  %v8865_v26 = vpop.eup %8864  ;;  %v4592_v47 = vmul.f32 %v14244_v7, %v13927_v37  ;;  %v16876_v37 = vld [vmem:[#allocation136_spill] sm:$0xff] }
 0x72f   : > { %8872 = vrcp.f32 %v5638_v57  ;;  %v4590_v52 = vmul.f32 %v14244_v7, %v14188_v9  ;;  %v4595_v23 = vmul.f32 %v14244_v7, %v16875_v41  ;;  %v8867_v38 = vpop.eup %8866  ;;  %v5656_v60 = vadd.f32 1e-05, %v5655_v45 }
 0x730   : > { %v5586_v46 = vadd.f32 %v8865_v26, %v5580_v63  ;;  %v4601_v33 = vmul.f32 0.5, %v4593_v32  ;;  %v4591_v19 = vmul.f32 %v14244_v7, %v14193_v61  ;;  %8874 = vrcp.f32 %v5644_v53  ;;  %v16880_v53 = vld [vmem:[#allocation107_spill] sm:$0xff] }
 0x731   : > { %v4600_v5 = vmul.f32 0.5, %v4592_v47  ;;  %v4598_v24 = vmul.f32 0.5, %v4590_v52  ;;  %v4603_v30 = vmul.f32 0.5, %v4595_v23  ;;  %8876 = vrcp.f32 %v5650_v3  ;;  %v16881_v3 = vld [vmem:[#allocation142_spill] sm:$0xff] }
 0x732   : > { %v5592_v42 = vadd.f32 %v8867_v38, %v5586_v46  ;;  %v4617_v49 = vmul.f32 %v16876_v37, %v4601_v33  ;;  %v4599_v31 = vmul.f32 0.5, %v4591_v19  ;;  %v8869_v9 = vpop.eup %8868  ;;  %v4597_v0 = vmul.f32 %v14244_v7, %v16878_v44 }
 0x733   : > { %v4616_v8 = vmul.f32 %v13959_v11, %v4600_v5  ;;  %v4614_v34 = vmul.f32 %v14197_v40, %v4598_v24  ;;  %v4619_v16 = vmul.f32 %v16877_v2, %v4603_v30  ;;  %v8871_v61 = vpop.eup %8870  ;;  %v2757_v29 = vmul.f32 0.5, %v14185_v20 }
 0x734   : > { %8878 = vrcp.f32 %v5656_v60  ;;  %v4629_v10 = vmul.f32 %v14068_v17, %v4617_v49  ;;  %v4615_v4 = vmul.f32 %v4607_v21, %v4599_v31  ;;  %v5598_v55 = vadd.f32 %v8869_v9, %v5592_v42  ;;  %v16882_v60 = vld [vmem:[#allocation87_spill] sm:$0xff]  ;;  %v16884_v42 = vld [vmem:[#allocation81_spill] sm:$0xff] }
 0x735   : > { %v8873_v54 = vpop.eup %8872  ;;  %v4628_v27 = vmul.f32 %v14068_v17, %v4616_v8  ;;  %v4626_v11 = vmul.f32 %v14068_v17, %v4614_v34  ;;  %v4605_v62 = vmul.f32 0.5, %v4597_v0  ;;  %v4631_v51 = vmul.f32 %v14068_v17, %v4619_v16  ;;  %v16886_v49 = vld [vmem:[#allocation83_spill] sm:$0xff]  ;;  %v16889_v16 = vld [vmem:[#allocation249_spill] sm:$0xff] }
 0x736   : > { %v5640_v40 = vadd.f32 %v8873_v54, %v8871_v61  ;;  %v4641_v36 = vadd.f32 %v14077_v48, %v4629_v10  ;;  %v4594_v50 = vmul.f32 %v14244_v7, %v16879_v22  ;;  %v8875_v20 = vpop.eup %8874  ;;  %v4627_v57 = vmul.f32 %v14068_v17, %v4615_v4  ;;  %v16888_v34 = vld [vmem:[#allocation147_spill] sm:$0xff] }
 0x737   : > { %v4640_v45 = vadd.f32 %v14077_v48, %v4628_v27  ;;  %v4638_v18 = vadd.f32 %v14077_v48, %v4626_v11  ;;  %v4621_v21 = vmul.f32 %v16880_v53, %v4605_v62  ;;  %v8877_v63 = vpop.eup %8876  ;;  %v2706_v39 = vadd.f32 %v16881_v3, %v16872_v28  ;;  %v16890_v11 = vld [vmem:[#allocation144_spill] sm:$0xff] }
 0x738   : > { %8880 = vtanh.f32 %v2757_v29  ;;  %v5646_v32 = vadd.f32 %v8875_v20, %v5640_v40  ;;  %v5723_v26 = vadd.f32 1.0, %v4641_v36  ;;  %v5599_v47 = vadd.f32 1e-05, %v14190_v59  ;;  %v16891_v40 = vld [vmem:[#allocation158_spill] sm:$0xff] }
 0x739   : > { %v5659_v52 = vadd.f32 1e-05, %v14210_v12  ;;  %v5722_v41 = vadd.f32 1.0, %v4640_v45  ;;  %v5720_v23 = vadd.f32 1.0, %v4638_v18  ;;  %v16883_v33 = vmax.f32 %v16882_v60, 0.0 }
 0x73a   : > { %v8879_v38 = vpop.eup %8878  ;;  %v5652_v46 = vadd.f32 %v8877_v63, %v5646_v32  ;;  %v4643_v5 = vadd.f32 %v14077_v48, %v4631_v51  ;;  %v4602_v24 = vmul.f32 0.5, %v4594_v50  ;;  %v5600_v30 = vmul.f32 %v5599_v47, %v5598_v55  ;;  %v16895_v47 = vld [vmem:[#allocation86_spill] sm:$0xff] }
 0x73b   : > { %v5731_v19 = vmul.f32 %v5723_v26, %v16883_v33  ;;  %v16885_v28 = vmax.f32 %v16884_v42, 0.0  ;;  %v16887_v31 = vmax.f32 %v16886_v49, 0.0  ;;  %v4639_v59 = vadd.f32 %v14077_v48, %v4627_v57 }
 0x73c   : > { %v5658_v12 = vadd.f32 %v8879_v38, %v5652_v46  ;;  %v4633_v8 = vmul.f32 %v14068_v17, %v4621_v21  ;;  %v4618_v2 = vmul.f32 %v16888_v34, %v4602_v24  ;;  %v4596_v44 = vmul.f32 %v14244_v7, %v16889_v16  ;;  %v16893_v21 = vld [vmem:[#allocation79_spill] sm:$0xff] }
 0x73d   : > { %v5730_v37 = vmul.f32 %v5722_v41, %v16885_v28  ;;  %v5728_v9 = vmul.f32 %v5720_v23, %v16887_v31  ;;  %5774 = vrot.lane.b32.xlu2 %v5731_v19, %s9193_s14  ;;  %v2756_v0 = vmul.f32 0.5, %v2706_v39  ;;  %v5076_v61 = vmul.f32 0.2, %v14176_v58  ;;  %v16892_v58 = vld [vmem:[#allocation250_spill] sm:$0xff]  ;;  %v16898_v31 = vld [vmem:[#allocation84_spill] sm:$0xff] }
 0x73e   : > { %v5524_v29 = vmul.f32 0.2, %v14248_v15  ;;  %v8881_v10 = vpop.eup %8880  ;;  %v5660_v4 = vmul.f32 %v5659_v52, %v5658_v12  ;;  %v5725_v54 = vadd.f32 1.0, %v4643_v5  ;;  %v4630_v55 = vmul.f32 %v14068_v17, %v4618_v2  ;;  %v16897_v5 = vld [vmem:[#allocation132_spill] sm:$0xff] }
 0x73f   : > { %5772 = vrot.lane.b32.xlu1 %v5730_v37, %s9193_s14  ;;  %5768 = vrot.lane.b32.xlu0 %v5728_v9, %s9193_s14  ;;  %v4604_v27 = vmul.f32 0.5, %v4596_v44  ;;  %v2802_v62 = vmul.f32 0.5, %v16890_v11  ;;  %v2803_v36 = vmul.f32 0.5, %v16891_v40  ;;  %v5721_v7 = vadd.f32 1.0, %v4639_v59 }
 0x740   : > { %v14304_v51 = vadd.f32 %v5524_v29, %v5076_v61  ;;  %v5601_v22 = vmul.f32 0.2, %v5600_v30  ;;  %v5661_v50 = vmul.f32 0.2, %v5660_v4  ;;  %v4645_v20 = vadd.f32 %v14077_v48, %v4633_v8  ;;  %v16903_v4 = vld [vmem:[#allocation154_spill] sm:$0xff] }
 0x741   : > { %v4620_v45 = vmul.f32 %v16892_v58, %v4604_v27  ;;  %v2805_v15 = vmul.f32 0.5, %v8881_v10  ;;  %v5539_v18 = vmul.f32 0.5, %v14063_v56  ;;  %v5538_v57 = vmul.f32 0.5, %v14094_v13 }
 0x742   : > { %v5662_v53 = vadd.f32 %v5661_v50, %v5601_v22  ;;  %v16894_v63 = vmax.f32 %v16893_v21, 0.0  ;;  %v4642_v39 = vadd.f32 %v14077_v48, %v4630_v55  ;;  %v2826_v32 = vadd.f32 0.5, %v2802_v62  ;;  %v16904_v62 = vld [vmem:[#allocation106_spill] sm:$0xff]  ;;  %v16905_v50 = vld [vmem:[#allocation115_spill] sm:$0xff] }
 0x743   : > { %v2827_v26 = vadd.f32 0.5, %v2803_v36  ;;  %v16896_v52 = vmax.f32 %v16895_v47, 0.0  ;;  %8882 = vtanh.f32 %v2756_v0  ;;  %v5727_v38 = vadd.f32 1.0, %v4645_v20  ;;  %v16900_v0 = vld [vmem:[#allocation82_spill] sm:$0xff] }
 0x744   : > { %v5733_v3 = vmul.f32 %v5725_v54, %v16894_v63  ;;  %v5663_v23 = vmul.f32 0.5, %v5662_v53  ;;  %v2829_v46 = vadd.f32 0.5, %v2805_v15  ;;  %v5684_v13 = vmul.f32 %v5538_v57, %v2826_v32  ;;  %v16906_v63 = vld [vmem:[#allocation91_spill] sm:$0xff] }
 0x745   : > { %v5729_v41 = vmul.f32 %v5721_v7, %v16896_v52  ;;  %v5685_v56 = vmul.f32 %v5539_v18, %v2827_v26  ;;  %v5541_v60 = vmul.f32 0.5, %v14242_v1  ;;  %v5724_v33 = vadd.f32 1.0, %v4642_v39 }
 0x746   : > { %5778 = vrot.lane.b32.xlu2 %v5733_v3, %s9193_s14  ;;  %v5666_v19 = vmul.f32 %v5663_v23, %v16821_v25  ;;  %v5665_v24 = vmul.f32 %v5663_v23, %v16897_v5  ;;  %v5669_v30 = vmul.f32 %v5663_v23, %v2827_v26  ;;  %v4632_v42 = vmul.f32 %v14068_v17, %v4620_v45  ;;  %v16902_v17 = vld [vmem:[#allocation99_spill] sm:$0xff] }
 0x747   : > { %5770 = vrot.lane.b32.xlu0 %v5729_v41, %s9193_s14  ;;  %v5668_v28 = vmul.f32 %v5663_v23, %v2826_v32  ;;  %v5664_v37 = vmul.f32 %v5663_v23, %v16867_v35  ;;  %v5667_v49 = vmul.f32 %v5663_v23, %v14181_v6  ;;  %v16899_v9 = vmax.f32 %v16898_v31, 0.0  ;;  %v16908_v32 = vld [vmem:[#allocation95_spill] sm:$0xff] }
 0x748   : > { %v5674_v12 = vmul.f32 0.5, %v5666_v19  ;;  %v5673_v8 = vmul.f32 0.5, %v5665_v24  ;;  %v5677_v34 = vmul.f32 0.5, %v5669_v30  ;;  %v5671_v16 = vmul.f32 %v5663_v23, %v2829_v46 }
 0x749   : > { %v5735_v59 = vmul.f32 %v5727_v38, %v16899_v9  ;;  %v5676_v1 = vmul.f32 0.5, %v5668_v28  ;;  %v5672_v2 = vmul.f32 0.5, %v5664_v37  ;;  %v5675_v25 = vmul.f32 0.5, %v5667_v49  ;;  %v8883_v44 = vpop.eup %8882  ;;  %v16910_v38 = vld [vmem:[#allocation88_spill] sm:$0xff]  ;;  %v16912_v49 = vld [vmem:[#allocation94_spill] sm:$0xff]  ;;  %v16914_v9 = vld [vmem:[#allocation93_spill] sm:$0xff] }
 0x74a   : > { %v16901_v61 = vmax.f32 %v16900_v0, 0.0  ;;  %v5690_v10 = vmul.f32 %v16902_v17, %v5674_v12  ;;  %v5689_v35 = vmul.f32 %v16903_v4, %v5673_v8  ;;  %v5693_v54 = vmul.f32 %v5685_v56, %v5677_v34  ;;  %v16916_v34 = vld [vmem:[#allocation90_spill] sm:$0xff] }
 0x74b   : > { %v4644_v6 = vadd.f32 %v14077_v48, %v4632_v42  ;;  %v5692_v55 = vmul.f32 %v5684_v13, %v5676_v1  ;;  %v5688_v27 = vmul.f32 %v14153_v14, %v5672_v2  ;;  %v5691_v11 = vmul.f32 %v14215_v43, %v5675_v25 }
 0x74c   : > { %v5732_v29 = vmul.f32 %v5724_v33, %v16901_v61  ;;  %v5702_v40 = vmul.f32 %v16904_v62, %v5690_v10  ;;  %v5701_v36 = vmul.f32 %v16904_v62, %v5689_v35  ;;  %v2804_v7 = vmul.f32 0.5, %v8883_v44  ;;  %v16918_v61 = vld [vmem:[#allocation100_spill] sm:$0xff] }
 0x74d   : > { %v5679_v22 = vmul.f32 0.5, %v5671_v16  ;;  %v5705_v48 = vmul.f32 %v16904_v62, %v5693_v54  ;;  %v5704_v14 = vmul.f32 %v16904_v62, %v5692_v55  ;;  %v5726_v45 = vadd.f32 1.0, %v4644_v6  ;;  %v16920_v10 = vld [vmem:[#allocation92_spill] sm:$0xff]  ;;  %v16922_v55 = vld [vmem:[#allocation97_spill] sm:$0xff] }
 0x74e   : > { %5782 = vrot.lane.b32.xlu2 %v5735_v59, %s9193_s14  ;;  %v5714_v20 = vadd.f32 %v16905_v50, %v5702_v40  ;;  %v5713_v58 = vadd.f32 %v16905_v50, %v5701_v36  ;;  %v5700_v43 = vmul.f32 %v16904_v62, %v5688_v27  ;;  %v5687_v15 = vmul.f32 %v5541_v60, %v2829_v46 }
 0x74f   : > { %5776 = vrot.lane.b32.xlu0 %v5732_v29, %s9193_s14  ;;  %v2828_v53 = vadd.f32 0.5, %v2804_v7  ;;  %v16907_v3 = vmax.f32 %v16906_v63, 0.0  ;;  %v16909_v26 = vmax.f32 %v16908_v32, 0.0  ;;  %v5717_v52 = vadd.f32 %v16905_v50, %v5705_v48 }
 0x750   : > { %v5738_v18 = vadd.f32 1.0, %v5714_v20  ;;  %v5737_v57 = vadd.f32 1.0, %v5713_v58  ;;  %v5695_v21 = vmul.f32 %v5687_v15, %v5679_v22  ;;  %v5716_v41 = vadd.f32 %v16905_v50, %v5704_v14 }
 0x751   : > { %v16911_v56 = vmax.f32 %v16910_v38, 0.0  ;;  %v5712_v33 = vadd.f32 %v16905_v50, %v5700_v43  ;;  %v5670_v46 = vmul.f32 %v5663_v23, %v2828_v53  ;;  %v5540_v60 = vmul.f32 0.5, %v14304_v51  ;;  %v16932_v38 = vld [vmem:[#allocation43_spill] sm:$0xff] }
 0x752   : > { %v5746_v39 = vmul.f32 %v5738_v18, %v16907_v3  ;;  %v5745_v47 = vmul.f32 %v5737_v57, %v16909_v26  ;;  %v5741_v19 = vadd.f32 1.0, %v5717_v52  ;;  %v5740_v5 = vadd.f32 1.0, %v5716_v41 }
 0x753   : > { %v5734_v13 = vmul.f32 %v5726_v45, %v16911_v56  ;;  %v5707_v24 = vmul.f32 %v16904_v62, %v5695_v21  ;;  %v5736_v30 = vadd.f32 1.0, %v5712_v33  ;;  %v5703_v42 = vmul.f32 %v16904_v62, %v5691_v11  ;;  %v16933_v33 = vld [vmem:[#allocation40_spill] sm:$0xff] }
 0x754   : > { %5786 = vrot.lane.b32.xlu1 %v5745_v47, %s9193_s14  ;;  %v5678_v28 = vmul.f32 0.5, %v5670_v46  ;;  %v5686_v37 = vmul.f32 %v5540_v60, %v2828_v53  ;;  %v16913_v31 = vmax.f32 %v16912_v49, 0.0  ;;  %v16915_v59 = vmax.f32 %v16914_v9, 0.0  ;;  %v16928_v53 = vld [vmem:[#allocation41_spill] sm:$0xff]  ;;  %v16937_v49 = vld [vmem:[#allocation38_spill] sm:$0xff] }
 0x755   : > { %v5719_v8 = vadd.f32 %v16905_v50, %v5707_v24  ;;  %v16917_v1 = vmax.f32 %v16916_v34, 0.0  ;;  %v5715_v2 = vadd.f32 %v16905_v50, %v5703_v42  ;;  %v16919_v29 = vmax.f32 %v16918_v61, 0.0 }
 0x756   : > { %5788 = vrot.lane.b32.xlu2 %v5746_v39, %s9193_s14  ;;  %v5749_v23 = vmul.f32 %v5741_v19, %v16913_v31  ;;  %v5748_v12 = vmul.f32 %v5740_v5, %v16915_v59  ;;  %v5694_v16 = vmul.f32 %v5686_v37, %v5678_v28  ;;  %v16921_v4 = vmax.f32 %v16920_v10, 0.0  ;;  %v16929_v39 = vld [vmem:[#allocation42_spill] sm:$0xff]  ;;  %v16934_v5 = vld [vmem:[#allocation45_spill] sm:$0xff]  ;;  %v16936_v28 = vld [vmem:[#allocation39_spill] sm:$0xff] }
 0x757   : > { %5780 = vrot.lane.b32.xlu0 %v5734_v13, %s9193_s14  ;;  %v5744_v51 = vmul.f32 %v5736_v30, %v16917_v1  ;;  %v5743_v25 = vadd.f32 1.0, %v5719_v8  ;;  %v5739_v44 = vadd.f32 1.0, %v5715_v2  ;;  %v16923_v27 = vmax.f32 %v16922_v55, 0.0  ;;  %v16935_v30 = vld [vmem:[#allocation62_spill] sm:$0xff]  ;;  %v16939_v59 = vld [vmem:[#allocation33_spill] sm:$0xff] }
 0x758   : > { %v5706_v0 = vmul.f32 %v16904_v62, %v5694_v16 }
 0x759   : > { %v5751_v17 = vmul.f32 %v5743_v25, %v16919_v29  ;;  %v5747_v35 = vmul.f32 %v5739_v44, %v16921_v4  ;;  %v16940_v25 = vld [vmem:[#allocation52_spill] sm:$0xff]  ;;  %v16943_v4 = vld [vmem:[#allocation37_spill] sm:$0xff] }
 0x75a   : > { %v5718_v54 = vadd.f32 %v16905_v50, %v5706_v0  ;;  %v16941_v0 = vld [vmem:[#allocation51_spill] sm:$0xff] }
 0x75c   : > { %5792 = vrot.lane.b32.xlu1 %v5748_v12, %s9193_s14  ;;  %v5742_v6 = vadd.f32 1.0, %v5718_v54 }
 0x75e   : > { %5794 = vrot.lane.b32.xlu2 %v5749_v23, %s9193_s14  ;;  %v5750_v11 = vmul.f32 %v5742_v6, %v16923_v27  ;;  %v16938_v23 = vld [vmem:[#allocation34_spill] sm:$0xff] }
 0x75f   : > { %5784 = vrot.lane.b32.xlu0 %v5744_v51, %s9193_s14 }
 0x764   : > { %5798 = vrot.lane.b32.xlu1 %v5751_v17, %s9193_s14  ;;  %v16942_v17 = vld [vmem:[#allocation36_spill] sm:$0xff] }
 0x767   : > { %5790 = vrot.lane.b32.xlu0 %v5747_v35, %s9193_s14 }
 0x76f   : > { %5796 = vrot.lane.b32.xlu0 %v5750_v11, %s9193_s14  ;;  %s15564_s14 = scalar_lea.vmem [#allocation14], %s7099_s29  ;;  %s7209_s29 = sshll.u32 %s9286_s16, 6 }
 0x797   : > { %v5775_v62 = vpop.permute.xlu2 %5774 }
 0x7a0   : > { %v5779_v45 = vpop.permute.xlu2 %5778 }
 0x7a8   : > { %v5783_v63 = vpop.permute.xlu2 %5782 }
 0x7a9   : > { %v14461_v54 = vsel %vm657_vm0, %v5783_v63, 0.0 }
 0x7b0   : > { %v5789_v2 = vpop.permute.xlu2 %5788 }
 0x7b1   : > { %v5769_v40 = vpop.permute.xlu0 %5768  ;;  %v5773_v36 = vpop.permute.xlu1 %5772 }
 0x7b2   : > { %v14379_v22 = vsel %vm657_vm0, %v5773_v36, %v5775_v62  ;;  %v14382_v20 = vsel %vm657_vm0, 0.0, %v5769_v40 }
 0x7b3   : > { %16924 = vst [vmem:[#allocation197_spill] sm:$0xff] %v14379_v22  ;;  %v5855_v32 = vmul.f32 %v14379_v22, %v16929_v39  ;;  %v5873_v46 = vmul.f32 %v14379_v22, %v16933_v33  ;;  %v5852_v12 = vmul.f32 %v16939_v59, %v14382_v20 }
 0x7b9   : > { %v5771_v7 = vpop.permute.xlu0 %5770 }
 0x7ba   : > { %v14385_v50 = vsel %vm657_vm0, %v5769_v40, %v5771_v7  ;;  %v14388_v58 = vsel %vm657_vm0, %v5771_v7, %v5773_v36  ;;  %v5795_v40 = vpop.permute.xlu2 %5794  ;;  %v16944_v36 = vld [vmem:[#allocation72_spill] sm:$0xff] }
 0x7bb   : > { %16925 = vst [vmem:[#allocation201_spill] sm:$0xff] %v14388_v58  ;;  %v8071_v48 = vpack.i.bf16 %v14379_v22, %v14388_v58  ;;  %v8066_v14 = vpack.i.bf16 %v14385_v50, %v14382_v20  ;;  %v5854_v21 = vmul.f32 %v14388_v58, %v16928_v53  ;;  %v5872_v56 = vmul.f32 %v14388_v58, %v16932_v38 }
 0x7bc   : > { %v8101_v19 = vpack.i.bf16 %v14388_v58, %v14385_v50  ;;  %v5907_v24 = vmul.f32 %v14385_v50, %v16934_v5  ;;  %v5908_v42 = vmul.f32 %v14388_v58, %v16935_v30  ;;  %v5853_v9 = vmul.f32 %v14385_v50, %v16938_v23 }
 0x7bd   : > { %8072 = vrot.lane.b32.xlu0 %v8071_v48, %s9199_s2  ;;  %8067 = vrot.lane.b32.xlu2 %v8066_v14, %s9199_s2  ;;  %v8111_v52 = vpack.i.bf16 %v5855_v32, %v5854_v21  ;;  %v8131_v60 = vpack.i.bf16 %v5873_v46, %v5872_v56  ;;  %v5925_v7 = vmul.f32 %v14385_v50, %v16944_v36 }
 0x7be   : > { %v8146_v34 = vpack.i.bf16 %v5908_v42, %v5907_v24  ;;  %v8106_v51 = vpack.i.bf16 %v5853_v9, %v5852_v12  ;;  %v16951_v24 = vld [vmem:[#allocation55_spill] sm:$0xff] }
 0x7c1   : > { %v5777_v43 = vpop.permute.xlu0 %5776 }
 0x7c2   : > { %v14397_v15 = vsel %vm657_vm0, %v5775_v62, %v5777_v43  ;;  %v14400_v18 = vsel %vm657_vm0, %v5777_v43, %v5779_v45  ;;  %v16947_v43 = vld [vmem:[#allocation49_spill] sm:$0xff] }
 0x7c3   : > { %16926 = vst [vmem:[#allocation203_spill] sm:$0xff] %v14397_v15  ;;  %v14404_v57 = vpack.i.bf16 %v14400_v18, %v14397_v15  ;;  %v5856_v37 = vmul.f32 %v14397_v15, %v16936_v28  ;;  %v5857_v31 = vmul.f32 %v14400_v18, %v16937_v49  ;;  %v5874_v44 = vmul.f32 %v14397_v15, %v16940_v25 }
 0x7c4   : > { %16927 = vst [vmem:[#allocation196_spill] sm:$0xff] %v14400_v18  ;;  %v5875_v61 = vmul.f32 %v14400_v18, %v16941_v0  ;;  %v5871_v21 = vmul.f32 %v14385_v50, %v16947_v43 }
 0x7c5   : > { %8092 = vrot.lane.b32.xlu0 %v8071_v48, %s9198_s25  ;;  %8077 = vrot.lane.b32.xlu1 %v14404_v57, %s9199_s2  ;;  %v8116_v1 = vpack.i.bf16 %v5857_v31, %v5856_v37  ;;  %v16945_v48 = vld [vmem:[#allocation71_spill] sm:$0xff] }
 0x7c6   : > { %v5787_v16 = vpop.permute.xlu1 %5786  ;;  %v8136_v6 = vpack.i.bf16 %v5875_v61, %v5874_v44 }
 0x7c7   : > { %v14498_v37 = vsel %vm657_vm0, %v5787_v16, %v5789_v2 }
 0x7c8   : > { %16952 = vst [vmem:[#allocation217_spill] sm:$0xff] %v14498_v37 }
 0x7c9   : > { %v5781_v3 = vpop.permute.xlu0 %5780 }
 0x7ca   : > { %v14414_v26 = vsel %vm657_vm0, %v5779_v45, %v5781_v3  ;;  %v14417_v47 = vsel %vm657_vm0, %v5781_v3, %v5783_v63  ;;  %v16949_v3 = vld [vmem:[#allocation46_spill] sm:$0xff] }
 0x7cb   : > { %16930 = vst [vmem:[#allocation189_spill] sm:$0xff] %v14414_v26  ;;  %v8081_v41 = vpack.i.bf16 %v14417_v47, %v14414_v26  ;;  %v5858_v10 = vmul.f32 %v14414_v26, %v16942_v17  ;;  %v5859_v35 = vmul.f32 %v14417_v47, %v16943_v4  ;;  %v5870_v32 = vmul.f32 %v16949_v3, %v14382_v20 }
 0x7cc   : > { %16931 = vst [vmem:[#allocation190_spill] sm:$0xff] %v14417_v47  ;;  %v5877_v42 = vmul.f32 %v14417_v47, %v16951_v24 }
 0x7cd   : > { %8112 = vrot.lane.b32.xlu0 %v8111_v52, %s9200_s6  ;;  %8097 = vrot.lane.b32.xlu1 %v14404_v57, %s9198_s25  ;;  %v8121_v27 = vpack.i.bf16 %v5859_v35, %v5858_v10  ;;  %v8126_v56 = vpack.i.bf16 %v5871_v21, %v5870_v32 }
 0x7ce   : > { %8082 = vrot.lane.b32.xlu2 %v8081_v41, %s9199_s2  ;;  %v5793_v62 = vpop.permute.xlu1 %5792 }
 0x7cf   : > { %v14478_v63 = vsel %vm657_vm0, %v5793_v62, %v5795_v40 }
 0x7d0   : > { %16948 = vst [vmem:[#allocation221_spill] sm:$0xff] %v14478_v63 }
 0x7d1   : > { %v5785_v13 = vpop.permute.xlu0 %5784 }
 0x7d2   : > { %v14454_v29 = vsel %vm657_vm0, 0.0, %v5785_v13  ;;  %v14491_v46 = vsel %vm657_vm0, %v5785_v13, %v5787_v16 }
 0x7d3   : > { %v8161_v55 = vpack.i.bf16 %v14454_v29, %v14461_v54  ;;  %v8166_v31 = vpack.i.bf16 %v14498_v37, %v14491_v46  ;;  %v8196_v10 = vpack.i.bf16 %v14454_v29, %v14498_v37  ;;  %v8186_v21 = vpack.i.bf16 %v14491_v46, %v14414_v26 }
 0x7d4   : > { %v5862_v32 = vmul.f32 %v14491_v46, %v16938_v23 }
 0x7d5   : > { %8132 = vrot.lane.b32.xlu0 %v8131_v60, %s9201_s5  ;;  %8102 = vrot.lane.b32.xlu1 %v8101_v19, %s9204_s26  ;;  %v16950_v60 = vld [vmem:[#allocation54_spill] sm:$0xff] }
 0x7d6   : > { %8087 = vrot.lane.b32.xlu2 %v8066_v14, %s9198_s25  ;;  %v5926_v14 = vmul.f32 %v14388_v58, %v16945_v48  ;;  %v5876_v19 = vmul.f32 %v14414_v26, %v16950_v60  ;;  %v5799_v13 = vpop.permute.xlu1 %5798 }
 0x7d7   : > { %v14513_v44 = vsel %vm657_vm0, %v5799_v13, 0.0 }
 0x7d8   : > { %v8156_v52 = vpack.i.bf16 %v5926_v14, %v5925_v7  ;;  %v8141_v9 = vpack.i.bf16 %v5877_v42, %v5876_v19  ;;  %v5863_v19 = vmul.f32 %v14498_v37, %v16928_v53  ;;  %v5866_v42 = vmul.f32 %v14478_v63, %v16937_v49 }
 0x7d9   : > { %v5791_v8 = vpop.permute.xlu0 %5790 }
 0x7dd   : > { %8147 = vrot.lane.b32.xlu0 %v8146_v34, %s9196_s7  ;;  %8117 = vrot.lane.b32.xlu1 %v8116_v1, %s9200_s6  ;;  %v16954_v34 = vld [vmem:[#allocation50_spill] sm:$0xff] }
 0x7de   : > { %8107 = vrot.lane.b32.xlu2 %v8106_v51, %s9200_s6  ;;  %v5889_v1 = vmul.f32 %v14385_v50, %v16954_v34  ;;  %v16955_v51 = vld [vmem:[#allocation56_spill] sm:$0xff] }
 0x7df   : > { %v5890_v16 = vmul.f32 %v14388_v58, %v16955_v51 }
 0x7e1   : > { %v5797_v11 = vpop.permute.xlu0 %5796  ;;  %v8151_v35 = vpack.i.bf16 %v5890_v16, %v5889_v1 }
 0x7e2   : > { %v14473_v45 = vsel %vm657_vm0, %v5795_v40, %v5797_v11  ;;  %v14506_v12 = vsel %vm657_vm0, %v5797_v11, %v5799_v13 }
 0x7e3   : > { %16946 = vst [vmem:[#allocation96_spill] sm:$0xff] %v14473_v45  ;;  %v14484_v41 = vpack.i.bf16 %v14473_v45, %v14478_v63  ;;  %v14517_v61 = vpack.i.bf16 %v14513_v44, %v14506_v12 }
 0x7e4   : > { %16953 = vst [vmem:[#allocation124_spill] sm:$0xff] %v14506_v12 }
 0x7e5   : > { %8137 = vrot.lane.b32.xlu1 %v8136_v6, %s9201_s5  ;;  %8162 = vrot.lane.b32.xlu0 %v8161_v55, %s9199_s2  ;;  %v14526_v6 = vsel %vm657_vm0, %v5791_v8, %v5793_v62  ;;  %v14529_v55 = vsel %vm657_vm0, %v5789_v2, %v5791_v8  ;;  %v5861_v62 = vmul.f32 %v16939_v59, %v14454_v29  ;;  %v16958_v8 = vld [vmem:[#allocation35_spill] sm:$0xff]  ;;  %vm6586_vm0 = vcmask 130048  }
 0x7e6   : > { %8122 = vrot.lane.b32.xlu2 %v8121_v27, %s9200_s6  ;;  %16956 = vst [vmem:[#allocation122_spill] sm:$0xff] %v14526_v6  ;;  %v8201_v27 = vpack.i.bf16 %v14382_v20, %v14454_v29  ;;  %v8211_v11 = vpack.i.bf16 %v14478_v63, %v14526_v6  ;;  %v8171_v40 = vpack.i.bf16 %v14526_v6, %v14529_v55 }
 0x7e7   : > { %16957 = vst [vmem:[#allocation168_spill] sm:$0xff] %v14529_v55  ;;  %v5860_v2 = vmul.f32 %v16958_v8, %v14461_v54  ;;  %v8206_v7 = vpack.i.bf16 %v14379_v22, %v14529_v55  ;;  %v5867_v59 = vmul.f32 %v14473_v45, %v16942_v17  ;;  %v5882_v53 = vmul.f32 %v14529_v55, %v16933_v33  ;;  %v16959_v17 = vld [vmem:[#allocation47_spill] sm:$0xff] }
 0x7e8   : > { %v5883_v49 = vmul.f32 %v14526_v6, %v16940_v25  ;;  %v5869_v23 = vmul.f32 %v16958_v8, %v14513_v44  ;;  %v5878_v1 = vmul.f32 %v16959_v17, %v14461_v54  ;;  %v5880_v33 = vmul.f32 %v14491_v46, %v16947_v43 }
 0x7e9   : > { %v8216_v14 = vpack.i.bf16 %v5861_v62, %v5860_v2  ;;  %v5885_v25 = vmul.f32 %v14473_v45, %v16950_v60  ;;  %v5917_v62 = vmul.f32 %v14498_v37, %v16935_v30  ;;  %v16960_v60 = vld [vmem:[#allocation75_spill] sm:$0xff]  ;;  %v5887_v30 = vmul.f32 %v16959_v17, %v14513_v44  ;;  %v16969_v17 = vld [vmem:[#allocation60_spill] sm:$0xff] }
 0x7ed   : > { %8157 = vrot.lane.b32.xlu1 %v8156_v52, %s9205_s11  ;;  %8177 = vrot.lane.b32.xlu0 %v14484_v41, %s9199_s2  ;;  %v5864_v52 = vmul.f32 %v14529_v55, %v16929_v39  ;;  %v5868_v39 = vmul.f32 %v14506_v12, %v16943_v4 }
 0x7ee   : > { %8127 = vrot.lane.b32.xlu2 %v8126_v56, %s9201_s5  ;;  %v5865_v56 = vmul.f32 %v14526_v6, %v16936_v28  ;;  %v5879_v28 = vmul.f32 %v16949_v3, %v14454_v29  ;;  %v5916_v3 = vmul.f32 %v14491_v46, %v16934_v5  ;;  %v5886_v5 = vmul.f32 %v14506_v12, %v16951_v24 }
 0x7ef   : > { %v8236_v16 = vpack.i.bf16 %v5869_v23, %v5868_v39 }
 0x7f0   : > { %v8226_v13 = vpack.i.bf16 %v5865_v56, %v5864_v52  ;;  %v8266_v43 = vpack.i.bf16 %v5917_v62, %v5916_v3  ;;  %v16964_v56 = vld [vmem:[#allocation67_spill] sm:$0xff] }
 0x7f5   : > { %8167 = vrot.lane.b32.xlu1 %v8166_v31, %s9199_s2  ;;  %8192 = vrot.lane.b32.xlu0 %v8166_v31, %s9204_s26  ;;  %v8221_v31 = vpack.i.bf16 %v5863_v19, %v5862_v32  ;;  %v5910_v19 = vmul.f32 %v14397_v15, %v16964_v56 }
 0x7f6   : > { %8142 = vrot.lane.b32.xlu2 %v8141_v9, %s9201_s5  ;;  %v8231_v9 = vpack.i.bf16 %v5867_v59, %v5866_v42  ;;  %v5898_v59 = vmul.f32 %v14491_v46, %v16954_v34  ;;  %v16965_v42 = vld [vmem:[#allocation66_spill] sm:$0xff] }
 0x7fd   : > { %8182 = vrot.lane.b32.xlu1 %v14517_v61, %s9199_s2  ;;  %8197 = vrot.lane.b32.xlu0 %v8196_v10, %s9198_s25  ;;  %v8241_v10 = vpack.i.bf16 %v5879_v28, %v5878_v1  ;;  %v5892_v1 = vmul.f32 %v14397_v15, %v16969_v17 }
 0x7fe   : > { %8152 = vrot.lane.b32.xlu2 %v8151_v35, %s9202_s18  ;;  %v8251_v35 = vpack.i.bf16 %v5883_v49, %v5882_v53 }
 0x805   : > { %8202 = vrot.lane.b32.xlu1 %v8201_v27, %s9204_s26  ;;  %8212 = vrot.lane.b32.xlu0 %v8211_v11, %s9204_s26  ;;  %v5881_v27 = vmul.f32 %v14498_v37, %v16932_v38  ;;  %v5884_v11 = vmul.f32 %v14478_v63, %v16941_v0  ;;  %v5928_v38 = vmul.f32 %v14397_v15, %v16960_v60  ;;  %v16962_v0 = vld [vmem:[#allocation70_spill] sm:$0xff] }
 0x806   : > { %8172 = vrot.lane.b32.xlu2 %v8171_v40, %s9199_s2  ;;  %s6938_s2 = scalar_lea.hbm %s15617_s9, %s7209_s29 }
 0x807   : > { %v8246_v8 = vpack.i.bf16 %v5881_v27, %v5880_v33  ;;  %v8256_v2 = vpack.i.bf16 %v5885_v25, %v5884_v11  ;;  %v14657_v27 = vpack.i.bf16 %v14461_v54, %v14417_v47  ;;  %s6942_s16 = sshll.u32 %s6938_s2, 4  ;;  %s6943_s16 = int_to_ptr.hbm [resolvable:$true] %s6942_s16 }
 0x80d   : > { %8207 = vrot.lane.b32.xlu1 %v8206_v7, %s9204_s26  ;;  %8217 = vrot.lane.b32.xlu0 %v8216_v14, %s9200_s6  ;;  %v5927_v14 = vmul.f32 %v14379_v22, %v16962_v0 }
 0x80e   : > { %8187 = vrot.lane.b32.xlu2 %v8186_v21, %s9198_s25  ;;  %v8261_v21 = vpack.i.bf16 %v5887_v30, %v5886_v5 }
 0x80f   : > { %v8291_v32 = vpack.i.bf16 %v5928_v38, %v5927_v14  ;;  %v16974_v38 = vld [vmem:[#allocation44_spill] sm:$0xff] }
 0x810   : > { %v5915_v30 = vmul.f32 %v16974_v38, %v14454_v29  ;;  %v16975_v14 = vld [vmem:[#allocation64_spill] sm:$0xff] }
 0x815   : > { %8222 = vrot.lane.b32.xlu1 %v8221_v31, %s9200_s6  ;;  %8232 = vrot.lane.b32.xlu0 %v8231_v9, %s9200_s6  ;;  %v5911_v31 = vmul.f32 %v14400_v18, %v16965_v42  ;;  %v5899_v9 = vmul.f32 %v14498_v37, %v16955_v51  ;;  %v8296_v51 = vpack.i.bf16 %v14506_v12, %v14473_v45 }
 0x816   : > { %8227 = vrot.lane.b32.xlu2 %v8226_v13, %s9200_s6 }
 0x817   : > { %v14585_v4 = vpop.permute.xlu2 %8067  ;;  %v8271_v13 = vpack.i.bf16 %v5899_v9, %v5898_v59  ;;  %v8286_v39 = vpack.i.bf16 %v5911_v31, %v5910_v19  ;;  %v5906_v59 = vmul.f32 %v16974_v38, %v14382_v20  ;;  %v16978_v38 = vld [vmem:[#allocation59_spill] sm:$0xff] }
 0x819   : > { %v8326_v9 = vpack.i.bf16 %v5906_v59, %v5915_v30  ;;  %v5900_v30 = vmul.f32 %v14529_v55, %v16978_v38  ;;  %v5891_v59 = vmul.f32 %v14379_v22, %v16978_v38 }
 0x81d   : > { %8237 = vrot.lane.b32.xlu1 %v8236_v16, %s9200_s6  ;;  %8242 = vrot.lane.b32.xlu0 %v8241_v10, %s9201_s5  ;;  %v16970_v16 = vld [vmem:[#allocation61_spill] sm:$0xff]  ;;  %s6940_s6 = sshll.u32 %s15564_s14, 4  ;;  %s6941_s6 = int_to_ptr.vmem [resolvable:$true] %s6940_s6 }
 0x81e   : > { %8252 = vrot.lane.b32.xlu2 %v8251_v35, %s9201_s5  ;;  %v5893_v10 = vmul.f32 %v14400_v18, %v16970_v16  ;;  %v16971_v35 = vld [vmem:[#allocation48_spill] sm:$0xff] }
 0x81f   : > { %v5897_v33 = vmul.f32 %v16971_v35, %v14454_v29 }
 0x825   : > { %8247 = vrot.lane.b32.xlu1 %v8246_v8, %s9201_s5  ;;  %8257 = vrot.lane.b32.xlu0 %v8256_v2, %s9201_s5  ;;  %v16973_v8 = vld [vmem:[#allocation68_spill] sm:$0xff] }
 0x826   : > { %8267 = vrot.lane.b32.xlu2 %v8266_v43, %s9196_s7  ;;  %v5913_v2 = vmul.f32 %v14417_v47, %v16973_v8  ;;  %v5934_v43 = vmul.f32 %v14491_v46, %v16944_v36 }
 0x828   : > { %v14602_v7 = vpop.permute.xlu2 %8082 }
 0x829   : > { %16961 = vst [vmem:[#allocation117_spill] sm:$0xff] %v14602_v7 }
 0x82d   : > { %8262 = vrot.lane.b32.xlu1 %v8261_v21, %s9201_s5  ;;  %8292 = vrot.lane.b32.xlu0 %v8291_v32, %s9205_s11  ;;  %v5914_v21 = vmul.f32 %v16975_v14, %v14461_v54  ;;  %v5935_v32 = vmul.f32 %v14498_v37, %v16945_v48  ;;  %v5937_v48 = vmul.f32 %v14526_v6, %v16960_v60  ;;  %s6927_s5 = scalar_lea.sflag [#allocation4], %s9409_s3 }
 0x82e   : > { %8282 = vrot.lane.b32.xlu2 %v8171_v40, %s9198_s25  ;;  %v8301_v40 = vpack.i.bf16 %v14414_v26, %v14513_v44 }
 0x82f   : > { %v14611_v24 = vpop.permute.xlu0 %8072  ;;  %v8321_v19 = vpack.i.bf16 %v5914_v21, %v5913_v2  ;;  %v8341_v31 = vpack.i.bf16 %v5935_v32, %v5934_v43  ;;  %v5902_v21 = vmul.f32 %v14478_v63, %v16970_v16  ;;  %v16979_v16 = vld [vmem:[#allocation65_spill] sm:$0xff] }
 0x830   : > { %16963 = vst [vmem:[#allocation104_spill] sm:$0xff] %v14611_v24  ;;  %v14615_v52 = vpop.permute.xlu2 %8087 }
 0x835   : > { %8272 = vrot.lane.b32.xlu1 %v8271_v13, %s9202_s18  ;;  %8302 = vrot.lane.b32.xlu0 %v8301_v40, %s9204_s26  ;;  %v5936_v40 = vmul.f32 %v14529_v55, %v16962_v0 }
 0x836   : > { %8287 = vrot.lane.b32.xlu2 %v8286_v39, %s9196_s7  ;;  %v5919_v39 = vmul.f32 %v14526_v6, %v16964_v56 }
 0x837   : > { %v14628_v34 = vpop.permute.xlu1 %8077  ;;  %v14630_v28 = vpop.permute.xlu0 %8092 }
 0x838   : > { %16966 = vst [vmem:[#allocation111_spill] sm:$0xff] %v14628_v34  ;;  %v14632_v53 = vpop.permute.xlu2 %8107 }
 0x839   : > { %16967 = vst [vmem:[#allocation103_spill] sm:$0xff] %v14630_v28 }
 0x83d   : > { %8277 = vrot.lane.b32.xlu1 %v14404_v57, %s9204_s26  ;;  %8317 = vrot.lane.b32.xlu0 %v14484_v41, %s9198_s25  ;;  %v5888_v57 = vmul.f32 %v16971_v35, %v14382_v20  ;;  %v8306_v41 = vpack.i.bf16 %v5893_v10, %v5892_v1  ;;  %v16976_v1 = vld [vmem:[#allocation63_spill] sm:$0xff]  ;;  %v5920_v35 = vmul.f32 %v14478_v63, %v16965_v42  ;;  %v16977_v42 = vld [vmem:[#allocation69_spill] sm:$0xff] }
 0x83e   : > { %8297 = vrot.lane.b32.xlu2 %v8296_v51, %s9204_s26  ;;  %v5918_v10 = vmul.f32 %v14529_v55, %v16976_v1  ;;  %v5933_v2 = vmul.f32 %v16977_v42, %v14454_v29  ;;  %v5924_v32 = vmul.f32 %v16977_v42, %v14382_v20 }
 0x83f   : > { %v14641_v49 = vpop.permute.xlu1 %8097  ;;  %v14643_v23 = vpop.permute.xlu0 %8112  ;;  %v8331_v3 = vpack.i.bf16 %v5888_v57, %v5897_v33  ;;  %v5909_v33 = vmul.f32 %v14379_v22, %v16976_v1  ;;  %v8356_v57 = vpack.i.bf16 %v5937_v48, %v5936_v40  ;;  %v5921_v48 = vmul.f32 %v14473_v45, %v16979_v16  ;;  %v16980_v1 = vld [vmem:[#allocation53_spill] sm:$0xff] }
 0x840   : > { %16968 = vst [vmem:[#allocation119_spill] sm:$0xff] %v14643_v23  ;;  %v14651_v25 = vpop.permute.xlu2 %8122 }
 0x841   : > { %v8336_v0 = vpack.i.bf16 %v5909_v33, %v5918_v10  ;;  %v5905_v10 = vmul.f32 %v16980_v1, %v14513_v44  ;;  %v5923_v33 = vmul.f32 %v16975_v14, %v14513_v44  ;;  %v16983_v14 = vld [vmem:[#allocation57_spill] sm:$0xff] }
 0x845   : > { %8307 = vrot.lane.b32.xlu1 %v8306_v41, %s9202_s18  ;;  %8332 = vrot.lane.b32.xlu0 %v8331_v3, %s9202_s18  ;;  %v8351_v41 = vpack.i.bf16 %v5920_v35, %v5919_v39  ;;  %v5901_v3 = vmul.f32 %v14526_v6, %v16969_v17  ;;  %v8346_v17 = vpack.i.bf16 %v5891_v59, %v5900_v30 }
 0x846   : > { %8312 = vrot.lane.b32.xlu2 %v14657_v27, %s9204_s26  ;;  %v5922_v39 = vmul.f32 %v14506_v12, %v16973_v8  ;;  %v5895_v30 = vmul.f32 %v14417_v47, %v16983_v14 }
 0x847   : > { %v14663_v11 = vpop.permute.xlu1 %8102  ;;  %v14665_v62 = vpop.permute.xlu0 %8132 }
 0x848   : > { %16972 = vst [vmem:[#allocation121_spill] sm:$0xff] %v14663_v11  ;;  %v14671_v5 = vpop.permute.xlu2 %8127 }
 0x84d   : > { %8322 = vrot.lane.b32.xlu1 %v8321_v19, %s9196_s7  ;;  %8342 = vrot.lane.b32.xlu0 %v8341_v31, %s9205_s11  ;;  %v8361_v19 = vpack.i.bf16 %v5902_v21, %v5901_v3  ;;  %v8381_v31 = vpack.i.bf16 %v5924_v32, %v5933_v2  ;;  %v8366_v3 = vpack.i.bf16 %v5922_v39, %v5921_v48 }
 0x84e   : > { %8327 = vrot.lane.b32.xlu2 %v8326_v9, %s9196_s7  ;;  %v5896_v48 = vmul.f32 %v16980_v1, %v14461_v54 }
 0x84f   : > { %v14684_v36 = vpop.permute.xlu1 %8117  ;;  %v14686_v13 = vpop.permute.xlu0 %8147 }
 0x850   : > { %v14694_v51 = vpop.permute.xlu2 %8142 }
 0x855   : > { %8357 = vrot.lane.b32.xlu1 %v8356_v57, %s9205_s11  ;;  %8352 = vrot.lane.b32.xlu0 %v8351_v41, %s9196_s7  ;;  %v16981_v57 = vld [vmem:[#allocation58_spill] sm:$0xff] }
 0x856   : > { %8337 = vrot.lane.b32.xlu2 %v8336_v0, %s9196_s7  ;;  %v5894_v41 = vmul.f32 %v14414_v26, %v16981_v57  ;;  %v5912_v0 = vmul.f32 %v14414_v26, %v16979_v16  ;;  %v8104_v16 = vunpack.i.l.bf16 %v14663_v11 }
 0x857   : > { %v14705_v60 = vpop.permute.xlu1 %8137  ;;  %v14707_v56 = vpop.permute.xlu0 %8162 }
 0x858   : > { %v14713_v43 = vpop.permute.xlu2 %8152  ;;  %v8396_v42 = vpack.i.bf16 %v5894_v41, %v5905_v10  ;;  %v8376_v2 = vpack.i.bf16 %v5912_v0, %v5923_v33  ;;  %v8371_v10 = vpack.i.bf16 %v5896_v48, %v5895_v30  ;;  %v16984_v0 = vld [vmem:[#allocation73_spill] sm:$0xff] }
 0x859   : > { %v8154_v6 = vunpack.i.l.bf16 %v14713_v43 }
 0x85d   : > { %8362 = vrot.lane.b32.xlu1 %v8361_v19, %s9202_s18  ;;  %8382 = vrot.lane.b32.xlu0 %v8381_v31, %s9205_s11  ;;  %v5903_v19 = vmul.f32 %v14473_v45, %v16981_v57  ;;  %v5904_v31 = vmul.f32 %v14506_v12, %v16983_v14 }
 0x85e   : > { %8347 = vrot.lane.b32.xlu2 %v8346_v17, %s9202_s18  ;;  %v15958_v17 = vunpack.i.h.bf16 %v14663_v11 }
 0x85f   : > { %v14726_v9 = vpop.permute.xlu1 %8157  ;;  %v14728_v40 = vpop.permute.xlu0 %8177  ;;  %v8386_v33 = vpack.i.bf16 %v5904_v31, %v5903_v19 }
 0x860   : > { %v14736_v35 = vpop.permute.xlu2 %8172  ;;  %v6463_v57 = vsel %vm1202_vm13, %v8104_v16, %v15958_v17 }
 0x865   : > { %8367 = vrot.lane.b32.xlu1 %v8366_v3, %s9196_s7  ;;  %8397 = vrot.lane.b32.xlu0 %v8396_v42, %s9202_s18  ;;  %v5939_v3 = vmul.f32 %v14473_v45, %v16984_v0  ;;  %v16985_v42 = vld [vmem:[#allocation77_spill] sm:$0xff] }
 0x866   : > { %8377 = vrot.lane.b32.xlu2 %v8376_v2, %s9196_s7  ;;  %v5940_v2 = vmul.f32 %v14506_v12, %v16985_v42  ;;  %v5931_v19 = vmul.f32 %v14417_v47, %v16985_v42 }
 0x867   : > { %v14747_v8 = vpop.permute.xlu1 %8167  ;;  %v14749_v38 = vpop.permute.xlu0 %8192 }
 0x868   : > { %16982 = vst [vmem:[#allocation231_spill] sm:$0xff] %v14749_v38  ;;  %v14753_v21 = vpop.permute.xlu2 %8187  ;;  %v15959_v32 = vunpack.i.h.bf16 %v14749_v38  ;;  %v8194_v59 = vunpack.i.l.bf16 %v14749_v38  ;;  %v8416_v48 = vpack.i.bf16 %v5931_v19, %v5940_v2 }
 0x86a   : > { %v6471_v39 = vsel %vm1202_vm13, %v8194_v59, %v15959_v32 }
 0x86b   : > { %6630 = vmatpush.msra.mxu2 %v6471_v39 }
 0x86d   : > { %8372 = vrot.lane.b32.xlu1 %v8371_v10, %s9202_s18  ;;  %8402 = vrot.lane.b32.xlu0 %v14657_v27, %s9198_s25  ;;  %v16986_v27 = vld [vmem:[#allocation74_spill] sm:$0xff] }
 0x86e   : > { %8387 = vrot.lane.b32.xlu2 %v8386_v33, %s9202_s18  ;;  %6631 = vmatpush.msra.mxu2 %v6463_v57  ;;  %v5938_v30 = vmul.f32 %v14478_v63, %v16986_v27  ;;  %v16987_v33 = vld [vmem:[#allocation76_spill] sm:$0xff]  ;;  %v15986_v63 = vunpack.i.l.bf16 %v14602_v7  ;;  %s9114_s18 = sshra.s32 %s6943_s16, 4  ;;  %s9115_s18 = int_to_ptr.hbm [resolvable:$true] %s9114_s18 }
 0x86f   : > { %v14775_v1 = vpop.permute.xlu1 %8182  ;;  %v14777_v41 = vpop.permute.xlu0 %8197  ;;  %v5941_v57 = vmul.f32 %v16987_v33, %v14513_v44  ;;  %v5932_v42 = vmul.f32 %v16987_v33, %v14461_v54  ;;  %s9116_s26 = scalar_lea.hbm %s9115_s18, 64  ;;  %p9121_p7 = scmp.lt.s32.totalorder %s9115_s18, %s15617_s9 }
 0x870   : > { %v14783_v14 = vpop.permute.xlu2 %8227  ;;  %v8406_v31 = vpack.i.bf16 %v5939_v3, %v5938_v30  ;;  %v5930_v3 = vmul.f32 %v14414_v26, %v16984_v0  ;;  %v8200_v12 = vunpack.i.h.bf16 %v14777_v41  ;;  %p9117_p1 = scmp.ne.s32.totalorder %s9115_s18, %s9116_s26  ;;  %p9122_p9 = scmp.lt.s32.totalorder %s9120_s27, %s9116_s26 }
 0x871   : > { %v8421_v30 = vpack.i.bf16 %v5932_v42, %v5941_v57  ;;  %v15966_v42 = vunpack.i.h.bf16 %v14615_v52 }
 0x872   : > { %p9118_p3 = pnand %p9117_p1, %p9352_p0  ;;  %p9123_p4 = por %p9122_p9, %p9121_p7 }
 0x874   : > { %p9119_p13 = pneg %p9118_p3 }
 0x875   : > { %8407 = vrot.lane.b32.xlu1 %v8406_v31, %s9205_s11  ;;  %8417 = vrot.lane.b32.xlu0 %v8416_v48, %s9205_s11 }
 0x876   : > { %8392 = vrot.lane.b32.xlu2 %v14517_v61, %s9198_s25  ;;  %v5929_v61 = vmul.f32 %v14400_v18, %v16986_v27  ;;  %p9124_p8 = pnand %p9123_p4, %p9119_p13 }
 0x877   : > { %v8203_v39 = vpop.permute.xlu1 %8202  ;;  %v14793_v10 = vpop.permute.xlu0 %8212 }
 0x878   : > { %v14797_v17 = vpop.permute.xlu2 %8252  ;;  %v8205_v32 = vunpack.i.h.bf16 %v8203_v39  ;;  %v8204_v45 = vunpack.i.l.bf16 %v8203_v39  ;;  %v8411_v19 = vpack.i.bf16 %v5930_v3, %v5929_v61  ;;  %v15965_v3 = vunpack.i.l.bf16 %v14630_v28 }
 0x879   : > { %v15969_v61 = vunpack.i.l.bf16 %v14665_v62 }
 0x87a   : > { %v6470_v2 = vsel %vm1202_vm13, %v8204_v45, %v8194_v59  ;;  %v6462_v44 = vsel %vm1202_vm13, %v8205_v32, %v8104_v16  ;;  %v15961_v45 = vunpack.i.h.bf16 %v14686_v13  ;;  %v15963_v59 = vunpack.i.l.bf16 %v14686_v13 }
 0x87b   : > { %6590 = vmatpush.msrb.mxu0 %v6470_v2  ;;  %v15970_v2 = vunpack.i.h.bf16 %v14671_v5 }
 0x87c   : > { %v6395_v16 = vsel %vm842_vm3, %v15963_v59, %v15961_v45  ;;  %v15976_v59 = vunpack.i.l.bf16 %v14643_v23 }
 0x87d   : > { %8422 = vrot.lane.b32.xlu1 %v8421_v30, %s9205_s11  ;;  %6591 = vmatpush.msrb.mxu0 %v6462_v44  ;;  %v14854_v45 = vsel %vm1036_vm10, %v15970_v2, %v15969_v61  ;;  %v15984_v2 = vunpack.i.l.bf16 %v14628_v34 }
 0x87e   : > { %8412 = vrot.lane.b32.xlu2 %v8411_v19, %s9205_s11 }
 0x87f   : > { %v14809_v31 = vpop.permute.xlu1 %8207  ;;  %v14811_v0 = vpop.permute.xlu0 %8217 }
 0x880   : > { %v14813_v54 = vpop.permute.xlu2 %8267  ;;  %v16003_v38 = vunpack.i.l.bf16 %v14809_v31 }
 0x881   : > { %16988 = vst [vmem:[#allocation85_spill] sm:$0xff] %v14813_v54  ;;  %v15962_v27 = vunpack.i.h.bf16 %v14813_v54  ;;  %v8269_v48 = vunpack.i.l.bf16 %v14813_v54 }
 0x883   : > { %v6403_v32 = vsel %vm842_vm3, %v8269_v48, %v15962_v27  ;;  %v15972_v27 = vunpack.i.h.bf16 %v14585_v4 }
 0x884   : > { %6632 = vmatpush.msra.mxu2 %v6403_v32  ;;  %v6223_v32 = vsel %vm1071_vm7, %v15966_v42, %v15965_v3  ;;  %v15977_v3 = vunpack.i.h.bf16 %v14632_v53 }
 0x886   : > { %6633 = vmatpush.msra.mxu2 %v6395_v16  ;;  %v15971_v16 = vunpack.i.l.bf16 %v14611_v24  ;;  %v14877_v61 = vsel %vm983_vm9, %v15977_v3, %v15976_v59  ;;  %v8190_v59 = vunpack.i.h.bf16 %v14753_v21 }
 0x887   : > { %v14827_v39 = vpop.permute.xlu1 %8222  ;;  %v14829_v33 = vpop.permute.xlu0 %8232 }
 0x888   : > { %16989 = vst [vmem:[#allocation113_spill] sm:$0xff] %v14827_v39  ;;  %v14831_v57 = vpop.permute.xlu2 %8282  ;;  %v14863_v26 = vsel %vm939_vm6, %v15972_v27, %v15971_v16  ;;  %v15987_v16 = vunpack.i.h.bf16 %v14628_v34  ;;  %v15983_v27 = vunpack.i.h.bf16 %v14611_v24  ;;  %v14906_v24 = vsel %vm1071_vm7, %v8200_v12, %v8190_v59 }
 0x889   : > { %16990 = vst [vmem:[#allocation220_spill] sm:$0xff] %v14831_v57  ;;  %v16997_v57 = vunpack.i.h.bf16 %v14713_v43 }
 0x88a   : > { %v14889_v58 = vsel %vm939_vm6, %v15983_v27, %v15984_v2  ;;  %v14901_v22 = vsel %vm939_vm6, %v15987_v16, %v15986_v63  ;;  %v15997_v27 = vunpack.i.l.bf16 %v14641_v49  ;;  %v15996_v2 = vunpack.i.h.bf16 %v14630_v28 }
 0x88b   : > { %16992 = vst [vmem:[#allocation194_spill] sm:$0xff] %v14889_v58  ;;  %v8169_v58 = vunpack.i.l.bf16 %v14747_v8  ;;  %v8165_v63 = vunpack.i.h.bf16 %v14707_v56  ;;  %v6309_v11 = vsel %vm1124_vm11, %v8154_v6, %v16997_v57 }
 0x88c   : > { %16994 = vst [vmem:[#allocation232_spill] sm:$0xff] %v14901_v22  ;;  %v14916_v15 = vsel %vm1071_vm7, %v15996_v2, %v15997_v27 }
 0x88d   : > { %16995 = vst [vmem:[#allocation253_spill] sm:$0xff] %v14916_v15  ;;  %v14928_v2 = vsel %vm939_vm6, %v8165_v63, %v8169_v58 }
 0x88f   : > { %v14837_v30 = vpop.permute.xlu1 %8237  ;;  %v14839_v19 = vpop.permute.xlu0 %8242 }
 0x890   : > { %16991 = vst [vmem:[#allocation110_spill] sm:$0xff] %v14837_v30  ;;  %v14841_v44 = vpop.permute.xlu2 %8287 }
 0x897   : > { %v14866_v42 = vpop.permute.xlu1 %8247  ;;  %v14868_v18 = vpop.permute.xlu0 %8257 }
 0x898   : > { %v14870_v47 = vpop.permute.xlu2 %8297  ;;  %v16005_v27 = vunpack.i.h.bf16 %v14866_v42 }
 0x89f   : > { %v14892_v3 = vpop.permute.xlu1 %8262  ;;  %v14894_v37 = vpop.permute.xlu0 %8292 }
 0x8a0   : > { %16993 = vst [vmem:[#allocation192_spill] sm:$0xff] %v14892_v3  ;;  %v14903_v55 = vpop.permute.xlu2 %8312 }
 0x8a7   : > { %v14919_v16 = vpop.permute.xlu1 %8272  ;;  %v14921_v22 = vpop.permute.xlu0 %8302 }
 0x8a8   : > { %16996 = vst [vmem:[#allocation108_spill] sm:$0xff] %v14919_v16  ;;  %v16002_v34 = vunpack.i.h.bf16 %v14919_v16  ;;  %v8274_v30 = vunpack.i.l.bf16 %v14919_v16  ;;  %v8328_v3 = vpop.permute.xlu2 %8327  ;;  %v16006_v16 = vunpack.i.l.bf16 %v14866_v42 }
 0x8a9   : > { %v8330_v54 = vunpack.i.h.bf16 %v8328_v3  ;;  %v8329_v28 = vunpack.i.l.bf16 %v8328_v3  ;;  %v16998_v3 = vunpack.i.l.bf16 %v14686_v13 }
 0x8aa   : > { %v6317_v15 = vsel %vm1124_vm11, %v8274_v30, %v16002_v34  ;;  %v16014_v34 = vunpack.i.h.bf16 %v14684_v36 }
 0x8ab   : > { %v6402_v12 = vsel %vm842_vm3, %v8329_v28, %v8269_v48  ;;  %6634 = vmatpush.msra.mxu2 %v6317_v15  ;;  %v6394_v63 = vsel %vm842_vm3, %v8330_v54, %v16998_v3  ;;  %v16999_v28 = vunpack.i.l.bf16 %v14777_v41  ;;  %v16004_v48 = vunpack.i.l.bf16 %v14793_v10 }
 0x8ac   : > { %6592 = vmatpush.msrb.mxu0 %v6402_v12  ;;  %v16010_v54 = vunpack.i.l.bf16 %v14684_v36  ;;  %v16008_v3 = vunpack.i.l.bf16 %v14827_v39 }
 0x8ad   : > { %6635 = vmatpush.msra.mxu2 %v6309_v11  ;;  %v6231_v15 = vsel %vm1071_vm7, %v8190_v59, %v16999_v28  ;;  %v14958_v11 = vsel %vm1202_vm13, %v16003_v38, %v16004_v48  ;;  %v16007_v59 = vunpack.i.h.bf16 %v14827_v39  ;;  %v16013_v28 = vunpack.i.l.bf16 %v14651_v25 }
 0x8ae   : > { %6593 = vmatpush.msrb.mxu0 %v6394_v63 }
 0x8af   : > { %v14948_v12 = vpop.permute.xlu1 %8277  ;;  %v14950_v57 = vpop.permute.xlu0 %8317  ;;  %6636 = vmatpush.msra.mxu2 %v6231_v15  ;;  %v16009_v15 = vunpack.i.h.bf16 %v14643_v23  ;;  %v6077_v48 = vsel %vm983_vm9, %v16008_v3, %v16007_v59  ;;  %v17002_v23 = vunpack.i.h.bf16 %v14747_v8  ;;  %v16016_v3 = vunpack.i.h.bf16 %v14665_v62 }
 0x8b0   : > { %v14963_v63 = vpop.permute.xlu2 %8337 }
 0x8b1   : > { %6637 = vmatpush.msra.mxu2 %v6223_v32  ;;  %v6163_v32 = vsel %vm1036_vm10, %v16006_v16, %v16005_v27 }
 0x8b3   : > { %6638 = vmatpush.msra.mxu2 %v6163_v32  ;;  %v14984_v32 = vsel %vm983_vm9, %v16009_v15, %v16010_v54  ;;  %v16015_v15 = vunpack.i.h.bf16 %v14797_v17 }
 0x8b4   : > { %17000 = vst [vmem:[#allocation183_spill] sm:$0xff] %v14984_v32  ;;  %v5991_v32 = vsel %vm939_vm6, %v8169_v58, %v17002_v23  ;;  %v16018_v58 = vunpack.i.h.bf16 %v14602_v7  ;;  %v8129_v23 = vunpack.i.l.bf16 %v14671_v5 }
 0x8b5   : > { %6639 = vmatpush.msra.mxu2 %v14854_v45  ;;  %v14991_v45 = vsel %vm983_vm9, %v16014_v34, %v16013_v28  ;;  %v8164_v34 = vunpack.i.l.bf16 %v14707_v56  ;;  %v16017_v56 = vunpack.i.l.bf16 %v14694_v51  ;;  %v17004_v28 = vunpack.i.l.bf16 %v14868_v18 }
 0x8b6   : > { %17001 = vst [vmem:[#allocation123_spill] sm:$0xff] %v14991_v45 }
 0x8b7   : > { %v14993_v27 = vpop.permute.xlu1 %8307  ;;  %v8333_v16 = vpop.permute.xlu0 %8332  ;;  %6640 = vmatpush.msra.mxu2 %v6077_v48 }
 0x8b8   : > { %v8335_v38 = vunpack.i.h.bf16 %v8333_v16  ;;  %v8334_v59 = vunpack.i.l.bf16 %v8333_v16  ;;  %v17003_v16 = vld [vmem:[#allocation29_spill] sm:$0xff] }
 0x8b9   : > { %6641 = vmatpush.msra.mxu2 %v14877_v61  ;;  %v5837_v48 = vmul.f32 %v17003_v16, %v14385_v50  ;;  %v8089_v61 = vunpack.i.l.bf16 %v14615_v52  ;;  %v5845_v50 = vmul.f32 %v17003_v16, %v14491_v46  ;;  %v8245_v46 = vunpack.i.h.bf16 %v14839_v19 }
 0x8ba   : > { %v6316_v54 = vsel %vm1124_vm11, %v8334_v59, %v8274_v30  ;;  %v15009_v30 = vpop.permute.xlu2 %8347  ;;  %v6308_v59 = vsel %vm1124_vm11, %v8335_v38, %v8154_v6  ;;  %v15025_v6 = vsel %vm1036_vm10, %v16015_v15, %v17004_v28  ;;  %v17005_v38 = vunpack.i.l.bf16 %v14705_v60  ;;  %v15041_v28 = vld [vmem:[#allocation11] sm:$0xff] }
 0x8bb   : > { %6594 = vmatpush.msrb.mxu0 %v6316_v54  ;;  %6642 = vmatpush.msra.mxu2 %v5991_v32  ;;  %v17007_v15 = vunpack.i.h.bf16 %v14705_v60 }
 0x8bd   : > { %6595 = vmatpush.msrb.mxu0 %v6308_v59  ;;  %6643 = vmatpush.msra.mxu2 %v14863_v26  ;;  %v15032_v26 = vsel %vm1036_vm10, %v16016_v3, %v17005_v38  ;;  %v15048_v38 = vsel %vm1036_vm10, %v17007_v15, %v16017_v56  ;;  %v15053_v3 = vsel %vm939_vm6, %v16018_v58, %v8164_v34  ;;  %v17011_v56 = vunpack.i.l.bf16 %v14866_v42 }
 0x8be   : > { %17008 = vst [vmem:[#allocation195_spill] sm:$0xff] %v15048_v38  ;;  %v17016_v15 = vunpack.i.l.bf16 %v14726_v9  ;;  %v8304_v38 = vunpack.i.l.bf16 %v14921_v22 }
 0x8bf   : > { %v15036_v59 = vpop.permute.xlu1 %8322  ;;  %v15038_v54 = vpop.permute.xlu0 %8342  ;;  %6596 = vmatpush.msrb.mxu0 %v14906_v24  ;;  %6644 = vmatpush.msra.mxu2 %v5845_v50  ;;  %17009 = vst [vmem:[#allocation165_spill] sm:$0xff] %v15053_v3  ;;  %v17010_v50 = vunpack.i.h.bf16 %v14615_v52  ;;  %v6162_v34 = vsel %vm1036_vm10, %v8245_v46, %v17011_v56  ;;  %v17012_v52 = vunpack.i.l.bf16 %v14829_v33  ;;  %v17014_v56 = vunpack.i.h.bf16 %v14671_v5 }
 0x8c0   : > { %17006 = vst [vmem:[#allocation163_spill] sm:$0xff] %v15036_v59  ;;  %v8345_v16 = vunpack.i.h.bf16 %v15038_v54  ;;  %v16019_v24 = vunpack.i.l.bf16 %v15038_v54  ;;  %v17020_v5 = vunpack.i.h.bf16 %v14736_v35  ;;  %v8215_v3 = vunpack.i.h.bf16 %v14793_v10 }
 0x8c1   : > { %v6222_v32 = vsel %vm1071_vm7, %v8089_v61, %v17010_v50  ;;  %6645 = vmatpush.msra.mxu2 %v5837_v48  ;;  %v17013_v61 = vunpack.i.h.bf16 %v14783_v14  ;;  %v8109_v48 = vunpack.i.l.bf16 %v14632_v53  ;;  %v6154_v46 = vsel %vm1036_vm10, %v8129_v23, %v17014_v56 }
 0x8c2   : > { %6597 = vmatpush.msrb.mxu0 %v6222_v32  ;;  %v6557_v58 = vsel %vm1246_vm12, %v16019_v24, %v8345_v16  ;;  %6646 = vmatmul.f32.vlgmr.msra.gmra.mxu2 %v15041_v28  ;;  %v8220_v32 = vunpack.i.h.bf16 %v14811_v0  ;;  %v17015_v24 = vunpack.i.h.bf16 %v14726_v9  ;;  %v8069_v56 = vunpack.i.l.bf16 %v14585_v4 }
 0x8c3   : > { %v15075_v50 = vsel %vm983_vm9, %v17013_v61, %v17012_v52  ;;  %6664 = vmatpush.msrb.mxu2 %v6557_v58  ;;  %v15087_v52 = vpop.permute.xlu2 %8377  ;;  %v17018_v61 = vunpack.i.l.bf16 %v14827_v39 }
 0x8c4   : > { %6598 = vmatpush.msrb.mxu0 %v6162_v34  ;;  %v6549_v45 = vsel %vm1246_vm12, %v17016_v15, %v17015_v24  ;;  %17017 = vst [vmem:[#allocation116_spill] sm:$0xff] %v15087_v52  ;;  %v17019_v34 = vunpack.i.l.bf16 %v14728_v40 }
 0x8c5   : > { %6665 = vmatpush.msrb.mxu2 %v6549_v45  ;;  %v6076_v58 = vsel %vm983_vm9, %v8220_v32, %v17018_v61  ;;  %v17021_v45 = vunpack.i.h.bf16 %v14632_v53  ;;  %v8294_v61 = vunpack.i.l.bf16 %v14894_v37  ;;  %v17022_v53 = vld [vmem:[#allocation28_spill] sm:$0xff] }
 0x8c6   : > { %6599 = vmatpush.msrb.mxu0 %v6154_v46  ;;  %v15097_v23 = vsel %vm939_vm6, %v17020_v5, %v17019_v34  ;;  %v15107_v46 = vld [vmem:[#allocation11 + $0x8] sm:$0xff] }
 0x8c7   : > { %v15100_v7 = vpop.permute.xlu1 %8357  ;;  %v15102_v24 = vpop.permute.xlu0 %8352  ;;  %v6068_v15 = vsel %vm983_vm9, %v8109_v48, %v17021_v45  ;;  %v17023_v48 = vunpack.i.h.bf16 %v14585_v4 }
 0x8c8   : > { %6600 = vmatpush.msrb.mxu0 %v6076_v58  ;;  %v16025_v34 = vunpack.i.h.bf16 %v15100_v7  ;;  %v8359_v5 = vunpack.i.l.bf16 %v15100_v7  ;;  %v5844_v58 = vmul.f32 %v17022_v53, %v14454_v29  ;;  %v8279_v29 = vunpack.i.l.bf16 %v14948_v12 }
 0x8c9   : > { %v16027_v52 = vunpack.i.h.bf16 %v15102_v24 }
 0x8ca   : > { %6601 = vmatpush.msrb.mxu0 %v6068_v15  ;;  %v6558_v32 = vsel %vm1246_vm12, %v8345_v16, %v8359_v5  ;;  %v6559_v59 = vsel %vm1246_vm12, %v8359_v5, %v16025_v34  ;;  %7195 = vmatmul.msk.f32.vlgmr.msrb.gmra.mxu2 %vm6586_vm0, %v15107_v46  ;;  %v16026_v16 = vunpack.i.l.bf16 %v14736_v35  ;;  %v5982_v5 = vsel %vm939_vm6, %v8069_v56, %v17023_v48 }
 0x8cb   : > { %6704 = vmatpush.msra.mxu3 %v6558_v32  ;;  %6744 = vmatpush.msra.mxu2 %v6559_v59  ;;  %v17024_v34 = vunpack.i.h.bf16 %v14726_v9  ;;  %v17025_v15 = vunpack.i.h.bf16 %v14894_v37  ;;  %v17026_v59 = vunpack.i.l.bf16 %v14793_v10  ;;  %v17027_v56 = vunpack.i.h.bf16 %v14870_v47 }
 0x8cc   : > { %6602 = vmatpush.msrb.mxu0 %v14928_v2  ;;  %v8354_v2 = vunpack.i.l.bf16 %v15102_v24  ;;  %v17029_v10 = vunpack.i.l.bf16 %v14753_v21 }
 0x8cd   : > { %v6550_v45 = vsel %vm1246_vm12, %v17024_v34, %v8294_v61  ;;  %v6551_v39 = vsel %vm1246_vm12, %v8294_v61, %v17025_v15  ;;  %v6474_v4 = vsel %vm1202_vm13, %v17026_v59, %v8215_v3  ;;  %v15148_v32 = vsel %vm1202_vm13, %v17027_v56, %v8304_v38 }
 0x8ce   : > { %6603 = vmatpush.msrb.mxu0 %v5982_v5  ;;  %6705 = vmatpush.msra.mxu3 %v6550_v45  ;;  %v5836_v61 = vmul.f32 %v17022_v53, %v14382_v20  ;;  %v17028_v34 = vunpack.i.h.bf16 %v14747_v8  ;;  %v17030_v45 = vunpack.i.h.bf16 %v14641_v49  ;;  %v8289_v38 = vunpack.i.l.bf16 %v14841_v44 }
 0x8cf   : > { %6745 = vmatpush.msra.mxu2 %v6551_v39  ;;  %v15168_v5 = vpop.permute.xlu1 %8362  ;;  %v8383_v20 = vpop.permute.xlu0 %8382  ;;  %v17031_v8 = vunpack.i.h.bf16 %v14948_v12  ;;  %7196 = vmatmul.msk.f32.vlgmr.msra.gmra.mxu3 %vm6586_vm0, %v15107_v46  ;;  %v17032_v59 = vunpack.i.l.bf16 %v14870_v47  ;;  %v6406_v39 = vsel %vm842_vm3, %v8354_v2, %v16027_v52  ;;  %v17034_v56 = vunpack.i.h.bf16 %v14841_v44 }
 0x8d0   : > { %6750 = vmatpush.msrb.mxu3 %v6474_v4  ;;  %v15157_v48 = vsel %vm939_vm6, %v17028_v34, %v16026_v16  ;;  %v15164_v15 = vsel %vm1071_vm7, %v17030_v45, %v17029_v10  ;;  %6604 = vmatpush.msrb.mxu0 %v5844_v58  ;;  %v8385_v34 = vunpack.i.h.bf16 %v8383_v20  ;;  %v8384_v10 = vunpack.i.l.bf16 %v8383_v20 }
 0x8d1   : > { %v6466_v53 = vsel %vm1202_vm13, %v8279_v29, %v17031_v8  ;;  %v15178_v4 = vsel %vm1202_vm13, %v8215_v3, %v17032_v59  ;;  %v8210_v16 = vunpack.i.h.bf16 %v14809_v31  ;;  %v15184_v8 = vpop.permute.xlu2 %8387  ;;  %v16028_v3 = vunpack.i.l.bf16 %v14903_v55 }
 0x8d2   : > { %6751 = vmatpush.msrb.mxu3 %v6466_v53  ;;  %6605 = vmatpush.msrb.mxu0 %v5836_v61  ;;  %v8364_v20 = vunpack.i.l.bf16 %v15168_v5  ;;  %v17033_v53 = vunpack.i.l.bf16 %v15038_v54  ;;  %v8340_v58 = vunpack.i.h.bf16 %v14963_v63  ;;  %v8339_v61 = vunpack.i.l.bf16 %v14963_v63 }
 0x8d3   : > { %v6465_v52 = vsel %vm1202_vm13, %v8210_v16, %v8279_v29  ;;  %v6398_v59 = vsel %vm842_vm3, %v8289_v38, %v17034_v56  ;;  %6606 = vmatmul.f32.vlgmr.msrb.gmra.mxu0 %v15041_v28  ;;  %v17035_v54 = vunpack.i.l.bf16 %v14726_v9  ;;  %v17036_v63 = vunpack.i.h.bf16 %v14921_v22  ;;  %7197 = vmatmul.msk.f32.vlgmr.msra.gmra.mxu2 %vm6586_vm0, %v15107_v46 }
 0x8d4   : > { %6710 = vmatpush.msra.mxu0 %v14958_v11  ;;  %6752 = vmatpush.msrb.mxu3 %v6406_v39  ;;  %v6556_v45 = vsel %vm1246_vm12, %v8384_v10, %v17033_v53  ;;  %v8309_v39 = vunpack.i.l.bf16 %v14993_v27  ;;  %v17037_v56 = vunpack.i.l.bf16 %v14809_v31  ;;  %v8319_v9 = vunpack.i.l.bf16 %v14950_v57 }
 0x8d5   : > { %6624 = vmatpush.msrb.mxu1 %v6556_v45  ;;  %v6548_v10 = vsel %vm1246_vm12, %v8385_v34, %v17035_v54  ;;  %v15213_v29 = vsel %vm1202_vm13, %v17036_v63, %v16028_v3  ;;  %v17038_v45 = vld [vmem:[#allocation231_spill] sm:$0xff]  ;;  %v17040_v34 = vunpack.i.h.bf16 %v15168_v5  ;;  %v17041_v54 = vunpack.i.l.bf16 %v14775_v1 }
 0x8d6   : > { %6711 = vmatpush.msra.mxu0 %v6465_v52  ;;  %6753 = vmatpush.msrb.mxu3 %v6398_v59  ;;  %v17039_v53 = vunpack.i.h.bf16 %v17038_v45  ;;  %v6405_v52 = vsel %vm842_vm3, %v8339_v61, %v8354_v2  ;;  %v17042_v31 = vunpack.i.h.bf16 %v14728_v40  ;;  %v8350_v2 = vunpack.i.h.bf16 %v15009_v30 }
 0x8d7   : > { %6625 = vmatpush.msrb.mxu1 %v6548_v10  ;;  %v6320_v59 = vsel %vm1124_vm11, %v8364_v20, %v17040_v34  ;;  %v8349_v63 = vunpack.i.l.bf16 %v15009_v30  ;;  %v17045_v34 = vld [vmem:[#allocation220_spill] sm:$0xff] }
 0x8d8   : > { %v6472_v11 = vsel %vm1202_vm13, %v17039_v53, %v17037_v56  ;;  %6712 = vmatpush.msra.mxu0 %v6405_v52  ;;  %v15232_v10 = vsel %vm939_vm6, %v17042_v31, %v17041_v54  ;;  %6754 = vmatpush.msrb.mxu3 %v6320_v59  ;;  %v15236_v56 = vpop.permute.xlu1 %8367  ;;  %v6397_v52 = vsel %vm842_vm3, %v8340_v58, %v8289_v38  ;;  %v8285_v3 = vunpack.i.h.bf16 %v17045_v34  ;;  %v17047_v31 = vld [vmem:[#allocation85_spill] sm:$0xff] }
 0x8d9   : > { %6670 = vmatpush.msra.mxu1 %v6472_v11  ;;  %v17043_v11 = vld [vmem:[#allocation121_spill] sm:$0xff]  ;;  %v17046_v54 = vunpack.i.h.bf16 %v14993_v27  ;;  %v8284_v59 = vunpack.i.l.bf16 %v17045_v34  ;;  %v6319_v38 = vsel %vm1124_vm11, %v8349_v63, %v8364_v20  ;;  %v17051_v20 = vunpack.i.l.bf16 %v14641_v49 }
 0x8da   : > { %v17044_v45 = vunpack.i.h.bf16 %v17043_v11  ;;  %7194 = vmatmul.msk.f32.vlgmr.msrb.gmra.mxu1 %vm6586_vm0, %v15107_v46  ;;  %6713 = vmatpush.msra.mxu0 %v6397_v52  ;;  %v17048_v11 = vunpack.i.h.bf16 %v17047_v31  ;;  %v17049_v52 = vunpack.i.h.bf16 %v14686_v13  ;;  %v8254_v31 = vunpack.i.l.bf16 %v14797_v17 }
 0x8db   : > { %v6312_v30 = vsel %vm1124_vm11, %v8309_v39, %v17046_v54  ;;  %v6311_v54 = vsel %vm1124_vm11, %v8350_v2, %v8309_v39  ;;  %v8145_v39 = vunpack.i.h.bf16 %v14694_v51 }
 0x8dc   : > { %v6464_v53 = vsel %vm1202_vm13, %v17044_v45, %v8210_v16  ;;  %6755 = vmatpush.msrb.mxu3 %v6312_v30  ;;  %v6404_v16 = vsel %vm842_vm3, %v17048_v11, %v8339_v61  ;;  %6714 = vmatpush.msra.mxu0 %v6319_v38  ;;  %v6234_v45 = vsel %vm1071_vm7, %v8285_v3, %v8319_v9  ;;  %v17050_v61 = vunpack.i.h.bf16 %v14641_v49  ;;  %v15275_v49 = vpop.permute.xlu0 %8397 }
 0x8dd   : > { %6671 = vmatpush.msra.mxu1 %v6464_v53  ;;  %v15256_v53 = vpop.permute.xlu2 %8392  ;;  %v6396_v34 = vsel %vm842_vm3, %v17049_v52, %v8340_v58  ;;  %v8244_v11 = vunpack.i.l.bf16 %v14839_v19  ;;  %v6233_v58 = vsel %vm1071_vm7, %v8284_v59, %v8285_v3  ;;  %v17055_v19 = vunpack.i.h.bf16 %v14713_v43  ;;  %v17056_v3 = vld [vmem:[#allocation253_spill] sm:$0xff] }
 0x8de   : > { %6756 = vmatpush.msrb.mxu3 %v6234_v45  ;;  %6715 = vmatpush.msra.mxu0 %v6311_v54  ;;  %v6226_v30 = vsel %vm1071_vm7, %v17051_v20, %v17050_v61  ;;  %v17054_v45 = vld [vmem:[#allocation192_spill] sm:$0xff]  ;;  %v17057_v61 = vunpack.i.h.bf16 %v14705_v60  ;;  %v17058_v20 = vunpack.i.l.bf16 %v14705_v60  ;;  %v8219_v60 = vunpack.i.l.bf16 %v14811_v0 }
 0x8df   : > { %6672 = vmatpush.msra.mxu1 %v6404_v16  ;;  %v17052_v16 = vld [vmem:[#allocation108_spill] sm:$0xff]  ;;  %v8264_v52 = vunpack.i.l.bf16 %v17054_v45  ;;  %v6310_v54 = vsel %vm1124_vm11, %v17055_v19, %v8350_v2  ;;  %v17060_v2 = vunpack.i.h.bf16 %v14797_v17  ;;  %v8125_v0 = vunpack.i.h.bf16 %v14651_v25 }
 0x8e0   : > { %6757 = vmatpush.msrb.mxu3 %v6226_v30  ;;  %v17053_v38 = vunpack.i.h.bf16 %v17052_v16  ;;  %6716 = vmatpush.msra.mxu0 %v6233_v58  ;;  %v6158_v30 = vsel %vm1036_vm10, %v17058_v20, %v17057_v61  ;;  %v8260_v16 = vunpack.i.h.bf16 %v14868_v18  ;;  %v17061_v58 = vld [vmem:[#allocation110_spill] sm:$0xff]  ;;  %v8235_v20 = vunpack.i.h.bf16 %v14829_v33 }
 0x8e1   : > { %6673 = vmatpush.msra.mxu1 %v6396_v34  ;;  %v15278_v34 = vpop.permute.xlu1 %8372  ;;  %v8239_v19 = vunpack.i.l.bf16 %v17061_v58 }
 0x8e2   : > { %v6318_v13 = vsel %vm1124_vm11, %v17053_v38, %v8349_v63  ;;  %6758 = vmatpush.msrb.mxu3 %v15025_v6  ;;  %v8229_v63 = vunpack.i.l.bf16 %v14783_v14  ;;  %6717 = vmatpush.msra.mxu0 %v17056_v3  ;;  %v17059_v6 = vunpack.i.l.bf16 %v14777_v41  ;;  %v6165_v38 = vsel %vm1036_vm10, %v8254_v31, %v17060_v2  ;;  %v17062_v41 = vld [vmem:[#allocation103_spill] sm:$0xff] }
 0x8e3   : > { %6674 = vmatpush.msra.mxu1 %v6318_v13  ;;  %v15300_v13 = vsel %vm1036_vm10, %v8145_v39, %v8244_v11  ;;  %v15315_v11 = vsel %vm1036_vm10, %v8260_v16, %v8264_v52  ;;  %v17066_v3 = vunpack.i.l.bf16 %v14684_v36  ;;  %v17068_v2 = vunpack.i.h.bf16 %v14783_v14 }
 0x8e4   : > { %6759 = vmatpush.msrb.mxu3 %v6158_v30  ;;  %v6232_v43 = vsel %vm1071_vm7, %v17059_v6, %v8284_v59  ;;  %6718 = vmatpush.msra.mxu0 %v6165_v38  ;;  %v17064_v59 = vunpack.i.l.bf16 %v17062_v41  ;;  %v17067_v6 = vunpack.i.h.bf16 %v14866_v42  ;;  %v17070_v42 = vunpack.i.l.bf16 %v14665_v62 }
 0x8e5   : > { %6675 = vmatpush.msra.mxu1 %v6310_v54  ;;  %v17063_v54 = vunpack.i.h.bf16 %v17062_v41  ;;  %v15325_v30 = vpop.permute.xlu2 %8412  ;;  %v6079_v38 = vsel %vm983_vm9, %v8229_v63, %v17068_v2  ;;  %v17069_v41 = vunpack.i.h.bf16 %v14665_v62  ;;  %v15351_v14 = vsel %vm983_vm9, %v8235_v20, %v8239_v19 }
 0x8e6   : > { %6760 = vmatpush.msrb.mxu3 %v15075_v50  ;;  %6719 = vmatpush.msra.mxu0 %v15032_v26  ;;  %v17065_v50 = vunpack.i.h.bf16 %v14684_v36  ;;  %v15336_v36 = vsel %vm983_vm9, %v8125_v0, %v8219_v60  ;;  %v8414_v60 = vunpack.i.l.bf16 %v15325_v30  ;;  %v17077_v2 = vunpack.i.h.bf16 %v14736_v35 }
 0x8e7   : > { %6676 = vmatpush.msra.mxu1 %v6232_v43  ;;  %v6224_v17 = vsel %vm1071_vm7, %v17064_v59, %v17063_v54  ;;  %v6164_v43 = vsel %vm1036_vm10, %v17067_v6, %v8254_v31  ;;  %v6156_v31 = vsel %vm1036_vm10, %v17070_v42, %v17069_v41  ;;  %v17072_v59 = vld [vmem:[#allocation111_spill] sm:$0xff]  ;;  %v17079_v42 = vld [vmem:[#allocation122_spill] sm:$0xff] }
 0x8e8   : > { %v6072_v61 = vsel %vm983_vm9, %v17066_v3, %v17065_v50  ;;  %6720 = vmatpush.msra.mxu0 %v6079_v38  ;;  %v17074_v62 = vunpack.i.l.bf16 %v17072_v59  ;;  %v15361_v3 = vpop.permute.xlu0 %8402  ;;  %v17078_v38 = vunpack.i.l.bf16 %v14736_v35 }
 0x8e9   : > { %6677 = vmatpush.msra.mxu1 %v6224_v17  ;;  %6761 = vmatpush.msrb.mxu3 %v6072_v61  ;;  %v15339_v26 = vpop.permute.xlu1 %8407  ;;  %v17073_v17 = vunpack.i.h.bf16 %v17072_v59  ;;  %v17075_v61 = vld [vmem:[#allocation113_spill] sm:$0xff]  ;;  %v17081_v59 = vunpack.i.h.bf16 %v15100_v7  ;;  %v17087_v7 = vunpack.i.h.bf16 %v14894_v37  ;;  %v8369_v37 = vunpack.i.l.bf16 %v15236_v56 }
 0x8ea   : > { %v8409_v54 = vunpack.i.l.bf16 %v15339_v26  ;;  %v17076_v6 = vunpack.i.h.bf16 %v17075_v61  ;;  %v5993_v41 = vsel %vm939_vm6, %v17078_v38, %v17077_v2  ;;  %v17086_v2 = vld [vmem:[#allocation194_spill] sm:$0xff] }
 0x8eb   : > { %6678 = vmatpush.msra.mxu1 %v6164_v43  ;;  %6762 = vmatpush.msrb.mxu3 %v15097_v23  ;;  %v17071_v23 = vld [vmem:[#allocation183_spill] sm:$0xff]  ;;  %v5986_v50 = vsel %vm939_vm6, %v17074_v62, %v17073_v17  ;;  %v8315_v62 = vunpack.i.h.bf16 %v14903_v55  ;;  %v6552_v38 = vsel %vm1246_vm12, %v17087_v7, %v8414_v60 }
 0x8ec   : > { %6721 = vmatpush.msra.mxu0 %v17071_v23  ;;  %v6078_v43 = vsel %vm983_vm9, %v17076_v6, %v8229_v63  ;;  %v6560_v17 = vsel %vm1246_vm12, %v17081_v59, %v8409_v54  ;;  %v17082_v63 = vld [vmem:[#allocation119_spill] sm:$0xff] }
 0x8ed   : > { %6679 = vmatpush.msra.mxu1 %v6156_v31  ;;  %6763 = vmatpush.msrb.mxu3 %v5986_v50  ;;  %v17080_v31 = vld [vmem:[#allocation25_spill] sm:$0xff]  ;;  %v17083_v50 = vunpack.i.h.bf16 %v17082_v63  ;;  %v17084_v35 = vunpack.i.l.bf16 %v17082_v63  ;;  %v17085_v6 = vld [vmem:[#allocation203_spill] sm:$0xff]  ;;  %v17091_v63 = vld [vmem:[#allocation116_spill] sm:$0xff] }
 0x8ee   : > { %v5848_v23 = vmul.f32 %v17080_v31, %v17079_v42  ;;  %6722 = vmatpush.msra.mxu0 %v5993_v41  ;;  %6784 = vmatpush.msrb.mxu2 %v6560_v17  ;;  %v8370_v41 = vunpack.i.h.bf16 %v15236_v56  ;;  %v17088_v42 = vld [vmem:[#allocation168_spill] sm:$0xff]  ;;  %v17097_v56 = vunpack.i.h.bf16 %v14921_v22  ;;  %v8410_v22 = vunpack.i.h.bf16 %v15339_v26 }
 0x8ef   : > { %6680 = vmatpush.msra.mxu1 %v6078_v43  ;;  %v6070_v61 = vsel %vm983_vm9, %v17084_v35, %v17083_v50  ;;  %v5840_v43 = vmul.f32 %v17080_v31, %v17085_v6  ;;  %v17090_v31 = vld [vmem:[#allocation197_spill] sm:$0xff]  ;;  %v8379_v50 = vunpack.i.l.bf16 %v17091_v63  ;;  %v17092_v35 = vunpack.i.l.bf16 %v14903_v55  ;;  %v17093_v6 = vld [vmem:[#allocation104_spill] sm:$0xff] }
 0x8f0   : > { %6764 = vmatpush.msrb.mxu3 %v5848_v23  ;;  %6723 = vmatpush.msra.mxu0 %v17086_v2  ;;  %v17089_v23 = vld [vmem:[#allocation26_spill] sm:$0xff]  ;;  %v17096_v2 = vld [vmem:[#allocation163_spill] sm:$0xff] }
 0x8f1   : > { %6681 = vmatpush.msra.mxu1 %v6070_v61  ;;  %6785 = vmatpush.msrb.mxu2 %v6552_v38  ;;  %v5847_v59 = vmul.f32 %v17089_v23, %v17088_v42  ;;  %v5839_v17 = vmul.f32 %v17089_v23, %v17090_v31  ;;  %v6469_v61 = vsel %vm1202_vm13, %v17092_v35, %v8315_v62  ;;  %v8325_v7 = vunpack.i.h.bf16 %v17096_v2  ;;  %v17101_v35 = vld [vmem:[#allocation217_spill] sm:$0xff] }
 0x8f2   : > { %6765 = vmatpush.msrb.mxu3 %v5840_v43  ;;  %v17094_v43 = vunpack.i.h.bf16 %v17093_v6  ;;  %v8324_v38 = vunpack.i.l.bf16 %v17096_v2  ;;  %v8380_v62 = vunpack.i.h.bf16 %v17091_v63  ;;  %v17099_v42 = vunpack.i.h.bf16 %v14870_v47  ;;  %v15428_v63 = vpop.permute.xlu0 %8417  ;;  %7198 = vmatmul.msk.f32.vlgmr.msrb.gmra.mxu2 %vm6586_vm0, %v15107_v46 }
 0x8f3   : > { %6682 = vmatpush.msra.mxu1 %v15157_v48  ;;  %6724 = vmatpush.msra.mxu0 %v5847_v59  ;;  %v17100_v23 = vunpack.i.l.bf16 %v14870_v47  ;;  %v6409_v31 = vsel %vm842_vm3, %v8370_v41, %v8379_v50  ;;  %v17103_v47 = vunpack.i.h.bf16 %v15102_v24  ;;  %v8415_v2 = vunpack.i.h.bf16 %v15325_v30 }
 0x8f4   : > { %6870 = vmatpush.msra.mxu3 %v15148_v32  ;;  %6790 = vmatpush.msra.mxu2 %v15178_v4  ;;  %v17095_v32 = vunpack.i.l.bf16 %v17093_v6  ;;  %v17098_v4 = vunpack.i.h.bf16 %v14948_v12  ;;  %v8399_v12 = vunpack.i.l.bf16 %v15275_v49  ;;  %v8375_v24 = vunpack.i.h.bf16 %v15278_v34 }
 0x8f5   : > { %6725 = vmatpush.msra.mxu0 %v5839_v17  ;;  %v6476_v59 = vsel %vm1202_vm13, %v17100_v23, %v17099_v42  ;;  %v6407_v17 = vsel %vm842_vm3, %v17103_v47, %v8369_v37  ;;  %v17105_v42 = vunpack.i.h.bf16 %v14841_v44  ;;  %v6553_v26 = vsel %vm1246_vm12, %v8414_v60, %v8415_v2  ;;  %6766 = vmatmul.f32.vlgmr.msrb.gmra.mxu3 %v15041_v28 }
 0x8f6   : > { %v5984_v48 = vsel %vm939_vm6, %v17095_v32, %v17094_v43  ;;  %6871 = vmatpush.msra.mxu3 %v6469_v61  ;;  %v6467_v55 = vsel %vm1202_vm13, %v17098_v4, %v17097_v56  ;;  %v17102_v61 = vld [vmem:[#allocation27_spill] sm:$0xff]  ;;  %6726 = vmatmul.f32.vlgmr.msra.gmra.mxu0 %v15041_v28  ;;  %v17104_v43 = vld [vmem:[#allocation201_spill] sm:$0xff]  ;;  %v8390_v32 = vunpack.i.h.bf16 %v15184_v8  ;;  %v6401_v56 = vsel %vm842_vm3, %v8324_v38, %v8325_v7 }
 0x8f7   : > { %6683 = vmatpush.msra.mxu1 %v5984_v48  ;;  %6791 = vmatpush.msra.mxu2 %v6467_v55  ;;  %v5846_v6 = vmul.f32 %v17102_v61, %v17101_v35  ;;  %v5838_v50 = vmul.f32 %v17102_v61, %v17104_v43  ;;  %v8389_v48 = vunpack.i.l.bf16 %v15184_v8  ;;  %v8400_v4 = vunpack.i.h.bf16 %v15275_v49 }
 0x8f8   : > { %6830 = vmatpush.msrb.mxu0 %v6476_v59  ;;  %6872 = vmatpush.msra.mxu3 %v6409_v31  ;;  %v8374_v55 = vunpack.i.l.bf16 %v15278_v34  ;;  %v6399_v23 = vsel %vm842_vm3, %v17105_v42, %v8380_v62  ;;  %v8320_v8 = vunpack.i.h.bf16 %v14950_v57  ;;  %v8419_v59 = vunpack.i.l.bf16 %v15428_v63  ;;  %v17120_v42 = vld [vmem:[#allocation30_spill] sm:$0xff] }
 0x8f9   : > { %6684 = vmatpush.msra.mxu1 %v5846_v6  ;;  %6792 = vmatpush.msra.mxu2 %v6407_v17  ;;  %v6408_v49 = vsel %vm842_vm3, %v8369_v37, %v8370_v41  ;;  %v8395_v34 = vunpack.i.h.bf16 %v15256_v53  ;;  %v8394_v7 = vunpack.i.l.bf16 %v15256_v53  ;;  %v6323_v44 = vsel %vm1124_vm11, %v8390_v32, %v8399_v12  ;;  %v8423_v6 = vpop.permute.xlu1 %8422 }
 0x8fa   : > { %6831 = vmatpush.msrb.mxu0 %v15213_v29  ;;  %6873 = vmatpush.msra.mxu3 %v6401_v56  ;;  %v6561_v29 = vsel %vm1246_vm12, %v8409_v54, %v8410_v22  ;;  %v17106_v31 = vunpack.i.h.bf16 %v15168_v5  ;;  %v8420_v61 = vunpack.i.h.bf16 %v15428_v63  ;;  %v6400_v54 = vsel %vm842_vm3, %v8380_v62, %v8324_v38  ;;  %v17110_v56 = vld [vmem:[#allocation195_spill] sm:$0xff] }
 0x8fb   : > { %6685 = vmatpush.msra.mxu1 %v5838_v50  ;;  %6793 = vmatpush.msra.mxu2 %v6399_v23  ;;  %v8405_v53 = vunpack.i.h.bf16 %v15361_v3  ;;  %v8404_v41 = vunpack.i.l.bf16 %v15361_v3  ;;  %v6315_v5 = vsel %vm1124_vm11, %v8374_v55, %v8375_v24  ;;  %v17107_v37 = vunpack.i.h.bf16 %v14993_v27  ;;  %v8889_v24 = vld [vmem:[#allocation13] sm:$0xff] }
 0x8fc   : > { %6686 = vmatmul.f32.vlgmr.msra.gmra.mxu1 %v15041_v28  ;;  %6832 = vmatpush.msrb.mxu0 %v6408_v49  ;;  %v6321_v35 = vsel %vm1124_vm11, %v17106_v31, %v8389_v48  ;;  %v6562_v30 = vsel %vm1246_vm12, %v8410_v22, %v8419_v59  ;;  %v6322_v60 = vsel %vm1124_vm11, %v8389_v48, %v8390_v32  ;;  %v8265_v38 = vunpack.i.h.bf16 %v17054_v45  ;;  %v17125_v49 = vld [vmem:[#allocation117_spill] sm:$0xff]  ;;  %v17128_v31 = vld [vmem:[#allocation196_spill] sm:$0xff] }
 0x8fd   : > { %6824 = vmatpush.msrb.mxu1 %v6561_v29  ;;  %6874 = vmatpush.msra.mxu3 %v6323_v44  ;;  %v6313_v12 = vsel %vm1124_vm11, %v17107_v37, %v8400_v4  ;;  %v8424_v62 = vunpack.i.l.bf16 %v8423_v6  ;;  %v6237_v3 = vsel %vm1071_vm7, %v8394_v7, %v8395_v34  ;;  %v6235_v63 = vsel %vm1071_vm7, %v8319_v9, %v8320_v8 }
 0x8fe   : > { %6794 = vmatpush.msra.mxu2 %v6321_v35  ;;  %6833 = vmatpush.msrb.mxu0 %v6400_v54  ;;  %v6554_v27 = vsel %vm1246_vm12, %v8415_v2, %v8420_v61  ;;  %v6314_v47 = vsel %vm1124_vm11, %v8400_v4, %v8374_v55  ;;  %v8425_v22 = vunpack.i.h.bf16 %v8423_v6  ;;  %v6229_v17 = vsel %vm1071_vm7, %v8404_v41, %v8405_v53  ;;  %v17118_v55 = vld [vmem:[#allocation165_spill] sm:$0xff]  ;;  %v17130_v6 = vld [vmem:[#allocation31_spill] sm:$0xff] }
 0x8ff   : > { %6825 = vmatpush.msrb.mxu1 %v6553_v26  ;;  %6875 = vmatpush.msra.mxu3 %v6315_v5  ;;  %v6236_v43 = vsel %vm1071_vm7, %v8320_v8, %v8394_v7  ;;  %v8240_v57 = vunpack.i.h.bf16 %v17061_v58  ;;  %v6169_v9 = vsel %vm1036_vm10, %v8264_v52, %v8265_v38  ;;  %v6563_v50 = vsel %vm1246_vm12, %v8419_v59, %v8424_v62  ;;  %v17121_v8 = vld [vmem:[#allocation232_spill] sm:$0xff]  ;;  %v17131_v26 = vld [vmem:[#allocation189_spill] sm:$0xff] }
 0x900   : > { %6795 = vmatpush.msra.mxu2 %v6313_v12  ;;  %6834 = vmatpush.msrb.mxu0 %v6322_v60  ;;  %v17109_v48 = vunpack.i.l.bf16 %v14753_v21  ;;  %v6555_v45 = vsel %vm1246_vm12, %v8420_v61, %v8425_v22  ;;  %v8185_v52 = vunpack.i.h.bf16 %v14775_v1  ;;  %v17111_v21 = vunpack.i.l.bf16 %v14829_v33  ;;  %v17123_v59 = vld [vmem:[#allocation24_spill] sm:$0xff] }
 0x901   : > { %6864 = vmatpush.msra.mxu1 %v6562_v30  ;;  %6876 = vmatpush.msra.mxu3 %v6237_v3  ;;  %v17114_v33 = vunpack.i.l.bf16 %v14775_v1  ;;  %v17115_v4 = vunpack.i.h.bf16 %v14728_v40  ;;  %v17117_v1 = vunpack.i.l.bf16 %v14651_v25  ;;  %v17124_v25 = vld [vmem:[#allocation190_spill] sm:$0xff]  ;;  %v17126_v34 = vunpack.i.h.bf16 %v17125_v49  ;;  %v17129_v61 = vld [vmem:[#allocation96_spill] sm:$0xff] }
 0x902   : > { %6796 = vmatpush.msra.mxu2 %v6235_v63  ;;  %6835 = vmatpush.msrb.mxu0 %v6314_v47  ;;  %v6228_v2 = vsel %vm1071_vm7, %v17109_v48, %v8404_v41  ;;  %v17127_v7 = vunpack.i.l.bf16 %v17125_v49  ;;  %v5841_v35 = vmul.f32 %v17123_v59, %v17128_v31  ;;  %v5842_v54 = vmul.f32 %v17130_v6, %v17131_v26 }
 0x903   : > { %6865 = vmatpush.msra.mxu1 %v6554_v27  ;;  %6877 = vmatpush.msra.mxu3 %v6229_v17 }
 0x904   : > { %6797 = vmatpush.msra.mxu2 %v15164_v15  ;;  %7199 = vmatmul.msk.f32.vlgmr.msrb.gmra.mxu1 %vm6586_vm0, %v15107_v46  ;;  %v17108_v15 = vunpack.i.l.bf16 %v14868_v18  ;;  %v6083_v18 = vsel %vm983_vm9, %v8239_v19, %v8240_v57  ;;  %v17113_v19 = vld [vmem:[#allocation123_spill] sm:$0xff]  ;;  %v5988_v44 = vsel %vm939_vm6, %v17127_v7, %v17126_v34 }
 0x905   : > { %6836 = vmatpush.msrb.mxu0 %v6236_v43  ;;  %6878 = vmatpush.msra.mxu3 %v6169_v9 }
 0x906   : > { %6904 = vmatpush.msrb.mxu1 %v6563_v50  ;;  %v6167_v32 = vsel %vm1036_vm10, %v17108_v15, %v8260_v16  ;;  %v6081_v16 = vsel %vm983_vm9, %v17111_v21, %v8235_v20  ;;  %v9211_v20 = vmov 6  }
 0x907   : > { %6798 = vmatpush.msra.mxu2 %v6167_v32  ;;  %6837 = vmatpush.msrb.mxu0 %v6228_v2 }
 0x908   : > { %6879 = vmatpush.msra.mxu3 %v15300_v13  ;;  %6905 = vmatpush.msrb.mxu1 %v6555_v45  ;;  %v17112_v13 = vunpack.i.l.bf16 %v14694_v51  ;;  %v17116_v51 = vunpack.i.l.bf16 %v14728_v40  ;;  %v17122_v40 = vld [vmem:[#allocation221_spill] sm:$0xff] }
 0x909   : > { %6799 = vmatpush.msra.mxu2 %v17110_v56  ;;  %6838 = vmatpush.msrb.mxu0 %v15315_v11  ;;  %v5997_v11 = vsel %vm939_vm6, %v17114_v33, %v8185_v52  ;;  %v5849_v29 = vmul.f32 %v17123_v59, %v17122_v40 }
 0x90a   : > { %6880 = vmatpush.msra.mxu3 %v6083_v18  ;;  %v6160_v58 = vsel %vm1036_vm10, %v17112_v13, %v8145_v39  ;;  %8426 = vset.pattern.permute.xlu2 %v9211_v20  ;;  %v5995_v39 = vsel %vm939_vm6, %v17116_v51, %v17115_v4 }
 0x90b   : > { %6800 = vmatpush.msra.mxu2 %v6081_v16  ;;  %6839 = vmatpush.msrb.mxu0 %v6160_v58 }
 0x90c   : > { %6881 = vmatpush.msra.mxu3 %v15336_v36  ;;  %6583 = vperm.xlu2 %8426, %v8889_v24   ;;  %v6074_v36 = vsel %vm983_vm9, %v17117_v1, %v8125_v0  ;;  %v5843_v0 = vmul.f32 %v17120_v42, %v17124_v25 }
 0x90d   : > { %6801 = vmatpush.msra.mxu2 %v17113_v19  ;;  %6840 = vmatpush.msrb.mxu0 %v15351_v14  ;;  %v17119_v14 = vld [vmem:[#allocation124_spill] sm:$0xff] }
 0x90e   : > { %6882 = vmatpush.msra.mxu3 %v5997_v11  ;;  %v5851_v23 = vmul.f32 %v17120_v42, %v17119_v14  ;;  %7200 = vmatmul.msk.f32.vlgmr.msra.gmra.mxu1 %vm6586_vm0, %v15107_v46 }
 0x90f   : > { %6802 = vmatpush.msra.mxu2 %v5995_v39  ;;  %6841 = vmatpush.msrb.mxu0 %v6074_v36 }
 0x910   : > { %6883 = vmatpush.msra.mxu3 %v17118_v55  ;;  %8427 = vset.pattern.permute.xlu0 %v9211_v20 }
 0x911   : > { %6803 = vmatpush.msra.mxu2 %v17121_v8  ;;  %6842 = vmatpush.msrb.mxu0 %v15232_v10  ;;  %v5850_v10 = vmul.f32 %v17130_v6, %v17129_v61 }
 0x912   : > { %6884 = vmatpush.msra.mxu3 %v5851_v23 }
 0x913   : > { %6804 = vmatpush.msra.mxu2 %v5849_v29  ;;  %6843 = vmatpush.msrb.mxu0 %v5988_v44 }
 0x914   : > { %6885 = vmatpush.msra.mxu3 %v5843_v0 }
 0x915   : > { %6805 = vmatpush.msra.mxu2 %v5841_v35  ;;  %6886 = vmatmul.f32.vlgmr.msra.gmra.mxu3 %v15041_v28 }
 0x916   : > { %6806 = vmatmul.f32.vlgmr.msra.gmra.mxu2 %v15041_v28  ;;  %6844 = vmatpush.msrb.mxu0 %v5850_v10 }
 0x917   : > { %7201 = vmatmul.msk.f32.vlgmr.msrb.gmra.mxu1 %vm6586_vm0, %v15107_v46 }
 0x918   : > { %6845 = vmatpush.msrb.mxu0 %v5842_v54 }
 0x919   : > { %6846 = vmatmul.f32.vlgmr.msrb.gmra.mxu0 %v15041_v28 }
 0x945   : > { %v6647_v53 = vpop.f32.mrf.mxu2 }
 0x94d   : > { %v6667_v41 = vpop.f32.mrf.mxu2 }
 0x950   : > { %v6607_v37 = vpop.f32.mrf.mxu0 }
 0x952   : > { %v6707_v43 = vpop.f32.mrf.mxu3 }
 0x956   : > { %v6747_v46 = vpop.f32.mrf.mxu2 }
 0x957   : > { %v6627_v60 = vpop.f32.mrf.mxu1 }
 0x966   : > { %v6584_v5 = vpop.permute.xlu2 %6583 }
 0x967   : > { %v6648_v12 = vadd.f32 %v6647_v53, %v6584_v5  ;;  %v6608_v30 = vadd.f32 %v6607_v37, %v6584_v5 }
 0x969   : > { %v6668_v38 = vadd.f32 %v6667_v41, %v6648_v12  ;;  %v6628_v62 = vadd.f32 %v6627_v60, %v6608_v30 }
 0x96b   : > { %v6911_v3 = vmax.f32 %v6668_v38, 0.0  ;;  %v6910_v63 = vmax.f32 %v6628_v62, 0.0 }
 0x96d   : > { %6919 = vst [vmem:[%s15564_s14 + $0x8] sm:$0xff] %v6911_v3 }
 0x96e   : > { %6918 = vst [vmem:[%s15564_s14] sm:$0xff] %v6910_v63 }
 0x973   : > { %v6727_v28 = vpop.f32.mrf.mxu0 }
 0x974   : > { %v6728_v27 = vadd.f32 %v6727_v28, %v6584_v5 }
 0x975   : > { %v6787_v32 = vpop.f32.mrf.mxu2 }
 0x976   : > { %v6748_v47 = vadd.f32 %v6747_v46, %v6728_v27 }
 0x978   : > { %v6913_v57 = vmax.f32 %v6748_v47, 0.0  ;;  %v6767_v48 = vpop.f32.mrf.mxu3 }
 0x979   : > { %v6687_v22 = vpop.f32.mrf.mxu1  ;;  %v6768_v45 = vadd.f32 %v6767_v48, %v6584_v5 }
 0x97a   : > { %v6688_v17 = vadd.f32 %v6687_v22, %v6584_v5  ;;  %6921 = vst [vmem:[%s15564_s14 + $0x18] sm:$0xff] %v6913_v57 }
 0x97b   : > { %v6788_v52 = vadd.f32 %v6787_v32, %v6768_v45 }
 0x97c   : > { %v6708_v9 = vadd.f32 %v6707_v43, %v6688_v17 }
 0x97d   : > { %v6914_v56 = vmax.f32 %v6788_v52, 0.0 }
 0x97e   : > { %v6912_v50 = vmax.f32 %v6708_v9, 0.0 }
 0x97f   : > { %6922 = vst [vmem:[%s15564_s14 + $0x20] sm:$0xff] %v6914_v56 }
 0x980   : > { %6920 = vst [vmem:[%s15564_s14 + $0x10] sm:$0xff] %v6912_v50 }
 0x981   : > { %v6827_v15 = vpop.f32.mrf.mxu1 }
 0x98b   : > { %v6867_v2 = vpop.f32.mrf.mxu1 }
 0x994   : > { %v6907_v13 = vpop.f32.mrf.mxu1 }
 0x996   : > { %v6847_v18 = vpop.f32.mrf.mxu0 }
 0x997   : > { %v6848_v21 = vadd.f32 %v6847_v18, %v6584_v5 }
 0x998   : > { %v6887_v16 = vpop.f32.mrf.mxu3 }
 0x999   : > { %v6868_v58 = vadd.f32 %v6867_v2, %v6848_v21  ;;  %v6807_v19 = vpop.f32.mrf.mxu2  ;;  %v6888_v33 = vadd.f32 %v6887_v16, %v6584_v5 }
 0x99a   : > { %v6808_v11 = vadd.f32 %v6807_v19, %v6584_v5 }
 0x99b   : > { %v6916_v20 = vmax.f32 %v6868_v58, 0.0  ;;  %v6908_v4 = vadd.f32 %v6907_v13, %v6888_v33 }
 0x99c   : > { %v6828_v51 = vadd.f32 %v6827_v15, %v6808_v11 }
 0x99d   : > { %6924 = vst [vmem:[%s15564_s14 + $0x30] sm:$0xff] %v6916_v20  ;;  %v6917_v39 = vmax.f32 %v6908_v4, 0.0 }
 0x99e   : > { %v6915_v24 = vmax.f32 %v6828_v51, 0.0 }
 0x99f   : > { %6925 = vst [vmem:[%s15564_s14 + $0x38] sm:$0xff] %v6917_v39 }
 0x9a0   : > { %6923 = vst [vmem:[%s15564_s14 + $0x28] sm:$0xff] %v6915_v24 }
 0x9a1   : > { %9127 = shalt.err (!%p9124_p8)
}
 0x9a2   : > { %7234 = dma.vmem_to_hbm [thread:$0]  (%p9352_p0), %s6941_s6, 1024, %s6943_s16, %s6927_s5  }
 0x9a3 PF: > { %s6954_s3 = sand.u32 1, %s9170_s30   ;;  %p17132_p10 = scmp.ge.s32.totalorder %s9182_s12, 2 }
 0x9a4   : > { %s6955_s28 = scalar_lea.sflag [#allocation4], %s6954_s3 }
 0x9a5   : > { %p7260_p11 = pnand %p17132_p10, %p9360_p6 }
 0x9a7   : > { %p7261_p12 = pneg %p7260_p11 }
 0x9a9   : > { %9165 = dma.done.wait (%p7261_p12), %s6955_s28, 1024  }
 0x9aa   : > { %9167 = vsyncadd (%p7261_p12), %s6955_s28, 4294966272  ;;  %s17133_s12 = sld [smem:[#allocation22_spill]]  ;;  %s17136_s30 = smov %s9174_s10 }
 0x9ab   : > { %s17134_s23 = sld [smem:[#allocation21_spill]] }
 0x9ac   : > { %s17135_s11 = sld [smem:[#allocation23_spill]] }
 0x9b0   : > { %p27_p2 = scmp.ge.s32.totalorder %s17133_s12, 4  }
 0x9b1   : > { %s17137_s10 = smov %s17134_s23 }
 0x9b2   :  { %29 = sbr.rel (!%p27_p2) target bundleno = 15 (0xf), region = 137 }
 0x9b7   :  { %6961 = vsyncpa [#allocation3], 1 }
 0x9b8   :  { %6963 = vsyncpa [#allocation3 + $0x1], 1 }
 0x9b9   :  { %6964 = vsyncpa [#allocation6], 1 }
 0x9ba   :  { %6966 = vsyncpa [#allocation6 + $0x1], 1 }
 0x9bb   :  { %6967 = vsyncpa [#allocation9], 1 }
 0x9bc   :  { %6968 = vsyncpa [#allocation12], 1 }
 0x9bd   :  { %6969 = vsyncpa [#allocation4], 1 }
 0x9be   :  { %6971 = vsyncpa [#allocation4 + $0x1], 1 }

</bundles_post_ra>
